<compile_context>
chip_gen: v7x
topology: tpu7x:2x2x1
jax: 0.10.0
libtpu: 0.0.40
codegen_flags: <defaults>
</compile_context>

<pallas_src>
import functools

import jax
import jax.numpy as jnp
from jax import lax
from jax.experimental import pallas as pl
from jax.experimental.pallas import tpu as pltpu

LANE = 128


def _round_up(x, m):
    return ((x + m - 1) // m) * m


# --------------------------- glue: phase flattening ------------------------- #

def _phase_flatten(x, K, s, pad, pad_value):
    """Pad x spatially and decompose into the s*s stride phases, each flattened
    over (row, col).

    Returns (phases, Ho, Wo, Wq) with phases: (N, s*s, Hq*Wq + extra, C).
    Inside a kernel, the shifted window for filter offset (kh, kw) is the
    contiguous row range [ (kh//s)*Wq + kw//s , + Ho*Wq ) of phase
    (kh%s)*s + (kw%s).  Columns wo >= Wo of each Wq-group are wrap-around
    garbage and are cropped in glue.  Total HBM bytes ~= the padded input
    (no K*K im2col amplification in HBM)."""
    N, H, W, C = x.shape
    Hp, Wp = H + 2 * pad, W + 2 * pad
    Ho = (Hp - K) // s + 1
    Wo = (Wp - K) // s + 1
    Hq = -(-Hp // s)
    Wq = -(-Wp // s)
    xp = jnp.pad(
        x,
        ((0, 0), (pad, pad + Hq * s - Hp), (pad, pad + Wq * s - Wp), (0, 0)),
        constant_values=pad_value)
    ph = xp.reshape(N, Hq, s, Wq, s, C).transpose(0, 2, 4, 1, 3, 5)
    ph = ph.reshape(N, s * s, Hq * Wq, C)
    extra = (K - 1) // s
    if extra:
        ph = jnp.pad(ph, ((0, 0), (0, 0), (0, extra), (0, 0)),
                     constant_values=pad_value)
    return ph, Ho, Wo, Wq


# ----------------------------- Pallas kernels ------------------------------ #

def _conv_kernel(x_ref, w_ref, b_ref, *rest, K, s, Wq, Ho, N, Cres, leaky):
    # x_ref : (N, s*s, R, Cin) bf16 -- padded, phase-decomposed activations
    # w_ref : (K*K*Cin, CP) bf16    -- BN scale folded in, lane-padded to CP
    # b_ref : (1, CP) f32           -- lane-padded bias
    # rest  : [r_ref,] o_ref        -- optional fused-shortcut residual, output
    if Cres:
        r_ref, o_ref = rest
    else:
        (o_ref,) = rest
    M = Ho * Wq
    CP = o_ref.shape[-1]

    # Build the (N*M, K*K*Cin) im2col LHS in registers/VMEM by concatenating
    # the K*K statically shifted views along the lane axis, then issue ONE MXU
    # matmul with contraction depth K*K*Cin and f32 accumulation (no scratch).
    taps = []
    for kh in range(K):
        for kw in range(K):
            phase = (kh % s) * s + (kw % s)
            start = (kh // s) * Wq + (kw // s)
            rows = [x_ref[n, phase, pl.ds(start, M), :] for n in range(N)]
            taps.append(rows[0] if N == 1 else jnp.concatenate(rows, axis=0))
    lhs = taps[0] if len(taps) == 1 else jnp.concatenate(taps, axis=-1)

    y = lax.dot_general(lhs, w_ref[...], (((1,), (0,)), ((), ())),
                        preferred_element_type=jnp.float32)
    y = y + b_ref[...]                                      # f32 epilogue
    if leaky:
        y = jnp.where(y > 0, y, 0.1 * y)
    if Cres:
        r = r_ref[...].astype(jnp.float32)
        if CP > Cres:
            r = jnp.concatenate(
                [r, jnp.zeros((r.shape[0], CP - Cres), jnp.float32)], axis=-1)
        y = y + r                                           # fused shortcut
    o_ref[...] = y.astype(o_ref.dtype)                      # lane-dense bf16 store


def _maxpool_kernel(x_ref, o_ref, *, K, s, Wq, Ho, N):
    # x_ref: (N, s*s, R, C) bf16 -- padded, phase-decomposed activations
    M = Ho * Wq
    for n in range(N):                       # batch folded into one grid step
        res = x_ref[n, 0, pl.ds(0, M), :]
        for kh in range(K):
            for kw in range(K):
                if kh == 0 and kw == 0:
                    continue
                phase = (kh % s) * s + (kw % s)
                start = (kh // s) * Wq + (kw // s)
                res = jnp.maximum(res, x_ref[n, phase, pl.ds(start, M), :])
        o_ref[n] = res


def _yolo_decode_kernel(p_ref, o_ref, *, stride, na, anchor_vec):
    # p_ref: (bs*na, ny, nx, no) bf16 logits; anchors/stride are trace-time
    # constants -> no anchor tensor in HBM, single grid step per YOLO head.
    p = p_ref[...].astype(jnp.float32)
    ci = lax.broadcasted_iota(jnp.int32, p.shape, 3)
    gx = lax.broadcasted_iota(jnp.int32, p.shape, 2).astype(jnp.float32)
    gy = lax.broadcasted_iota(jnp.int32, p.shape, 1).astype(jnp.float32)
    bi = lax.broadcasted_iota(jnp.int32, p.shape, 0)
    B = p.shape[0]
    aw = jnp.zeros(p.shape, jnp.float32)
    ah = jnp.zeros(p.shape, jnp.float32)
    for b in range(B):                       # baked per-row anchor constants
        w_, h_ = anchor_vec[b % na]
        aw = jnp.where(bi == b, w_, aw)
        ah = jnp.where(bi == b, h_, ah)
    gxy = jnp.where(ci == 0, gx, gy)
    anc = jnp.where(ci == 2, aw, ah)
    sig = jax.nn.sigmoid(p)
    is_wh = jnp.logical_and(ci >= 2, ci < 4)
    # mask logits BEFORE exp: never produces inf*0 NaN on non-wh channels
    wh = jnp.exp(jnp.where(is_wh, p, 0.0)) * anc * stride
    io = jnp.where(ci < 2, (sig + gxy) * stride, jnp.where(is_wh, wh, sig))
    o_ref[...] = io


# ----------------------------- layer wrappers ------------------------------ #

def conv_bn_act(x, w2d, bias, cout, *, K, stride, pad, leaky, residual=None):
    """x: (N,H,W,Cin) bf16 NHWC -> (N,Ho,Wo,cout) bf16.
    Single fused im2col GEMM (bf16 MXU, f32 acc) + folded BN bias + LeakyReLU
    (+ optional fused shortcut residual) in one Pallas kernel, one grid step
    (batch folded into M).  Output is lane-padded to CP=128 inside the kernel
    and cropped here in glue."""
    N, H, W, Cin = x.shape
    CP = w2d.shape[1]
    s = stride
    ph, Ho, Wo, Wq = _phase_flatten(x, K, s, pad, 0.0)
    ph = ph.astype(jnp.bfloat16)
    R = ph.shape[2]
    M = Ho * Wq
    NM = N * M

    inputs = [ph, w2d, bias.reshape(1, CP)]
    in_specs = [
        pl.BlockSpec((N, s * s, R, Cin), lambda i: (0, 0, 0, 0)),
        pl.BlockSpec((K * K * Cin, CP), lambda i: (0, 0)),
        pl.BlockSpec((1, CP), lambda i: (0, 0)),
    ]
    Cres = 0
    if residual is not None:
        Cres = residual.shape[-1]
        r = jnp.pad(residual, ((0, 0), (0, 0), (0, Wq - Wo), (0, 0)))
        inputs.append(r.reshape(NM, Cres).astype(jnp.bfloat16))
        in_specs.append(pl.BlockSpec((NM, Cres), lambda i: (0, 0)))

    flops = 2 * NM * K * K * Cin * CP
    bytes_acc = (ph.size * 2 + w2d.size * 2 + NM * CP * 2
                 + (NM * Cres * 2 if Cres else 0))

    out = pl.pallas_call(
        functools.partial(_conv_kernel, K=K, s=s, Wq=Wq, Ho=Ho, N=N,
                          Cres=Cres, leaky=leaky),
        out_shape=jax.ShapeDtypeStruct((NM, CP), jnp.bfloat16),
        grid=(1,),
        in_specs=in_specs,
        out_specs=pl.BlockSpec((NM, CP), lambda i: (0, 0)),
        compiler_params=pltpu.CompilerParams(dimension_semantics=("arbitrary",)),
        cost_estimate=pl.CostEstimate(flops=flops, transcendentals=0,
                                      bytes_accessed=int(bytes_acc)),
    )(*inputs)
    # crop the wrap-around columns (wo >= Wo) and the lane-padded channels
    return out.reshape(N, Ho, Wq, CP)[:, :, :Wo, :cout]


def maxpool(x, *, K, stride):
    """nn.MaxPool2d(K, stride, padding=(K-1)//2) on NHWC bf16 input.
    -inf padding matches PyTorch; every valid window has >=1 real pixel."""
    N, H, W, C = x.shape
    pad = (K - 1) // 2
    s = stride
    ph, Ho, Wo, Wq = _phase_flatten(x, K, s, pad, -jnp.inf)
    R = ph.shape[2]
    M = Ho * Wq
    out = pl.pallas_call(
        functools.partial(_maxpool_kernel, K=K, s=s, Wq=Wq, Ho=Ho, N=N),
        out_shape=jax.ShapeDtypeStruct((N, M, C), x.dtype),
        grid=(1,),
        in_specs=[pl.BlockSpec((N, s * s, R, C), lambda i: (0, 0, 0, 0))],
        out_specs=pl.BlockSpec((N, M, C), lambda i: (0, 0, 0)),
        compiler_params=pltpu.CompilerParams(dimension_semantics=("arbitrary",)),
    )(ph)
    return out.reshape(N, Ho, Wq, C)[:, :, :Wo, :]


class YoloLayer:
    def __init__(self, anchors, nc, stride):
        self.anchors = [(float(a), float(b)) for a, b in anchors]
        self.na = len(self.anchors)
        self.nc = nc
        self.no = nc + 5
        self.stride = float(stride)
        self.anchor_vec = tuple((aw / self.stride, ah / self.stride)
                                for aw, ah in self.anchors)

    def __call__(self, x_nhwc):
        # PyTorch: p.view(bs,na,no,ny,nx).permute(0,1,3,4,2) -- in NHWC terms:
        bs, ny, nx, _ = x_nhwc.shape
        p5 = jnp.transpose(x_nhwc.reshape(bs, ny, nx, self.na, self.no),
                           (0, 3, 1, 2, 4))                 # (bs,na,ny,nx,no)
        p4 = p5.reshape(bs * self.na, ny, nx, self.no)      # bf16 logits
        io4 = pl.pallas_call(
            functools.partial(_yolo_decode_kernel, stride=self.stride,
                              na=self.na, anchor_vec=self.anchor_vec),
            out_shape=jax.ShapeDtypeStruct((bs * self.na, ny, nx, self.no),
                                           jnp.float32),
            grid=(1,),
            in_specs=[pl.BlockSpec((bs * self.na, ny, nx, self.no),
                                   lambda i: (0, 0, 0, 0))],
            out_specs=pl.BlockSpec((bs * self.na, ny, nx, self.no),
                                   lambda i: (0, 0, 0, 0)),
            compiler_params=pltpu.CompilerParams(
                dimension_semantics=("arbitrary",)),
        )(p4)
        io = io4.reshape(bs, self.na * ny * nx, self.no)
        return io, p5.astype(jnp.float32)


# ------------------------------ Darknet model ------------------------------ #

# Synthetic parsed cfg (stands in for parse_model_cfg output).
MODULE_DEFS = [
    {"type": "net"},  # popped, like the torch code
    {"type": "convolutional", "filters": 8,  "size": 3, "stride": 1, "pad": 1,
     "batch_normalize": 1, "activation": "leaky"},
    {"type": "convolutional", "filters": 16, "size": 3, "stride": 2, "pad": 1,
     "batch_normalize": 1, "activation": "leaky"},
    {"type": "convolutional", "filters": 16, "size": 1, "stride": 1, "pad": 1,
     "batch_normalize": 1, "activation": "leaky"},
    {"type": "shortcut", "from": [-2]},
    {"type": "maxpool", "size": 3, "stride": 2},
    {"type": "convolutional", "filters": 21, "size": 1, "stride": 1, "pad": 1,
     "batch_normalize": 0, "activation": "linear"},
    {"type": "yolo", "mask": [3, 4, 5], "classes": 2,
     "anchors": [(10, 13), (16, 30), (33, 23), (30, 61), (62, 45), (59, 119)]},
    {"type": "route", "layers": [-3]},
    {"type": "upsample", "stride": 2},
    {"type": "route", "layers": [-1, 1]},
    {"type": "convolutional", "filters": 21, "size": 3, "stride": 1, "pad": 1,
     "batch_normalize": 0, "activation": "linear"},
    {"type": "yolo", "mask": [0, 1, 2], "classes": 2,
     "anchors": [(10, 13), (16, 30), (33, 23), (30, 61), (62, 45), (59, 119)]},
]


class DarknetPallas:
    def __init__(self, module_defs, img_size=(16, 16), key=jax.random.PRNGKey(0)):
        defs = list(module_defs)
        defs.pop(0)
        out_filters = [3]
        yolo_index = -1
        self.layers = []
        for mdef in defs:
            t = mdef["type"]
            if t == "convolutional":
                K, s, Cout = mdef["size"], mdef["stride"], mdef["filters"]
                bn, Cin = mdef["batch_normalize"], out_filters[-1]
                pad = K // 2 if mdef["pad"] else 0
                key, k1, k2, k3, k4, k5 = jax.random.split(key, 6)
                w = 0.05 * jax.random.normal(k1, (K, K, Cin, Cout), jnp.float32)
                if bn:
                    gamma = 1.0 + 0.1 * jax.random.normal(k2, (Cout,), jnp.float32)
                    beta = 0.05 * jax.random.normal(k3, (Cout,), jnp.float32)
                    rmean = 0.05 * jax.random.normal(k4, (Cout,), jnp.float32)
                    rvar = 1.0 + 0.1 * jax.random.uniform(k5, (Cout,), jnp.float32)
                    scale = gamma / jnp.sqrt(rvar + 1e-5)   # eval-mode BN
                    bias = beta - rmean * scale
                else:
                    scale = jnp.ones((Cout,), jnp.float32)
                    bias = 0.05 * jax.random.normal(k2, (Cout,), jnp.float32)
                # fold BN scale into the weights; lane-pad Cout -> CP for
                # dense output stores (padded channels are exactly zero).
                CP = _round_up(Cout, LANE)
                w = w * scale
                w = jnp.pad(w, ((0, 0), (0, 0), (0, 0), (0, CP - Cout)))
                w2d = w.reshape(K * K * Cin, CP).astype(jnp.bfloat16)
                bias_p = jnp.pad(bias, (0, CP - Cout)).astype(jnp.float32)
                self.layers.append(("conv", dict(
                    w=w2d, bias=bias_p, cout=Cout, K=K, stride=s, pad=pad,
                    leaky=(mdef["activation"] == "leaky"))))
                filters = Cout
            elif t == "maxpool":
                self.layers.append(("maxpool", dict(K=mdef["size"],
                                                    stride=mdef["stride"])))
                filters = out_filters[-1]
            elif t == "upsample":
                self.layers.append(("upsample", dict(scale=mdef["stride"])))
                filters = out_filters[-1]
            elif t == "route":
                layers_ = mdef["layers"]
                filters = sum(out_filters[l if l < 0 else l + 1] for l in layers_)
                self.layers.append(("route", dict(layers=layers_)))
            elif t == "shortcut":
                self.layers.append(("shortcut", dict(layers=mdef["from"])))
                filters = out_filters[-1]
            elif t == "yolo":
                yolo_index += 1
                stride = [32, 16, 8][yolo_index]
                anchors = [mdef["anchors"][m] for m in mdef["mask"]]
                self.layers.append(("yolo", YoloLayer(anchors, mdef["classes"],
                                                      stride)))
                filters = out_filters[-1]
            else:
                raise ValueError(t)
            out_filters.append(filters)

        # --- fuse shortcut-after-conv into the conv epilogue (fewer launches,
        #     no extra HBM round trip) when the conv output is never routed. ---
        referenced = set()
        for i, (kind, cfg) in enumerate(self.layers):
            if kind == "route":
                for l in cfg["layers"]:
                    referenced.add(i + l if l < 0 else l)
            elif kind == "shortcut":
                for l in cfg["layers"]:
                    referenced.add(i + l if l < 0 else l)
        for i, (kind, cfg) in enumerate(self.layers):
            if (kind == "shortcut" and len(cfg["layers"]) == 1
                    and cfg["layers"][0] < -1 and i > 0
                    and self.layers[i - 1][0] == "conv"
                    and (i - 1) not in referenced):
                self.layers[i - 1][1]["res_from"] = i + cfg["layers"][0]
                self.layers[i] = ("identity", {})

    def __call__(self, x_nchw):
        # layout: NCHW input (PyTorch convention) -> internal NHWC, bf16
        x = jnp.transpose(x_nchw, (0, 2, 3, 1)).astype(jnp.bfloat16)
        out, yolo_out = [], []
        for kind, cfg in self.layers:
            if kind == "conv":
                res = out[cfg["res_from"]] if "res_from" in cfg else None
                x = conv_bn_act(x, cfg["w"], cfg["bias"], cfg["cout"],
                                K=cfg["K"], stride=cfg["stride"], pad=cfg["pad"],
                                leaky=cfg["leaky"], residual=res)
            elif kind == "identity":
                pass  # shortcut already fused into the preceding conv kernel
            elif kind == "maxpool":
                x = maxpool(x, K=cfg["K"], stride=cfg["stride"])
            elif kind == "upsample":
                sc = cfg["scale"]  # nearest-neighbour upsample = data movement
                x = jnp.repeat(jnp.repeat(x, sc, axis=1), sc, axis=2)
            elif kind == "route":
                feats = [out[l] for l in cfg["layers"]]  # FeatureConcat
                x = feats[0] if len(feats) == 1 else jnp.concatenate(feats, axis=-1)
            elif kind == "shortcut":
                # unfused fallback: trivial elementwise add, left to XLA fusion
                for l in cfg["layers"]:
                    x = x + out[l]
            elif kind == "yolo":
                yolo_out.append(cfg(x))
            out.append(x)
        ios, ps = zip(*yolo_out)
        return jnp.concatenate(ios, axis=1), ps


# ---------------------------------- main ----------------------------------- #

if __name__ == "__main__":
    key = jax.random.PRNGKey(0)
    kparams, kx = jax.random.split(key)
    model = DarknetPallas(MODULE_DEFS, img_size=(16, 16), key=kparams)

    x = jax.random.normal(kx, (2, 3, 16, 16), jnp.float32)  # NCHW like PyTorch

    io, ps = jax.jit(model.__call__)(x)
    jax.block_until_ready((io, ps))

    assert io.shape == (2, 3 * 4 * 4 + 3 * 8 * 8, 7), io.shape
    assert ps[0].shape == (2, 3, 4, 4, 7) and ps[1].shape == (2, 3, 8, 8, 7)
    assert bool(jnp.all(jnp.isfinite(io)))
    print("KERNEL_OK")
</pallas_src>

<mosaic_0001>
module attributes {stable_mosaic.version = 11 : i64} {
  func.func @_conv_kernel(%arg0: i32, %arg1: memref<2x1x326x3xbf16, #tpu.memory_space<vmem>>, %arg2: memref<27x128xbf16, #tpu.memory_space<vmem>>, %arg3: memref<1x128xf32, #tpu.memory_space<vmem>>, %arg4: memref<576x128xbf16, #tpu.memory_space<vmem>>) attributes {dimension_semantics = [#tpu.dimension_semantics<arbitrary>], iteration_bounds = array<i64: 1>, scalar_prefetch = 0 : i64, scratch_operands = 0 : i64, tpu.core_type = #tpu.core_type<tc>, window_params = [{pipeline_mode = #tpu.pipeline_mode<synchronous>, transform_indices = @transform_0, window_bounds = array<i64: 2, 1, 326, 3>}, {pipeline_mode = #tpu.pipeline_mode<synchronous>, transform_indices = @transform_1, window_bounds = array<i64: 27, 128>}, {pipeline_mode = #tpu.pipeline_mode<synchronous>, transform_indices = @transform_2, window_bounds = array<i64: 1, 128>}, {pipeline_mode = #tpu.pipeline_mode<synchronous>, transform_indices = @transform_3, window_bounds = array<i64: 576, 128>}]} {
    %c0 = arith.constant 0 : index
    %c0_0 = arith.constant 0 : index
    %c0_1 = arith.constant 0 : index
    %c0_2 = arith.constant 0 : index
    %0 = vector.load %arg1[%c0, %c0_0, %c0_1, %c0_2] : memref<2x1x326x3xbf16, #tpu.memory_space<vmem>>, vector<1x1x288x3xbf16>
    %1 = vector.shape_cast %0 : vector<1x1x288x3xbf16> to vector<288x3xbf16>
    %c1 = arith.constant 1 : index
    %c0_3 = arith.constant 0 : index
    %c0_4 = arith.constant 0 : index
    %c0_5 = arith.constant 0 : index
    %2 = vector.load %arg1[%c1, %c0_3, %c0_4, %c0_5] : memref<2x1x326x3xbf16, #tpu.memory_space<vmem>>, vector<1x1x288x3xbf16>
    %3 = vector.shape_cast %2 : vector<1x1x288x3xbf16> to vector<288x3xbf16>
    %4 = tpu.concatenate %1, %3 in 0 : vector<288x3xbf16>, vector<288x3xbf16> -> vector<576x3xbf16>
    %c0_6 = arith.constant 0 : index
    %c0_7 = arith.constant 0 : index
    %c1_8 = arith.constant 1 : index
    %c0_9 = arith.constant 0 : index
    %5 = vector.load %arg1[%c0_6, %c0_7, %c1_8, %c0_9] : memref<2x1x326x3xbf16, #tpu.memory_space<vmem>>, vector<1x1x288x3xbf16>
    %6 = vector.shape_cast %5 : vector<1x1x288x3xbf16> to vector<288x3xbf16>
    %c1_10 = arith.constant 1 : index
    %c0_11 = arith.constant 0 : index
    %c1_12 = arith.constant 1 : index
    %c0_13 = arith.constant 0 : index
    %7 = vector.load %arg1[%c1_10, %c0_11, %c1_12, %c0_13] : memref<2x1x326x3xbf16, #tpu.memory_space<vmem>>, vector<1x1x288x3xbf16>
    %8 = vector.shape_cast %7 : vector<1x1x288x3xbf16> to vector<288x3xbf16>
    %9 = tpu.concatenate %6, %8 in 0 : vector<288x3xbf16>, vector<288x3xbf16> -> vector<576x3xbf16>
    %c0_14 = arith.constant 0 : index
    %c0_15 = arith.constant 0 : index
    %c2 = arith.constant 2 : index
    %c0_16 = arith.constant 0 : index
    %10 = vector.load %arg1[%c0_14, %c0_15, %c2, %c0_16] : memref<2x1x326x3xbf16, #tpu.memory_space<vmem>>, vector<1x1x288x3xbf16>
    %11 = vector.shape_cast %10 : vector<1x1x288x3xbf16> to vector<288x3xbf16>
    %c1_17 = arith.constant 1 : index
    %c0_18 = arith.constant 0 : index
    %c2_19 = arith.constant 2 : index
    %c0_20 = arith.constant 0 : index
    %12 = vector.load %arg1[%c1_17, %c0_18, %c2_19, %c0_20] : memref<2x1x326x3xbf16, #tpu.memory_space<vmem>>, vector<1x1x288x3xbf16>
    %13 = vector.shape_cast %12 : vector<1x1x288x3xbf16> to vector<288x3xbf16>
    %14 = tpu.concatenate %11, %13 in 0 : vector<288x3xbf16>, vector<288x3xbf16> -> vector<576x3xbf16>
    %c0_21 = arith.constant 0 : index
    %c0_22 = arith.constant 0 : index
    %c18 = arith.constant 18 : index
    %c0_23 = arith.constant 0 : index
    %15 = vector.load %arg1[%c0_21, %c0_22, %c18, %c0_23] : memref<2x1x326x3xbf16, #tpu.memory_space<vmem>>, vector<1x1x288x3xbf16>
    %16 = vector.shape_cast %15 : vector<1x1x288x3xbf16> to vector<288x3xbf16>
    %c1_24 = arith.constant 1 : index
    %c0_25 = arith.constant 0 : index
    %c18_26 = arith.constant 18 : index
    %c0_27 = arith.constant 0 : index
    %17 = vector.load %arg1[%c1_24, %c0_25, %c18_26, %c0_27] : memref<2x1x326x3xbf16, #tpu.memory_space<vmem>>, vector<1x1x288x3xbf16>
    %18 = vector.shape_cast %17 : vector<1x1x288x3xbf16> to vector<288x3xbf16>
    %19 = tpu.concatenate %16, %18 in 0 : vector<288x3xbf16>, vector<288x3xbf16> -> vector<576x3xbf16>
    %c0_28 = arith.constant 0 : index
    %c0_29 = arith.constant 0 : index
    %c19 = arith.constant 19 : index
    %c0_30 = arith.constant 0 : index
    %20 = vector.load %arg1[%c0_28, %c0_29, %c19, %c0_30] : memref<2x1x326x3xbf16, #tpu.memory_space<vmem>>, vector<1x1x288x3xbf16>
    %21 = vector.shape_cast %20 : vector<1x1x288x3xbf16> to vector<288x3xbf16>
    %c1_31 = arith.constant 1 : index
    %c0_32 = arith.constant 0 : index
    %c19_33 = arith.constant 19 : index
    %c0_34 = arith.constant 0 : index
    %22 = vector.load %arg1[%c1_31, %c0_32, %c19_33, %c0_34] : memref<2x1x326x3xbf16, #tpu.memory_space<vmem>>, vector<1x1x288x3xbf16>
    %23 = vector.shape_cast %22 : vector<1x1x288x3xbf16> to vector<288x3xbf16>
    %24 = tpu.concatenate %21, %23 in 0 : vector<288x3xbf16>, vector<288x3xbf16> -> vector<576x3xbf16>
    %c0_35 = arith.constant 0 : index
    %c0_36 = arith.constant 0 : index
    %c20 = arith.constant 20 : index
    %c0_37 = arith.constant 0 : index
    %25 = vector.load %arg1[%c0_35, %c0_36, %c20, %c0_37] : memref<2x1x326x3xbf16, #tpu.memory_space<vmem>>, vector<1x1x288x3xbf16>
    %26 = vector.shape_cast %25 : vector<1x1x288x3xbf16> to vector<288x3xbf16>
    %c1_38 = arith.constant 1 : index
    %c0_39 = arith.constant 0 : index
    %c20_40 = arith.constant 20 : index
    %c0_41 = arith.constant 0 : index
    %27 = vector.load %arg1[%c1_38, %c0_39, %c20_40, %c0_41] : memref<2x1x326x3xbf16, #tpu.memory_space<vmem>>, vector<1x1x288x3xbf16>
    %28 = vector.shape_cast %27 : vector<1x1x288x3xbf16> to vector<288x3xbf16>
    %29 = tpu.concatenate %26, %28 in 0 : vector<288x3xbf16>, vector<288x3xbf16> -> vector<576x3xbf16>
    %c0_42 = arith.constant 0 : index
    %c0_43 = arith.constant 0 : index
    %c36 = arith.constant 36 : index
    %c0_44 = arith.constant 0 : index
    %30 = vector.load %arg1[%c0_42, %c0_43, %c36, %c0_44] : memref<2x1x326x3xbf16, #tpu.memory_space<vmem>>, vector<1x1x288x3xbf16>
    %31 = vector.shape_cast %30 : vector<1x1x288x3xbf16> to vector<288x3xbf16>
    %c1_45 = arith.constant 1 : index
    %c0_46 = arith.constant 0 : index
    %c36_47 = arith.constant 36 : index
    %c0_48 = arith.constant 0 : index
    %32 = vector.load %arg1[%c1_45, %c0_46, %c36_47, %c0_48] : memref<2x1x326x3xbf16, #tpu.memory_space<vmem>>, vector<1x1x288x3xbf16>
    %33 = vector.shape_cast %32 : vector<1x1x288x3xbf16> to vector<288x3xbf16>
    %34 = tpu.concatenate %31, %33 in 0 : vector<288x3xbf16>, vector<288x3xbf16> -> vector<576x3xbf16>
    %c0_49 = arith.constant 0 : index
    %c0_50 = arith.constant 0 : index
    %c37 = arith.constant 37 : index
    %c0_51 = arith.constant 0 : index
    %35 = vector.load %arg1[%c0_49, %c0_50, %c37, %c0_51] : memref<2x1x326x3xbf16, #tpu.memory_space<vmem>>, vector<1x1x288x3xbf16>
    %36 = vector.shape_cast %35 : vector<1x1x288x3xbf16> to vector<288x3xbf16>
    %c1_52 = arith.constant 1 : index
    %c0_53 = arith.constant 0 : index
    %c37_54 = arith.constant 37 : index
    %c0_55 = arith.constant 0 : index
    %37 = vector.load %arg1[%c1_52, %c0_53, %c37_54, %c0_55] : memref<2x1x326x3xbf16, #tpu.memory_space<vmem>>, vector<1x1x288x3xbf16>
    %38 = vector.shape_cast %37 : vector<1x1x288x3xbf16> to vector<288x3xbf16>
    %39 = tpu.concatenate %36, %38 in 0 : vector<288x3xbf16>, vector<288x3xbf16> -> vector<576x3xbf16>
    %c0_56 = arith.constant 0 : index
    %c0_57 = arith.constant 0 : index
    %c38 = arith.constant 38 : index
    %c0_58 = arith.constant 0 : index
    %40 = vector.load %arg1[%c0_56, %c0_57, %c38, %c0_58] : memref<2x1x326x3xbf16, #tpu.memory_space<vmem>>, vector<1x1x288x3xbf16>
    %41 = vector.shape_cast %40 : vector<1x1x288x3xbf16> to vector<288x3xbf16>
    %c1_59 = arith.constant 1 : index
    %c0_60 = arith.constant 0 : index
    %c38_61 = arith.constant 38 : index
    %c0_62 = arith.constant 0 : index
    %42 = vector.load %arg1[%c1_59, %c0_60, %c38_61, %c0_62] : memref<2x1x326x3xbf16, #tpu.memory_space<vmem>>, vector<1x1x288x3xbf16>
    %43 = vector.shape_cast %42 : vector<1x1x288x3xbf16> to vector<288x3xbf16>
    %44 = tpu.concatenate %41, %43 in 0 : vector<288x3xbf16>, vector<288x3xbf16> -> vector<576x3xbf16>
    %45 = tpu.concatenate %4, %9, %14, %19, %24, %29, %34, %39, %44 in 1 : vector<576x3xbf16>, vector<576x3xbf16>, vector<576x3xbf16>, vector<576x3xbf16>, vector<576x3xbf16>, vector<576x3xbf16>, vector<576x3xbf16>, vector<576x3xbf16>, vector<576x3xbf16> -> vector<576x27xbf16>
    %c0_63 = arith.constant 0 : index
    %c0_64 = arith.constant 0 : index
    %46 = vector.load %arg2[%c0_63, %c0_64] : memref<27x128xbf16, #tpu.memory_space<vmem>>, vector<27x128xbf16>
    %cst = arith.constant dense<0.000000e+00> : vector<576x128xf32>
    %47 = tpu.matmul %45, %46, %cst {dimension_numbers = #tpu.dot_dimension_numbers<[1], [0], [0], [1], [0, 0, 1, 1], [], []>} : vector<576x27xbf16>, vector<27x128xbf16>, vector<576x128xf32> -> vector<576x128xf32>
    %c0_65 = arith.constant 0 : index
    %c0_66 = arith.constant 0 : index
    %48 = vector.load %arg3[%c0_65, %c0_66] : memref<1x128xf32, #tpu.memory_space<vmem>>, vector<1x128xf32>
    %49 = vector.broadcast %48 : vector<1x128xf32> to vector<576x128xf32>
    %50 = arith.addf %47, %49 : vector<576x128xf32>
    %cst_67 = arith.constant 0.000000e+00 : f32
    %51 = vector.broadcast %cst_67 : f32 to vector<576x128xf32>
    %52 = arith.cmpf ogt, %50, %51 : vector<576x128xf32>
    %cst_68 = arith.constant 1.000000e-01 : f32
    %53 = vector.broadcast %cst_68 : f32 to vector<576x128xf32>
    %54 = arith.mulf %53, %50 : vector<576x128xf32>
    %55 = arith.select %52, %50, %54 : vector<576x128xi1>, vector<576x128xf32>
    %56 = arith.truncf %55 : vector<576x128xf32> to vector<576x128xbf16>
    %c0_69 = arith.constant 0 : index
    %c0_70 = arith.constant 0 : index
    %57 = vector.load %arg4[%c0_69, %c0_70] : memref<576x128xbf16, #tpu.memory_space<vmem>>, vector<576x128xbf16>
    tpu.vector_store %arg4[%c0_69, %c0_70], %56 {strides = array<i32>} : memref<576x128xbf16, #tpu.memory_space<vmem>>, vector<576x128xbf16>,
    return
  }
  func.func @transform_0(%arg0: i32) -> (i32, i32, i32, i32) {
    %c0_i32 = arith.constant 0 : i32
    %c0_i32_0 = arith.constant 0 : i32
    %c0_i32_1 = arith.constant 0 : i32
    %c0_i32_2 = arith.constant 0 : i32
    %c0_i32_3 = arith.constant 0 : i32
    return %c0_i32, %c0_i32_0, %c0_i32_1, %c0_i32_2 : i32, i32, i32, i32
  }
  func.func @transform_1(%arg0: i32) -> (i32, i32) {
    %c0_i32 = arith.constant 0 : i32
    %c0_i32_0 = arith.constant 0 : i32
    %c0_i32_1 = arith.constant 0 : i32
    return %c0_i32, %c0_i32_0 : i32, i32
  }
  func.func @transform_2(%arg0: i32) -> (i32, i32) {
    %c0_i32 = arith.constant 0 : i32
    %c0_i32_0 = arith.constant 0 : i32
    %c0_i32_1 = arith.constant 0 : i32
    return %c0_i32, %c0_i32_0 : i32, i32
  }
  func.func @transform_3(%arg0: i32) -> (i32, i32) {
    %c0_i32 = arith.constant 0 : i32
    %c0_i32_0 = arith.constant 0 : i32
    %c0_i32_1 = arith.constant 0 : i32
    return %c0_i32, %c0_i32_0 : i32, i32
  }
}

module attributes {stable_mosaic.version = 11 : i64} {
  func.func @_conv_kernel(%arg0: i32, %arg1: memref<2x4x82x8xbf16, #tpu.memory_space<vmem>>, %arg2: memref<72x128xbf16, #tpu.memory_space<vmem>>, %arg3: memref<1x128xf32, #tpu.memory_space<vmem>>, %arg4: memref<144x128xbf16, #tpu.memory_space<vmem>>) attributes {dimension_semantics = [#tpu.dimension_semantics<arbitrary>], iteration_bounds = array<i64: 1>, scalar_prefetch = 0 : i64, scratch_operands = 0 : i64, tpu.core_type = #tpu.core_type<tc>, window_params = [{pipeline_mode = #tpu.pipeline_mode<synchronous>, transform_indices = @transform_0, window_bounds = array<i64: 2, 4, 82, 8>}, {pipeline_mode = #tpu.pipeline_mode<synchronous>, transform_indices = @transform_1, window_bounds = array<i64: 72, 128>}, {pipeline_mode = #tpu.pipeline_mode<synchronous>, transform_indices = @transform_2, window_bounds = array<i64: 1, 128>}, {pipeline_mode = #tpu.pipeline_mode<synchronous>, transform_indices = @transform_3, window_bounds = array<i64: 144, 128>}]} {
    %c0 = arith.constant 0 : index
    %c0_0 = arith.constant 0 : index
    %c0_1 = arith.constant 0 : index
    %c0_2 = arith.constant 0 : index
    %0 = vector.load %arg1[%c0, %c0_0, %c0_1, %c0_2] : memref<2x4x82x8xbf16, #tpu.memory_space<vmem>>, vector<1x1x72x8xbf16>
    %1 = vector.shape_cast %0 : vector<1x1x72x8xbf16> to vector<72x8xbf16>
    %c1 = arith.constant 1 : index
    %c0_3 = arith.constant 0 : index
    %c0_4 = arith.constant 0 : index
    %c0_5 = arith.constant 0 : index
    %2 = vector.load %arg1[%c1, %c0_3, %c0_4, %c0_5] : memref<2x4x82x8xbf16, #tpu.memory_space<vmem>>, vector<1x1x72x8xbf16>
    %3 = vector.shape_cast %2 : vector<1x1x72x8xbf16> to vector<72x8xbf16>
    %4 = tpu.concatenate %1, %3 in 0 : vector<72x8xbf16>, vector<72x8xbf16> -> vector<144x8xbf16>
    %c0_6 = arith.constant 0 : index
    %c1_7 = arith.constant 1 : index
    %c0_8 = arith.constant 0 : index
    %c0_9 = arith.constant 0 : index
    %5 = vector.load %arg1[%c0_6, %c1_7, %c0_8, %c0_9] : memref<2x4x82x8xbf16, #tpu.memory_space<vmem>>, vector<1x1x72x8xbf16>
    %6 = vector.shape_cast %5 : vector<1x1x72x8xbf16> to vector<72x8xbf16>
    %c1_10 = arith.constant 1 : index
    %c1_11 = arith.constant 1 : index
    %c0_12 = arith.constant 0 : index
    %c0_13 = arith.constant 0 : index
    %7 = vector.load %arg1[%c1_10, %c1_11, %c0_12, %c0_13] : memref<2x4x82x8xbf16, #tpu.memory_space<vmem>>, vector<1x1x72x8xbf16>
    %8 = vector.shape_cast %7 : vector<1x1x72x8xbf16> to vector<72x8xbf16>
    %9 = tpu.concatenate %6, %8 in 0 : vector<72x8xbf16>, vector<72x8xbf16> -> vector<144x8xbf16>
    %c0_14 = arith.constant 0 : index
    %c0_15 = arith.constant 0 : index
    %c1_16 = arith.constant 1 : index
    %c0_17 = arith.constant 0 : index
    %10 = vector.load %arg1[%c0_14, %c0_15, %c1_16, %c0_17] : memref<2x4x82x8xbf16, #tpu.memory_space<vmem>>, vector<1x1x72x8xbf16>
    %11 = vector.shape_cast %10 : vector<1x1x72x8xbf16> to vector<72x8xbf16>
    %c1_18 = arith.constant 1 : index
    %c0_19 = arith.constant 0 : index
    %c1_20 = arith.constant 1 : index
    %c0_21 = arith.constant 0 : index
    %12 = vector.load %arg1[%c1_18, %c0_19, %c1_20, %c0_21] : memref<2x4x82x8xbf16, #tpu.memory_space<vmem>>, vector<1x1x72x8xbf16>
    %13 = vector.shape_cast %12 : vector<1x1x72x8xbf16> to vector<72x8xbf16>
    %14 = tpu.concatenate %11, %13 in 0 : vector<72x8xbf16>, vector<72x8xbf16> -> vector<144x8xbf16>
    %c0_22 = arith.constant 0 : index
    %c2 = arith.constant 2 : index
    %c0_23 = arith.constant 0 : index
    %c0_24 = arith.constant 0 : index
    %15 = vector.load %arg1[%c0_22, %c2, %c0_23, %c0_24] : memref<2x4x82x8xbf16, #tpu.memory_space<vmem>>, vector<1x1x72x8xbf16>
    %16 = vector.shape_cast %15 : vector<1x1x72x8xbf16> to vector<72x8xbf16>
    %c1_25 = arith.constant 1 : index
    %c2_26 = arith.constant 2 : index
    %c0_27 = arith.constant 0 : index
    %c0_28 = arith.constant 0 : index
    %17 = vector.load %arg1[%c1_25, %c2_26, %c0_27, %c0_28] : memref<2x4x82x8xbf16, #tpu.memory_space<vmem>>, vector<1x1x72x8xbf16>
    %18 = vector.shape_cast %17 : vector<1x1x72x8xbf16> to vector<72x8xbf16>
    %19 = tpu.concatenate %16, %18 in 0 : vector<72x8xbf16>, vector<72x8xbf16> -> vector<144x8xbf16>
    %c0_29 = arith.constant 0 : index
    %c3 = arith.constant 3 : index
    %c0_30 = arith.constant 0 : index
    %c0_31 = arith.constant 0 : index
    %20 = vector.load %arg1[%c0_29, %c3, %c0_30, %c0_31] : memref<2x4x82x8xbf16, #tpu.memory_space<vmem>>, vector<1x1x72x8xbf16>
    %21 = vector.shape_cast %20 : vector<1x1x72x8xbf16> to vector<72x8xbf16>
    %c1_32 = arith.constant 1 : index
    %c3_33 = arith.constant 3 : index
    %c0_34 = arith.constant 0 : index
    %c0_35 = arith.constant 0 : index
    %22 = vector.load %arg1[%c1_32, %c3_33, %c0_34, %c0_35] : memref<2x4x82x8xbf16, #tpu.memory_space<vmem>>, vector<1x1x72x8xbf16>
    %23 = vector.shape_cast %22 : vector<1x1x72x8xbf16> to vector<72x8xbf16>
    %24 = tpu.concatenate %21, %23 in 0 : vector<72x8xbf16>, vector<72x8xbf16> -> vector<144x8xbf16>
    %c0_36 = arith.constant 0 : index
    %c2_37 = arith.constant 2 : index
    %c1_38 = arith.constant 1 : index
    %c0_39 = arith.constant 0 : index
    %25 = vector.load %arg1[%c0_36, %c2_37, %c1_38, %c0_39] : memref<2x4x82x8xbf16, #tpu.memory_space<vmem>>, vector<1x1x72x8xbf16>
    %26 = vector.shape_cast %25 : vector<1x1x72x8xbf16> to vector<72x8xbf16>
    %c1_40 = arith.constant 1 : index
    %c2_41 = arith.constant 2 : index
    %c1_42 = arith.constant 1 : index
    %c0_43 = arith.constant 0 : index
    %27 = vector.load %arg1[%c1_40, %c2_41, %c1_42, %c0_43] : memref<2x4x82x8xbf16, #tpu.memory_space<vmem>>, vector<1x1x72x8xbf16>
    %28 = vector.shape_cast %27 : vector<1x1x72x8xbf16> to vector<72x8xbf16>
    %29 = tpu.concatenate %26, %28 in 0 : vector<72x8xbf16>, vector<72x8xbf16> -> vector<144x8xbf16>
    %c0_44 = arith.constant 0 : index
    %c0_45 = arith.constant 0 : index
    %c9 = arith.constant 9 : index
    %c0_46 = arith.constant 0 : index
    %30 = vector.load %arg1[%c0_44, %c0_45, %c9, %c0_46] : memref<2x4x82x8xbf16, #tpu.memory_space<vmem>>, vector<1x1x72x8xbf16>
    %31 = vector.shape_cast %30 : vector<1x1x72x8xbf16> to vector<72x8xbf16>
    %c1_47 = arith.constant 1 : index
    %c0_48 = arith.constant 0 : index
    %c9_49 = arith.constant 9 : index
    %c0_50 = arith.constant 0 : index
    %32 = vector.load %arg1[%c1_47, %c0_48, %c9_49, %c0_50] : memref<2x4x82x8xbf16, #tpu.memory_space<vmem>>, vector<1x1x72x8xbf16>
    %33 = vector.shape_cast %32 : vector<1x1x72x8xbf16> to vector<72x8xbf16>
    %34 = tpu.concatenate %31, %33 in 0 : vector<72x8xbf16>, vector<72x8xbf16> -> vector<144x8xbf16>
    %c0_51 = arith.constant 0 : index
    %c1_52 = arith.constant 1 : index
    %c9_53 = arith.constant 9 : index
    %c0_54 = arith.constant 0 : index
    %35 = vector.load %arg1[%c0_51, %c1_52, %c9_53, %c0_54] : memref<2x4x82x8xbf16, #tpu.memory_space<vmem>>, vector<1x1x72x8xbf16>
    %36 = vector.shape_cast %35 : vector<1x1x72x8xbf16> to vector<72x8xbf16>
    %c1_55 = arith.constant 1 : index
    %c1_56 = arith.constant 1 : index
    %c9_57 = arith.constant 9 : index
    %c0_58 = arith.constant 0 : index
    %37 = vector.load %arg1[%c1_55, %c1_56, %c9_57, %c0_58] : memref<2x4x82x8xbf16, #tpu.memory_space<vmem>>, vector<1x1x72x8xbf16>
    %38 = vector.shape_cast %37 : vector<1x1x72x8xbf16> to vector<72x8xbf16>
    %39 = tpu.concatenate %36, %38 in 0 : vector<72x8xbf16>, vector<72x8xbf16> -> vector<144x8xbf16>
    %c0_59 = arith.constant 0 : index
    %c0_60 = arith.constant 0 : index
    %c10 = arith.constant 10 : index
    %c0_61 = arith.constant 0 : index
    %40 = vector.load %arg1[%c0_59, %c0_60, %c10, %c0_61] : memref<2x4x82x8xbf16, #tpu.memory_space<vmem>>, vector<1x1x72x8xbf16>
    %41 = vector.shape_cast %40 : vector<1x1x72x8xbf16> to vector<72x8xbf16>
    %c1_62 = arith.constant 1 : index
    %c0_63 = arith.constant 0 : index
    %c10_64 = arith.constant 10 : index
    %c0_65 = arith.constant 0 : index
    %42 = vector.load %arg1[%c1_62, %c0_63, %c10_64, %c0_65] : memref<2x4x82x8xbf16, #tpu.memory_space<vmem>>, vector<1x1x72x8xbf16>
    %43 = vector.shape_cast %42 : vector<1x1x72x8xbf16> to vector<72x8xbf16>
    %44 = tpu.concatenate %41, %43 in 0 : vector<72x8xbf16>, vector<72x8xbf16> -> vector<144x8xbf16>
    %45 = tpu.concatenate %4, %9, %14, %19, %24, %29, %34, %39, %44 in 1 : vector<144x8xbf16>, vector<144x8xbf16>, vector<144x8xbf16>, vector<144x8xbf16>, vector<144x8xbf16>, vector<144x8xbf16>, vector<144x8xbf16>, vector<144x8xbf16>, vector<144x8xbf16> -> vector<144x72xbf16>
    %c0_66 = arith.constant 0 : index
    %c0_67 = arith.constant 0 : index
    %46 = vector.load %arg2[%c0_66, %c0_67] : memref<72x128xbf16, #tpu.memory_space<vmem>>, vector<72x128xbf16>
    %cst = arith.constant dense<0.000000e+00> : vector<144x128xf32>
    %47 = tpu.matmul %45, %46, %cst {dimension_numbers = #tpu.dot_dimension_numbers<[1], [0], [0], [1], [0, 0, 1, 1], [], []>} : vector<144x72xbf16>, vector<72x128xbf16>, vector<144x128xf32> -> vector<144x128xf32>
    %c0_68 = arith.constant 0 : index
    %c0_69 = arith.constant 0 : index
    %48 = vector.load %arg3[%c0_68, %c0_69] : memref<1x128xf32, #tpu.memory_space<vmem>>, vector<1x128xf32>
    %49 = vector.broadcast %48 : vector<1x128xf32> to vector<144x128xf32>
    %50 = arith.addf %47, %49 : vector<144x128xf32>
    %cst_70 = arith.constant 0.000000e+00 : f32
    %51 = vector.broadcast %cst_70 : f32 to vector<144x128xf32>
    %52 = arith.cmpf ogt, %50, %51 : vector<144x128xf32>
    %cst_71 = arith.constant 1.000000e-01 : f32
    %53 = vector.broadcast %cst_71 : f32 to vector<144x128xf32>
    %54 = arith.mulf %53, %50 : vector<144x128xf32>
    %55 = arith.select %52, %50, %54 : vector<144x128xi1>, vector<144x128xf32>
    %56 = arith.truncf %55 : vector<144x128xf32> to vector<144x128xbf16>
    %c0_72 = arith.constant 0 : index
    %c0_73 = arith.constant 0 : index
    %57 = vector.load %arg4[%c0_72, %c0_73] : memref<144x128xbf16, #tpu.memory_space<vmem>>, vector<144x128xbf16>
    tpu.vector_store %arg4[%c0_72, %c0_73], %56 {strides = array<i32>} : memref<144x128xbf16, #tpu.memory_space<vmem>>, vector<144x128xbf16>,
    return
  }
  func.func @transform_0(%arg0: i32) -> (i32, i32, i32, i32) {
    %c0_i32 = arith.constant 0 : i32
    %c0_i32_0 = arith.constant 0 : i32
    %c0_i32_1 = arith.constant 0 : i32
    %c0_i32_2 = arith.constant 0 : i32
    %c0_i32_3 = arith.constant 0 : i32
    return %c0_i32, %c0_i32_0, %c0_i32_1, %c0_i32_2 : i32, i32, i32, i32
  }
  func.func @transform_1(%arg0: i32) -> (i32, i32) {
    %c0_i32 = arith.constant 0 : i32
    %c0_i32_0 = arith.constant 0 : i32
    %c0_i32_1 = arith.constant 0 : i32
    return %c0_i32, %c0_i32_0 : i32, i32
  }
  func.func @transform_2(%arg0: i32) -> (i32, i32) {
    %c0_i32 = arith.constant 0 : i32
    %c0_i32_0 = arith.constant 0 : i32
    %c0_i32_1 = arith.constant 0 : i32
    return %c0_i32, %c0_i32_0 : i32, i32
  }
  func.func @transform_3(%arg0: i32) -> (i32, i32) {
    %c0_i32 = arith.constant 0 : i32
    %c0_i32_0 = arith.constant 0 : i32
    %c0_i32_1 = arith.constant 0 : i32
    return %c0_i32, %c0_i32_0 : i32, i32
  }
}

module attributes {stable_mosaic.version = 11 : i64} {
  func.func @_conv_kernel(%arg0: i32, %arg1: memref<2x1x64x16xbf16, #tpu.memory_space<vmem>>, %arg2: memref<16x128xbf16, #tpu.memory_space<vmem>>, %arg3: memref<1x128xf32, #tpu.memory_space<vmem>>, %arg4: memref<128x16xbf16, #tpu.memory_space<vmem>>, %arg5: memref<128x128xbf16, #tpu.memory_space<vmem>>) attributes {dimension_semantics = [#tpu.dimension_semantics<arbitrary>], iteration_bounds = array<i64: 1>, scalar_prefetch = 0 : i64, scratch_operands = 0 : i64, tpu.core_type = #tpu.core_type<tc>, window_params = [{pipeline_mode = #tpu.pipeline_mode<synchronous>, transform_indices = @transform_0, window_bounds = array<i64: 2, 1, 64, 16>}, {pipeline_mode = #tpu.pipeline_mode<synchronous>, transform_indices = @transform_1, window_bounds = array<i64: 16, 128>}, {pipeline_mode = #tpu.pipeline_mode<synchronous>, transform_indices = @transform_2, window_bounds = array<i64: 1, 128>}, {pipeline_mode = #tpu.pipeline_mode<synchronous>, transform_indices = @transform_3, window_bounds = array<i64: 128, 16>}, {pipeline_mode = #tpu.pipeline_mode<synchronous>, transform_indices = @transform_4, window_bounds = array<i64: 128, 128>}]} {
    %c0 = arith.constant 0 : index
    %c0_0 = arith.constant 0 : index
    %c0_1 = arith.constant 0 : index
    %c0_2 = arith.constant 0 : index
    %0 = vector.load %arg1[%c0, %c0_0, %c0_1, %c0_2] : memref<2x1x64x16xbf16, #tpu.memory_space<vmem>>, vector<1x1x64x16xbf16>
    %1 = vector.shape_cast %0 : vector<1x1x64x16xbf16> to vector<64x16xbf16>
    %c1 = arith.constant 1 : index
    %c0_3 = arith.constant 0 : index
    %c0_4 = arith.constant 0 : index
    %c0_5 = arith.constant 0 : index
    %2 = vector.load %arg1[%c1, %c0_3, %c0_4, %c0_5] : memref<2x1x64x16xbf16, #tpu.memory_space<vmem>>, vector<1x1x64x16xbf16>
    %3 = vector.shape_cast %2 : vector<1x1x64x16xbf16> to vector<64x16xbf16>
    %4 = tpu.concatenate %1, %3 in 0 : vector<64x16xbf16>, vector<64x16xbf16> -> vector<128x16xbf16>
    %c0_6 = arith.constant 0 : index
    %c0_7 = arith.constant 0 : index
    %5 = vector.load %arg2[%c0_6, %c0_7] : memref<16x128xbf16, #tpu.memory_space<vmem>>, vector<16x128xbf16>
    %cst = arith.constant dense<0.000000e+00> : vector<128x128xf32>
    %6 = tpu.matmul %4, %5, %cst {dimension_numbers = #tpu.dot_dimension_numbers<[1], [0], [0], [1], [0, 0, 1, 1], [], []>} : vector<128x16xbf16>, vector<16x128xbf16>, vector<128x128xf32> -> vector<128x128xf32>
    %c0_8 = arith.constant 0 : index
    %c0_9 = arith.constant 0 : index
    %7 = vector.load %arg3[%c0_8, %c0_9] : memref<1x128xf32, #tpu.memory_space<vmem>>, vector<1x128xf32>
    %8 = vector.broadcast %7 : vector<1x128xf32> to vector<128x128xf32>
    %9 = arith.addf %6, %8 : vector<128x128xf32>
    %cst_10 = arith.constant 0.000000e+00 : f32
    %10 = vector.broadcast %cst_10 : f32 to vector<128x128xf32>
    %11 = arith.cmpf ogt, %9, %10 : vector<128x128xf32>
    %cst_11 = arith.constant 1.000000e-01 : f32
    %12 = vector.broadcast %cst_11 : f32 to vector<128x128xf32>
    %13 = arith.mulf %12, %9 : vector<128x128xf32>
    %14 = arith.select %11, %9, %13 : vector<128x128xi1>, vector<128x128xf32>
    %c0_12 = arith.constant 0 : index
    %c0_13 = arith.constant 0 : index
    %15 = vector.load %arg4[%c0_12, %c0_13] : memref<128x16xbf16, #tpu.memory_space<vmem>>, vector<128x16xbf16>
    %16 = arith.extf %15 : vector<128x16xbf16> to vector<128x16xf32>
    %cst_14 = arith.constant 0.000000e+00 : f32
    %17 = vector.broadcast %cst_14 : f32 to vector<128x112xf32>
    %18 = tpu.concatenate %16, %17 in 1 : vector<128x16xf32>, vector<128x112xf32> -> vector<128x128xf32>
    %19 = arith.addf %14, %18 : vector<128x128xf32>
    %20 = arith.truncf %19 : vector<128x128xf32> to vector<128x128xbf16>
    %c0_15 = arith.constant 0 : index
    %c0_16 = arith.constant 0 : index
    %21 = vector.load %arg5[%c0_15, %c0_16] : memref<128x128xbf16, #tpu.memory_space<vmem>>, vector<128x128xbf16>
    tpu.vector_store %arg5[%c0_15, %c0_16], %20 {strides = array<i32>} : memref<128x128xbf16, #tpu.memory_space<vmem>>, vector<128x128xbf16>,
    return
  }
  func.func @transform_0(%arg0: i32) -> (i32, i32, i32, i32) {
    %c0_i32 = arith.constant 0 : i32
    %c0_i32_0 = arith.constant 0 : i32
    %c0_i32_1 = arith.constant 0 : i32
    %c0_i32_2 = arith.constant 0 : i32
    %c0_i32_3 = arith.constant 0 : i32
    return %c0_i32, %c0_i32_0, %c0_i32_1, %c0_i32_2 : i32, i32, i32, i32
  }
  func.func @transform_1(%arg0: i32) -> (i32, i32) {
    %c0_i32 = arith.constant 0 : i32
    %c0_i32_0 = arith.constant 0 : i32
    %c0_i32_1 = arith.constant 0 : i32
    return %c0_i32, %c0_i32_0 : i32, i32
  }
  func.func @transform_2(%arg0: i32) -> (i32, i32) {
    %c0_i32 = arith.constant 0 : i32
    %c0_i32_0 = arith.constant 0 : i32
    %c0_i32_1 = arith.constant 0 : i32
    return %c0_i32, %c0_i32_0 : i32, i32
  }
  func.func @transform_3(%arg0: i32) -> (i32, i32) {
    %c0_i32 = arith.constant 0 : i32
    %c0_i32_0 = arith.constant 0 : i32
    %c0_i32_1 = arith.constant 0 : i32
    return %c0_i32, %c0_i32_0 : i32, i32
  }
  func.func @transform_4(%arg0: i32) -> (i32, i32) {
    %c0_i32 = arith.constant 0 : i32
    %c0_i32_0 = arith.constant 0 : i32
    %c0_i32_1 = arith.constant 0 : i32
    return %c0_i32, %c0_i32_0 : i32, i32
  }
}

module attributes {stable_mosaic.version = 11 : i64} {
  func.func @_maxpool_kernel(%arg0: i32, %arg1: memref<2x4x26x16xbf16, #tpu.memory_space<vmem>>, %arg2: memref<2x20x16xbf16, #tpu.memory_space<vmem>>) attributes {dimension_semantics = [#tpu.dimension_semantics<arbitrary>], iteration_bounds = array<i64: 1>, scalar_prefetch = 0 : i64, scratch_operands = 0 : i64, tpu.core_type = #tpu.core_type<tc>, window_params = [{pipeline_mode = #tpu.pipeline_mode<synchronous>, transform_indices = @transform_0, window_bounds = array<i64: 2, 4, 26, 16>}, {pipeline_mode = #tpu.pipeline_mode<synchronous>, transform_indices = @transform_1, window_bounds = array<i64: 2, 20, 16>}]} {
    %c0 = arith.constant 0 : index
    %c0_0 = arith.constant 0 : index
    %c0_1 = arith.constant 0 : index
    %c0_2 = arith.constant 0 : index
    %0 = vector.load %arg1[%c0, %c0_0, %c0_1, %c0_2] : memref<2x4x26x16xbf16, #tpu.memory_space<vmem>>, vector<1x1x20x16xbf16>
    %1 = vector.shape_cast %0 : vector<1x1x20x16xbf16> to vector<20x16xbf16>
    %c0_3 = arith.constant 0 : index
    %c1 = arith.constant 1 : index
    %c0_4 = arith.constant 0 : index
    %c0_5 = arith.constant 0 : index
    %2 = vector.load %arg1[%c0_3, %c1, %c0_4, %c0_5] : memref<2x4x26x16xbf16, #tpu.memory_space<vmem>>, vector<1x1x20x16xbf16>
    %3 = vector.shape_cast %2 : vector<1x1x20x16xbf16> to vector<20x16xbf16>
    %4 = arith.maximumf %1, %3 : vector<20x16xbf16>
    %c0_6 = arith.constant 0 : index
    %c0_7 = arith.constant 0 : index
    %c1_8 = arith.constant 1 : index
    %c0_9 = arith.constant 0 : index
    %5 = vector.load %arg1[%c0_6, %c0_7, %c1_8, %c0_9] : memref<2x4x26x16xbf16, #tpu.memory_space<vmem>>, vector<1x1x20x16xbf16>
    %6 = vector.shape_cast %5 : vector<1x1x20x16xbf16> to vector<20x16xbf16>
    %7 = arith.maximumf %4, %6 : vector<20x16xbf16>
    %c0_10 = arith.constant 0 : index
    %c2 = arith.constant 2 : index
    %c0_11 = arith.constant 0 : index
    %c0_12 = arith.constant 0 : index
    %8 = vector.load %arg1[%c0_10, %c2, %c0_11, %c0_12] : memref<2x4x26x16xbf16, #tpu.memory_space<vmem>>, vector<1x1x20x16xbf16>
    %9 = vector.shape_cast %8 : vector<1x1x20x16xbf16> to vector<20x16xbf16>
    %10 = arith.maximumf %7, %9 : vector<20x16xbf16>
    %c0_13 = arith.constant 0 : index
    %c3 = arith.constant 3 : index
    %c0_14 = arith.constant 0 : index
    %c0_15 = arith.constant 0 : index
    %11 = vector.load %arg1[%c0_13, %c3, %c0_14, %c0_15] : memref<2x4x26x16xbf16, #tpu.memory_space<vmem>>, vector<1x1x20x16xbf16>
    %12 = vector.shape_cast %11 : vector<1x1x20x16xbf16> to vector<20x16xbf16>
    %13 = arith.maximumf %10, %12 : vector<20x16xbf16>
    %c0_16 = arith.constant 0 : index
    %c2_17 = arith.constant 2 : index
    %c1_18 = arith.constant 1 : index
    %c0_19 = arith.constant 0 : index
    %14 = vector.load %arg1[%c0_16, %c2_17, %c1_18, %c0_19] : memref<2x4x26x16xbf16, #tpu.memory_space<vmem>>, vector<1x1x20x16xbf16>
    %15 = vector.shape_cast %14 : vector<1x1x20x16xbf16> to vector<20x16xbf16>
    %16 = arith.maximumf %13, %15 : vector<20x16xbf16>
    %c0_20 = arith.constant 0 : index
    %c0_21 = arith.constant 0 : index
    %c5 = arith.constant 5 : index
    %c0_22 = arith.constant 0 : index
    %17 = vector.load %arg1[%c0_20, %c0_21, %c5, %c0_22] : memref<2x4x26x16xbf16, #tpu.memory_space<vmem>>, vector<1x1x20x16xbf16>
    %18 = vector.shape_cast %17 : vector<1x1x20x16xbf16> to vector<20x16xbf16>
    %19 = arith.maximumf %16, %18 : vector<20x16xbf16>
    %c0_23 = arith.constant 0 : index
    %c1_24 = arith.constant 1 : index
    %c5_25 = arith.constant 5 : index
    %c0_26 = arith.constant 0 : index
    %20 = vector.load %arg1[%c0_23, %c1_24, %c5_25, %c0_26] : memref<2x4x26x16xbf16, #tpu.memory_space<vmem>>, vector<1x1x20x16xbf16>
    %21 = vector.shape_cast %20 : vector<1x1x20x16xbf16> to vector<20x16xbf16>
    %22 = arith.maximumf %19, %21 : vector<20x16xbf16>
    %c0_27 = arith.constant 0 : index
    %c0_28 = arith.constant 0 : index
    %c6 = arith.constant 6 : index
    %c0_29 = arith.constant 0 : index
    %23 = vector.load %arg1[%c0_27, %c0_28, %c6, %c0_29] : memref<2x4x26x16xbf16, #tpu.memory_space<vmem>>, vector<1x1x20x16xbf16>
    %24 = vector.shape_cast %23 : vector<1x1x20x16xbf16> to vector<20x16xbf16>
    %25 = arith.maximumf %22, %24 : vector<20x16xbf16>
    %c0_30 = arith.constant 0 : index
    %c0_31 = arith.constant 0 : index
    %c0_32 = arith.constant 0 : index
    %26 = vector.load %arg2[%c0_30, %c0_31, %c0_32] : memref<2x20x16xbf16, #tpu.memory_space<vmem>>, vector<1x20x16xbf16>
    %27 = vector.shape_cast %26 : vector<1x20x16xbf16> to vector<20x16xbf16>
    %28 = vector.shape_cast %25 : vector<20x16xbf16> to vector<1x20x16xbf16>
    tpu.vector_store %arg2[%c0_30, %c0_31, %c0_32], %28 {strides = array<i32>} : memref<2x20x16xbf16, #tpu.memory_space<vmem>>, vector<1x20x16xbf16>,
    %c1_33 = arith.constant 1 : index
    %c0_34 = arith.constant 0 : index
    %c0_35 = arith.constant 0 : index
    %c0_36 = arith.constant 0 : index
    %29 = vector.load %arg1[%c1_33, %c0_34, %c0_35, %c0_36] : memref<2x4x26x16xbf16, #tpu.memory_space<vmem>>, vector<1x1x20x16xbf16>
    %30 = vector.shape_cast %29 : vector<1x1x20x16xbf16> to vector<20x16xbf16>
    %c1_37 = arith.constant 1 : index
    %c1_38 = arith.constant 1 : index
    %c0_39 = arith.constant 0 : index
    %c0_40 = arith.constant 0 : index
    %31 = vector.load %arg1[%c1_37, %c1_38, %c0_39, %c0_40] : memref<2x4x26x16xbf16, #tpu.memory_space<vmem>>, vector<1x1x20x16xbf16>
    %32 = vector.shape_cast %31 : vector<1x1x20x16xbf16> to vector<20x16xbf16>
    %33 = arith.maximumf %30, %32 : vector<20x16xbf16>
    %c1_41 = arith.constant 1 : index
    %c0_42 = arith.constant 0 : index
    %c1_43 = arith.constant 1 : index
    %c0_44 = arith.constant 0 : index
    %34 = vector.load %arg1[%c1_41, %c0_42, %c1_43, %c0_44] : memref<2x4x26x16xbf16, #tpu.memory_space<vmem>>, vector<1x1x20x16xbf16>
    %35 = vector.shape_cast %34 : vector<1x1x20x16xbf16> to vector<20x16xbf16>
    %36 = arith.maximumf %33, %35 : vector<20x16xbf16>
    %c1_45 = arith.constant 1 : index
    %c2_46 = arith.constant 2 : index
    %c0_47 = arith.constant 0 : index
    %c0_48 = arith.constant 0 : index
    %37 = vector.load %arg1[%c1_45, %c2_46, %c0_47, %c0_48] : memref<2x4x26x16xbf16, #tpu.memory_space<vmem>>, vector<1x1x20x16xbf16>
    %38 = vector.shape_cast %37 : vector<1x1x20x16xbf16> to vector<20x16xbf16>
    %39 = arith.maximumf %36, %38 : vector<20x16xbf16>
    %c1_49 = arith.constant 1 : index
    %c3_50 = arith.constant 3 : index
    %c0_51 = arith.constant 0 : index
    %c0_52 = arith.constant 0 : index
    %40 = vector.load %arg1[%c1_49, %c3_50, %c0_51, %c0_52] : memref<2x4x26x16xbf16, #tpu.memory_space<vmem>>, vector<1x1x20x16xbf16>
    %41 = vector.shape_cast %40 : vector<1x1x20x16xbf16> to vector<20x16xbf16>
    %42 = arith.maximumf %39, %41 : vector<20x16xbf16>
    %c1_53 = arith.constant 1 : index
    %c2_54 = arith.constant 2 : index
    %c1_55 = arith.constant 1 : index
    %c0_56 = arith.constant 0 : index
    %43 = vector.load %arg1[%c1_53, %c2_54, %c1_55, %c0_56] : memref<2x4x26x16xbf16, #tpu.memory_space<vmem>>, vector<1x1x20x16xbf16>
    %44 = vector.shape_cast %43 : vector<1x1x20x16xbf16> to vector<20x16xbf16>
    %45 = arith.maximumf %42, %44 : vector<20x16xbf16>
    %c1_57 = arith.constant 1 : index
    %c0_58 = arith.constant 0 : index
    %c5_59 = arith.constant 5 : index
    %c0_60 = arith.constant 0 : index
    %46 = vector.load %arg1[%c1_57, %c0_58, %c5_59, %c0_60] : memref<2x4x26x16xbf16, #tpu.memory_space<vmem>>, vector<1x1x20x16xbf16>
    %47 = vector.shape_cast %46 : vector<1x1x20x16xbf16> to vector<20x16xbf16>
    %48 = arith.maximumf %45, %47 : vector<20x16xbf16>
    %c1_61 = arith.constant 1 : index
    %c1_62 = arith.constant 1 : index
    %c5_63 = arith.constant 5 : index
    %c0_64 = arith.constant 0 : index
    %49 = vector.load %arg1[%c1_61, %c1_62, %c5_63, %c0_64] : memref<2x4x26x16xbf16, #tpu.memory_space<vmem>>, vector<1x1x20x16xbf16>
    %50 = vector.shape_cast %49 : vector<1x1x20x16xbf16> to vector<20x16xbf16>
    %51 = arith.maximumf %48, %50 : vector<20x16xbf16>
    %c1_65 = arith.constant 1 : index
    %c0_66 = arith.constant 0 : index
    %c6_67 = arith.constant 6 : index
    %c0_68 = arith.constant 0 : index
    %52 = vector.load %arg1[%c1_65, %c0_66, %c6_67, %c0_68] : memref<2x4x26x16xbf16, #tpu.memory_space<vmem>>, vector<1x1x20x16xbf16>
    %53 = vector.shape_cast %52 : vector<1x1x20x16xbf16> to vector<20x16xbf16>
    %54 = arith.maximumf %51, %53 : vector<20x16xbf16>
    %c1_69 = arith.constant 1 : index
    %c0_70 = arith.constant 0 : index
    %c0_71 = arith.constant 0 : index
    %55 = vector.load %arg2[%c1_69, %c0_70, %c0_71] : memref<2x20x16xbf16, #tpu.memory_space<vmem>>, vector<1x20x16xbf16>
    %56 = vector.shape_cast %55 : vector<1x20x16xbf16> to vector<20x16xbf16>
    %57 = vector.shape_cast %54 : vector<20x16xbf16> to vector<1x20x16xbf16>
    tpu.vector_store %arg2[%c1_69, %c0_70, %c0_71], %57 {strides = array<i32>} : memref<2x20x16xbf16, #tpu.memory_space<vmem>>, vector<1x20x16xbf16>,
    return
  }
  func.func @transform_0(%arg0: i32) -> (i32, i32, i32, i32) {
    %c0_i32 = arith.constant 0 : i32
    %c0_i32_0 = arith.constant 0 : i32
    %c0_i32_1 = arith.constant 0 : i32
    %c0_i32_2 = arith.constant 0 : i32
    %c0_i32_3 = arith.constant 0 : i32
    return %c0_i32, %c0_i32_0, %c0_i32_1, %c0_i32_2 : i32, i32, i32, i32
  }
  func.func @transform_1(%arg0: i32) -> (i32, i32, i32) {
    %c0_i32 = arith.constant 0 : i32
    %c0_i32_0 = arith.constant 0 : i32
    %c0_i32_1 = arith.constant 0 : i32
    %c0_i32_2 = arith.constant 0 : i32
    return %c0_i32, %c0_i32_0, %c0_i32_1 : i32, i32, i32
  }
}

module attributes {stable_mosaic.version = 11 : i64} {
  func.func @_conv_kernel(%arg0: i32, %arg1: memref<2x1x102x32xbf16, #tpu.memory_space<vmem>>, %arg2: memref<288x128xbf16, #tpu.memory_space<vmem>>, %arg3: memref<1x128xf32, #tpu.memory_space<vmem>>, %arg4: memref<160x128xbf16, #tpu.memory_space<vmem>>) attributes {dimension_semantics = [#tpu.dimension_semantics<arbitrary>], iteration_bounds = array<i64: 1>, scalar_prefetch = 0 : i64, scratch_operands = 0 : i64, tpu.core_type = #tpu.core_type<tc>, window_params = [{pipeline_mode = #tpu.pipeline_mode<synchronous>, transform_indices = @transform_0, window_bounds = array<i64: 2, 1, 102, 32>}, {pipeline_mode = #tpu.pipeline_mode<synchronous>, transform_indices = @transform_1, window_bounds = array<i64: 288, 128>}, {pipeline_mode = #tpu.pipeline_mode<synchronous>, transform_indices = @transform_2, window_bounds = array<i64: 1, 128>}, {pipeline_mode = #tpu.pipeline_mode<synchronous>, transform_indices = @transform_3, window_bounds = array<i64: 160, 128>}]} {
    %c0 = arith.constant 0 : index
    %c0_0 = arith.constant 0 : index
    %c0_1 = arith.constant 0 : index
    %c0_2 = arith.constant 0 : index
    %0 = vector.load %arg1[%c0, %c0_0, %c0_1, %c0_2] : memref<2x1x102x32xbf16, #tpu.memory_space<vmem>>, vector<1x1x80x32xbf16>
    %1 = vector.shape_cast %0 : vector<1x1x80x32xbf16> to vector<80x32xbf16>
    %c1 = arith.constant 1 : index
    %c0_3 = arith.constant 0 : index
    %c0_4 = arith.constant 0 : index
    %c0_5 = arith.constant 0 : index
    %2 = vector.load %arg1[%c1, %c0_3, %c0_4, %c0_5] : memref<2x1x102x32xbf16, #tpu.memory_space<vmem>>, vector<1x1x80x32xbf16>
    %3 = vector.shape_cast %2 : vector<1x1x80x32xbf16> to vector<80x32xbf16>
    %4 = tpu.concatenate %1, %3 in 0 : vector<80x32xbf16>, vector<80x32xbf16> -> vector<160x32xbf16>
    %c0_6 = arith.constant 0 : index
    %c0_7 = arith.constant 0 : index
    %c1_8 = arith.constant 1 : index
    %c0_9 = arith.constant 0 : index
    %5 = vector.load %arg1[%c0_6, %c0_7, %c1_8, %c0_9] : memref<2x1x102x32xbf16, #tpu.memory_space<vmem>>, vector<1x1x80x32xbf16>
    %6 = vector.shape_cast %5 : vector<1x1x80x32xbf16> to vector<80x32xbf16>
    %c1_10 = arith.constant 1 : index
    %c0_11 = arith.constant 0 : index
    %c1_12 = arith.constant 1 : index
    %c0_13 = arith.constant 0 : index
    %7 = vector.load %arg1[%c1_10, %c0_11, %c1_12, %c0_13] : memref<2x1x102x32xbf16, #tpu.memory_space<vmem>>, vector<1x1x80x32xbf16>
    %8 = vector.shape_cast %7 : vector<1x1x80x32xbf16> to vector<80x32xbf16>
    %9 = tpu.concatenate %6, %8 in 0 : vector<80x32xbf16>, vector<80x32xbf16> -> vector<160x32xbf16>
    %c0_14 = arith.constant 0 : index
    %c0_15 = arith.constant 0 : index
    %c2 = arith.constant 2 : index
    %c0_16 = arith.constant 0 : index
    %10 = vector.load %arg1[%c0_14, %c0_15, %c2, %c0_16] : memref<2x1x102x32xbf16, #tpu.memory_space<vmem>>, vector<1x1x80x32xbf16>
    %11 = vector.shape_cast %10 : vector<1x1x80x32xbf16> to vector<80x32xbf16>
    %c1_17 = arith.constant 1 : index
    %c0_18 = arith.constant 0 : index
    %c2_19 = arith.constant 2 : index
    %c0_20 = arith.constant 0 : index
    %12 = vector.load %arg1[%c1_17, %c0_18, %c2_19, %c0_20] : memref<2x1x102x32xbf16, #tpu.memory_space<vmem>>, vector<1x1x80x32xbf16>
    %13 = vector.shape_cast %12 : vector<1x1x80x32xbf16> to vector<80x32xbf16>
    %14 = tpu.concatenate %11, %13 in 0 : vector<80x32xbf16>, vector<80x32xbf16> -> vector<160x32xbf16>
    %c0_21 = arith.constant 0 : index
    %c0_22 = arith.constant 0 : index
    %c10 = arith.constant 10 : index
    %c0_23 = arith.constant 0 : index
    %15 = vector.load %arg1[%c0_21, %c0_22, %c10, %c0_23] : memref<2x1x102x32xbf16, #tpu.memory_space<vmem>>, vector<1x1x80x32xbf16>
    %16 = vector.shape_cast %15 : vector<1x1x80x32xbf16> to vector<80x32xbf16>
    %c1_24 = arith.constant 1 : index
    %c0_25 = arith.constant 0 : index
    %c10_26 = arith.constant 10 : index
    %c0_27 = arith.constant 0 : index
    %17 = vector.load %arg1[%c1_24, %c0_25, %c10_26, %c0_27] : memref<2x1x102x32xbf16, #tpu.memory_space<vmem>>, vector<1x1x80x32xbf16>
    %18 = vector.shape_cast %17 : vector<1x1x80x32xbf16> to vector<80x32xbf16>
    %19 = tpu.concatenate %16, %18 in 0 : vector<80x32xbf16>, vector<80x32xbf16> -> vector<160x32xbf16>
    %c0_28 = arith.constant 0 : index
    %c0_29 = arith.constant 0 : index
    %c11 = arith.constant 11 : index
    %c0_30 = arith.constant 0 : index
    %20 = vector.load %arg1[%c0_28, %c0_29, %c11, %c0_30] : memref<2x1x102x32xbf16, #tpu.memory_space<vmem>>, vector<1x1x80x32xbf16>
    %21 = vector.shape_cast %20 : vector<1x1x80x32xbf16> to vector<80x32xbf16>
    %c1_31 = arith.constant 1 : index
    %c0_32 = arith.constant 0 : index
    %c11_33 = arith.constant 11 : index
    %c0_34 = arith.constant 0 : index
    %22 = vector.load %arg1[%c1_31, %c0_32, %c11_33, %c0_34] : memref<2x1x102x32xbf16, #tpu.memory_space<vmem>>, vector<1x1x80x32xbf16>
    %23 = vector.shape_cast %22 : vector<1x1x80x32xbf16> to vector<80x32xbf16>
    %24 = tpu.concatenate %21, %23 in 0 : vector<80x32xbf16>, vector<80x32xbf16> -> vector<160x32xbf16>
    %c0_35 = arith.constant 0 : index
    %c0_36 = arith.constant 0 : index
    %c12 = arith.constant 12 : index
    %c0_37 = arith.constant 0 : index
    %25 = vector.load %arg1[%c0_35, %c0_36, %c12, %c0_37] : memref<2x1x102x32xbf16, #tpu.memory_space<vmem>>, vector<1x1x80x32xbf16>
    %26 = vector.shape_cast %25 : vector<1x1x80x32xbf16> to vector<80x32xbf16>
    %c1_38 = arith.constant 1 : index
    %c0_39 = arith.constant 0 : index
    %c12_40 = arith.constant 12 : index
    %c0_41 = arith.constant 0 : index
    %27 = vector.load %arg1[%c1_38, %c0_39, %c12_40, %c0_41] : memref<2x1x102x32xbf16, #tpu.memory_space<vmem>>, vector<1x1x80x32xbf16>
    %28 = vector.shape_cast %27 : vector<1x1x80x32xbf16> to vector<80x32xbf16>
    %29 = tpu.concatenate %26, %28 in 0 : vector<80x32xbf16>, vector<80x32xbf16> -> vector<160x32xbf16>
    %c0_42 = arith.constant 0 : index
    %c0_43 = arith.constant 0 : index
    %c20 = arith.constant 20 : index
    %c0_44 = arith.constant 0 : index
    %30 = vector.load %arg1[%c0_42, %c0_43, %c20, %c0_44] : memref<2x1x102x32xbf16, #tpu.memory_space<vmem>>, vector<1x1x80x32xbf16>
    %31 = vector.shape_cast %30 : vector<1x1x80x32xbf16> to vector<80x32xbf16>
    %c1_45 = arith.constant 1 : index
    %c0_46 = arith.constant 0 : index
    %c20_47 = arith.constant 20 : index
    %c0_48 = arith.constant 0 : index
    %32 = vector.load %arg1[%c1_45, %c0_46, %c20_47, %c0_48] : memref<2x1x102x32xbf16, #tpu.memory_space<vmem>>, vector<1x1x80x32xbf16>
    %33 = vector.shape_cast %32 : vector<1x1x80x32xbf16> to vector<80x32xbf16>
    %34 = tpu.concatenate %31, %33 in 0 : vector<80x32xbf16>, vector<80x32xbf16> -> vector<160x32xbf16>
    %c0_49 = arith.constant 0 : index
    %c0_50 = arith.constant 0 : index
    %c21 = arith.constant 21 : index
    %c0_51 = arith.constant 0 : index
    %35 = vector.load %arg1[%c0_49, %c0_50, %c21, %c0_51] : memref<2x1x102x32xbf16, #tpu.memory_space<vmem>>, vector<1x1x80x32xbf16>
    %36 = vector.shape_cast %35 : vector<1x1x80x32xbf16> to vector<80x32xbf16>
    %c1_52 = arith.constant 1 : index
    %c0_53 = arith.constant 0 : index
    %c21_54 = arith.constant 21 : index
    %c0_55 = arith.constant 0 : index
    %37 = vector.load %arg1[%c1_52, %c0_53, %c21_54, %c0_55] : memref<2x1x102x32xbf16, #tpu.memory_space<vmem>>, vector<1x1x80x32xbf16>
    %38 = vector.shape_cast %37 : vector<1x1x80x32xbf16> to vector<80x32xbf16>
    %39 = tpu.concatenate %36, %38 in 0 : vector<80x32xbf16>, vector<80x32xbf16> -> vector<160x32xbf16>
    %c0_56 = arith.constant 0 : index
    %c0_57 = arith.constant 0 : index
    %c22 = arith.constant 22 : index
    %c0_58 = arith.constant 0 : index
    %40 = vector.load %arg1[%c0_56, %c0_57, %c22, %c0_58] : memref<2x1x102x32xbf16, #tpu.memory_space<vmem>>, vector<1x1x80x32xbf16>
    %41 = vector.shape_cast %40 : vector<1x1x80x32xbf16> to vector<80x32xbf16>
    %c1_59 = arith.constant 1 : index
    %c0_60 = arith.constant 0 : index
    %c22_61 = arith.constant 22 : index
    %c0_62 = arith.constant 0 : index
    %42 = vector.load %arg1[%c1_59, %c0_60, %c22_61, %c0_62] : memref<2x1x102x32xbf16, #tpu.memory_space<vmem>>, vector<1x1x80x32xbf16>
    %43 = vector.shape_cast %42 : vector<1x1x80x32xbf16> to vector<80x32xbf16>
    %44 = tpu.concatenate %41, %43 in 0 : vector<80x32xbf16>, vector<80x32xbf16> -> vector<160x32xbf16>
    %45 = tpu.concatenate %4, %9, %14, %19, %24, %29, %34, %39, %44 in 1 : vector<160x32xbf16>, vector<160x32xbf16>, vector<160x32xbf16>, vector<160x32xbf16>, vector<160x32xbf16>, vector<160x32xbf16>, vector<160x32xbf16>, vector<160x32xbf16>, vector<160x32xbf16> -> vector<160x288xbf16>
    %c0_63 = arith.constant 0 : index
    %c0_64 = arith.constant 0 : index
    %46 = vector.load %arg2[%c0_63, %c0_64] : memref<288x128xbf16, #tpu.memory_space<vmem>>, vector<288x128xbf16>
    %cst = arith.constant dense<0.000000e+00> : vector<160x128xf32>
    %47 = tpu.matmul %45, %46, %cst {dimension_numbers = #tpu.dot_dimension_numbers<[1], [0], [0], [1], [0, 0, 1, 1], [], []>} : vector<160x288xbf16>, vector<288x128xbf16>, vector<160x128xf32> -> vector<160x128xf32>
    %c0_65 = arith.constant 0 : index
    %c0_66 = arith.constant 0 : index
    %48 = vector.load %arg3[%c0_65, %c0_66] : memref<1x128xf32, #tpu.memory_space<vmem>>, vector<1x128xf32>
    %49 = vector.broadcast %48 : vector<1x128xf32> to vector<160x128xf32>
    %50 = arith.addf %47, %49 : vector<160x128xf32>
    %51 = arith.truncf %50 : vector<160x128xf32> to vector<160x128xbf16>
    %c0_67 = arith.constant 0 : index
    %c0_68 = arith.constant 0 : index
    %52 = vector.load %arg4[%c0_67, %c0_68] : memref<160x128xbf16, #tpu.memory_space<vmem>>, vector<160x128xbf16>
    tpu.vector_store %arg4[%c0_67, %c0_68], %51 {strides = array<i32>} : memref<160x128xbf16, #tpu.memory_space<vmem>>, vector<160x128xbf16>,
    return
  }
  func.func @transform_0(%arg0: i32) -> (i32, i32, i32, i32) {
    %c0_i32 = arith.constant 0 : i32
    %c0_i32_0 = arith.constant 0 : i32
    %c0_i32_1 = arith.constant 0 : i32
    %c0_i32_2 = arith.constant 0 : i32
    %c0_i32_3 = arith.constant 0 : i32
    return %c0_i32, %c0_i32_0, %c0_i32_1, %c0_i32_2 : i32, i32, i32, i32
  }
  func.func @transform_1(%arg0: i32) -> (i32, i32) {
    %c0_i32 = arith.constant 0 : i32
    %c0_i32_0 = arith.constant 0 : i32
    %c0_i32_1 = arith.constant 0 : i32
    return %c0_i32, %c0_i32_0 : i32, i32
  }
  func.func @transform_2(%arg0: i32) -> (i32, i32) {
    %c0_i32 = arith.constant 0 : i32
    %c0_i32_0 = arith.constant 0 : i32
    %c0_i32_1 = arith.constant 0 : i32
    return %c0_i32, %c0_i32_0 : i32, i32
  }
  func.func @transform_3(%arg0: i32) -> (i32, i32) {
    %c0_i32 = arith.constant 0 : i32
    %c0_i32_0 = arith.constant 0 : i32
    %c0_i32_1 = arith.constant 0 : i32
    return %c0_i32, %c0_i32_0 : i32, i32
  }
}

module attributes {stable_mosaic.version = 11 : i64} {
  func.func @_yolo_decode_kernel(%arg0: i32, %arg1: memref<6x8x8x7xbf16, #tpu.memory_space<vmem>>, %arg2: memref<6x8x8x7xf32, #tpu.memory_space<vmem>>) attributes {dimension_semantics = [#tpu.dimension_semantics<arbitrary>], iteration_bounds = array<i64: 1>, scalar_prefetch = 0 : i64, scratch_operands = 0 : i64, tpu.core_type = #tpu.core_type<tc>, window_params = [{pipeline_mode = #tpu.pipeline_mode<synchronous>, transform_indices = @transform_0, window_bounds = array<i64: 6, 8, 8, 7>}, {pipeline_mode = #tpu.pipeline_mode<synchronous>, transform_indices = @transform_1, window_bounds = array<i64: 6, 8, 8, 7>}]} {
    %c0 = arith.constant 0 : index
    %c0_0 = arith.constant 0 : index
    %c0_1 = arith.constant 0 : index
    %c0_2 = arith.constant 0 : index
    %0 = vector.load %arg1[%c0, %c0_0, %c0_1, %c0_2] : memref<6x8x8x7xbf16, #tpu.memory_space<vmem>>, vector<6x8x8x7xbf16>
    %1 = arith.extf %0 : vector<6x8x8x7xbf16> to vector<6x8x8x7xf32>
    %2 = tpu.iota {dimensions = array<i32: 3>} : vector<6x8x8x7xi32>
    %3 = tpu.iota {dimensions = array<i32: 2>} : vector<6x8x8x7xi32>
    %4 = arith.sitofp %3 : vector<6x8x8x7xi32> to vector<6x8x8x7xf32>
    %5 = tpu.iota {dimensions = array<i32: 1>} : vector<6x8x8x7xi32>
    %6 = arith.sitofp %5 : vector<6x8x8x7xi32> to vector<6x8x8x7xf32>
    %7 = tpu.iota {dimensions = array<i32: 0>} : vector<6x8x8x7xi32>
    %cst = arith.constant 0.000000e+00 : f32
    %8 = vector.broadcast %cst : f32 to vector<6x8x8x7xf32>
    %cst_3 = arith.constant 0.000000e+00 : f32
    %9 = vector.broadcast %cst_3 : f32 to vector<6x8x8x7xf32>
    %c0_i32 = arith.constant 0 : i32
    %10 = vector.broadcast %c0_i32 : i32 to vector<6x8x8x7xi32>
    %11 = arith.cmpi eq, %7, %10 : vector<6x8x8x7xi32>
    %cst_4 = arith.constant 6.250000e-01 : f32
    %12 = vector.broadcast %cst_4 : f32 to vector<6x8x8x7xf32>
    %13 = arith.select %11, %12, %8 : vector<6x8x8x7xi1>, vector<6x8x8x7xf32>
    %c0_i32_5 = arith.constant 0 : i32
    %14 = vector.broadcast %c0_i32_5 : i32 to vector<6x8x8x7xi32>
    %15 = arith.cmpi eq, %7, %14 : vector<6x8x8x7xi32>
    %cst_6 = arith.constant 8.125000e-01 : f32
    %16 = vector.broadcast %cst_6 : f32 to vector<6x8x8x7xf32>
    %17 = arith.select %15, %16, %9 : vector<6x8x8x7xi1>, vector<6x8x8x7xf32>
    %c1_i32 = arith.constant 1 : i32
    %18 = vector.broadcast %c1_i32 : i32 to vector<6x8x8x7xi32>
    %19 = arith.cmpi eq, %7, %18 : vector<6x8x8x7xi32>
    %cst_7 = arith.constant 1.000000e+00 : f32
    %20 = vector.broadcast %cst_7 : f32 to vector<6x8x8x7xf32>
    %21 = arith.select %19, %20, %13 : vector<6x8x8x7xi1>, vector<6x8x8x7xf32>
    %c1_i32_8 = arith.constant 1 : i32
    %22 = vector.broadcast %c1_i32_8 : i32 to vector<6x8x8x7xi32>
    %23 = arith.cmpi eq, %7, %22 : vector<6x8x8x7xi32>
    %cst_9 = arith.constant 1.875000e+00 : f32
    %24 = vector.broadcast %cst_9 : f32 to vector<6x8x8x7xf32>
    %25 = arith.select %23, %24, %17 : vector<6x8x8x7xi1>, vector<6x8x8x7xf32>
    %c2_i32 = arith.constant 2 : i32
    %26 = vector.broadcast %c2_i32 : i32 to vector<6x8x8x7xi32>
    %27 = arith.cmpi eq, %7, %26 : vector<6x8x8x7xi32>
    %cst_10 = arith.constant 2.062500e+00 : f32
    %28 = vector.broadcast %cst_10 : f32 to vector<6x8x8x7xf32>
    %29 = arith.select %27, %28, %21 : vector<6x8x8x7xi1>, vector<6x8x8x7xf32>
    %c2_i32_11 = arith.constant 2 : i32
    %30 = vector.broadcast %c2_i32_11 : i32 to vector<6x8x8x7xi32>
    %31 = arith.cmpi eq, %7, %30 : vector<6x8x8x7xi32>
    %cst_12 = arith.constant 1.437500e+00 : f32
    %32 = vector.broadcast %cst_12 : f32 to vector<6x8x8x7xf32>
    %33 = arith.select %31, %32, %25 : vector<6x8x8x7xi1>, vector<6x8x8x7xf32>
    %c3_i32 = arith.constant 3 : i32
    %34 = vector.broadcast %c3_i32 : i32 to vector<6x8x8x7xi32>
    %35 = arith.cmpi eq, %7, %34 : vector<6x8x8x7xi32>
    %cst_13 = arith.constant 6.250000e-01 : f32
    %36 = vector.broadcast %cst_13 : f32 to vector<6x8x8x7xf32>
    %37 = arith.select %35, %36, %29 : vector<6x8x8x7xi1>, vector<6x8x8x7xf32>
    %c3_i32_14 = arith.constant 3 : i32
    %38 = vector.broadcast %c3_i32_14 : i32 to vector<6x8x8x7xi32>
    %39 = arith.cmpi eq, %7, %38 : vector<6x8x8x7xi32>
    %cst_15 = arith.constant 8.125000e-01 : f32
    %40 = vector.broadcast %cst_15 : f32 to vector<6x8x8x7xf32>
    %41 = arith.select %39, %40, %33 : vector<6x8x8x7xi1>, vector<6x8x8x7xf32>
    %c4_i32 = arith.constant 4 : i32
    %42 = vector.broadcast %c4_i32 : i32 to vector<6x8x8x7xi32>
    %43 = arith.cmpi eq, %7, %42 : vector<6x8x8x7xi32>
    %cst_16 = arith.constant 1.000000e+00 : f32
    %44 = vector.broadcast %cst_16 : f32 to vector<6x8x8x7xf32>
    %45 = arith.select %43, %44, %37 : vector<6x8x8x7xi1>, vector<6x8x8x7xf32>
    %c4_i32_17 = arith.constant 4 : i32
    %46 = vector.broadcast %c4_i32_17 : i32 to vector<6x8x8x7xi32>
    %47 = arith.cmpi eq, %7, %46 : vector<6x8x8x7xi32>
    %cst_18 = arith.constant 1.875000e+00 : f32
    %48 = vector.broadcast %cst_18 : f32 to vector<6x8x8x7xf32>
    %49 = arith.select %47, %48, %41 : vector<6x8x8x7xi1>, vector<6x8x8x7xf32>
    %c5_i32 = arith.constant 5 : i32
    %50 = vector.broadcast %c5_i32 : i32 to vector<6x8x8x7xi32>
    %51 = arith.cmpi eq, %7, %50 : vector<6x8x8x7xi32>
    %cst_19 = arith.constant 2.062500e+00 : f32
    %52 = vector.broadcast %cst_19 : f32 to vector<6x8x8x7xf32>
    %53 = arith.select %51, %52, %45 : vector<6x8x8x7xi1>, vector<6x8x8x7xf32>
    %c5_i32_20 = arith.constant 5 : i32
    %54 = vector.broadcast %c5_i32_20 : i32 to vector<6x8x8x7xi32>
    %55 = arith.cmpi eq, %7, %54 : vector<6x8x8x7xi32>
    %cst_21 = arith.constant 1.437500e+00 : f32
    %56 = vector.broadcast %cst_21 : f32 to vector<6x8x8x7xf32>
    %57 = arith.select %55, %56, %49 : vector<6x8x8x7xi1>, vector<6x8x8x7xf32>
    %c0_i32_22 = arith.constant 0 : i32
    %58 = vector.broadcast %c0_i32_22 : i32 to vector<6x8x8x7xi32>
    %59 = arith.cmpi eq, %2, %58 : vector<6x8x8x7xi32>
    %60 = arith.select %59, %4, %6 : vector<6x8x8x7xi1>, vector<6x8x8x7xf32>
    %c2_i32_23 = arith.constant 2 : i32
    %61 = vector.broadcast %c2_i32_23 : i32 to vector<6x8x8x7xi32>
    %62 = arith.cmpi eq, %2, %61 : vector<6x8x8x7xi32>
    %63 = arith.select %62, %53, %57 : vector<6x8x8x7xi1>, vector<6x8x8x7xf32>
    %64 = arith.negf %1 : vector<6x8x8x7xf32>
    %65 = math.exp %64 : vector<6x8x8x7xf32>
    %cst_24 = arith.constant 1.000000e+00 : f32
    %66 = vector.broadcast %cst_24 : f32 to vector<6x8x8x7xf32>
    %67 = arith.addf %66, %65 : vector<6x8x8x7xf32>
    %68 = arith.divf %66, %67 : vector<6x8x8x7xf32>
    %c2_i32_25 = arith.constant 2 : i32
    %69 = vector.broadcast %c2_i32_25 : i32 to vector<6x8x8x7xi32>
    %70 = arith.cmpi sge, %2, %69 : vector<6x8x8x7xi32>
    %c4_i32_26 = arith.constant 4 : i32
    %71 = vector.broadcast %c4_i32_26 : i32 to vector<6x8x8x7xi32>
    %72 = arith.cmpi slt, %2, %71 : vector<6x8x8x7xi32>
    %73 = arith.andi %70, %72 : vector<6x8x8x7xi1>
    %cst_27 = arith.constant 0.000000e+00 : f32
    %74 = vector.broadcast %cst_27 : f32 to vector<6x8x8x7xf32>
    %75 = arith.select %73, %1, %74 : vector<6x8x8x7xi1>, vector<6x8x8x7xf32>
    %76 = math.exp %75 : vector<6x8x8x7xf32>
    %77 = arith.mulf %76, %63 : vector<6x8x8x7xf32>
    %cst_28 = arith.constant 1.600000e+01 : f32
    %78 = vector.broadcast %cst_28 : f32 to vector<6x8x8x7xf32>
    %79 = arith.mulf %77, %78 : vector<6x8x8x7xf32>
    %c2_i32_29 = arith.constant 2 : i32
    %80 = vector.broadcast %c2_i32_29 : i32 to vector<6x8x8x7xi32>
    %81 = arith.cmpi slt, %2, %80 : vector<6x8x8x7xi32>
    %82 = arith.addf %68, %60 : vector<6x8x8x7xf32>
    %cst_30 = arith.constant 1.600000e+01 : f32
    %83 = vector.broadcast %cst_30 : f32 to vector<6x8x8x7xf32>
    %84 = arith.mulf %82, %83 : vector<6x8x8x7xf32>
    %85 = arith.select %73, %79, %68 : vector<6x8x8x7xi1>, vector<6x8x8x7xf32>
    %86 = arith.select %81, %84, %85 : vector<6x8x8x7xi1>, vector<6x8x8x7xf32>
    %c0_31 = arith.constant 0 : index
    %c0_32 = arith.constant 0 : index
    %c0_33 = arith.constant 0 : index
    %c0_34 = arith.constant 0 : index
    %87 = vector.load %arg2[%c0_31, %c0_32, %c0_33, %c0_34] : memref<6x8x8x7xf32, #tpu.memory_space<vmem>>, vector<6x8x8x7xf32>
    tpu.vector_store %arg2[%c0_31, %c0_32, %c0_33, %c0_34], %86 {strides = array<i32>} : memref<6x8x8x7xf32, #tpu.memory_space<vmem>>, vector<6x8x8x7xf32>,
    return
  }
  func.func @transform_0(%arg0: i32) -> (i32, i32, i32, i32) {
    %c0_i32 = arith.constant 0 : i32
    %c0_i32_0 = arith.constant 0 : i32
    %c0_i32_1 = arith.constant 0 : i32
    %c0_i32_2 = arith.constant 0 : i32
    %c0_i32_3 = arith.constant 0 : i32
    return %c0_i32, %c0_i32_0, %c0_i32_1, %c0_i32_2 : i32, i32, i32, i32
  }
  func.func @transform_1(%arg0: i32) -> (i32, i32, i32, i32) {
    %c0_i32 = arith.constant 0 : i32
    %c0_i32_0 = arith.constant 0 : i32
    %c0_i32_1 = arith.constant 0 : i32
    %c0_i32_2 = arith.constant 0 : i32
    %c0_i32_3 = arith.constant 0 : i32
    return %c0_i32, %c0_i32_0, %c0_i32_1, %c0_i32_2 : i32, i32, i32, i32
  }
}

module attributes {stable_mosaic.version = 11 : i64} {
  func.func @_conv_kernel(%arg0: i32, %arg1: memref<2x1x16x16xbf16, #tpu.memory_space<vmem>>, %arg2: memref<16x128xbf16, #tpu.memory_space<vmem>>, %arg3: memref<1x128xf32, #tpu.memory_space<vmem>>, %arg4: memref<32x128xbf16, #tpu.memory_space<vmem>>) attributes {dimension_semantics = [#tpu.dimension_semantics<arbitrary>], iteration_bounds = array<i64: 1>, scalar_prefetch = 0 : i64, scratch_operands = 0 : i64, tpu.core_type = #tpu.core_type<tc>, window_params = [{pipeline_mode = #tpu.pipeline_mode<synchronous>, transform_indices = @transform_0, window_bounds = array<i64: 2, 1, 16, 16>}, {pipeline_mode = #tpu.pipeline_mode<synchronous>, transform_indices = @transform_1, window_bounds = array<i64: 16, 128>}, {pipeline_mode = #tpu.pipeline_mode<synchronous>, transform_indices = @transform_2, window_bounds = array<i64: 1, 128>}, {pipeline_mode = #tpu.pipeline_mode<synchronous>, transform_indices = @transform_3, window_bounds = array<i64: 32, 128>}]} {
    %c0 = arith.constant 0 : index
    %c0_0 = arith.constant 0 : index
    %c0_1 = arith.constant 0 : index
    %c0_2 = arith.constant 0 : index
    %0 = vector.load %arg1[%c0, %c0_0, %c0_1, %c0_2] : memref<2x1x16x16xbf16, #tpu.memory_space<vmem>>, vector<1x1x16x16xbf16>
    %1 = vector.shape_cast %0 : vector<1x1x16x16xbf16> to vector<16x16xbf16>
    %c1 = arith.constant 1 : index
    %c0_3 = arith.constant 0 : index
    %c0_4 = arith.constant 0 : index
    %c0_5 = arith.constant 0 : index
    %2 = vector.load %arg1[%c1, %c0_3, %c0_4, %c0_5] : memref<2x1x16x16xbf16, #tpu.memory_space<vmem>>, vector<1x1x16x16xbf16>
    %3 = vector.shape_cast %2 : vector<1x1x16x16xbf16> to vector<16x16xbf16>
    %4 = tpu.concatenate %1, %3 in 0 : vector<16x16xbf16>, vector<16x16xbf16> -> vector<32x16xbf16>
    %c0_6 = arith.constant 0 : index
    %c0_7 = arith.constant 0 : index
    %5 = vector.load %arg2[%c0_6, %c0_7] : memref<16x128xbf16, #tpu.memory_space<vmem>>, vector<16x128xbf16>
    %cst = arith.constant dense<0.000000e+00> : vector<32x128xf32>
    %6 = tpu.matmul %4, %5, %cst {dimension_numbers = #tpu.dot_dimension_numbers<[1], [0], [0], [1], [0, 0, 1, 1], [], []>} : vector<32x16xbf16>, vector<16x128xbf16>, vector<32x128xf32> -> vector<32x128xf32>
    %c0_8 = arith.constant 0 : index
    %c0_9 = arith.constant 0 : index
    %7 = vector.load %arg3[%c0_8, %c0_9] : memref<1x128xf32, #tpu.memory_space<vmem>>, vector<1x128xf32>
    %8 = vector.broadcast %7 : vector<1x128xf32> to vector<32x128xf32>
    %9 = arith.addf %6, %8 : vector<32x128xf32>
    %10 = arith.truncf %9 : vector<32x128xf32> to vector<32x128xbf16>
    %c0_10 = arith.constant 0 : index
    %c0_11 = arith.constant 0 : index
    %11 = vector.load %arg4[%c0_10, %c0_11] : memref<32x128xbf16, #tpu.memory_space<vmem>>, vector<32x128xbf16>
    tpu.vector_store %arg4[%c0_10, %c0_11], %10 {strides = array<i32>} : memref<32x128xbf16, #tpu.memory_space<vmem>>, vector<32x128xbf16>,
    return
  }
  func.func @transform_0(%arg0: i32) -> (i32, i32, i32, i32) {
    %c0_i32 = arith.constant 0 : i32
    %c0_i32_0 = arith.constant 0 : i32
    %c0_i32_1 = arith.constant 0 : i32
    %c0_i32_2 = arith.constant 0 : i32
    %c0_i32_3 = arith.constant 0 : i32
    return %c0_i32, %c0_i32_0, %c0_i32_1, %c0_i32_2 : i32, i32, i32, i32
  }
  func.func @transform_1(%arg0: i32) -> (i32, i32) {
    %c0_i32 = arith.constant 0 : i32
    %c0_i32_0 = arith.constant 0 : i32
    %c0_i32_1 = arith.constant 0 : i32
    return %c0_i32, %c0_i32_0 : i32, i32
  }
  func.func @transform_2(%arg0: i32) -> (i32, i32) {
    %c0_i32 = arith.constant 0 : i32
    %c0_i32_0 = arith.constant 0 : i32
    %c0_i32_1 = arith.constant 0 : i32
    return %c0_i32, %c0_i32_0 : i32, i32
  }
  func.func @transform_3(%arg0: i32) -> (i32, i32) {
    %c0_i32 = arith.constant 0 : i32
    %c0_i32_0 = arith.constant 0 : i32
    %c0_i32_1 = arith.constant 0 : i32
    return %c0_i32, %c0_i32_0 : i32, i32
  }
}

module attributes {stable_mosaic.version = 11 : i64} {
  func.func @_yolo_decode_kernel(%arg0: i32, %arg1: memref<6x4x4x7xbf16, #tpu.memory_space<vmem>>, %arg2: memref<6x4x4x7xf32, #tpu.memory_space<vmem>>) attributes {dimension_semantics = [#tpu.dimension_semantics<arbitrary>], iteration_bounds = array<i64: 1>, scalar_prefetch = 0 : i64, scratch_operands = 0 : i64, tpu.core_type = #tpu.core_type<tc>, window_params = [{pipeline_mode = #tpu.pipeline_mode<synchronous>, transform_indices = @transform_0, window_bounds = array<i64: 6, 4, 4, 7>}, {pipeline_mode = #tpu.pipeline_mode<synchronous>, transform_indices = @transform_1, window_bounds = array<i64: 6, 4, 4, 7>}]} {
    %c0 = arith.constant 0 : index
    %c0_0 = arith.constant 0 : index
    %c0_1 = arith.constant 0 : index
    %c0_2 = arith.constant 0 : index
    %0 = vector.load %arg1[%c0, %c0_0, %c0_1, %c0_2] : memref<6x4x4x7xbf16, #tpu.memory_space<vmem>>, vector<6x4x4x7xbf16>
    %1 = arith.extf %0 : vector<6x4x4x7xbf16> to vector<6x4x4x7xf32>
    %2 = tpu.iota {dimensions = array<i32: 3>} : vector<6x4x4x7xi32>
    %3 = tpu.iota {dimensions = array<i32: 2>} : vector<6x4x4x7xi32>
    %4 = arith.sitofp %3 : vector<6x4x4x7xi32> to vector<6x4x4x7xf32>
    %5 = tpu.iota {dimensions = array<i32: 1>} : vector<6x4x4x7xi32>
    %6 = arith.sitofp %5 : vector<6x4x4x7xi32> to vector<6x4x4x7xf32>
    %7 = tpu.iota {dimensions = array<i32: 0>} : vector<6x4x4x7xi32>
    %cst = arith.constant 0.000000e+00 : f32
    %8 = vector.broadcast %cst : f32 to vector<6x4x4x7xf32>
    %cst_3 = arith.constant 0.000000e+00 : f32
    %9 = vector.broadcast %cst_3 : f32 to vector<6x4x4x7xf32>
    %c0_i32 = arith.constant 0 : i32
    %10 = vector.broadcast %c0_i32 : i32 to vector<6x4x4x7xi32>
    %11 = arith.cmpi eq, %7, %10 : vector<6x4x4x7xi32>
    %cst_4 = arith.constant 9.375000e-01 : f32
    %12 = vector.broadcast %cst_4 : f32 to vector<6x4x4x7xf32>
    %13 = arith.select %11, %12, %8 : vector<6x4x4x7xi1>, vector<6x4x4x7xf32>
    %c0_i32_5 = arith.constant 0 : i32
    %14 = vector.broadcast %c0_i32_5 : i32 to vector<6x4x4x7xi32>
    %15 = arith.cmpi eq, %7, %14 : vector<6x4x4x7xi32>
    %cst_6 = arith.constant 1.906250e+00 : f32
    %16 = vector.broadcast %cst_6 : f32 to vector<6x4x4x7xf32>
    %17 = arith.select %15, %16, %9 : vector<6x4x4x7xi1>, vector<6x4x4x7xf32>
    %c1_i32 = arith.constant 1 : i32
    %18 = vector.broadcast %c1_i32 : i32 to vector<6x4x4x7xi32>
    %19 = arith.cmpi eq, %7, %18 : vector<6x4x4x7xi32>
    %cst_7 = arith.constant 1.937500e+00 : f32
    %20 = vector.broadcast %cst_7 : f32 to vector<6x4x4x7xf32>
    %21 = arith.select %19, %20, %13 : vector<6x4x4x7xi1>, vector<6x4x4x7xf32>
    %c1_i32_8 = arith.constant 1 : i32
    %22 = vector.broadcast %c1_i32_8 : i32 to vector<6x4x4x7xi32>
    %23 = arith.cmpi eq, %7, %22 : vector<6x4x4x7xi32>
    %cst_9 = arith.constant 1.406250e+00 : f32
    %24 = vector.broadcast %cst_9 : f32 to vector<6x4x4x7xf32>
    %25 = arith.select %23, %24, %17 : vector<6x4x4x7xi1>, vector<6x4x4x7xf32>
    %c2_i32 = arith.constant 2 : i32
    %26 = vector.broadcast %c2_i32 : i32 to vector<6x4x4x7xi32>
    %27 = arith.cmpi eq, %7, %26 : vector<6x4x4x7xi32>
    %cst_10 = arith.constant 1.843750e+00 : f32
    %28 = vector.broadcast %cst_10 : f32 to vector<6x4x4x7xf32>
    %29 = arith.select %27, %28, %21 : vector<6x4x4x7xi1>, vector<6x4x4x7xf32>
    %c2_i32_11 = arith.constant 2 : i32
    %30 = vector.broadcast %c2_i32_11 : i32 to vector<6x4x4x7xi32>
    %31 = arith.cmpi eq, %7, %30 : vector<6x4x4x7xi32>
    %cst_12 = arith.constant 3.718750e+00 : f32
    %32 = vector.broadcast %cst_12 : f32 to vector<6x4x4x7xf32>
    %33 = arith.select %31, %32, %25 : vector<6x4x4x7xi1>, vector<6x4x4x7xf32>
    %c3_i32 = arith.constant 3 : i32
    %34 = vector.broadcast %c3_i32 : i32 to vector<6x4x4x7xi32>
    %35 = arith.cmpi eq, %7, %34 : vector<6x4x4x7xi32>
    %cst_13 = arith.constant 9.375000e-01 : f32
    %36 = vector.broadcast %cst_13 : f32 to vector<6x4x4x7xf32>
    %37 = arith.select %35, %36, %29 : vector<6x4x4x7xi1>, vector<6x4x4x7xf32>
    %c3_i32_14 = arith.constant 3 : i32
    %38 = vector.broadcast %c3_i32_14 : i32 to vector<6x4x4x7xi32>
    %39 = arith.cmpi eq, %7, %38 : vector<6x4x4x7xi32>
    %cst_15 = arith.constant 1.906250e+00 : f32
    %40 = vector.broadcast %cst_15 : f32 to vector<6x4x4x7xf32>
    %41 = arith.select %39, %40, %33 : vector<6x4x4x7xi1>, vector<6x4x4x7xf32>
    %c4_i32 = arith.constant 4 : i32
    %42 = vector.broadcast %c4_i32 : i32 to vector<6x4x4x7xi32>
    %43 = arith.cmpi eq, %7, %42 : vector<6x4x4x7xi32>
    %cst_16 = arith.constant 1.937500e+00 : f32
    %44 = vector.broadcast %cst_16 : f32 to vector<6x4x4x7xf32>
    %45 = arith.select %43, %44, %37 : vector<6x4x4x7xi1>, vector<6x4x4x7xf32>
    %c4_i32_17 = arith.constant 4 : i32
    %46 = vector.broadcast %c4_i32_17 : i32 to vector<6x4x4x7xi32>
    %47 = arith.cmpi eq, %7, %46 : vector<6x4x4x7xi32>
    %cst_18 = arith.constant 1.406250e+00 : f32
    %48 = vector.broadcast %cst_18 : f32 to vector<6x4x4x7xf32>
    %49 = arith.select %47, %48, %41 : vector<6x4x4x7xi1>, vector<6x4x4x7xf32>
    %c5_i32 = arith.constant 5 : i32
    %50 = vector.broadcast %c5_i32 : i32 to vector<6x4x4x7xi32>
    %51 = arith.cmpi eq, %7, %50 : vector<6x4x4x7xi32>
    %cst_19 = arith.constant 1.843750e+00 : f32
    %52 = vector.broadcast %cst_19 : f32 to vector<6x4x4x7xf32>
    %53 = arith.select %51, %52, %45 : vector<6x4x4x7xi1>, vector<6x4x4x7xf32>
    %c5_i32_20 = arith.constant 5 : i32
    %54 = vector.broadcast %c5_i32_20 : i32 to vector<6x4x4x7xi32>
    %55 = arith.cmpi eq, %7, %54 : vector<6x4x4x7xi32>
    %cst_21 = arith.constant 3.718750e+00 : f32
    %56 = vector.broadcast %cst_21 : f32 to vector<6x4x4x7xf32>
    %57 = arith.select %55, %56, %49 : vector<6x4x4x7xi1>, vector<6x4x4x7xf32>
    %c0_i32_22 = arith.constant 0 : i32
    %58 = vector.broadcast %c0_i32_22 : i32 to vector<6x4x4x7xi32>
    %59 = arith.cmpi eq, %2, %58 : vector<6x4x4x7xi32>
    %60 = arith.select %59, %4, %6 : vector<6x4x4x7xi1>, vector<6x4x4x7xf32>
    %c2_i32_23 = arith.constant 2 : i32
    %61 = vector.broadcast %c2_i32_23 : i32 to vector<6x4x4x7xi32>
    %62 = arith.cmpi eq, %2, %61 : vector<6x4x4x7xi32>
    %63 = arith.select %62, %53, %57 : vector<6x4x4x7xi1>, vector<6x4x4x7xf32>
    %64 = arith.negf %1 : vector<6x4x4x7xf32>
    %65 = math.exp %64 : vector<6x4x4x7xf32>
    %cst_24 = arith.constant 1.000000e+00 : f32
    %66 = vector.broadcast %cst_24 : f32 to vector<6x4x4x7xf32>
    %67 = arith.addf %66, %65 : vector<6x4x4x7xf32>
    %68 = arith.divf %66, %67 : vector<6x4x4x7xf32>
    %c2_i32_25 = arith.constant 2 : i32
    %69 = vector.broadcast %c2_i32_25 : i32 to vector<6x4x4x7xi32>
    %70 = arith.cmpi sge, %2, %69 : vector<6x4x4x7xi32>
    %c4_i32_26 = arith.constant 4 : i32
    %71 = vector.broadcast %c4_i32_26 : i32 to vector<6x4x4x7xi32>
    %72 = arith.cmpi slt, %2, %71 : vector<6x4x4x7xi32>
    %73 = arith.andi %70, %72 : vector<6x4x4x7xi1>
    %cst_27 = arith.constant 0.000000e+00 : f32
    %74 = vector.broadcast %cst_27 : f32 to vector<6x4x4x7xf32>
    %75 = arith.select %73, %1, %74 : vector<6x4x4x7xi1>, vector<6x4x4x7xf32>
    %76 = math.exp %75 : vector<6x4x4x7xf32>
    %77 = arith.mulf %76, %63 : vector<6x4x4x7xf32>
    %cst_28 = arith.constant 3.200000e+01 : f32
    %78 = vector.broadcast %cst_28 : f32 to vector<6x4x4x7xf32>
    %79 = arith.mulf %77, %78 : vector<6x4x4x7xf32>
    %c2_i32_29 = arith.constant 2 : i32
    %80 = vector.broadcast %c2_i32_29 : i32 to vector<6x4x4x7xi32>
    %81 = arith.cmpi slt, %2, %80 : vector<6x4x4x7xi32>
    %82 = arith.addf %68, %60 : vector<6x4x4x7xf32>
    %cst_30 = arith.constant 3.200000e+01 : f32
    %83 = vector.broadcast %cst_30 : f32 to vector<6x4x4x7xf32>
    %84 = arith.mulf %82, %83 : vector<6x4x4x7xf32>
    %85 = arith.select %73, %79, %68 : vector<6x4x4x7xi1>, vector<6x4x4x7xf32>
    %86 = arith.select %81, %84, %85 : vector<6x4x4x7xi1>, vector<6x4x4x7xf32>
    %c0_31 = arith.constant 0 : index
    %c0_32 = arith.constant 0 : index
    %c0_33 = arith.constant 0 : index
    %c0_34 = arith.constant 0 : index
    %87 = vector.load %arg2[%c0_31, %c0_32, %c0_33, %c0_34] : memref<6x4x4x7xf32, #tpu.memory_space<vmem>>, vector<6x4x4x7xf32>
    tpu.vector_store %arg2[%c0_31, %c0_32, %c0_33, %c0_34], %86 {strides = array<i32>} : memref<6x4x4x7xf32, #tpu.memory_space<vmem>>, vector<6x4x4x7xf32>,
    return
  }
  func.func @transform_0(%arg0: i32) -> (i32, i32, i32, i32) {
    %c0_i32 = arith.constant 0 : i32
    %c0_i32_0 = arith.constant 0 : i32
    %c0_i32_1 = arith.constant 0 : i32
    %c0_i32_2 = arith.constant 0 : i32
    %c0_i32_3 = arith.constant 0 : i32
    return %c0_i32, %c0_i32_0, %c0_i32_1, %c0_i32_2 : i32, i32, i32, i32
  }
  func.func @transform_1(%arg0: i32) -> (i32, i32, i32, i32) {
    %c0_i32 = arith.constant 0 : i32
    %c0_i32_0 = arith.constant 0 : i32
    %c0_i32_1 = arith.constant 0 : i32
    %c0_i32_2 = arith.constant 0 : i32
    %c0_i32_3 = arith.constant 0 : i32
    return %c0_i32, %c0_i32_0, %c0_i32_1, %c0_i32_2 : i32, i32, i32, i32
  }
}

</mosaic_0001>

<bundles_post_ra>
// kernel: a_call__.10
= control target key start
LH: loop header
LB: loop body
LE: loop exit
PB: predicated region body
PF: predicated region fallthrough
CT: control target
= control target key end

     0   :  { %vm90_vm0 = vcmask 130048   ;;  %s775_s1 = inlined_call_operand.vmem [shape: bf16[16,128], index: 1, kind: input, shape index: {}]   ;;  %s776_s0 = inlined_call_operand.vmem [shape: bf16[2,1,64,16], index: 0, kind: input, shape index: {}]   ;;  %s777_s3 = inlined_call_operand.vmem [shape: bf16[128,16], index: 3, kind: input, shape index: {}]   ;;  %s778_s2 = inlined_call_operand.vmem [shape: f32[1,128], index: 2, kind: input, shape index: {}]   ;;  %s779_s4 = inlined_call_operand.vmem [shape: bf16[128,128], index: 4, kind: output, shape index: {}]  }
   0x1   :  { %v581_v0 = vld [vmem:[%s775_s1] sm:$0xff]   ;;  %v584_v3 = vld [vmem:[%s776_s0 + $0x8] sm:$0xff]   ;;  %v586_v5 = vld [vmem:[%s776_s0 + $0x10] sm:$0xff]  }
   0x2   :  { %v582_v1 = vld [vmem:[%s776_s0] sm:$0xff]   ;;  %561 = vmatprep.subr.bf16.mxu0 %v581_v0  ;;  %579 = vmatprep.subr.bf16.mxu1 %v581_v0  ;;  %v585_v4 = vld [vmem:[%s776_s0 + $0x28] sm:$0xff]   ;;  %v587_v6 = vld [vmem:[%s776_s0 + $0x30] sm:$0xff]  }
   0x3   :  { %v583_v2 = vld [vmem:[%s776_s0 + $0x20] sm:$0xff]   ;;  %562 = vmatpush3.bf16.msra.mxu0 %v581_v0  ;;  %580 = vmatpush3.bf16.msra.mxu1 %v581_v0  ;;  %v588_v7 = vld [vmem:[%s776_s0 + $0x18] sm:$0xff]   ;;  %v538_v9 = vld [vmem:[%s777_s3 + $0x8] sm:$0xff]  }
   0x4   :  { %563 = vmatprep.mubr.msk.bf16.mxu0 %vm90_vm0, %v582_v1  ;;  %571 = vmatprep.mubr.msk.bf16.mxu1 %vm90_vm0, %v583_v2  ;;  %v589_v8 = vld [vmem:[%s776_s0 + $0x38] sm:$0xff]   ;;  %v542_v10 = vld [vmem:[%s777_s3 + $0x28] sm:$0xff]   ;;  %v467_v11 = vld [vmem:[%s777_s3] sm:$0xff]   ;;  %v472_v15 = vunpack.c.l.bf16 %v538_v9  ;;  %v473_v21 = vunpack.c.h.bf16 %v538_v9 }
   0x5   :  { %v541_v12 = vld [vmem:[%s777_s3 + $0x20] sm:$0xff]   ;;  %v540_v13 = vld [vmem:[%s777_s3 + $0x18] sm:$0xff]   ;;  %v488_v16 = vunpack.c.l.bf16 %v542_v10  ;;  %v468_v17 = vunpack.c.l.bf16 %v467_v11  ;;  %v539_v18 = vld [vmem:[%s777_s3 + $0x10] sm:$0xff]   ;;  %v489_v22 = vunpack.c.h.bf16 %v542_v10  ;;  %v469_v23 = vunpack.c.h.bf16 %v467_v11 }
   0x6   :  { %564 = vmatmul.mubr.msk.bf16.vlgmr.msra.gmra.mrb[0].mxu0 %vm90_vm0, %v584_v3  ;;  %572 = vmatmul.mubr.msk.bf16.vlgmr.msra.gmra.mrb[0].mxu1 %vm90_vm0, %v585_v4  ;;  %v544_v14 = vld [vmem:[%s777_s3 + $0x38] sm:$0xff]   ;;  %v674_v19 = vld [vmem:[%s777_s3 + $0x30] sm:$0xff]   ;;  %v484_v20 = vunpack.c.l.bf16 %v541_v12  ;;  %v485_v24 = vunpack.c.h.bf16 %v541_v12  ;;  %v480_v25 = vunpack.c.l.bf16 %v540_v13  ;;  %v476_v27 = vunpack.c.l.bf16 %v539_v18  ;;  %v680_v29 = vld [vmem:[%s778_s2] ss:$0 sm:$0xff] }
   0x7   :  { %567 = vmatprep.mubr.msk.bf16.mxu0 %vm90_vm0, %v586_v5  ;;  %575 = vmatprep.mubr.msk.bf16.mxu1 %vm90_vm0, %v587_v6  ;;  %v496_v26 = vunpack.c.l.bf16 %v544_v14  ;;  %v492_v28 = vunpack.c.l.bf16 %v674_v19  ;;  %v294_v30 = vsel %vm90_vm0, %v472_v15, 0.0  ;;  %v302_v31 = vsel %vm90_vm0, %v488_v16, 0.0 }
   0x8   :  { %v685_v32 = vsel %vm90_vm0, %v468_v17, 0.0  ;;  %v688_v33 = vsel %vm90_vm0, %v484_v20, 0.0  ;;  %v295_v34 = vsel %vm90_vm0, %v473_v21, 0.0  ;;  %v303_v35 = vsel %vm90_vm0, %v489_v22, 0.0 }
   0x9   :  { %v693_v36 = vsel %vm90_vm0, %v469_v23, 0.0  ;;  %v696_v39 = vsel %vm90_vm0, %v485_v24, 0.0  ;;  %v699_v40 = vsel %vm90_vm0, %v480_v25, 0.0  ;;  %v702_v41 = vsel %vm90_vm0, %v496_v26, 0.0 }
   0xa   :  { %v481_v42 = vunpack.c.h.bf16 %v540_v13  ;;  %v707_v47 = vsel %vm90_vm0, %v476_v27, 0.0  ;;  %v710_v48 = vsel %vm90_vm0, %v492_v28, 0.0  ;;  %v497_v53 = vunpack.c.h.bf16 %v544_v14 }
   0xb   :  { %v477_v54 = vunpack.c.h.bf16 %v539_v18  ;;  %v493_v60 = vunpack.c.h.bf16 %v674_v19 }
   0xc   :  { %v715_v59 = vsel %vm90_vm0, %v481_v42, 0.0  ;;  %v721_v3 = vsel %vm90_vm0, %v497_v53, 0.0 }
   0xd   :  { %v724_v4 = vsel %vm90_vm0, %v477_v54, 0.0 }
   0xe   :  { %568 = vmatmul.mubr.msk.bf16.gmra.mrb[4].mxu0 %vm90_vm0, %v588_v7  ;;  %576 = vmatmul.mubr.msk.bf16.gmra.mrb[4].mxu1 %vm90_vm0, %v589_v8 }
  0xd9   :  { %v565_v37 = vpop.f32.mrb[0].mxu0  ;;  %v573_v38 = vpop.f32.mrb[0].mxu1 }
  0xda   :  { %v158_v43 = vadd.f32 %v565_v37, %v680_v29  ;;  %v190_v44 = vadd.f32 %v573_v38, %v680_v29  ;;  %v149_v45 = vpop.f32.mrb[1].mxu0  ;;  %v181_v46 = vpop.f32.mrb[1].mxu1 }
  0xdb   :  { %v150_v49 = vadd.f32 %v680_v29, %v149_v45  ;;  %v182_v50 = vadd.f32 %v680_v29, %v181_v46  ;;  %v566_v51 = vpop.f32.mrb[2].mxu0  ;;  %v574_v52 = vpop.f32.mrb[2].mxu1 }
  0xdc   :  { %vm214_vm1 = vcmp.gt.f32.partialorder %v158_v43, 0.0  ;;  %v230_v55 = vmul.f32 0.1, %v158_v43  ;;  %vm222_vm2 = vcmp.gt.f32.partialorder %v190_v44, 0.0  ;;  %v238_v56 = vmul.f32 0.1, %v190_v44 }
  0xdd   :  { %v228_v57 = vmul.f32 0.1, %v150_v49  ;;  %v236_v58 = vmul.f32 0.1, %v182_v50  ;;  %v161_v63 = vadd.f32 %v566_v51, %v680_v29  ;;  %v193_v0 = vadd.f32 %v574_v52, %v680_v29  ;;  %v152_v1 = vpop.f32.mrb[3].mxu0  ;;  %v184_v2 = vpop.f32.mrb[3].mxu1 }
  0xde   :  { %v246_v61 = vsel %vm214_vm1, %v158_v43, %v230_v55  ;;  %v254_v62 = vsel %vm222_vm2, %v190_v44, %v238_v56  ;;  %vm212_vm3 = vcmp.gt.f32.partialorder %v150_v49, 0.0  ;;  %vm220_vm4 = vcmp.gt.f32.partialorder %v182_v50, 0.0 }
  0xdf   :  { %v310_v5 = vadd.f32 %v294_v30, %v246_v61  ;;  %v318_v6 = vadd.f32 %v302_v31, %v254_v62  ;;  %vm215_vm5 = vcmp.gt.f32.partialorder %v161_v63, 0.0  ;;  %v231_v7 = vmul.f32 0.1, %v161_v63 }
  0xe0   :  { %vm223_vm6 = vcmp.gt.f32.partialorder %v193_v0, 0.0  ;;  %v239_v8 = vmul.f32 0.1, %v193_v0  ;;  %v153_v9 = vadd.f32 %v680_v29, %v152_v1  ;;  %v185_v10 = vadd.f32 %v680_v29, %v184_v2 }
  0xe1   :  { %v569_v11 = vpop.f32.mrb[4].mxu0  ;;  %v577_v12 = vpop.f32.mrb[4].mxu1  ;;  %v244_v13 = vsel %vm212_vm3, %v150_v49, %v228_v57  ;;  %v252_v14 = vsel %vm220_vm4, %v182_v50, %v236_v58  ;;  %v247_v15 = vsel %vm215_vm5, %v161_v63, %v231_v7  ;;  %v305_v57 = vsel %vm90_vm0, %v493_v60, 0.0 }
  0xe2   :  { %v174_v16 = vadd.f32 %v569_v11, %v680_v29  ;;  %v165_v17 = vpop.f32.mrb[5].mxu0  ;;  %v197_v18 = vpop.f32.mrb[5].mxu1  ;;  %v311_v20 = vadd.f32 %v295_v34, %v247_v15  ;;  %v255_v21 = vsel %vm223_vm6, %v193_v0, %v239_v8  ;;  %vm213_vm7 = vcmp.gt.f32.partialorder %v153_v9, 0.0 }
  0xe3   :  { %v229_v22 = vmul.f32 0.1, %v153_v9  ;;  %v570_v23 = vpop.f32.mrb[6].mxu0  ;;  %v578_v24 = vpop.f32.mrb[6].mxu1  ;;  %v319_v25 = vadd.f32 %v303_v35, %v255_v21  ;;  %vm221_vm8 = vcmp.gt.f32.partialorder %v185_v10, 0.0  ;;  %v206_v27 = vadd.f32 %v577_v12, %v680_v29 }
  0xe4   :  { %v237_v26 = vmul.f32 0.1, %v185_v10  ;;  %v168_v28 = vpop.f32.mrb[7].mxu0  ;;  %v200_v30 = vpop.f32.mrb[7].mxu1  ;;  %v308_v31 = vadd.f32 %v685_v32, %v244_v13  ;;  %v506_v37 = vpack.c.bf16 %v311_v20, %v310_v5  ;;  %v234_v42 = vmul.f32 0.1, %v174_v16 }
  0xe5   :  { %v245_v38 = vsel %vm213_vm7, %v153_v9, %v229_v22  ;;  %v526_v43 = vpack.c.bf16 %v319_v25, %v318_v6  ;;  %vm218_vm9 = vcmp.gt.f32.partialorder %v174_v16, 0.0  ;;  %v316_v45 = vadd.f32 %v688_v33, %v252_v14 }
  0xe6   :  { %v309_v34 = vadd.f32 %v693_v36, %v245_v38  ;;  %v253_v44 = vsel %vm221_vm8, %v185_v10, %v237_v26  ;;  %545 = vst [vmem:[%s779_s4 + $0x8] sm:$0xff] %v506_v37   ;;  %v166_v46 = vadd.f32 %v680_v29, %v165_v17  ;;  %v198_v32 = vadd.f32 %v680_v29, %v197_v18 }
  0xe7   :  { %v317_v35 = vadd.f32 %v696_v39, %v253_v44  ;;  %549 = vst [vmem:[%s779_s4 + $0x28] sm:$0xff] %v526_v43   ;;  %vm226_vm10 = vcmp.gt.f32.partialorder %v206_v27, 0.0  ;;  %v242_v36 = vmul.f32 0.1, %v206_v27  ;;  %v177_v50 = vadd.f32 %v570_v23, %v680_v29 }
  0xe8   :  { %v501_v49 = vpack.c.bf16 %v309_v34, %v308_v31  ;;  %v250_v51 = vsel %vm218_vm9, %v174_v16, %v234_v42  ;;  %vm216_vm11 = vcmp.gt.f32.partialorder %v166_v46, 0.0  ;;  %v232_v52 = vmul.f32 0.1, %v166_v46 }
  0xe9   :  { %v521_v33 = vpack.c.bf16 %v317_v35, %v316_v45  ;;  %vm224_vm12 = vcmp.gt.f32.partialorder %v198_v32, 0.0  ;;  %v240_v39 = vmul.f32 0.1, %v198_v32  ;;  %vm219_vm13 = vcmp.gt.f32.partialorder %v177_v50, 0.0 }
  0xea   :  { %502 = vst [vmem:[%s779_s4] sm:$0xff] %v501_v49   ;;  %v235_v53 = vmul.f32 0.1, %v177_v50  ;;  %v209_v54 = vadd.f32 %v578_v24, %v680_v29  ;;  %v169_v55 = vadd.f32 %v680_v29, %v168_v28  ;;  %v201_v56 = vadd.f32 %v680_v29, %v200_v30 }
  0xeb   :  { %548 = vst [vmem:[%s779_s4 + $0x20] sm:$0xff] %v521_v33   ;;  %v314_v58 = vadd.f32 %v699_v40, %v250_v51  ;;  %v258_v61 = vsel %vm226_vm10, %v206_v27, %v242_v36  ;;  %v248_v62 = vsel %vm216_vm11, %v166_v46, %v232_v52  ;;  %v256_v0 = vsel %vm224_vm12, %v198_v32, %v240_v39 }
  0xec   :  { %v251_v63 = vsel %vm219_vm13, %v177_v50, %v235_v53  ;;  %vm227_vm14 = vcmp.gt.f32.partialorder %v209_v54, 0.0  ;;  %v243_v2 = vmul.f32 0.1, %v209_v54  ;;  %vm217_vm15 = vcmp.gt.f32.partialorder %v169_v55, 0.0 }
  0xed   :  { %v315_v1 = vadd.f32 %v715_v59, %v251_v63  ;;  %v233_v5 = vmul.f32 0.1, %v169_v55  ;;  %vm225_vm1 = vcmp.gt.f32.partialorder %v201_v56, 0.0  ;;  %v241_v6 = vmul.f32 0.1, %v201_v56 }
  0xee   :  { %v259_v7 = vsel %vm227_vm14, %v209_v54, %v243_v2  ;;  %v322_v19 = vadd.f32 %v702_v41, %v258_v61  ;;  %v312_v9 = vadd.f32 %v707_v47, %v248_v62  ;;  %v320_v10 = vadd.f32 %v710_v48, %v256_v0 }
  0xef   :  { %v516_v29 = vpack.c.bf16 %v315_v1, %v314_v58  ;;  %v323_v60 = vadd.f32 %v721_v3, %v259_v7  ;;  %v249_v40 = vsel %vm217_vm15, %v169_v55, %v233_v5  ;;  %v257_v8 = vsel %vm225_vm1, %v201_v56, %v241_v6 }
  0xf0   :  { %v313_v59 = vadd.f32 %v724_v4, %v249_v40  ;;  %v321_v11 = vadd.f32 %v305_v57, %v257_v8 }
  0xf1   :  { %547 = vst [vmem:[%s779_s4 + $0x18] sm:$0xff] %v516_v29   ;;  %v536_v12 = vpack.c.bf16 %v323_v60, %v322_v19 }
  0xf2   :  { %v511_v13 = vpack.c.bf16 %v313_v59, %v312_v9  ;;  %v531_v14 = vpack.c.bf16 %v321_v11, %v320_v10 }
  0xf3   :  { %551 = vst [vmem:[%s779_s4 + $0x38] sm:$0xff] %v536_v12  }
  0xf4   :  { %546 = vst [vmem:[%s779_s4 + $0x10] sm:$0xff] %v511_v13   ;;  %550 = vst [vmem:[%s779_s4 + $0x30] sm:$0xff] %v531_v14  }

// kernel: a_call__.9
= control target key start
LH: loop header
LB: loop body
LE: loop exit
PB: predicated region body
PF: predicated region fallthrough
CT: control target
= control target key end

     0   :  { %vm158_vm0 = vsmask.f32 7424  ;;  %s1744_s20 = smov 24   ;;  %s1745_s29 = smov 8   ;;  %vm702_vm1 = vcmask 1046528   ;;  %vm715_vm3 = vcmask 1042432   ;;  %s2723_s0 = inlined_call_operand.vmem [shape: bf16[2,4,82,8], index: 0, kind: input, shape index: {}]   ;;  %s2724_s1 = inlined_call_operand.vmem [shape: bf16[72,128], index: 1, kind: input, shape index: {}]   ;;  %s2725_s2 = inlined_call_operand.vmem [shape: f32[1,128], index: 2, kind: input, shape index: {}]   ;;  %s2726_s3 = inlined_call_operand.vmem [shape: bf16[144,128], index: 3, kind: output, shape index: {}]  }
   0x1   :  { %v1673_v0 = vld [vmem:[%s2723_s0 + $0x58] sm:$0xff]   ;;  %v1369_v1 = vld [vmem:[%s2723_s0 + $0x2c] sm:$0xf]  ;;  %v1370_v2 = vld [vmem:[%s2723_s0 + $0x30] sm:$0xf]  ;;  %s1746_s7 = smov 32  }
   0x2   :  { %v1786_v3 = vld [vmem:[%s2723_s0 + $0x34] sm:$0xf]  ;;  %767 = vrot.lane.b32.xlu1 %v1673_v0, %s1744_s20  ;;  %v1387_v4 = vcombine.low %v1369_v1, %v1370_v2  ;;  %v1676_v6 = vld [vmem:[%s2723_s0 + $0x84] sm:$0xff]   ;;  %v15_v7 = vld [vmem:[%s2723_s0] sm:$0xf]  ;;  %v399_v10 = vshll.u32 %v1673_v0, 16 }
   0x3   :  { %v1480_v5 = vcombine.low %v1370_v2, %v1786_v3  ;;  %v16_v8 = vld [vmem:[%s2723_s0 + $0x4] sm:$0xf]  ;;  %v17_v9 = vld [vmem:[%s2723_s0 + $0x8] sm:$0xf]  ;;  %v18_v12 = vld [vmem:[%s2723_s0 + $0xc] sm:$0xf] }
   0x4   :  { %729 = vrot.lane.b32.xlu0 %v1387_v4, %s1745_s29  ;;  %v1806_v13 = vcombine.low %v15_v7, %v16_v8  ;;  %v1470_v14 = vcombine.low %v16_v8, %v17_v9  ;;  %v1808_v15 = vcombine.low %v17_v9, %v18_v12  ;;  %v19_v16 = vld [vmem:[%s2723_s0 + $0x10] sm:$0xf]  ;;  %v1821_v21 = vld [vmem:[%s2723_s0 + $0x60] sm:$0xff]   ;;  %v397_v25 = vshrl.u32 %v1673_v0, 16  ;;  %v1832_v31 = vld [vmem:[%s2723_s0 + $0x38] sm:$0xf] }
   0x5   :  { %v609_v11 = vshll.u32 %v1480_v5, 16  ;;  %v607_v17 = vshrl.u32 %v1480_v5, 16  ;;  %v1816_v20 = vcombine.low %v18_v12, %v19_v16  ;;  %v697_v26 = vld [vmem:[%s2723_s0 + $0x4] sm:$0xe]  ;;  %v401_v29 = vrot.slane %v399_v10, 1  ;;  %s1747_s25 = smov 16  }
   0x6   :  { %2740 = vst [vmem:[#allocation2_spill] sm:$0xff] %v1806_v13  ;;  %2741 = vst [vmem:[#allocation3_spill] sm:$0xff] %v1808_v15  ;;  %786 = vrot.lane.b32.xlu1 %v1676_v6, %s1746_s7  ;;  %v160_v18 = vshrl.u32 %v1806_v13, 16  ;;  %v162_v19 = vshll.u32 %v1806_v13, 16  ;;  %v167_v22 = vshll.u32 %v1808_v15, 16  ;;  %v503_v23 = vshrl.u32 %v1470_v14, 16 }
   0x7   :  { %v505_v24 = vshll.u32 %v1470_v14, 16  ;;  %v510_v28 = vshll.u32 %v1816_v20, 16  ;;  %v404_v30 = vshll.u32 %v1821_v21, 16  ;;  %v611_v32 = vrot.slane %v609_v11, 1  ;;  %v1839_v36 = vld [vmem:[%s2723_s0 + $0x3c] sm:$0xf] }
   0x8   :  { %v164_v27 = vrot.slane %v162_v19, 1  ;;  %v1834_v33 = vrot.slane %v167_v22, 1  ;;  %v1487_v35 = vcombine.low %v697_v26, %v17_v9  ;;  %v402_v39 = vor.u32 %v401_v29, %v397_v25  ;;  %v1853_v45 = vld [vmem:[%s2723_s0 + $0xb0] sm:$0xf]  ;;  %v1351_v46 = vld [vmem:[%s2723_s0 + $0xb4] sm:$0xf] }
   0x9   :  { %v507_v34 = vrot.slane %v505_v24, 1  ;;  %v1841_v38 = vrot.slane %v510_v28, 1  ;;  %v1843_v40 = vrot.slane %v404_v30, 1  ;;  %v704_v43 = vrot.slane %v1816_v20, 1  ;;  %2742 = vst [vmem:[#allocation4_spill] sm:$0xff] %v1853_v45  ;;  %s1748_s28 = smov 48  }
   0xa   :  { %v165_v37 = vor.u32 %v164_v27, %v160_v18  ;;  %v703_v42 = vrot.slane %v1487_v35, 1  ;;  %v1848_v44 = vcombine.low %v1832_v31, %v1839_v36  ;;  %v1863_v48 = vld [vmem:[%s2723_s0 + $0xb8] sm:$0xf]  ;;  %v1353_v49 = vld [vmem:[%s2723_s0 + $0xbc] sm:$0xf]  ;;  %v1399_v50 = vcombine.low %v1853_v45, %v1351_v46  ;;  %s1749_s14 = smov 40  }
   0xb   :  { %v508_v41 = vor.u32 %v507_v34, %v503_v23  ;;  %v1876_v53 = vld [vmem:[%s2723_s0 + $0x14] sm:$0xf]  ;;  %v407_v54 = vsel %vm158_vm0, %v402_v39, %v1843_v40  ;;  %v612_v55 = vor.u32 %v611_v32, %v607_v17  ;;  %v1400_v56 = vcombine.low %v1863_v48, %v1353_v49  ;;  %v1885_v57 = vld [vmem:[%s2723_s0 + $0x108] sm:$0xf]  ;;  %v1890_v58 = vld [vmem:[%s2723_s0 + $0x10c] sm:$0xf] }
   0xc   :  { %v170_v47 = vsel %vm158_vm0, %v165_v37, %v1834_v33  ;;  %v614_v52 = vshll.u32 %v1848_v44, 16  ;;  %v705_v59 = vsel %vm702_vm1, %v703_v42, %v704_v43  ;;  %v1900_v61 = vld [vmem:[%s2723_s0 + $0xc0] sm:$0xf]  ;;  %v207_v62 = vshrl.u32 %v1399_v50, 16  ;;  %v1905_v0 = vld [vmem:[%s2723_s0 + $0x110] sm:$0xf] }
   0xd   :  { %748 = vrot.lane.b32.xlu0 %v170_v47, %s1747_s25  ;;  %v513_v51 = vsel %vm158_vm0, %v508_v41, %v1841_v38  ;;  %v210_v63 = vshll.u32 %v1399_v50, 16  ;;  %v215_v1 = vshrl.u32 %v1400_v56, 16  ;;  %v218_v2 = vshll.u32 %v1400_v56, 16  ;;  %v1914_v6 = vld [vmem:[%s2723_s0 + $0x114] sm:$0xf]  ;;  %s1750_s15 = smov 64  }
   0xe   :  { %824 = vrot.lane.b32.xlu1 %v513_v51, %s1748_s28  ;;  %v1895_v60 = vrot.slane %v614_v52, 1  ;;  %v1908_v4 = vcombine.low %v19_v16, %v1876_v53  ;;  %v171_v5 = vshrl.u32 %v1808_v15, 16  ;;  %v209_v7 = vrot.slane %v207_v62, 4  ;;  %v1923_v10 = vld [vmem:[%s2723_s0 + $0xe0] sm:$0xff]   ;;  %s1751_s18 = smov 56   ;;  %v1949_v27 = vld [vmem:[%s2723_s0 + $0x68] sm:$0xff]  }
   0xf   :  { %v212_v8 = vrot.slane %v210_v63, 5  ;;  %v217_v11 = vrot.slane %v215_v1, 4  ;;  %v220_v12 = vrot.slane %v218_v2, 5  ;;  %v1463_v17 = vcombine.low %v1885_v57, %v1890_v58  ;;  %v1975_v50 = vld [vmem:[%s2723_s0 + $0xe8] sm:$0xff]   ;;  %v1984_v56 = vld [vmem:[%s2723_s0 + $0x40] sm:$0xf] }
  0x10   :  { %2743 = vst [vmem:[#allocation5_spill] sm:$0xff] %v1908_v4  ;;  %v617_v9 = vsel %vm158_vm0, %v612_v55, %v1895_v60  ;;  %v175_v14 = vshll.u32 %v1908_v4, 16  ;;  %v1464_v18 = vcombine.low %v1905_v0, %v1914_v6  ;;  %v1933_v19 = vcombine.low %v1351_v46, %v1863_v48  ;;  %v1989_v62 = vld [vmem:[%s2723_s0 + $0x44] sm:$0xf]  ;;  %v1486_v63 = vld [vmem:[%s2723_s0 + $0xb4] sm:$0xe] }
  0x11   :  { %805 = vrot.lane.b32.xlu0 %v407_v54, %s1749_s14  ;;  %v1926_v16 = vor.u32 %v212_v8, %v209_v7  ;;  %v1936_v22 = vcombine.low %v1353_v49, %v1900_v61  ;;  %vm205_vm2 = vsmask.f32 3328  ;;  %v1938_v23 = vor.u32 %v220_v12, %v217_v11  ;;  %v1694_v8 = vld [vmem:[%s2723_s0 + $0x138] sm:$0xff]  }
  0x12   :  { %862 = vrot.lane.b32.xlu1 %v705_v59, %s1750_s15  ;;  %2744 = vst [vmem:[#allocation6_spill] sm:$0xff] %v1933_v19  ;;  %v1388_v24 = vcombine.low %v1786_v3, %v1832_v31  ;;  %v173_v25 = vor.u32 %v171_v5, %v1834_v33  ;;  %v1944_v26 = vrot.slane %v175_v14, 1  ;;  %v443_v28 = vshrl.u32 %v1463_v17, 16  ;;  %v21_v33 = vld [vmem:[%s2723_s0 + $0x18] sm:$0xf] }
  0x13   :  { %v446_v29 = vshll.u32 %v1463_v17, 16  ;;  %v451_v30 = vshrl.u32 %v1464_v18, 16  ;;  %v651_v32 = vshrl.u32 %v1923_v10, 16  ;;  %v654_v34 = vshll.u32 %v1923_v10, 16 }
  0x14   :  { %v222_v3 = vsel %vm205_vm2, %v1926_v16, %v1938_v23  ;;  %v454_v31 = vshll.u32 %v1464_v18, 16  ;;  %v1428_v35 = vcombine.low %v1890_v58, %v1905_v0  ;;  %v547_v37 = vshrl.u32 %v1933_v19, 16  ;;  %v1355_v18 = vld [vmem:[%s2723_s0 + $0xc4] sm:$0xf] }
  0x15   :  { %843 = vrot.lane.b32.xlu0 %v617_v9, %s1751_s18  ;;  %v550_v39 = vshll.u32 %v1933_v19, 16  ;;  %v555_v41 = vshrl.u32 %v1936_v22, 16  ;;  %v178_v42 = vsel %vm158_vm0, %v173_v25, %v1944_v26  ;;  %v408_v46 = vshrl.u32 %v1821_v21, 16 }
  0x16   :  { %739 = vrot.lane.b32.xlu1 %v1923_v10, %s1745_s29  ;;  %v412_v47 = vshll.u32 %v1949_v27, 16  ;;  %v558_v49 = vshll.u32 %v1936_v22, 16  ;;  %v445_v51 = vrot.slane %v443_v28, 4  ;;  %v448_v52 = vrot.slane %v446_v29, 5 }
  0x17   :  { %v453_v54 = vrot.slane %v451_v30, 4  ;;  %v1979_v55 = vcombine.low %v1876_v53, %v21_v33  ;;  %v456_v58 = vrot.slane %v454_v31, 5  ;;  %v549_v59 = vrot.slane %v547_v37, 4 }
  0x18   :  { %v552_v0 = vrot.slane %v550_v39, 5  ;;  %v557_v1 = vrot.slane %v555_v41, 4  ;;  %v560_v53 = vrot.slane %v558_v49, 5  ;;  %v514_v2 = vshrl.u32 %v1816_v20, 16 }
  0x19   :  { %731 = vrot.lane.b32.xlu0 %v1388_v24, %s1745_s29  ;;  %v659_v5 = vshrl.u32 %v1975_v50, 16  ;;  %v662_v7 = vshll.u32 %v1975_v50, 16  ;;  %v518_v9 = vshll.u32 %v1979_v55, 16  ;;  %v2005_v10 = vcombine.low %v1984_v56, %v1989_v62  ;;  %v22_v24 = vld [vmem:[%s2723_s0 + $0x1c] sm:$0xf] }
  0x1a   :  { %758 = vrot.lane.b32.xlu1 %v222_v3, %s1747_s25  ;;  %v2007_v11 = vor.u32 %v448_v52, %v445_v51  ;;  %v2009_v12 = vor.u32 %v456_v58, %v453_v54  ;;  %v410_v14 = vor.u32 %v408_v46, %v1843_v40  ;;  %v1488_v17 = vcombine.low %v1486_v63, %v1863_v48  ;;  %v2027_v40 = vld [vmem:[%s2723_s0 + $0xc8] sm:$0xf]  ;;  %v1695_v48 = vld [vmem:[%s2723_s0 + $0x8c] sm:$0xff]  }
  0x1b   :  { %v2019_v25 = vrot.slane %v412_v47, 1  ;;  %v2021_v28 = vor.u32 %v552_v0, %v549_v59  ;;  %v516_v29 = vor.u32 %v514_v2, %v1841_v38  ;;  %v653_v30 = vrot.slane %v651_v32, 4 }
  0x1c   :  { %v2034_v3 = vor.u32 %v560_v53, %v557_v1  ;;  %v656_v31 = vrot.slane %v654_v34, 5  ;;  %v664_v37 = vrot.slane %v662_v7, 5  ;;  %v520_v38 = vrot.slane %v518_v9, 1 }
  0x1d   :  { %750 = vrot.lane.b32.xlu0 %v178_v42, %s1747_s25  ;;  %v622_v32 = vshll.u32 %v2005_v10, 16  ;;  %v1401_v39 = vcombine.low %v1900_v61, %v1355_v18  ;;  %v2039_v41 = vcombine.low %v21_v33, %v22_v24  ;;  %v458_v34 = vsel %vm205_vm2, %v2007_v11, %v2009_v12  ;;  %v2056_v61 = vld [vmem:[%s2723_s0 + $0x11c] sm:$0xf] }
  0x1e   :  { %777 = vrot.lane.b32.xlu1 %v1428_v35, %s1744_s20  ;;  %v661_v35 = vrot.slane %v659_v5, 4  ;;  %v618_v42 = vshrl.u32 %v1848_v44, 16  ;;  %v2050_v46 = vrot.slane %v1488_v17, 5  ;;  %v2727_v47 = vrot.slane %v1936_v22, 5  ;;  %v2065_v44 = vld [vmem:[%s2723_s0 + $0x70] sm:$0xff]  }
  0x1f   :  { %2745 = vst [vmem:[#allocation7_spill] sm:$0xff] %v2039_v41  ;;  %v2728_v33 = vrot.slane %v1979_v55, 1  ;;  %v2060_v49 = vcombine.low %v1355_v18, %v2027_v40  ;;  %v224_v51 = vshrl.u32 %v1401_v39, 16  ;;  %v227_v52 = vshll.u32 %v1401_v39, 16  ;;  %v2085_v5 = vld [vmem:[%s2723_s0 + $0x20] sm:$0xf] }
  0x20   :  { %v415_v54 = vsel %vm158_vm0, %v410_v14, %v2019_v25  ;;  %v562_v58 = vsel %vm205_vm2, %v2021_v28, %v2034_v3  ;;  %v2073_v59 = vor.u32 %v656_v31, %v653_v30  ;;  %v2075_v63 = vor.u32 %v664_v37, %v661_v35  ;;  %2746 = vst [vmem:[#allocation8_spill] sm:$0xff] %v2085_v5  ;;  %v2093_v17 = vld [vmem:[%s2723_s0 + $0x48] sm:$0xf] }
  0x21   :  { %769 = vrot.lane.b32.xlu0 %v1821_v21, %s1744_s20  ;;  %v2044_v21 = vld [vmem:[%s2723_s0 + $0x118] sm:$0xf]  ;;  %v521_v0 = vsel %vm158_vm0, %v516_v29, %v520_v38  ;;  %v624_v1 = vrot.slane %v622_v32, 1  ;;  %v183_v53 = vshll.u32 %v2039_v41, 16  ;;  %v620_v7 = vor.u32 %v618_v42, %v1895_v60 }
  0x22   :  { %796 = vrot.lane.b32.xlu1 %v1694_v8, %s1746_s7  ;;  %v1465_v2 = vcombine.low %v2044_v21, %v2056_v61  ;;  %v226_v9 = vrot.slane %v224_v51, 4  ;;  %v229_v14 = vrot.slane %v227_v52, 5  ;;  %v718_v18 = vsel %vm715_vm3, %v2050_v46, %v2727_v47 }
  0x23   :  { %v2104_v60 = vsel %vm702_vm1, %v704_v43, %v2728_v33  ;;  %v420_v29 = vshll.u32 %v2065_v44, 16  ;;  %v564_v30 = vshrl.u32 %v2060_v49, 16  ;;  %v666_v31 = vsel %vm205_vm2, %v2073_v59, %v2075_v63  ;;  %v1460_v33 = vld [vmem:[%s2723_s0 + $0x7c] sm:$0x1] }
  0x24   :  { %v179_v20 = vshrl.u32 %v1908_v4, 16  ;;  %v2119_v43 = vcombine.low %v22_v24, %v2085_v5  ;;  %v522_v35 = vshrl.u32 %v1979_v55, 16  ;;  %v2123_v37 = vrot.slane %v183_v53, 1  ;;  %v2132_v24 = vld [vmem:[%s2723_s0 + $0xf0] sm:$0xff]  }
  0x25   :  { %788 = vrot.lane.b32.xlu0 %v1695_v48, %s1746_s7  ;;  %v2111_v48 = vld [vmem:[%s2723_s0 + $0x4c] sm:$0xf]  ;;  %v460_v32 = vshrl.u32 %v1465_v2, 16  ;;  %v463_v39 = vshll.u32 %v1465_v2, 16  ;;  %v2126_v42 = vor.u32 %v229_v14, %v226_v9  ;;  %v2141_v53 = vrot.slane %v420_v29, 1 }
  0x26   :  { %815 = vrot.lane.b32.xlu1 %v458_v34, %s1749_s14  ;;  %2747 = vst [vmem:[#allocation9_spill] sm:$0xff] %v2111_v48  ;;  %v524_v51 = vor.u32 %v522_v35, %v520_v38  ;;  %v526_v52 = vshll.u32 %v2119_v43, 16  ;;  %v2143_v2 = vrot.slane %v564_v30, 4  ;;  %v567_v38 = vshll.u32 %v2060_v49, 16  ;;  %v153_v14 = vld [vmem:[%s2723_s0 + $0x24] sm:$0x1] }
  0x27   :  { %v626_v9 = vshrl.u32 %v2005_v10, 16  ;;  %v625_v35 = vsel %vm158_vm0, %v620_v7, %v624_v1  ;;  %v2160_v30 = vld [vmem:[%s2723_s0 + $0x120] sm:$0xf]  ;;  %v2165_v10 = vld [vmem:[%s2723_s0 + $0x124] sm:$0xf]  ;;  %v181_v7 = vor.u32 %v179_v20, %v1944_v26  ;;  %v2733_v8 = vrot.slane %v2119_v43, 1 }
  0x28   :  { %v2154_v34 = vrot.slane %v526_v52, 1  ;;  %2748 = vst [vmem:[#allocation10_spill] sm:$0xff] %v2165_v10  ;;  %v462_v52 = vrot.slane %v460_v32, 4  ;;  %v231_v4 = vsel %vm205_vm2, %v1938_v23, %v2126_v42  ;;  %v465_v15 = vrot.slane %v463_v39, 5 }
  0x29   :  { %807 = vrot.lane.b32.xlu0 %v415_v54, %s1749_s14  ;;  %v2136_v54 = vcombine.low %v2093_v17, %v2111_v48  ;;  %v628_v47 = vor.u32 %v626_v9, %v624_v1  ;;  %v2185_v13 = vrot.slane %v567_v38, 5  ;;  %v668_v26 = vshrl.u32 %v2132_v24, 16 }
  0x2a   :  { %834 = vrot.lane.b32.xlu1 %v562_v58, %s1748_s28  ;;  %v1357_v58 = vld [vmem:[%s2723_s0 + $0xcc] sm:$0xf]  ;;  %v2183_v19 = vsel %vm158_vm0, %v524_v51, %v2154_v34  ;;  %v2749_v1 = vrot.slane %v1979_v55, 1  ;;  %v671_v23 = vshll.u32 %v2132_v24, 16  ;;  %v2202_v51 = vcombine.low %v2085_v5, %v153_v14  ;;  %v2209_v55 = vld [vmem:[%s2723_s0 + $0xd0] sm:$0xf] }
  0x2b   :  { %v630_v29 = vshll.u32 %v2136_v54, 16  ;;  %v1402_v32 = vcombine.low %v2027_v40, %v1357_v58  ;;  %v187_v38 = vshrl.u32 %v2039_v41, 16  ;;  %v2219_v14 = vld [vmem:[%s2723_s0 + $0xf8] sm:$0xff]   ;;  %v2240_v5 = vcombine.low %v1357_v58, %v2209_v55 }
  0x2c   :  { %v2193_v20 = vsel %vm702_vm1, %v2749_v1, %v2733_v8  ;;  %2750 = vst [vmem:[#allocation11_spill] sm:$0xff] %v2219_v14  ;;  %v191_v1 = vshll.u32 %v2202_v51, 16  ;;  %v424_v8 = vshrl.u32 %v2065_v44, 16  ;;  %vm80_vm4 = vcmask 1043456  }
  0x2d   :  { %826 = vrot.lane.b32.xlu0 %v521_v0, %s1748_s28  ;;  %v2170_v0 = vld [vmem:[%s2723_s0 + $0x78] sm:$0xf]  ;;  %v233_v40 = vshrl.u32 %v1402_v32, 16  ;;  %v236_v9 = vshll.u32 %v1402_v32, 16  ;;  %v2229_v32 = vld [vmem:[%s2723_s0 + $0x24] sm:$0x1f]  }
  0x2e   :  { %853 = vrot.lane.b32.xlu1 %v666_v31, %s1751_s18  ;;  %v632_v31 = vrot.slane %v630_v29, 1  ;;  %v2221_v29 = vor.u32 %v465_v15, %v462_v52  ;;  %v670_v15 = vrot.slane %v668_v26, 4  ;;  %v2233_v52 = vrot.slane %v191_v1, 1 }
  0x2f   :  { %v238_v41 = vrot.slane %v236_v9, 5  ;;  %v534_v58 = vshll.u32 %v2229_v32, 16  ;;  %v673_v1 = vrot.slane %v671_v23, 5  ;;  %vm1753_vm5 = vmmov 0  }
  0x30   :  { %v2199_v39 = vsel %vm158_vm0, %v628_v47, %v632_v31  ;;  %v2214_v47 = vcombine.low %v2170_v0, %v1460_v33  ;;  %v235_v33 = vrot.slane %v233_v40, 4  ;;  %vm880_vm6 = vcmask 64512  }
  0x31   :  { %845 = vrot.lane.b32.xlu0 %v625_v35, %s1751_s18  ;;  %v1466_v35 = vcombine.low %v2160_v30, %v2165_v10  ;;  %vm899_vm7 = vcmask 130048   ;;  %vm918_vm8 = vcmask 195584   ;;  %vm937_vm9 = vcmask 261120  }
  0x32   :  { %872 = vrot.lane.b32.xlu1 %v718_v18, %s1750_s15  ;;  %v189_v18 = vor.u32 %v187_v38, %v2123_v37  ;;  %v426_v38 = vor.u32 %v424_v8, %v2141_v53  ;;  %v428_v45 = vshll.u32 %v2214_v47, 16  ;;  %v2242_v40 = vor.u32 %v238_v41, %v235_v33 }
  0x33   :  { %v469_v10 = vshrl.u32 %v1466_v35, 16  ;;  %v472_v48 = vshll.u32 %v1466_v35, 16  ;;  %v2274_v33 = vrot.slane %v534_v58, 1  ;;  %vm956_vm10 = vcmask 326656  }
  0x34   :  { %v2251_v8 = vsel %vm158_vm0, %v189_v18, %v2233_v52  ;;  %v2253_v26 = vrot.slane %v428_v45, 1  ;;  %v2260_v41 = vsel %vm205_vm2, %v2126_v42, %v2242_v40  ;;  %v2751_v18 = vcombine.low %v1839_v36, %v1984_v56 }
  0x35   :  { %864 = vrot.lane.b32.xlu0 %v2104_v60, %s1750_s15  ;;  %v471_v9 = vrot.slane %v469_v10, 4  ;;  %v474_v35 = vrot.slane %v472_v48, 5  ;;  %v2247_v60 = vld [vmem:[%s2723_s0 + $0x50] sm:$0x1f]   ;;  %v677_v10 = vshrl.u32 %v2219_v14, 16  ;;  %v680_v42 = vshll.u32 %v2219_v14, 16 }
  0x36   :  { %741 = vrot.lane.b32.xlu1 %v1975_v50, %s1745_s29  ;;  %v530_v50 = vshrl.u32 %v2119_v43, 16  ;;  %v2271_v45 = vsel %vm158_vm0, %v426_v38, %v2253_v26  ;;  %v186_v36 = vsel %vm158_vm0, %v181_v7, %v2123_v37  ;;  %v638_v37 = vshll.u32 %v2247_v60, 16  ;;  %v2301_v7 = vld [vmem:[%s2723_s0 + $0x128] sm:$0xf] }
  0x37   :  { %v2262_v48 = vor.u32 %v474_v35, %v471_v9  ;;  %2752 = vst [vmem:[#allocation12_spill] sm:$0xff] %v2271_v45  ;;  %v1725_v9 = vld [vmem:[%s2724_s1] sm:$0xff]   ;;  %v679_v38 = vrot.slane %v677_v10, 4  ;;  %v1397_v35 = vld [vmem:[%s2723_s0 + $0xd4] sm:$0x1]  ;;  %v682_v58 = vrot.slane %v680_v42, 5  ;;  %v674_v14 = vor.u32 %v673_v1, %v670_v15 }
  0x38   :  { %v532_v23 = vor.u32 %v530_v50, %v2154_v34  ;;  %v634_v34 = vshrl.u32 %v2136_v54, 16  ;;  %v573_v50 = vshrl.u32 %v2240_v5, 16  ;;  %v710_v54 = vrot.slane %v2229_v32, 1  ;;  %v1707_v15 = vld [vmem:[%s2723_s0 + $0x140] sm:$0xff]  }
  0x39   :  { %733 = vrot.lane.b32.xlu0 %v2751_v18, %s1745_s29  ;;  %v2286_v56 = vsel %vm205_vm2, %v2221_v29, %v2262_v48  ;;  %v1427_v18 = vcombine.low %v1885_v57, %v1885_v57  ;;  %v2310_v42 = vrot.slane %v638_v37, 1  ;;  %v1752_v45 = vmov 0.0  }
  0x3a   :  { %760 = vrot.lane.b32.xlu1 %v231_v4, %s1747_s25  ;;  %v2295_v4 = vsel %vm158_vm0, %v532_v23, %v2274_v33  ;;  %v636_v10 = vor.u32 %v634_v34, %v632_v31  ;;  %v576_v23 = vshll.u32 %v2240_v5, 16  ;;  %1607 = vmatprep.subr.bf16.mxu0 %v1752_v45  ;;  %v1461_v31 = vld [vmem:[%s2723_s0 + $0x12c] sm:$0x1]  ;;  %v2754_v57 = vcombine.low %v1914_v6, %v2044_v21 }
  0x3b   :  { %2753 = vst [vmem:[#allocation13_spill] sm:$0xff] %v2295_v4  ;;  %v2308_v4 = vor.u32 %v682_v58, %v679_v38  ;;  %v2755_v1 = vshrl.u32 %v1949_v27, 16  ;;  %v2756_v38 = vrot.slane %v2119_v43, 1  ;;  %1608 = vmatpush3.bf16.msra.mxu0 %v1725_v9  ;;  %v1403_v58 = vcombine.low %v2209_v55, %v1397_v35  ;;  %v1729_v6 = vld [vmem:[%s2724_s1 + $0x8] sm:$0xff]   ;;  %1653 = vmatprep.subr.bf16.mxu1 %v1752_v45 }
  0x3c   :  { %v2339_v21 = vor.u32 %v2185_v13, %v2143_v2  ;;  %v2347_v43 = vsel %vm158_vm0, %v636_v10, %v2310_v42  ;;  %1609 = vmatprep.subr.bf16.mxu0 %v1752_v45  ;;  %v195_v55 = vshrl.u32 %v2202_v51, 16  ;;  %v575_v35 = vrot.slane %v573_v50, 4  ;;  %1658 = vmatpush3.bf16.msra.mxu1 %v1725_v9  ;;  %v1708_v2 = vld [vmem:[%s2723_s0 + $0x94] sm:$0xff]  }
  0x3d   :  { %752 = vrot.lane.b32.xlu0 %v186_v36, %s1747_s25  ;;  %v418_v36 = vor.u32 %v2755_v1, %v2019_v25  ;;  %v2331_v34 = vsel %vm702_vm1, %v2756_v38, %v710_v54  ;;  %v2343_v25 = vsel %vm205_vm2, %v674_v14, %v2308_v4  ;;  %v242_v37 = vshrl.u32 %v1403_v58, 16  ;;  %v1732_v51 = vld [vmem:[%s2724_s1 + $0x10] sm:$0xff]   ;;  %1654 = vmatprep.subr.bf16.mxu1 %v1752_v45 }
  0x3e   :  { %779 = vrot.lane.b32.xlu1 %v2754_v57, %s1744_s20  ;;  %v245_v57 = vshll.u32 %v1403_v58, 16  ;;  %v1467_v13 = vcombine.low %v2301_v7, %v1461_v31  ;;  %v578_v10 = vrot.slane %v576_v23, 5  ;;  %v197_v1 = vor.u32 %v195_v55, %v2233_v52  ;;  %v1740_v52 = vld [vmem:[%s2723_s0 + $0xd4] sm:$0x1f]   ;;  %v1739_v55 = vld [vmem:[%s2724_s1 + $0x20] ss:$0 sps:$4 sm:$0xff]   ;;  %1617 = vmatprep.mubr.msk.bf16.mxu0 %vm1753_vm5, %v1752_v45 }
  0x3f   :  { %v1426_v50 = vcombine.low %v2170_v0, %v2170_v0  ;;  %1610 = vmatpush3.bf16.msra.mxu0 %v1729_v6  ;;  %v467_v23 = vsel %vm205_vm2, %v2009_v12, %v2221_v29  ;;  %v423_v0 = vsel %vm158_vm0, %v418_v36, %v2141_v53  ;;  %v1741_v53 = vld [vmem:[%s2723_s0 + $0x100] sm:$0x1f]   ;;  %1637 = vmatprep.mubr.msk.bf16.mxu1 %vm1753_vm5, %v1752_v45  ;;  %vm975_vm11 = vcmask 392192  }
  0x40   :  { %v247_v9 = vrot.slane %v245_v57, 5  ;;  %v478_v31 = vshrl.u32 %v1467_v13, 16  ;;  %v481_v38 = vshll.u32 %v1467_v13, 16  ;;  %v2376_v58 = vsel %vm80_vm4, %v197_v1, %v1926_v16  ;;  %1611 = vmatprep.subr.bf16.mxu0 %v1752_v45  ;;  %1659 = vmatpush3.bf16.msra.mxu1 %v1729_v6  ;;  %v1736_v6 = vld [vmem:[%s2724_s1 + $0x18] sm:$0xff]  }
  0x41   :  { %771 = vrot.lane.b32.xlu0 %v1949_v27, %s1744_s20  ;;  %v244_v27 = vrot.slane %v242_v37, 4  ;;  %v719_v37 = vrot.slane %v2060_v49, 5  ;;  %v571_v16 = vsel %vm205_vm2, %v2034_v3, %v2339_v21  ;;  %v2395_v36 = vor.u32 %v578_v10, %v575_v35  ;;  %1655 = vmatprep.subr.bf16.mxu1 %v1752_v45 }
  0x42   :  { %798 = vrot.lane.b32.xlu1 %v1707_v15, %s1746_s7  ;;  %v2380_v15 = vsel %vm80_vm4, %v1426_v50, %v1427_v18  ;;  %v480_v12 = vrot.slane %v478_v31, 4  ;;  %v483_v29 = vrot.slane %v481_v38, 5  ;;  %v675_v18 = vsel %vm205_vm2, %v2075_v63, %v674_v14 }
  0x43   :  { %v248_v57 = vor.u32 %v247_v9, %v244_v27  ;;  %1612 = vmatpush3.bf16.msra.mxu0 %v1732_v51  ;;  %v432_v3 = vshrl.u32 %v2214_v47, 16  ;;  %v582_v1 = vshrl.u32 %v1740_v52, 16  ;;  %v721_v63 = vrot.slane %v2240_v5, 5 }
  0x44   :  { %1613 = vmatprep.subr.bf16.mxu0 %v1752_v45  ;;  %v1095_v14 = vsel %vm80_vm4, %v1739_v55, 0  ;;  %v538_v35 = vshrl.u32 %v2229_v32, 16  ;;  %v686_v27 = vshrl.u32 %v1741_v53, 16  ;;  %1660 = vmatpush3.bf16.msra.mxu1 %v1732_v51  ;;  %v689_v38 = vshll.u32 %v1741_v53, 16 }
  0x45   :  { %790 = vrot.lane.b32.xlu0 %v1708_v2, %s1746_s7  ;;  %v2401_v13 = vsel %vm205_vm2, %v2242_v40, %v248_v57  ;;  %v484_v2 = vor.u32 %v483_v29, %v480_v12  ;;  %v585_v40 = vshll.u32 %v1740_v52, 16  ;;  %v434_v47 = vor.u32 %v432_v3, %v2253_v26  ;;  %1656 = vmatprep.subr.bf16.mxu1 %v1752_v45  ;;  %v1727_v12 = vld [vmem:[%s2723_s0 + $0xdc] ss:$0 sps:$4 sm:$0xff]  }
  0x46   :  { %817 = vrot.lane.b32.xlu1 %v467_v23, %s1749_s14  ;;  %v584_v50 = vrot.slane %v582_v1, 4  ;;  %v540_v31 = vor.u32 %v538_v35, %v2274_v33  ;;  %v642_v23 = vshrl.u32 %v2247_v60, 16  ;;  %v723_v51 = vrot.slane %v1740_v52, 5 }
  0x47   :  { %v2415_v10 = vsel %vm205_vm2, %v2262_v48, %v484_v2  ;;  %v587_v9 = vrot.slane %v585_v40, 5  ;;  %1614 = vmatpush3.bf16.msra.mxu0 %v1736_v6  ;;  %v2427_v26 = vsel %vm80_vm4, %v434_v47, %v2007_v11  ;;  %v688_v48 = vrot.slane %v686_v27, 4 }
  0x48   :  { %1615 = vmatprep.subr.bf16.mxu0 %v1752_v45  ;;  %v2438_v33 = vsel %vm80_vm4, %v540_v31, %v2021_v28  ;;  %v691_v55 = vrot.slane %v689_v38, 5  ;;  %v644_v57 = vor.u32 %v642_v23, %v2310_v42  ;;  %v2444_v11 = vsel %vm715_vm3, %v721_v63, %v723_v51  ;;  %1661 = vmatpush3.bf16.msra.mxu1 %v1736_v6 }
  0x49   :  { %809 = vrot.lane.b32.xlu0 %v423_v0, %s1749_s14  ;;  %v2433_v0 = vsel %vm80_vm4, %v710_v54, %v2050_v46  ;;  %v588_v60 = vor.u32 %v587_v9, %v584_v50  ;;  %1657 = vmatprep.subr.bf16.mxu1 %v1752_v45  ;;  %v2757_v54 = vrot.slane %v1936_v22, 5  ;;  %vm994_vm12 = vcmask 457728  }
  0x4a   :  { %836 = vrot.lane.b32.xlu1 %v571_v16, %s1748_s28  ;;  %v692_v32 = vor.u32 %v691_v55, %v688_v48  ;;  %v2454_v28 = vsel %vm80_vm4, %v644_v57, %v2073_v59  ;;  %v1390_v59 = vcombine.low %v1989_v62, %v2093_v17  ;;  %v1719_v62 = vld [vmem:[%s2723_s0 + $0x148] sm:$0xff]   ;;  %v1720_v17 = vld [vmem:[%s2723_s0 + $0x9c] sm:$0xff]   ;;  %vm1013_vm13 = vcmask 523264  }
  0x4b   :  { %v2450_v46 = vsel %vm205_vm2, %v2395_v36, %v588_v60  ;;  %1616 = vmatpush3.bf16.msra.mxu0 %v1095_v14  ;;  %v2764_v16 = vld [vmem:[#allocation10_spill] sm:$0xff]  ;;  %vm1075_vm14 = vcmask 588800  }
  0x4c   :  { %v2465_v42 = vsel %vm205_vm2, %v2308_v4, %v692_v32  ;;  %1662 = vmatpush3.bf16.msra.mxu1 %v1095_v14  ;;  %v1430_v4 = vcombine.low %v2056_v61, %v2160_v30  ;;  %v580_v61 = vsel %vm205_vm2, %v2339_v21, %v2395_v36  ;;  %v2759_v30 = vld [vmem:[#allocation8_spill] sm:$0xff]  ;;  %v2762_v21 = vld [vmem:[#allocation9_spill] sm:$0xff]  ;;  %v1737_v36 = vld [vmem:[%s2723_s0 + $0xa4] ss:$0 sps:$4 sm:$0xff]  }
  0x4d   :  { %828 = vrot.lane.b32.xlu0 %v2183_v19, %s1748_s28  ;;  %v720_v19 = vsel %vm715_vm3, %v2757_v54, %v719_v37  ;;  %v1391_v52 = vcombine.low %v2762_v21, %v2762_v21 }
  0x4e   :  { %855 = vrot.lane.b32.xlu1 %v675_v18, %s1751_s18  ;;  %v1431_v18 = vcombine.low %v2764_v16, %v2301_v7  ;;  %v1738_v7 = vld [vmem:[%s2723_s0 + $0x134] ss:$0 sps:$4 sm:$0xff]  }
  0x4f   :  { %v390_v14 = vsel %vm80_vm4, %v1737_v36, %v1738_v7 }
  0x51   :  { %847 = vrot.lane.b32.xlu0 %v2199_v39, %s1751_s18 }
  0x52   :  { %874 = vrot.lane.b32.xlu1 %v720_v19, %s1750_s15 }
  0x55   :  { %866 = vrot.lane.b32.xlu0 %v2193_v20, %s1750_s15  ;;  %v2760_v20 = vld [vmem:[#allocation4_spill] sm:$0xff] }
  0x56   :  { %743 = vrot.lane.b32.xlu1 %v2132_v24, %s1745_s29  ;;  %v2758_v24 = vld [vmem:[#allocation12_spill] sm:$0xff]  ;;  %v1364_v39 = vcombine.low %v2760_v20, %v2760_v20 }
  0x59   :  { %735 = vrot.lane.b32.xlu0 %v1390_v59, %s1745_s29  ;;  %v2767_v59 = vld [vmem:[#allocation3_spill] sm:$0xff] }
  0x5a   :  { %762 = vrot.lane.b32.xlu1 %v2260_v41, %s1747_s25  ;;  %v2761_v41 = vld [vmem:[#allocation13_spill] sm:$0xff] }
  0x5d   :  { %754 = vrot.lane.b32.xlu0 %v2251_v8, %s1747_s25 }
  0x5e   :  { %781 = vrot.lane.b32.xlu1 %v1430_v4, %s1744_s20 }
  0x61   :  { %773 = vrot.lane.b32.xlu0 %v2065_v44, %s1744_s20  ;;  %v1363_v44 = vcombine.low %v2759_v30, %v2759_v30 }
  0x62   :  { %800 = vrot.lane.b32.xlu1 %v1719_v62, %s1746_s7 }
  0x63   :  { %v2507_v8 = vsel %vm80_vm4, %v1363_v44, %v1364_v39 }
  0x65   :  { %792 = vrot.lane.b32.xlu0 %v1720_v17, %s1746_s7 }
  0x66   :  { %819 = vrot.lane.b32.xlu1 %v2286_v56, %s1749_s14  ;;  %v722_v56 = vsel %vm715_vm3, %v719_v37, %v721_v63  ;;  %v152_v37 = vsel %vm80_vm4, %v1391_v52, %v1727_v12 }
  0x69   :  { %811 = vrot.lane.b32.xlu0 %v2758_v24, %s1749_s14 }
  0x6a   :  { %838 = vrot.lane.b32.xlu1 %v580_v61, %s1748_s28 }
  0x6d   :  { %830 = vrot.lane.b32.xlu0 %v2761_v41, %s1748_s28 }
  0x6e   :  { %857 = vrot.lane.b32.xlu1 %v2343_v25, %s1751_s18  ;;  %v2763_v25 = vld [vmem:[#allocation11_spill] sm:$0xff] }
  0x71   :  { %849 = vrot.lane.b32.xlu0 %v2347_v43, %s1751_s18 }
  0x72   :  { %876 = vrot.lane.b32.xlu1 %v722_v56, %s1750_s15 }
  0x74   :  { %v768_v29 = vpop.permute.xlu1 %767 }
  0x75   :  { %868 = vrot.lane.b32.xlu0 %v2331_v34, %s1750_s15  ;;  %v1735_v34 = vld [vmem:[%s2723_s0 + $0x150] sm:$0xff]  }
  0x76   :  { %745 = vrot.lane.b32.xlu1 %v2763_v25, %s1745_s29  ;;  %v730_v43 = vpop.permute.xlu0 %729 }
  0x78   :  { %v787_v53 = vpop.permute.xlu1 %786 }
  0x79   :  { %737 = vrot.lane.b32.xlu0 %v152_v37, %s1745_s29 }
  0x7a   :  { %764 = vrot.lane.b32.xlu1 %v2401_v13, %s1747_s25  ;;  %v2765_v13 = vld [vmem:[#allocation2_spill] sm:$0xff] }
  0x7b   :  { %v882_v6 = vsel %vm880_vm6, %v2765_v13, %v730_v43 }
  0x7d   :  { %756 = vrot.lane.b32.xlu0 %v2376_v58, %s1747_s25 }
  0x7e   :  { %783 = vrot.lane.b32.xlu1 %v1431_v18, %s1744_s20 }
  0x7f   :  { %v749_v58 = vpop.permute.xlu0 %748 }
  0x80   :  { %v901_v2 = vsel %vm899_vm7, %v882_v6, %v749_v58  ;;  %v825_v3 = vpop.permute.xlu1 %824 }
  0x81   :  { %v920_v1 = vsel %vm918_vm8, %v901_v2, %v768_v29  ;;  %775 = vrot.lane.b32.xlu0 %v2380_v15, %s1744_s20 }
  0x82   :  { %802 = vrot.lane.b32.xlu1 %v1735_v34, %s1746_s7  ;;  %v939_v63 = vsel %vm937_vm9, %v920_v1, %v787_v53 }
  0x83   :  { %v806_v40 = vpop.permute.xlu0 %805 }
  0x84   :  { %v958_v35 = vsel %vm956_vm10, %v939_v63, %v806_v40  ;;  %v863_v47 = vpop.permute.xlu1 %862  ;;  %v2768_v63 = vld [vmem:[#allocation5_spill] sm:$0xff] }
  0x85   :  { %794 = vrot.lane.b32.xlu0 %v390_v14, %s1746_s7  ;;  %v977_v15 = vsel %vm975_vm11, %v958_v35, %v825_v3 }
  0x86   :  { %821 = vrot.lane.b32.xlu1 %v2415_v10, %s1749_s14 }
  0x87   :  { %v844_v50 = vpop.permute.xlu0 %843 }
  0x88   :  { %v996_v27 = vsel %vm994_vm12, %v977_v15, %v844_v50  ;;  %v740_v9 = vpop.permute.xlu1 %739 }
  0x89   :  { %813 = vrot.lane.b32.xlu0 %v2427_v26, %s1749_s14  ;;  %v1015_v31 = vsel %vm1013_vm13, %v996_v27, %v863_v47 }
  0x8a   :  { %840 = vrot.lane.b32.xlu1 %v2450_v46, %s1748_s28  ;;  %1618 = vmatmul.mubr.msk.bf16.vlgmr.msra.gmra.mrb[0].mxu0 %vm1075_vm14, %v1015_v31 }
  0x8b   :  { %v732_v38 = vpop.permute.xlu0 %731  ;;  %1621 = vmatprep.mubr.msk.bf16.mxu0 %vm1753_vm5, %v1752_v45 }
  0x8c   :  { %v759_v10 = vpop.permute.xlu1 %758 }
  0x8d   :  { %832 = vrot.lane.b32.xlu0 %v2438_v33, %s1748_s28  ;;  %v2766_v33 = vld [vmem:[#allocation6_spill] sm:$0xff] }
  0x8e   :  { %859 = vrot.lane.b32.xlu1 %v2465_v42, %s1751_s18  ;;  %v892_v46 = vsel %vm880_vm6, %v2766_v33, %v740_v9 }
  0x8f   :  { %v751_v23 = vpop.permute.xlu0 %750  ;;  %v911_v54 = vsel %vm899_vm7, %v892_v46, %v759_v10 }
  0x90   :  { %v778_v26 = vpop.permute.xlu1 %777 }
  0x91   :  { %851 = vrot.lane.b32.xlu0 %v2454_v28, %s1751_s18  ;;  %v930_v28 = vsel %vm918_vm8, %v911_v54, %v778_v26 }
  0x92   :  { %878 = vrot.lane.b32.xlu1 %v2444_v11, %s1750_s15  ;;  %v884_v11 = vsel %vm880_vm6, %v2767_v59, %v732_v38 }
  0x93   :  { %v770_v48 = vpop.permute.xlu0 %769 }
  0x94   :  { %v797_v51 = vpop.permute.xlu1 %796 }
  0x95   :  { %870 = vrot.lane.b32.xlu0 %v2433_v0, %s1750_s15  ;;  %v949_v4 = vsel %vm937_vm9, %v930_v28, %v797_v51  ;;  %v903_v0 = vsel %vm899_vm7, %v884_v11, %v751_v23 }
  0x96   :  { %v922_v17 = vsel %vm918_vm8, %v903_v0, %v770_v48 }
  0x97   :  { %v789_v60 = vpop.permute.xlu0 %788 }
  0x98   :  { %v816_v55 = vpop.permute.xlu1 %815  ;;  %v941_v30 = vsel %vm937_vm9, %v922_v17, %v789_v60 }
  0x99   :  { %v968_v62 = vsel %vm956_vm10, %v949_v4, %v816_v55 }
  0x9b   :  { %v808_v57 = vpop.permute.xlu0 %807 }
  0x9c   :  { %v835_v32 = vpop.permute.xlu1 %834  ;;  %v960_v39 = vsel %vm956_vm10, %v941_v30, %v808_v57 }
  0x9d   :  { %v987_v61 = vsel %vm975_vm11, %v968_v62, %v835_v32 }
  0x9f   :  { %v827_v19 = vpop.permute.xlu0 %826 }
  0xa0   :  { %v854_v42 = vpop.permute.xlu1 %853  ;;  %v979_v56 = vsel %vm975_vm11, %v960_v39, %v827_v19 }
  0xa1   :  { %v1006_v44 = vsel %vm994_vm12, %v987_v61, %v854_v42  ;;  %v2769_v61 = vld [vmem:[#allocation7_spill] sm:$0xff] }
  0xa3   :  { %v846_v24 = vpop.permute.xlu0 %845 }
  0xa4   :  { %v873_v20 = vpop.permute.xlu1 %872  ;;  %v998_v21 = vsel %vm994_vm12, %v979_v56, %v846_v24 }
  0xa5   :  { %v1025_v41 = vsel %vm1013_vm13, %v1006_v44, %v873_v20 }
  0xa6   :  { %1638 = vmatmul.mubr.msk.bf16.vlgmr.msra.gmra.mrb[0].mxu1 %vm1075_vm14, %v1025_v41 }
  0xa7   :  { %v865_v52 = vpop.permute.xlu0 %864  ;;  %1641 = vmatprep.mubr.msk.bf16.mxu1 %vm1753_vm5, %v1752_v45 }
  0xa8   :  { %v1017_v12 = vsel %vm1013_vm13, %v998_v21, %v865_v52  ;;  %v742_v29 = vpop.permute.xlu1 %741 }
  0xa9   :  { %1622 = vmatmul.mubr.msk.bf16.gmra.mrb[4].mxu0 %vm1075_vm14, %v1017_v12  ;;  %v894_v13 = vsel %vm880_vm6, %v1936_v22, %v742_v29 }
  0xaa   :  { %1625 = vmatprep.mubr.msk.bf16.mxu0 %vm1753_vm5, %v1752_v45 }
  0xab   :  { %v734_v25 = vpop.permute.xlu0 %733 }
  0xac   :  { %v761_v37 = vpop.permute.xlu1 %760  ;;  %v886_v14 = vsel %vm880_vm6, %v2768_v63, %v734_v25 }
  0xad   :  { %v913_v58 = vsel %vm899_vm7, %v894_v13, %v761_v37 }
  0xaf   :  { %v753_v43 = vpop.permute.xlu0 %752 }
  0xb0   :  { %v780_v53 = vpop.permute.xlu1 %779  ;;  %v905_v35 = vsel %vm899_vm7, %v886_v14, %v753_v43 }
  0xb1   :  { %v932_v3 = vsel %vm918_vm8, %v913_v58, %v780_v53 }
  0xb3   :  { %v772_v16 = vpop.permute.xlu0 %771 }
  0xb4   :  { %v799_v18 = vpop.permute.xlu1 %798  ;;  %v924_v15 = vsel %vm918_vm8, %v905_v35, %v772_v16 }
  0xb5   :  { %v951_v40 = vsel %vm937_vm9, %v932_v3, %v799_v18 }
  0xb7   :  { %v791_v34 = vpop.permute.xlu0 %790 }
  0xb8   :  { %v818_v36 = vpop.permute.xlu1 %817  ;;  %v943_v27 = vsel %vm937_vm9, %v924_v15, %v791_v34 }
  0xb9   :  { %v970_v47 = vsel %vm956_vm10, %v951_v40, %v818_v36 }
  0xbb   :  { %v810_v7 = vpop.permute.xlu0 %809 }
  0xbc   :  { %v837_v6 = vpop.permute.xlu1 %836  ;;  %v962_v38 = vsel %vm956_vm10, %v943_v27, %v810_v7 }
  0xbd   :  { %v989_v22 = vsel %vm975_vm11, %v970_v47, %v837_v6 }
  0xbf   :  { %v829_v2 = vpop.permute.xlu0 %828 }
  0xc0   :  { %v856_v1 = vpop.permute.xlu1 %855  ;;  %v981_v23 = vsel %vm975_vm11, %v962_v38, %v829_v2 }
  0xc1   :  { %v1008_v9 = vsel %vm994_vm12, %v989_v22, %v856_v1 }
  0xc3   :  { %v848_v50 = vpop.permute.xlu0 %847 }
  0xc4   :  { %v875_v31 = vpop.permute.xlu1 %874  ;;  %v1000_v26 = vsel %vm994_vm12, %v981_v23, %v848_v50 }
  0xc5   :  { %v1027_v10 = vsel %vm1013_vm13, %v1008_v9, %v875_v31 }
  0xc6   :  { %1642 = vmatmul.mubr.msk.bf16.gmra.mrb[4].mxu1 %vm1075_vm14, %v1027_v10 }
  0xc7   :  { %v867_v48 = vpop.permute.xlu0 %866  ;;  %1645 = vmatprep.mubr.msk.bf16.mxu1 %vm1753_vm5, %v1752_v45 }
  0xc8   :  { %v1019_v51 = vsel %vm1013_vm13, %v1000_v26, %v867_v48  ;;  %v744_v60 = vpop.permute.xlu1 %743 }
  0xc9   :  { %1626 = vmatmul.mubr.msk.bf16.gmra.mrb[8].mxu0 %vm1075_vm14, %v1019_v51  ;;  %v896_v59 = vsel %vm880_vm6, %v2060_v49, %v744_v60 }
  0xca   :  { %1629 = vmatprep.mubr.msk.bf16.mxu0 %vm1753_vm5, %v1752_v45 }
  0xcb   :  { %v736_v55 = vpop.permute.xlu0 %735 }
  0xcc   :  { %v763_v57 = vpop.permute.xlu1 %762  ;;  %v888_v24 = vsel %vm880_vm6, %v2769_v61, %v736_v55  ;;  %v2676_v55 = vld [vmem:[%s2725_s2] ss:$0 sm:$0xff] }
  0xcd   :  { %v915_v4 = vsel %vm899_vm7, %v896_v59, %v763_v57 }
  0xcf   :  { %v755_v33 = vpop.permute.xlu0 %754 }
  0xd0   :  { %v782_v46 = vpop.permute.xlu1 %781  ;;  %v907_v44 = vsel %vm899_vm7, %v888_v24, %v755_v33 }
  0xd1   :  { %v934_v62 = vsel %vm918_vm8, %v915_v4, %v782_v46 }
  0xd3   :  { %v774_v32 = vpop.permute.xlu0 %773 }
  0xd4   :  { %v801_v54 = vpop.permute.xlu1 %800  ;;  %v926_v39 = vsel %vm918_vm8, %v907_v44, %v774_v32 }
  0xd5   :  { %v953_v30 = vsel %vm937_vm9, %v934_v62, %v801_v54 }
  0xd7   :  { %v793_v19 = vpop.permute.xlu0 %792 }
  0xd8   :  { %v820_v28 = vpop.permute.xlu1 %819  ;;  %v945_v56 = vsel %vm937_vm9, %v926_v39, %v793_v19 }
  0xd9   :  { %v972_v20 = vsel %vm956_vm10, %v953_v30, %v820_v28 }
  0xdb   :  { %v812_v42 = vpop.permute.xlu0 %811 }
  0xdc   :  { %v839_v11 = vpop.permute.xlu1 %838  ;;  %v964_v12 = vsel %vm956_vm10, %v945_v56, %v812_v42 }
  0xdd   :  { %v991_v49 = vsel %vm975_vm11, %v972_v20, %v839_v11 }
  0xdf   :  { %v831_v0 = vpop.permute.xlu0 %830 }
  0xe0   :  { %v858_v17 = vpop.permute.xlu1 %857  ;;  %v983_v25 = vsel %vm975_vm11, %v964_v12, %v831_v0 }
  0xe1   :  { %v1010_v21 = vsel %vm994_vm12, %v991_v49, %v858_v17 }
  0xe3   :  { %v850_v41 = vpop.permute.xlu0 %849 }
  0xe4   :  { %v877_v52 = vpop.permute.xlu1 %876  ;;  %v1002_v37 = vsel %vm994_vm12, %v983_v25, %v850_v41 }
  0xe5   :  { %v1029_v29 = vsel %vm1013_vm13, %v1010_v21, %v877_v52 }
  0xe6   :  { %1646 = vmatmul.mubr.msk.bf16.gmra.mrb[8].mxu1 %vm1075_vm14, %v1029_v29 }
  0xe7   :  { %v869_v43 = vpop.permute.xlu0 %868  ;;  %1649 = vmatprep.mubr.msk.bf16.mxu1 %vm1753_vm5, %v1752_v45 }
  0xe8   :  { %v1021_v53 = vsel %vm1013_vm13, %v1002_v37, %v869_v43  ;;  %v746_v16 = vpop.permute.xlu1 %745 }
  0xe9   :  { %1630 = vmatmul.mubr.msk.bf16.gmra.mrb[12].mxu0 %vm1075_vm14, %v1021_v53  ;;  %v898_v1 = vsel %vm880_vm6, %v2240_v5, %v746_v16 }
  0xea   :  { %1633 = vmatprep.mubr.msk.bf16.mxu0 %vm1753_vm5, %v1752_v45 }
  0xeb   :  { %v738_v18 = vpop.permute.xlu0 %737 }
  0xec   :  { %v765_v34 = vpop.permute.xlu1 %764  ;;  %v890_v45 = vsel %vm880_vm6, %v2507_v8, %v738_v18 }
  0xed   :  { %v917_v14 = vsel %vm899_vm7, %v898_v1, %v765_v34 }
  0xef   :  { %v757_v36 = vpop.permute.xlu0 %756 }
  0xf0   :  { %v784_v7 = vpop.permute.xlu1 %783  ;;  %v909_v22 = vsel %vm899_vm7, %v890_v45, %v757_v36 }
  0xf1   :  { %v936_v35 = vsel %vm918_vm8, %v917_v14, %v784_v7 }
  0xf3   :  { %v776_v13 = vpop.permute.xlu0 %775 }
  0xf4   :  { %v803_v6 = vpop.permute.xlu1 %802  ;;  %v928_v27 = vsel %vm918_vm8, %v909_v22, %v776_v13 }
  0xf5   :  { %v955_v15 = vsel %vm937_vm9, %v936_v35, %v803_v6 }
  0xf7   :  { %v795_v58 = vpop.permute.xlu0 %794 }
  0xf8   :  { %v822_v2 = vpop.permute.xlu1 %821  ;;  %v947_v31 = vsel %vm937_vm9, %v928_v27, %v795_v58 }
  0xf9   :  { %v974_v50 = vsel %vm956_vm10, %v955_v15, %v822_v2 }
  0xfb   :  { %v814_v3 = vpop.permute.xlu0 %813 }
  0xfc   :  { %v841_v63 = vpop.permute.xlu1 %840  ;;  %v966_v23 = vsel %vm956_vm10, %v947_v31, %v814_v3 }
  0xfd   :  { %v993_v5 = vsel %vm975_vm11, %v974_v50, %v841_v63 }
  0xff   :  { %v833_v40 = vpop.permute.xlu0 %832 }
 0x100   :  { %v860_v47 = vpop.permute.xlu1 %859  ;;  %v985_v26 = vsel %vm975_vm11, %v966_v23, %v833_v40 }
 0x101   :  { %v1012_v38 = vsel %vm994_vm12, %v993_v5, %v860_v47 }
 0x103   :  { %v852_v9 = vpop.permute.xlu0 %851 }
 0x104   :  { %v879_v10 = vpop.permute.xlu1 %878  ;;  %v1004_v48 = vsel %vm994_vm12, %v985_v26, %v852_v9 }
 0x105   :  { %v1031_v8 = vsel %vm1013_vm13, %v1012_v38, %v879_v10 }
 0x106   :  { %1650 = vmatmul.mubr.msk.bf16.gmra.mrb[12].mxu1 %vm1075_vm14, %v1031_v8 }
 0x107   :  { %v871_v51 = vpop.permute.xlu0 %870 }
 0x108   :  { %v1023_v60 = vsel %vm1013_vm13, %v1004_v48, %v871_v51 }
 0x109   :  { %1634 = vmatmul.mubr.msk.bf16.gmra.mrb[16].mxu0 %vm1075_vm14, %v1023_v60 }
 0x15d   :  { %v1131_v57 = vpop.f32.mrb[0].mxu0 }
 0x15e   :  { %v1132_v33 = vadd.f32 %v2676_v55, %v1131_v57  ;;  %v1619_v46 = vpop.f32.mrb[1].mxu0 }
 0x15f   :  { %v1134_v32 = vpop.f32.mrb[2].mxu0 }
 0x160   :  { %v1220_v54 = vmul.f32 0.1, %v1132_v33  ;;  %v1135_v19 = vadd.f32 %v2676_v55, %v1134_v32  ;;  %v1620_v28 = vpop.f32.mrb[3].mxu0  ;;  %vm1202_vm15 = vcmp.gt.f32.partialorder %v1132_v33, 0.0 }
 0x162   :  { %vm1203_vm0 = vcmp.gt.f32.partialorder %v1135_v19, 0.0  ;;  %v1221_v42 = vmul.f32 0.1, %v1135_v19  ;;  %v1238_v59 = vsel %vm1202_vm15, %v1132_v33, %v1220_v54 }
 0x164   :  { %v1239_v11 = vsel %vm1203_vm0, %v1135_v19, %v1221_v42 }
 0x165   :  { %v1543_v4 = vpack.c.bf16 %v1239_v11, %v1238_v59 }
 0x167   :  { %1544 = vst [vmem:[%s2726_s3] sm:$0xff] %v1543_v4  }
 0x179   :  { %v1171_v0 = vpop.f32.mrb[0].mxu1 }
 0x17a   :  { %v1172_v62 = vadd.f32 %v2676_v55, %v1171_v0  ;;  %v1639_v17 = vpop.f32.mrb[1].mxu1 }
 0x17b   :  { %v1174_v61 = vpop.f32.mrb[2].mxu1 }
 0x17c   :  { %v1230_v24 = vmul.f32 0.1, %v1172_v62  ;;  %v1175_v30 = vadd.f32 %v2676_v55, %v1174_v61  ;;  %v1139_v44 = vpop.f32.mrb[4].mxu0  ;;  %v1640_v20 = vpop.f32.mrb[3].mxu1  ;;  %vm1212_vm1 = vcmp.gt.f32.partialorder %v1172_v62, 0.0 }
 0x17d   :  { %v1140_v39 = vadd.f32 %v2676_v55, %v1139_v44  ;;  %v1623_v49 = vpop.f32.mrb[5].mxu0 }
 0x17e   :  { %vm1213_vm2 = vcmp.gt.f32.partialorder %v1175_v30, 0.0  ;;  %v1231_v41 = vmul.f32 0.1, %v1175_v30  ;;  %v1142_v56 = vpop.f32.mrb[6].mxu0  ;;  %v1248_v29 = vsel %vm1212_vm1, %v1172_v62, %v1230_v24 }
 0x17f   :  { %v1222_v21 = vmul.f32 0.1, %v1140_v39  ;;  %v1143_v52 = vadd.f32 %v2676_v55, %v1142_v56  ;;  %v1624_v12 = vpop.f32.mrb[7].mxu0  ;;  %vm1204_vm3 = vcmp.gt.f32.partialorder %v1140_v39, 0.0 }
 0x180   :  { %v1249_v25 = vsel %vm1213_vm2, %v1175_v30, %v1231_v41 }
 0x181   :  { %v1568_v37 = vpack.c.bf16 %v1249_v25, %v1248_v29  ;;  %vm1205_vm4 = vcmp.gt.f32.partialorder %v1143_v52, 0.0  ;;  %v1223_v43 = vmul.f32 0.1, %v1143_v52  ;;  %v1240_v53 = vsel %vm1204_vm3, %v1140_v39, %v1222_v21 }
 0x183   :  { %1589 = vst [vmem:[%s2726_s3 + $0x28] sm:$0xff] %v1568_v37   ;;  %v1241_v16 = vsel %vm1205_vm4, %v1143_v52, %v1223_v43 }
 0x184   :  { %v1548_v18 = vpack.c.bf16 %v1241_v16, %v1240_v53 }
 0x186   :  { %1585 = vst [vmem:[%s2726_s3 + $0x8] sm:$0xff] %v1548_v18  }
 0x199   :  { %v1179_v34 = vpop.f32.mrb[4].mxu1 }
 0x19a   :  { %v1180_v36 = vadd.f32 %v2676_v55, %v1179_v34  ;;  %v1643_v7 = vpop.f32.mrb[5].mxu1 }
 0x19b   :  { %v1182_v13 = vpop.f32.mrb[6].mxu1 }
 0x19c   :  { %v1232_v6 = vmul.f32 0.1, %v1180_v36  ;;  %v1183_v58 = vadd.f32 %v2676_v55, %v1182_v13  ;;  %v1147_v2 = vpop.f32.mrb[8].mxu0  ;;  %v1644_v3 = vpop.f32.mrb[7].mxu1  ;;  %vm1214_vm5 = vcmp.gt.f32.partialorder %v1180_v36, 0.0 }
 0x19d   :  { %v1148_v1 = vadd.f32 %v2676_v55, %v1147_v2  ;;  %v1627_v63 = vpop.f32.mrb[9].mxu0 }
 0x19e   :  { %vm1215_vm6 = vcmp.gt.f32.partialorder %v1183_v58, 0.0  ;;  %v1233_v14 = vmul.f32 0.1, %v1183_v58  ;;  %v1150_v40 = vpop.f32.mrb[10].mxu0  ;;  %v1250_v15 = vsel %vm1214_vm5, %v1180_v36, %v1232_v6 }
 0x19f   :  { %v1224_v35 = vmul.f32 0.1, %v1148_v1  ;;  %v1151_v47 = vadd.f32 %v2676_v55, %v1150_v40  ;;  %v1628_v45 = vpop.f32.mrb[11].mxu0  ;;  %vm1206_vm7 = vcmp.gt.f32.partialorder %v1148_v1, 0.0 }
 0x1a0   :  { %v1251_v22 = vsel %vm1215_vm6, %v1183_v58, %v1233_v14 }
 0x1a1   :  { %v1573_v50 = vpack.c.bf16 %v1251_v22, %v1250_v15  ;;  %vm1207_vm8 = vcmp.gt.f32.partialorder %v1151_v47, 0.0  ;;  %v1225_v27 = vmul.f32 0.1, %v1151_v47  ;;  %v1242_v5 = vsel %vm1206_vm7, %v1148_v1, %v1224_v35 }
 0x1a3   :  { %1590 = vst [vmem:[%s2726_s3 + $0x30] sm:$0xff] %v1573_v50   ;;  %v1243_v9 = vsel %vm1207_vm8, %v1151_v47, %v1225_v27 }
 0x1a4   :  { %v1553_v31 = vpack.c.bf16 %v1243_v9, %v1242_v5 }
 0x1a6   :  { %1586 = vst [vmem:[%s2726_s3 + $0x10] sm:$0xff] %v1553_v31  }
 0x1b9   :  { %v1187_v38 = vpop.f32.mrb[8].mxu1 }
 0x1ba   :  { %v1188_v10 = vadd.f32 %v2676_v55, %v1187_v38  ;;  %v1647_v23 = vpop.f32.mrb[9].mxu1 }
 0x1bb   :  { %v1190_v8 = vpop.f32.mrb[10].mxu1 }
 0x1bc   :  { %v1234_v26 = vmul.f32 0.1, %v1188_v10  ;;  %v1191_v48 = vadd.f32 %v2676_v55, %v1190_v8  ;;  %v1155_v51 = vpop.f32.mrb[12].mxu0  ;;  %v1648_v60 = vpop.f32.mrb[11].mxu1  ;;  %vm1216_vm9 = vcmp.gt.f32.partialorder %v1188_v10, 0.0 }
 0x1bd   :  { %v1156_v57 = vadd.f32 %v2676_v55, %v1155_v51  ;;  %v1631_v33 = vpop.f32.mrb[13].mxu0 }
 0x1be   :  { %vm1217_vm10 = vcmp.gt.f32.partialorder %v1191_v48, 0.0  ;;  %v1235_v46 = vmul.f32 0.1, %v1191_v48  ;;  %v1158_v32 = vpop.f32.mrb[14].mxu0  ;;  %v1252_v42 = vsel %vm1216_vm9, %v1188_v10, %v1234_v26 }
 0x1bf   :  { %v1226_v54 = vmul.f32 0.1, %v1156_v57  ;;  %v1159_v19 = vadd.f32 %v2676_v55, %v1158_v32  ;;  %v1632_v28 = vpop.f32.mrb[15].mxu0  ;;  %vm1208_vm11 = vcmp.gt.f32.partialorder %v1156_v57, 0.0 }
 0x1c0   :  { %v1253_v59 = vsel %vm1217_vm10, %v1191_v48, %v1235_v46 }
 0x1c1   :  { %v1578_v11 = vpack.c.bf16 %v1253_v59, %v1252_v42  ;;  %vm1209_vm12 = vcmp.gt.f32.partialorder %v1159_v19, 0.0  ;;  %v1227_v4 = vmul.f32 0.1, %v1159_v19  ;;  %v1244_v0 = vsel %vm1208_vm11, %v1156_v57, %v1226_v54 }
 0x1c3   :  { %1591 = vst [vmem:[%s2726_s3 + $0x38] sm:$0xff] %v1578_v11   ;;  %v1245_v62 = vsel %vm1209_vm12, %v1159_v19, %v1227_v4 }
 0x1c4   :  { %v1558_v17 = vpack.c.bf16 %v1245_v62, %v1244_v0 }
 0x1c6   :  { %1587 = vst [vmem:[%s2726_s3 + $0x18] sm:$0xff] %v1558_v17  }
 0x1d9   :  { %v1195_v61 = vpop.f32.mrb[12].mxu1 }
 0x1da   :  { %v1196_v24 = vadd.f32 %v2676_v55, %v1195_v61  ;;  %v1651_v30 = vpop.f32.mrb[13].mxu1 }
 0x1db   :  { %v1198_v44 = vpop.f32.mrb[14].mxu1 }
 0x1dc   :  { %v1236_v20 = vmul.f32 0.1, %v1196_v24  ;;  %v1199_v39 = vadd.f32 %v2676_v55, %v1198_v44  ;;  %v1163_v49 = vpop.f32.mrb[16].mxu0  ;;  %v1652_v41 = vpop.f32.mrb[15].mxu1  ;;  %vm1218_vm13 = vcmp.gt.f32.partialorder %v1196_v24, 0.0 }
 0x1dd   :  { %v1164_v56 = vadd.f32 %v2676_v55, %v1163_v49  ;;  %v1635_v21 = vpop.f32.mrb[17].mxu0 }
 0x1de   :  { %vm1219_vm14 = vcmp.gt.f32.partialorder %v1199_v39, 0.0  ;;  %v1237_v52 = vmul.f32 0.1, %v1199_v39  ;;  %v1166_v12 = vpop.f32.mrb[18].mxu0  ;;  %v1254_v43 = vsel %vm1218_vm13, %v1196_v24, %v1236_v20 }
 0x1df   :  { %v1228_v29 = vmul.f32 0.1, %v1164_v56  ;;  %v1167_v25 = vadd.f32 %v2676_v55, %v1166_v12  ;;  %v1636_v37 = vpop.f32.mrb[19].mxu0  ;;  %vm1210_vm15 = vcmp.gt.f32.partialorder %v1164_v56, 0.0 }
 0x1e0   :  { %v1255_v53 = vsel %vm1219_vm14, %v1199_v39, %v1237_v52 }
 0x1e1   :  { %v1583_v16 = vpack.c.bf16 %v1255_v53, %v1254_v43  ;;  %vm1211_vm0 = vcmp.gt.f32.partialorder %v1167_v25, 0.0  ;;  %v1229_v18 = vmul.f32 0.1, %v1167_v25  ;;  %v1246_v34 = vsel %vm1210_vm15, %v1164_v56, %v1228_v29 }
 0x1e3   :  { %1592 = vst [vmem:[%s2726_s3 + $0x40] sm:$0xff] %v1583_v16   ;;  %v1247_v36 = vsel %vm1211_vm0, %v1167_v25, %v1229_v18 }
 0x1e4   :  { %v1563_v7 = vpack.c.bf16 %v1247_v36, %v1246_v34 }
 0x1e6   :  { %1588 = vst [vmem:[%s2726_s3 + $0x20] sm:$0xff] %v1563_v7  }

// kernel: a_call__.11
= control target key start
LH: loop header
LB: loop body
LE: loop exit
PB: predicated region body
PF: predicated region fallthrough
CT: control target
= control target key end

     0   :  { %vm19_vm0 = vsmask.f32 3328  ;;  %vm20_vm1 = vsmask.f32 7440  ;;  %vm110_vm2 = vsmask.f32 1280  ;;  %s750_s0 = inlined_call_operand.vmem [shape: bf16[2,4,26,16], index: 0, kind: input, shape index: {}]   ;;  %s751_s1 = inlined_call_operand.vmem [shape: bf16[2,20,16], index: 1, kind: output, shape index: {}]  }
   0x1   :  { %v8_v0 = vld [vmem:[%s750_s0] sm:$0xf]  ;;  %v482_v1 = vld [vmem:[%s750_s0 + $0x4] sm:$0xf]  ;;  %v427_v2 = vld [vmem:[%s750_s0 + $0x10] sm:$0xf] }
   0x2   :  { %v23_v3 = vshrl.u32 %v8_v0, 16  ;;  %v26_v4 = vshll.u32 %v8_v0, 16  ;;  %v32_v5 = vshll.u32 %v482_v1, 16  ;;  %v36_v6 = vshrl.u32 %v482_v1, 16  ;;  %v430_v7 = vld [vmem:[%s750_s0 + $0x20] sm:$0xf]  ;;  %vm512_vm3 = vmor %vm19_vm0, %vm20_vm1 }
   0x3   :  { %v495_v8 = vld [vmem:[%s750_s0 + $0x24] sm:$0xf]  ;;  %v500_v9 = vld [vmem:[%s750_s0 + $0x14] sm:$0xf]  ;;  %v73_v13 = vshrl.u32 %v430_v7, 16  ;;  %v15_v14 = vmax.bf16 %v427_v2, %v8_v0  ;;  %v76_v16 = vshll.u32 %v430_v7, 16 }
   0x4   :  { %v25_v10 = vrot.slane %v23_v3, 4  ;;  %v28_v11 = vrot.slane %v26_v4, 5  ;;  %v34_v12 = vrot.slane %v32_v5, 5  ;;  %v38_v15 = vrot.slane %v36_v6, 4  ;;  %v107_v17 = vld [vmem:[%s750_s0] sm:$0xc] }
   0x5   :  { %v161_v18 = vshrl.u32 %v500_v9, 16  ;;  %v75_v20 = vrot.slane %v73_v13, 4  ;;  %v82_v21 = vshll.u32 %v495_v8, 16  ;;  %v114_v22 = vshrl.u32 %v107_v17, 16  ;;  %v437_v23 = vld [vmem:[%s750_s0 + $0x10] sm:$0xc] }
   0x6   :  { %v29_v19 = vor.u32 %v28_v11, %v25_v10  ;;  %v78_v25 = vrot.slane %v76_v16, 5  ;;  %vm111_vm4 = vsmask.f32 5392  ;;  %v117_v26 = vshll.u32 %v107_v17, 16  ;;  %v433_v41 = vld [vmem:[%s750_s0 + $0x30] sm:$0xf] }
   0x7   :  { %v122_v27 = vrot.slane %v36_v6, 6  ;;  %v39_v29 = vor.u32 %v38_v15, %v34_v12  ;;  %v116_v30 = vrot.slane %v114_v22, 6  ;;  %v152_v31 = vshrl.u32 %v437_v23, 16  ;;  %v191_v45 = vld [vmem:[%s750_s0] sm:$0x8]  ;;  %vm534_vm7 = vmor %vm110_vm2, %vm111_vm4 }
   0x8   :  { %v30_v28 = vrot.slane %v29_v19, 4  ;;  %v79_v32 = vor.u32 %v78_v25, %v75_v20  ;;  %v119_v33 = vrot.slane %v117_v26, 7  ;;  %v123_v34 = vrot.slane %v32_v5, 7  ;;  %v528_v48 = vld [vmem:[%s750_s0 + $0x8] sm:$0x7] }
   0x9   :  { %v155_v35 = vshll.u32 %v437_v23, 16  ;;  %v154_v37 = vrot.slane %v152_v31, 6  ;;  %v163_v38 = vrot.slane %v161_v18, 6  ;;  %v164_v39 = vshll.u32 %v500_v9, 16  ;;  %v436_v58 = vld [vmem:[%s750_s0 + $0x28] sm:$0x7] }
   0xa   :  { %v35_v36 = vsel %vm512_vm3, %v30_v28, %v34_v12  ;;  %v80_v42 = vrot.slane %v79_v32, 4  ;;  %v120_v43 = vor.u32 %v119_v33, %v116_v30  ;;  %v84_v46 = vrot.slane %v82_v21, 5  ;;  %v548_v59 = vld [vmem:[%s750_s0 + $0x8] sm:$0xf]  ;;  %v438_v5 = vld [vmem:[%s750_s0 + $0x18] sm:$0xf] }
   0xb   :  { %v54_v40 = vmax.bf16 %v35_v36, %v15_v14  ;;  %v157_v44 = vrot.slane %v155_v35, 7  ;;  %v166_v47 = vrot.slane %v164_v39, 7  ;;  %vm196_vm5 = vcmask 1040384   ;;  %v434_v19 = vld [vmem:[%s750_s0 + $0x34] sm:$0xf] }
   0xc   :  { %vm197_vm6 = vcmask 1044484   ;;  %v16_v49 = vmax.bf16 %v500_v9, %v482_v1  ;;  %v121_v52 = vrot.slane %v120_v43, 4  ;;  %v85_v54 = vsel %vm512_vm3, %v80_v42, %v84_v46  ;;  %v10_v28 = vld [vmem:[%s750_s0 + $0x8] sm:$0x3]  ;;  %v429_v33 = vld [vmem:[%s750_s0 + $0x18] sm:$0x3] }
   0xd   :  { %v61_v50 = vmax.bf16 %v430_v7, %v54_v40  ;;  %v158_v53 = vor.u32 %v157_v44, %v154_v37  ;;  %v124_v55 = vor.u32 %v123_v34, %v122_v27  ;;  %v540_v56 = vor.u32 %v166_v47, %v163_v38  ;;  %vm552_vm8 = vmor %vm196_vm5, %vm197_vm6  ;;  %v109_v34 = vld [vmem:[%s750_s0 + $0xc] sm:$0x1]  ;;  %v446_v24 = vld [vmem:[%s750_s0 + $0x58] sm:$0x3] }
   0xe   :  { %v440_v57 = vrot.slane %v191_v45, 11  ;;  %v40_v63 = vrot.slane %v39_v29, 4  ;;  %v42_v0 = vshll.u32 %v528_v48, 16  ;;  %v201_v3 = vrot.slane %v482_v1, 7 }
   0xf   :  { %v68_v60 = vmax.bf16 %v433_v41, %v61_v50  ;;  %v159_v61 = vrot.slane %v158_v53, 4  ;;  %v125_v2 = vsel %vm534_vm7, %v121_v52, %v124_v55  ;;  %vm215_vm9 = vcmask 125952  }
  0x10   :  { %v86_v4 = vshrl.u32 %v495_v8, 16  ;;  %v44_v7 = vrot.slane %v42_v0, 5  ;;  %v92_v9 = vshll.u32 %v436_v58, 16  ;;  %v128_v10 = vshrl.u32 %v548_v59, 16 }
  0x11   :  { %v104_v6 = vmax.bf16 %v85_v54, %v68_v60  ;;  %v168_v11 = vsel %vm534_vm7, %v159_v61, %v540_v56  ;;  %v202_v12 = vsel %vm552_vm8, %v440_v57, %v201_v3  ;;  %v131_v13 = vshll.u32 %v548_v59, 16  ;;  %v441_v60 = vld [vmem:[%s750_s0 + $0x40] sm:$0xf]  ;;  %v613_v61 = vld [vmem:[%s750_s0 + $0x44] sm:$0xf] }
  0x12   :  { %v88_v1 = vrot.slane %v86_v4, 4  ;;  %v45_v15 = vsel %vm512_vm3, %v40_v63, %v44_v7  ;;  %v130_v16 = vrot.slane %v128_v10, 6  ;;  %v171_v17 = vshrl.u32 %v438_v5, 16  ;;  %v618_v4 = vld [vmem:[%s750_s0 + $0x60] sm:$0xf] }
  0x13   :  { %v145_v14 = vmax.bf16 %v125_v2, %v104_v6  ;;  %v55_v18 = vmax.bf16 %v45_v15, %v16_v49  ;;  %v133_v21 = vrot.slane %v131_v13, 7  ;;  %v174_v22 = vshll.u32 %v438_v5, 16  ;;  %v432_v6 = vld [vmem:[%s750_s0 + $0x28] sm:$0x3] }
  0x14   :  { %v89_v20 = vor.u32 %v88_v1, %v84_v46  ;;  %v94_v25 = vrot.slane %v92_v9, 5  ;;  %v126_v26 = vrot.slane %v124_v55, 4  ;;  %v173_v27 = vrot.slane %v171_v17, 6 }
  0x15   :  { %v188_v23 = vmax.bf16 %v168_v11, %v145_v14  ;;  %v62_v29 = vmax.bf16 %v495_v8, %v55_v18  ;;  %v134_v31 = vor.u32 %v133_v21, %v130_v16  ;;  %v176_v32 = vrot.slane %v174_v22, 7  ;;  %v439_v8 = vld [vmem:[%s750_s0 + $0x1c] sm:$0x1] }
  0x16   :  { %v90_v30 = vrot.slane %v89_v20, 4  ;;  %v169_v36 = vrot.slane %v540_v56, 4  ;;  %v203_v37 = vrot.slane %v201_v3, 4  ;;  %v46_v38 = vshrl.u32 %v528_v48, 16  ;;  %v444_v56 = vld [vmem:[%s750_s0 + $0x50] sm:$0xf] }
  0x17   :  { %v212_v35 = vmax.bf16 %v202_v12, %v188_v23  ;;  %v69_v39 = vmax.bf16 %v434_v19, %v62_v29  ;;  %v177_v41 = vor.u32 %v176_v32, %v173_v27  ;;  %v204_v42 = vrot.slane %v548_v59, 7  ;;  %v435_v12 = vld [vmem:[%s750_s0 + $0x38] sm:$0x3]  ;;  %v455_v19 = vld [vmem:[%s750_s0 + $0x40] sm:$0xc] }
  0x18   :  { %v95_v40 = vsel %vm512_vm3, %v90_v30, %v94_v25  ;;  %v135_v43 = vsel %vm534_vm7, %v126_v26, %v134_v31  ;;  %v48_v44 = vrot.slane %v46_v38, 4  ;;  %v96_v45 = vshrl.u32 %v436_v58, 16  ;;  %v637_v23 = vld [vmem:[%s750_s0 + $0x64] sm:$0xf] }
  0x19   :  { %216 = vst.msk [vmem:[%s751_s1] sm:$0xf] %vm215_vm9, %v212_v35  ;;  %v138_v46 = vshll.u32 %v109_v34, 16  ;;  %v105_v47 = vmax.bf16 %v95_v40, %v69_v39  ;;  %v17_v48 = vmax.bf16 %v429_v33, %v10_v28  ;;  %v136_v49 = vrot.slane %v134_v31, 4 }
  0x1a   :  { %v181_v50 = vshll.u32 %v439_v8, 16  ;;  %v178_v52 = vsel %vm534_vm7, %v169_v36, %v177_v41  ;;  %v49_v53 = vor.u32 %v48_v44, %v44_v7  ;;  %v98_v54 = vrot.slane %v96_v45, 4 }
  0x1b   :  { %v140_v55 = vrot.slane %v138_v46, 7  ;;  %v146_v57 = vmax.bf16 %v135_v43, %v105_v47  ;;  %v205_v59 = vsel %vm552_vm8, %v203_v37, %v204_v42  ;;  %v179_v58 = vrot.slane %v177_v41, 4 }
  0x1c   :  { %v50_v63 = vrot.slane %v49_v53, 4  ;;  %v99_v0 = vor.u32 %v98_v54, %v94_v25  ;;  %v183_v2 = vrot.slane %v181_v50, 7  ;;  %v206_v3 = vrot.slane %v204_v42, 4  ;;  %v445_v42 = vld [vmem:[%s750_s0 + $0x54] sm:$0xf] }
  0x1d   :  { %v189_v5 = vmax.bf16 %v178_v52, %v146_v57  ;;  %v141_v7 = vsel %vm534_vm7, %v136_v49, %v140_v55  ;;  %v207_v9 = vrot.slane %v109_v34, 7  ;;  %v228_v10 = vmax.bf16 %v444_v56, %v441_v60  ;;  %v458_v34 = vld [vmem:[%s750_s0 + $0x50] sm:$0xc]  ;;  %v461_v56 = vld [vmem:[%s750_s0 + $0x40] sm:$0x8] }
  0x1e   :  { %v56_v11 = vmax.bf16 %v50_v63, %v17_v48  ;;  %v100_v1 = vrot.slane %v99_v0, 4  ;;  %v233_v13 = vshrl.u32 %v441_v60, 16  ;;  %v236_v14 = vshll.u32 %v441_v60, 16  ;;  %v666_v0 = vld [vmem:[%s750_s0 + $0x48] sm:$0x7] }
  0x1f   :  { %v213_v15 = vmax.bf16 %v205_v59, %v189_v5  ;;  %v242_v16 = vshll.u32 %v613_v61, 16  ;;  %v246_v17 = vshrl.u32 %v613_v61, 16  ;;  %v283_v18 = vshrl.u32 %v618_v4, 16  ;;  %v451_v59 = vld [vmem:[%s750_s0 + $0x70] sm:$0xf] }
  0x20   :  { %v63_v20 = vmax.bf16 %v432_v6, %v56_v11  ;;  %v235_v21 = vrot.slane %v233_v13, 4  ;;  %v238_v22 = vrot.slane %v236_v14, 5  ;;  %v286_v25 = vshll.u32 %v618_v4, 16 }
  0x21   :  { %217 = vst.msk [vmem:[%s751_s1 + $0x4] sm:$0xf] %vm215_vm9, %v213_v15  ;;  %v184_v26 = vsel %vm534_vm7, %v179_v58, %v183_v2  ;;  %v208_v27 = vsel %vm552_vm8, %v206_v3, %v207_v9  ;;  %vm218_vm10 = vcmask 123904   ;;  %v244_v28 = vrot.slane %v242_v16, 5 }
  0x22   :  { %v285_v29 = vrot.slane %v283_v18, 4  ;;  %v70_v30 = vmax.bf16 %v435_v12, %v63_v20  ;;  %v239_v31 = vor.u32 %v238_v22, %v235_v21  ;;  %v288_v32 = vrot.slane %v286_v25, 5  ;;  %v454_v12 = vld [vmem:[%s750_s0 + $0x68] sm:$0x7] }
  0x23   :  { %v321_v33 = vshrl.u32 %v455_v19, 16  ;;  %v248_v35 = vrot.slane %v246_v17, 4  ;;  %v292_v36 = vshll.u32 %v637_v23, 16  ;;  %v324_v37 = vshll.u32 %v455_v19, 16 }
  0x24   :  { %v329_v38 = vrot.slane %v246_v17, 6  ;;  %v106_v8 = vmax.bf16 %v100_v1, %v70_v30  ;;  %v240_v39 = vrot.slane %v239_v31, 4  ;;  %v289_v40 = vor.u32 %v288_v32, %v285_v29  ;;  %v459_v30 = vld [vmem:[%s750_s0 + $0x58] sm:$0xf] }
  0x25   :  { %v323_v41 = vrot.slane %v321_v33, 6  ;;  %v326_v43 = vrot.slane %v324_v37, 7  ;;  %v330_v44 = vrot.slane %v242_v16, 7  ;;  %v359_v45 = vshrl.u32 %v458_v34, 16 }
  0x26   :  { %v362_v46 = vshll.u32 %v458_v34, 16  ;;  %v147_v47 = vmax.bf16 %v141_v7, %v106_v8  ;;  %v245_v48 = vsel %vm512_vm3, %v240_v39, %v244_v28  ;;  %v290_v49 = vrot.slane %v289_v40, 4  ;;  %v452_v8 = vld [vmem:[%s750_s0 + $0x74] sm:$0xf] }
  0x27   :  { %v368_v50 = vshrl.u32 %v445_v42, 16  ;;  %v249_v52 = vor.u32 %v248_v35, %v244_v28  ;;  %v264_v53 = vmax.bf16 %v245_v48, %v228_v10  ;;  %v327_v54 = vor.u32 %v326_v43, %v323_v41 }
  0x28   :  { %v361_v55 = vrot.slane %v359_v45, 6  ;;  %v190_v57 = vmax.bf16 %v184_v26, %v147_v47  ;;  %v294_v58 = vrot.slane %v292_v36, 5  ;;  %v331_v60 = vor.u32 %v330_v44, %v329_v38 }
  0x29   :  { %v364_v63 = vrot.slane %v362_v46, 7  ;;  %v271_v2 = vmax.bf16 %v618_v4, %v264_v53  ;;  %v328_v3 = vrot.slane %v327_v54, 4  ;;  %v370_v5 = vrot.slane %v368_v50, 6  ;;  %v678_v4 = vld [vmem:[%s750_s0 + $0x48] sm:$0xf] }
  0x2a   :  { %v371_v6 = vshll.u32 %v445_v42, 16  ;;  %v214_v7 = vmax.bf16 %v208_v27, %v190_v57  ;;  %v295_v9 = vsel %vm512_vm3, %v290_v49, %v294_v58  ;;  %v462_v11 = vrot.slane %v461_v56, 11 }
  0x2b   :  { %v365_v10 = vor.u32 %v364_v63, %v361_v55  ;;  %v278_v1 = vmax.bf16 %v451_v59, %v271_v2  ;;  %v250_v14 = vrot.slane %v249_v52, 4  ;;  %v252_v15 = vshll.u32 %v666_v0, 16  ;;  %v443_v59 = vld [vmem:[%s750_s0 + $0x48] sm:$0x3] }
  0x2c   :  { %v373_v13 = vrot.slane %v371_v6, 7  ;;  %219 = vst.msk [vmem:[%s751_s1 + $0x8] sm:$0x3] %vm218_vm10, %v214_v7  ;;  %v229_v16 = vmax.bf16 %v445_v42, %v613_v61  ;;  %v332_v17 = vsel %vm534_vm7, %v328_v3, %v331_v60  ;;  %v296_v19 = vshrl.u32 %v637_v23, 16 }
  0x2d   :  { %v366_v18 = vrot.slane %v365_v10, 4  ;;  %v314_v20 = vmax.bf16 %v295_v9, %v278_v1  ;;  %v405_v22 = vrot.slane %v613_v61, 7  ;;  %v254_v25 = vrot.slane %v252_v15, 5  ;;  %v460_v9 = vld [vmem:[%s750_s0 + $0x5c] sm:$0x1] }
  0x2e   :  { %v374_v21 = vor.u32 %v373_v13, %v370_v5  ;;  %v298_v26 = vrot.slane %v296_v19, 4  ;;  %v302_v27 = vshll.u32 %v454_v12, 16  ;;  %v335_v28 = vshrl.u32 %v678_v4, 16 }
  0x2f   :  { %v338_v29 = vshll.u32 %v678_v4, 16  ;;  %v352_v31 = vmax.bf16 %v332_v17, %v314_v20  ;;  %v406_v33 = vsel %vm552_vm8, %v462_v11, %v405_v22  ;;  %v255_v61 = vsel %vm512_vm3, %v250_v14, %v254_v25  ;;  %v450_v14 = vld [vmem:[%s750_s0 + $0x68] sm:$0x3] }
  0x30   :  { %v375_v32 = vsel %vm534_vm7, %v366_v18, %v374_v21  ;;  %v265_v34 = vmax.bf16 %v255_v61, %v229_v16  ;;  %v299_v35 = vor.u32 %v298_v26, %v294_v58  ;;  %v337_v36 = vrot.slane %v335_v28, 6  ;;  %v453_v16 = vld [vmem:[%s750_s0 + $0x78] sm:$0x3] }
  0x31   :  { %v340_v37 = vrot.slane %v338_v29, 7  ;;  %v395_v38 = vmax.bf16 %v375_v32, %v352_v31  ;;  %v333_v39 = vrot.slane %v331_v60, 4  ;;  %v378_v40 = vshrl.u32 %v459_v30, 16 }
  0x32   :  { %v381_v41 = vshll.u32 %v459_v30, 16  ;;  %v272_v42 = vmax.bf16 %v637_v23, %v265_v34  ;;  %v300_v43 = vrot.slane %v299_v35, 4  ;;  %v304_v44 = vrot.slane %v302_v27, 5 }
  0x33   :  { %v376_v45 = vrot.slane %v374_v21, 4  ;;  %v416_v46 = vmax.bf16 %v406_v33, %v395_v38  ;;  %v341_v47 = vor.u32 %v340_v37, %v337_v36  ;;  %v380_v48 = vrot.slane %v378_v40, 6 }
  0x34   :  { %v383_v49 = vrot.slane %v381_v41, 7  ;;  %v279_v50 = vmax.bf16 %v452_v8, %v272_v42  ;;  %v305_v52 = vsel %vm512_vm3, %v300_v43, %v304_v44  ;;  %v407_v53 = vrot.slane %v405_v22, 4 }
  0x35   :  { %463 = vst.msk [vmem:[%s751_s1 + $0xc] sm:$0xf] %vm215_vm9, %v416_v46  ;;  %v342_v23 = vsel %vm534_vm7, %v333_v39, %v341_v47  ;;  %v256_v55 = vshrl.u32 %v666_v0, 16  ;;  %v306_v56 = vshrl.u32 %v454_v12, 16  ;;  %v408_v60 = vrot.slane %v678_v4, 7 }
  0x36   :  { %v384_v54 = vor.u32 %v383_v49, %v380_v48  ;;  %v315_v57 = vmax.bf16 %v305_v52, %v279_v50  ;;  %v457_v0 = vld [vmem:[%s750_s0 + $0x4c] sm:$0x1]  ;;  %v230_v6 = vmax.bf16 %v446_v24, %v443_v59  ;;  %v388_v15 = vshll.u32 %v460_v9, 16 }
  0x37   :  { %v258_v63 = vrot.slane %v256_v55, 4  ;;  %v308_v2 = vrot.slane %v306_v56, 4  ;;  %v409_v5 = vsel %vm552_vm8, %v407_v53, %v408_v60  ;;  %v345_v11 = vshll.u32 %v457_v0, 16 }
  0x38   :  { %v385_v58 = vsel %vm534_vm7, %v376_v45, %v384_v54  ;;  %v353_v3 = vmax.bf16 %v342_v23, %v315_v57  ;;  %v343_v17 = vrot.slane %v341_v47, 4  ;;  %v386_v21 = vrot.slane %v384_v54, 4 }
  0x39   :  { %v259_v7 = vor.u32 %v258_v63, %v254_v25  ;;  %v309_v1 = vor.u32 %v308_v2, %v304_v44  ;;  %v347_v18 = vrot.slane %v345_v11, 7  ;;  %v390_v22 = vrot.slane %v388_v15, 7 }
  0x3a   :  { %v396_v10 = vmax.bf16 %v385_v58, %v353_v3  ;;  %v410_v27 = vrot.slane %v408_v60, 4  ;;  %v411_v28 = vrot.slane %v457_v0, 7 }
  0x3b   :  { %v260_v12 = vrot.slane %v259_v7, 4  ;;  %v310_v20 = vrot.slane %v309_v1, 4  ;;  %v348_v26 = vsel %vm534_vm7, %v343_v17, %v347_v18  ;;  %v391_v30 = vsel %vm534_vm7, %v386_v21, %v390_v22 }
  0x3c   :  { %v417_v13 = vmax.bf16 %v409_v5, %v396_v10  ;;  %v412_v32 = vsel %vm552_vm8, %v410_v27, %v411_v28 }
  0x3d   :  { %v266_v4 = vmax.bf16 %v260_v12, %v230_v6 }
  0x3e   :  { %464 = vst.msk [vmem:[%s751_s1 + $0x10] sm:$0xf] %vm215_vm9, %v417_v13 }
  0x3f   :  { %v273_v19 = vmax.bf16 %v450_v14, %v266_v4 }
  0x41   :  { %v280_v25 = vmax.bf16 %v453_v16, %v273_v19 }
  0x43   :  { %v316_v29 = vmax.bf16 %v310_v20, %v280_v25 }
  0x45   :  { %v354_v31 = vmax.bf16 %v348_v26, %v316_v29 }
  0x47   :  { %v397_v33 = vmax.bf16 %v391_v30, %v354_v31 }
  0x49   :  { %v418_v61 = vmax.bf16 %v412_v32, %v397_v33 }
  0x4b   :  { %465 = vst.msk [vmem:[%s751_s1 + $0x14] sm:$0x3] %vm218_vm10, %v418_v61 }

// kernel: a_call__.8
= control target key start
LH: loop header
LB: loop body
LE: loop exit
PB: predicated region body
PF: predicated region fallthrough
CT: control target
= control target key end

     0   :  { %vm273_vm0 = vsmask.f32 7424  ;;  %s4205_s7 = smov 3   ;;  %vm578_vm1 = vcmask 1046528   ;;  %s4206_s30 = smov 6   ;;  %vm892_vm3 = vcmask 1045504   ;;  %s7444_s0 = inlined_call_operand.vmem [shape: bf16[2,1,326,3], index: 0, kind: input, shape index: {}]   ;;  %s7445_s1 = inlined_call_operand.vmem [shape: bf16[27,128], index: 1, kind: input, shape index: {}]   ;;  %s7446_s2 = inlined_call_operand.vmem [shape: f32[1,128], index: 2, kind: input, shape index: {}]   ;;  %s7447_s3 = inlined_call_operand.vmem [shape: bf16[576,128], index: 3, kind: output, shape index: {}]  }
   0x1   :  { %v19_v0 = vld [vmem:[%s7444_s0 + $0x10] sm:$0xf]  ;;  %v20_v1 = vld [vmem:[%s7444_s0 + $0x14] sm:$0xf]  ;;  %v4245_v3 = vld [vmem:[%s7444_s0 + $0x18] sm:$0xff]   ;;  %s4207_s8 = smov 9  }
   0x2   :  { %v4240_v2 = vcombine.low %v19_v0, %v20_v1  ;;  %v15_v4 = vld [vmem:[%s7444_s0] sm:$0xf]  ;;  %v4253_v5 = vld [vmem:[%s7444_s0 + $0x4] sm:$0xf]  ;;  %v17_v6 = vld [vmem:[%s7444_s0 + $0x8] sm:$0xf] }
   0x3   :  { %v4261_v7 = vld [vmem:[%s7444_s0 + $0xc] sm:$0xf]  ;;  %v4266_v10 = vshll.u32 %v4245_v3, 16  ;;  %v4269_v11 = vcombine.low %v15_v4, %v4253_v5  ;;  %v4274_v12 = vld [vmem:[%s7444_s0 + $0x20] sm:$0xff]   ;;  %v4280_v14 = vshrl.u32 %v4245_v3, 16  ;;  %v4303_v25 = vld [vmem:[%s7444_s0 + $0x30] sm:$0xff]  }
   0x4   :  { %v7448_v8 = vshll.u32 %v4240_v2, 16  ;;  %v7449_v9 = vshrl.u32 %v4240_v2, 16  ;;  %v4277_v13 = vcombine.low %v17_v6, %v4261_v7  ;;  %v4285_v15 = vld [vmem:[%s7444_s0 + $0x28] sm:$0xff]   ;;  %v4294_v21 = vshll.u32 %v4274_v12, 16  ;;  %v4314_v28 = vld [vmem:[%s7444_s0 + $0x38] sm:$0xff]   ;;  %v4330_v39 = vld [vmem:[%s7444_s0 + $0x40] sm:$0xff]  }
   0x5   :  { %7586 = vst [vmem:[#allocation2_spill] sm:$0xff] %v4266_v10  ;;  %7587 = vst [vmem:[#allocation3_spill] sm:$0xff] %v4269_v11  ;;  %v300_v17 = vrot.slane %v4266_v10, 1  ;;  %v275_v18 = vshrl.u32 %v4269_v11, 16  ;;  %v277_v19 = vshll.u32 %v4269_v11, 16  ;;  %v4306_v26 = vshll.u32 %v4285_v15, 16 }
   0x6   :  { %v292_v16 = vrot.slane %v7448_v8, 1  ;;  %v282_v20 = vshll.u32 %v4277_v13, 16  ;;  %7588 = vst [vmem:[#allocation4_spill] sm:$0xff] %v4294_v21  ;;  %v286_v22 = vshrl.u32 %v4277_v13, 16  ;;  %v4309_v27 = vshrl.u32 %v4285_v15, 16  ;;  %v4343_v44 = vld [vmem:[%s7444_s0 + $0x48] sm:$0xff]  }
   0x7   :  { %v304_v24 = vor.u32 %v4280_v14, %v300_v17  ;;  %7589 = vst [vmem:[#allocation5_spill] sm:$0xff] %v4306_v26  ;;  %v279_v29 = vrot.slane %v277_v19, 1  ;;  %v308_v31 = vrot.slane %v4294_v21, 1  ;;  %v4318_v32 = vshrl.u32 %v4274_v12, 16  ;;  %v4352_v47 = vld [vmem:[%s7444_s0 + $0x50] sm:$0xff]   ;;  %v4364_v52 = vld [vmem:[%s7444_s0 + $0x58] sm:$0xff]  }
   0x8   :  { %v296_v23 = vor.u32 %v7449_v9, %v292_v16  ;;  %7590 = vst [vmem:[#allocation6_spill] sm:$0xff] %v4309_v27  ;;  %v284_v30 = vrot.slane %v282_v20, 1  ;;  %v316_v34 = vrot.slane %v4306_v26, 1  ;;  %v4323_v35 = vshll.u32 %v4303_v25, 16  ;;  %v4383_v60 = vld [vmem:[%s7444_s0 + $0x60] sm:$0xff]   ;;  %v4391_v62 = vld [vmem:[%s7444_s0 + $0x68] sm:$0xff]  }
   0x9   :  { %7591 = vst [vmem:[#allocation7_spill] sm:$0xff] %v4318_v32  ;;  %v280_v36 = vor.u32 %v279_v29, %v275_v18  ;;  %v309_v37 = vsel %vm273_vm0, %v304_v24, %v308_v31  ;;  %v4335_v42 = vshll.u32 %v4314_v28, 16  ;;  %v4338_v43 = vshrl.u32 %v4314_v28, 16  ;;  %v4401_v1 = vld [vmem:[%s7444_s0 + $0x70] sm:$0xff]   ;;  %v4415_v18 = vld [vmem:[%s7444_s0 + $0x78] sm:$0xff]   ;;  %s4208_s15 = smov 12  }
   0xa   :  { %v301_v33 = vsel %vm273_vm0, %v296_v23, %v300_v17  ;;  %7592 = vst [vmem:[#allocation8_spill] sm:$0xff] %v4323_v35  ;;  %v288_v38 = vor.u32 %v286_v22, %v284_v30  ;;  %v320_v40 = vor.u32 %v4309_v27, %v316_v34  ;;  %v324_v41 = vrot.slane %v4323_v35, 1  ;;  %v3451_v8 = vld [vmem:[%s7444_s0 + $0xb4] sm:$0xf]  ;;  %v3447_v9 = vld [vmem:[%s7444_s0 + $0xa4] sm:$0xf] }
   0xb   :  { %1288 = vrot.lane.b32.xlu1 %v301_v33, %s4205_s7  ;;  %7593 = vst [vmem:[#allocation9_spill] sm:$0xff] %v4335_v42  ;;  %7594 = vst [vmem:[#allocation10_spill] sm:$0xff] %v4338_v43  ;;  %v285_v45 = vsel %vm273_vm0, %v280_v36, %v284_v30  ;;  %v4347_v46 = vshll.u32 %v4330_v39, 16  ;;  %v312_v49 = vor.u32 %v4318_v32, %v308_v31  ;;  %v332_v50 = vrot.slane %v4335_v42, 1  ;;  %v4437_v33 = vld [vmem:[%s7444_s0 + $0x80] sm:$0xff]   ;;  %s4209_s26 = smov 15  }
   0xc   :  { %1284 = vrot.lane.b32.xlu0 %v285_v45, %s4205_s7  ;;  %v293_v48 = vsel %vm273_vm0, %v288_v38, %v292_v16  ;;  %v4359_v51 = vshll.u32 %v4343_v44, 16  ;;  %v4369_v54 = vshrl.u32 %v4303_v25, 16  ;;  %v4372_v55 = vshrl.u32 %v4343_v44, 16  ;;  %v4448_v38 = vld [vmem:[%s7444_s0 + $0x88] sm:$0xff]   ;;  %s4213_s18 = smov 24  }
   0xd   :  { %7595 = vst [vmem:[#allocation11_spill] sm:$0xff] %v4347_v46  ;;  %v340_v53 = vrot.slane %v4347_v46, 1  ;;  %v4375_v56 = vshll.u32 %v4352_v47, 16  ;;  %v325_v57 = vsel %vm273_vm0, %v320_v40, %v324_v41  ;;  %v336_v58 = vor.u32 %v4338_v43, %v332_v50  ;;  %v4578_v46 = vld [vmem:[%s7444_s0 + $0xd4] sm:$0xff]  }
   0xe   :  { %7596 = vst [vmem:[#allocation12_spill] sm:$0xff] %v4359_v51  ;;  %7597 = vst [vmem:[#allocation13_spill] sm:$0xff] %v4369_v54  ;;  %v348_v59 = vrot.slane %v4359_v51, 1  ;;  %v4386_v61 = vshll.u32 %v4364_v52, 16  ;;  %v317_v63 = vsel %vm273_vm0, %v312_v49, %v316_v34  ;;  %v4396_v0 = vshrl.u32 %v4330_v39, 16 }
   0xf   :  { %1290 = vrot.lane.b32.xlu1 %v309_v37, %s4205_s7  ;;  %7598 = vst [vmem:[#allocation14_spill] sm:$0xff] %v4372_v55  ;;  %7599 = vst [vmem:[#allocation15_spill] sm:$0xff] %v4375_v56  ;;  %v328_v4 = vor.u32 %v4369_v54, %v324_v41  ;;  %v356_v6 = vrot.slane %v4375_v56, 1  ;;  %v4407_v16 = vshrl.u32 %v4364_v52, 16  ;;  %v4410_v17 = vshll.u32 %v4391_v62, 16 }
  0x10   :  { %7600 = vst [vmem:[#allocation16_spill] sm:$0xff] %v4386_v61  ;;  %1286 = vrot.lane.b32.xlu0 %v293_v48, %s4205_s7  ;;  %7601 = vst [vmem:[#allocation17_spill] sm:$0xff] %v4396_v0  ;;  %v341_v19 = vsel %vm273_vm0, %v336_v58, %v340_v53  ;;  %v352_v20 = vor.u32 %v4372_v55, %v348_v59  ;;  %v364_v22 = vrot.slane %v4386_v61, 1  ;;  %v4421_v23 = vshll.u32 %v4383_v60, 16 }
  0x11   :  { %7602 = vst [vmem:[#allocation18_spill] sm:$0xff] %v4407_v16  ;;  %7603 = vst [vmem:[#allocation19_spill] sm:$0xff] %v4410_v17  ;;  %v4424_v24 = vshll.u32 %v4401_v1, 16  ;;  %v4428_v29 = vshrl.u32 %v4352_v47, 16  ;;  %v380_v30 = vrot.slane %v4410_v17, 1  ;;  %v4432_v31 = vshrl.u32 %v4391_v62, 16 }
  0x12   :  { %7604 = vst [vmem:[#allocation20_spill] sm:$0xff] %v4421_v23  ;;  %v333_v34 = vsel %vm273_vm0, %v328_v4, %v332_v50  ;;  %v344_v36 = vor.u32 %v4396_v0, %v340_v53  ;;  %v4443_v37 = vshll.u32 %v4415_v18, 16  ;;  %v357_v40 = vsel %vm273_vm0, %v352_v20, %v356_v6  ;;  %v4460_v50 = vld [vmem:[%s7444_s0 + $0x90] ss:$0 sps:$4 sm:$0x11]  }
  0x13   :  { %1294 = vrot.lane.b32.xlu1 %v325_v57, %s4205_s7  ;;  %7605 = vst [vmem:[#allocation21_spill] sm:$0xff] %v4424_v24  ;;  %7606 = vst [vmem:[#allocation22_spill] sm:$0xff] %v4428_v29  ;;  %v368_v41 = vor.u32 %v4407_v16, %v364_v22  ;;  %v372_v45 = vrot.slane %v4421_v23, 1  ;;  %v388_v48 = vrot.slane %v4424_v24, 1  ;;  %v4455_v49 = vshrl.u32 %v4383_v60, 16 }
  0x14   :  { %1292 = vrot.lane.b32.xlu0 %v317_v63, %s4205_s7  ;;  %7607 = vst [vmem:[#allocation23_spill] sm:$0xff] %v4432_v31  ;;  %7608 = vst [vmem:[#allocation24_spill] sm:$0xff] %v4443_v37  ;;  %v360_v53 = vor.u32 %v4428_v29, %v356_v6  ;;  %v4465_v57 = vshrl.u32 %v4415_v18, 16  ;;  %v4468_v58 = vshll.u32 %v4437_v33, 16  ;;  %v3449_v63 = vld [vmem:[%s7444_s0 + $0xac] sm:$0xf]  ;;  %v384_v6 = vor.u32 %v4432_v31, %v380_v30 }
  0x15   :  { %7609 = vst [vmem:[#allocation25_spill] sm:$0xff] %v4455_v49  ;;  %v4476_v4 = vld [vmem:[%s7444_s0 + $0xb0] sm:$0xf]  ;;  %v396_v20 = vrot.slane %v4443_v37, 1  ;;  %v373_v24 = vsel %vm273_vm0, %v368_v41, %v372_v45  ;;  %v376_v17 = vor.u32 %v4455_v49, %v372_v45  ;;  %v4515_v31 = vld [vmem:[%s7444_s0 + $0xbc] sm:$0xff]   ;;  %vm1206_vm5 = vcmask 1044480  }
  0x16   :  { %7610 = vst [vmem:[#allocation26_spill] sm:$0xff] %v4465_v57  ;;  %7611 = vst [vmem:[#allocation27_spill] sm:$0xff] %v4468_v58  ;;  %v365_v37 = vsel %vm273_vm0, %v360_v53, %v364_v22  ;;  %v404_v41 = vrot.slane %v4468_v58, 1  ;;  %v389_v23 = vsel %vm273_vm0, %v384_v6, %v388_v48  ;;  %v418_v22 = vshll.u32 %v4460_v50, 16 }
  0x17   :  { %1298 = vrot.lane.b32.xlu1 %v341_v19, %s4205_s7  ;;  %v349_v19 = vsel %vm273_vm0, %v344_v36, %v348_v59  ;;  %v4498_v59 = vld [vmem:[%s7444_s0 + $0xa8] sm:$0xf]  ;;  %v4503_v36 = vld [vmem:[%s7444_s0 + $0xb8] sm:$0xf]  ;;  %v400_v53 = vor.u32 %v4465_v57, %v396_v20  ;;  %v381_v6 = vsel %vm273_vm0, %v376_v17, %v380_v30  ;;  %v4543_v57 = vshll.u32 %v4515_v31, 16  ;;  %v4552_v17 = vld [vmem:[%s7444_s0 + $0xcc] sm:$0xff]  }
  0x18   :  { %1296 = vrot.lane.b32.xlu0 %v333_v34, %s4205_s7  ;;  %v4483_v34 = vshll.u32 %v4448_v38, 16  ;;  %7613 = vst [vmem:[#allocation29_spill] sm:$0xff] %v4503_v36  ;;  %v4524_v45 = vcombine.low %v3447_v9, %v4498_v59  ;;  %v4529_v49 = vcombine.low %v3451_v8, %v4503_v36  ;;  %v4540_v9 = vld [vmem:[%s7444_s0 + $0xc4] sm:$0xff]   ;;  %v4570_v29 = vshll.u32 %v4552_v17, 16 }
  0x19   :  { %7619 = vst [vmem:[#allocation35_spill] sm:$0xff] %v4543_v57  ;;  %v405_v30 = vsel %vm273_vm0, %v400_v53, %v404_v41  ;;  %vm703_vm2 = vsmask.f32 6400  ;;  %vm1017_vm4 = vsmask.f32 5376  ;;  %vm1860_vm6 = vcmask 23552  }
  0x1a   :  { %7612 = vst [vmem:[#allocation28_spill] sm:$0xff] %v4483_v34  ;;  %7616 = vst [vmem:[#allocation32_spill] sm:$0xff] %v4524_v45  ;;  %v412_v58 = vrot.slane %v4483_v34, 1  ;;  %v420_v34 = vrot.slane %v418_v22, 1  ;;  %v428_v11 = vshll.u32 %v4524_v45, 16  ;;  %v4561_v22 = vshrl.u32 %v4515_v31, 16 }
  0x1b   :  { %1302 = vrot.lane.b32.xlu1 %v357_v40, %s4205_s7  ;;  %v4493_v40 = vcombine.low %v3449_v63, %v4476_v4  ;;  %v4510_v63 = vshrl.u32 %v4401_v1, 16  ;;  %7617 = vst [vmem:[#allocation33_spill] sm:$0xff] %v4529_v49  ;;  %7622 = vst [vmem:[#allocation38_spill] sm:$0xff] %v4570_v29  ;;  %v7623_v51 = vshll.u32 %v4529_v49, 16  ;;  %vm1933_vm7 = vcmask 48128  }
  0x1c   :  { %1300 = vrot.lane.b32.xlu0 %v349_v19, %s4205_s7  ;;  %v4520_v19 = vshrl.u32 %v4448_v38, 16  ;;  %7620 = vst [vmem:[#allocation36_spill] sm:$0xff] %v4561_v22  ;;  %vm2006_vm8 = vcmask 72704   ;;  %vm2079_vm9 = vcmask 97280   ;;  %vm2152_vm10 = vcmask 121856  }
  0x1d   :  { %7614 = vst [vmem:[#allocation30_spill] sm:$0xff] %v4510_v63  ;;  %v433_v61 = vshll.u32 %v4493_v40, 16  ;;  %v392_v8 = vor.u32 %v4510_v63, %v388_v48  ;;  %v437_v16 = vshrl.u32 %v4493_v40, 16  ;;  %v451_v48 = vrot.slane %v4543_v57, 1 }
  0x1e   :  { %7615 = vst [vmem:[#allocation31_spill] sm:$0xff] %v4520_v19  ;;  %v4564_v63 = vshll.u32 %v4540_v9, 16  ;;  %v443_v55 = vrot.slane %v7623_v51, 1  ;;  %vm2225_vm11 = vcmask 146432   ;;  %vm2298_vm12 = vcmask 171008  }
  0x1f   :  { %1306 = vrot.lane.b32.xlu1 %v373_v24, %s4205_s7  ;;  %v4533_v24 = vshrl.u32 %v4437_v33, 16  ;;  %v435_v56 = vrot.slane %v433_v61, 1  ;;  %v397_v53 = vsel %vm273_vm0, %v392_v8, %v396_v20  ;;  %v4583_v20 = vld [vmem:[%s7444_s0 + $0xdc] sm:$0xff]   ;;  %v455_v8 = vor.u32 %v4561_v22, %v451_v48  ;;  %v4715_v22 = vld [vmem:[%s7444_s0 + $0x124] sm:$0xff]  }
  0x20   :  { %1304 = vrot.lane.b32.xlu0 %v365_v37, %s4205_s7  ;;  %v416_v37 = vor.u32 %v4520_v19, %v412_v58  ;;  %7621 = vst [vmem:[#allocation37_spill] sm:$0xff] %v4564_v63  ;;  %v430_v19 = vrot.slane %v428_v11, 1  ;;  %v4602_v11 = vshll.u32 %v4578_v46, 16  ;;  %v4743_v54 = vshll.u32 %v4715_v22, 16 }
  0x21   :  { %7618 = vst [vmem:[#allocation34_spill] sm:$0xff] %v4533_v24  ;;  %v408_v61 = vor.u32 %v4533_v24, %v404_v41  ;;  %v4767_v32 = vshrl.u32 %v4715_v22, 16  ;;  %vm2371_vm13 = vcmask 195584   ;;  %vm2466_vm14 = vcmask 220160  }
  0x22   :  { %7625 = vst [vmem:[#allocation40_spill] sm:$0xff] %v4602_v11  ;;  %7646 = vst [vmem:[#allocation60_spill] sm:$0xff] %v4743_v54 }
  0x23   :  { %1310 = vrot.lane.b32.xlu1 %v389_v23, %s4205_s7  ;;  %v426_v23 = vshrl.u32 %v4524_v45, 16  ;;  %v439_v45 = vor.u32 %v437_v16, %v435_v56  ;;  %v4589_v16 = vshrl.u32 %v4552_v17, 16  ;;  %v413_v51 = vsel %vm273_vm0, %v408_v61, %v412_v58  ;;  %7650 = vst [vmem:[#allocation64_spill] sm:$0xff] %v4767_v32 }
  0x24   :  { %1308 = vrot.lane.b32.xlu0 %v381_v6, %s4205_s7  ;;  %v421_v6 = vsel %vm273_vm0, %v416_v37, %v420_v34  ;;  %v459_v34 = vrot.slane %v4564_v63, 1  ;;  %v4598_v37 = vld [vmem:[%s7444_s0 + $0xec] sm:$0xff]   ;;  %v4610_v58 = vshll.u32 %v4583_v20, 16  ;;  %v4616_v61 = vshrl.u32 %v4540_v9, 16 }
  0x25   :  { %7624 = vst [vmem:[#allocation39_spill] sm:$0xff] %v4589_v16  ;;  %v431_v41 = vor.u32 %v430_v19, %v426_v23  ;;  %v7627_v19 = vshrl.u32 %v4529_v49, 16 }
  0x26   :  { %7626 = vst [vmem:[#allocation41_spill] sm:$0xff] %v4610_v58  ;;  %7628 = vst [vmem:[#allocation42_spill] sm:$0xff] %v4616_v61  ;;  %v460_v0 = vsel %vm273_vm0, %v455_v8, %v459_v34  ;;  %v483_v43 = vrot.slane %v4610_v58, 1  ;;  %v4646_v8 = vshrl.u32 %v4578_v46, 16 }
  0x27   :  { %1314 = vrot.lane.b32.xlu1 %v405_v30, %s4205_s7  ;;  %v467_v30 = vrot.slane %v4570_v29, 1  ;;  %v447_v23 = vor.u32 %v7627_v19, %v443_v55  ;;  %v436_v24 = vsel %vm273_vm0, %v431_v41, %v435_v56  ;;  %v475_v19 = vrot.slane %v4602_v11, 1 }
  0x28   :  { %1312 = vrot.lane.b32.xlu0 %v397_v53, %s4205_s7  ;;  %v444_v53 = vsel %vm273_vm0, %v439_v45, %v443_v55  ;;  %v4621_v45 = vld [vmem:[%s7444_s0 + $0xf4] sm:$0xff]   ;;  %v4633_v55 = vld [vmem:[%s7444_s0 + $0xfc] sm:$0xff]   ;;  %v463_v41 = vor.u32 %v4616_v61, %v459_v34  ;;  %7632 = vst [vmem:[#allocation46_spill] sm:$0xff] %v4646_v8 }
  0x29   :  { %v471_v42 = vor.u32 %v4589_v16, %v467_v30  ;;  %v4649_v29 = vshll.u32 %v4621_v45, 16  ;;  %v452_v58 = vsel %vm273_vm0, %v447_v23, %v451_v48  ;;  %v4655_v16 = vshrl.u32 %v4598_v37, 16  ;;  %v4671_v48 = vld [vmem:[%s7444_s0 + $0x10c] sm:$0xff]  }
  0x2a   :  { %v4663_v34 = vshll.u32 %v4633_v55, 16  ;;  %v468_v23 = vsel %vm273_vm0, %v463_v41, %v467_v30  ;;  %v4692_v30 = vld [vmem:[%s7444_s0 + $0x11c] sm:$0xff]   ;;  %v4701_v41 = vshll.u32 %v4671_v48, 16 }
  0x2b   :  { %1318 = vrot.lane.b32.xlu1 %v421_v6, %s4205_s7  ;;  %v4607_v6 = vld [vmem:[%s7444_s0 + $0xe4] sm:$0xff]   ;;  %7633 = vst [vmem:[#allocation47_spill] sm:$0xff] %v4649_v29  ;;  %7634 = vst [vmem:[#allocation48_spill] sm:$0xff] %v4655_v16  ;;  %v476_v63 = vsel %vm273_vm0, %v471_v42, %v475_v19  ;;  %v507_v36 = vrot.slane %v4649_v29, 1  ;;  %v4740_v35 = vshrl.u32 %v4692_v30, 16 }
  0x2c   :  { %1316 = vrot.lane.b32.xlu0 %v413_v51, %s4205_s7  ;;  %v4628_v51 = vshll.u32 %v4598_v37, 16  ;;  %v4641_v56 = vshll.u32 %v4607_v6, 16  ;;  %7635 = vst [vmem:[#allocation49_spill] sm:$0xff] %v4663_v34  ;;  %v4678_v57 = vshrl.u32 %v4607_v6, 16  ;;  %7639 = vst [vmem:[#allocation53_spill] sm:$0xff] %v4701_v41 }
  0x2d   :  { %7645 = vst [vmem:[#allocation59_spill] sm:$0xff] %v4740_v35 }
  0x2e   :  { %7629 = vst [vmem:[#allocation43_spill] sm:$0xff] %v4628_v51  ;;  %7631 = vst [vmem:[#allocation45_spill] sm:$0xff] %v4641_v56  ;;  %v499_v11 = vrot.slane %v4628_v51, 1  ;;  %v479_v51 = vor.u32 %v4646_v8, %v475_v19  ;;  %v4710_v8 = vshrl.u32 %v4621_v45, 16 }
  0x2f   :  { %1322 = vrot.lane.b32.xlu1 %v444_v53, %s4205_s7  ;;  %v4638_v53 = vshrl.u32 %v4583_v20, 16  ;;  %7636 = vst [vmem:[#allocation50_spill] sm:$0xff] %v4678_v57 }
  0x30   :  { %1320 = vrot.lane.b32.xlu0 %v436_v24, %s4205_s7  ;;  %v4660_v24 = vld [vmem:[%s7444_s0 + $0x104] sm:$0xff]   ;;  %v503_v42 = vor.u32 %v4655_v16, %v499_v11  ;;  %7640 = vst [vmem:[#allocation54_spill] sm:$0xff] %v4710_v8 }
  0x31   :  { %7630 = vst [vmem:[#allocation44_spill] sm:$0xff] %v4638_v53  ;;  %v487_v61 = vor.u32 %v4638_v53, %v483_v43  ;;  %v4684_v53 = vshrl.u32 %v4633_v55, 16 }
  0x32   :  { %v508_v16 = vsel %vm273_vm0, %v503_v42, %v507_v36 }
  0x33   :  { %1326 = vrot.lane.b32.xlu1 %v460_v0, %s4205_s7  ;;  %v491_v0 = vrot.slane %v4641_v56, 1  ;;  %v515_v56 = vrot.slane %v4663_v34, 1  ;;  %7637 = vst [vmem:[#allocation51_spill] sm:$0xff] %v4684_v53  ;;  %v484_v34 = vsel %vm273_vm0, %v479_v51, %v483_v43  ;;  %v531_v51 = vrot.slane %v4701_v41, 1 }
  0x34   :  { %1324 = vrot.lane.b32.xlu0 %v452_v58, %s4205_s7  ;;  %v4687_v58 = vshll.u32 %v4660_v24, 16  ;;  %v511_v41 = vor.u32 %v4710_v8, %v507_v36 }
  0x35   :  { %v492_v19 = vsel %vm273_vm0, %v487_v61, %v491_v0  ;;  %v495_v29 = vor.u32 %v4678_v57, %v491_v0  ;;  %v519_v43 = vor.u32 %v4684_v53, %v515_v56  ;;  %v4723_v0 = vshrl.u32 %v4671_v48, 16 }
  0x36   :  { %7638 = vst [vmem:[#allocation52_spill] sm:$0xff] %v4687_v58  ;;  %v523_v61 = vrot.slane %v4687_v58, 1  ;;  %v4734_v57 = vshrl.u32 %v4660_v24, 16 }
  0x37   :  { %1330 = vrot.lane.b32.xlu1 %v476_v63, %s4205_s7  ;;  %v4698_v63 = vld [vmem:[%s7444_s0 + $0x114] sm:$0xff]   ;;  %7642 = vst [vmem:[#allocation56_spill] sm:$0xff] %v4723_v0  ;;  %v500_v58 = vsel %vm273_vm0, %v495_v29, %v499_v11 }
  0x38   :  { %1328 = vrot.lane.b32.xlu0 %v468_v23, %s4205_s7  ;;  %v4718_v23 = vshll.u32 %v4692_v30, 16  ;;  %v4726_v42 = vshll.u32 %v4698_v63, 16  ;;  %7644 = vst [vmem:[#allocation58_spill] sm:$0xff] %v4734_v57  ;;  %v524_v26 = vsel %vm273_vm0, %v519_v43, %v523_v61  ;;  %v4119_v11 = vld [vmem:[%s7444_s0 + $0x134] ss:$0 sps:$4 sm:$0x11]   ;;  %v527_v43 = vor.u32 %v4734_v57, %v523_v61 }
  0x39   :  { %v4755_v36 = vshrl.u32 %v4698_v63, 16  ;;  %v3525_v61 = vld [vmem:[%s7444_s0 + $0xac] sm:$0xe] }
  0x3a   :  { %7641 = vst [vmem:[#allocation55_spill] sm:$0xff] %v4718_v23  ;;  %7643 = vst [vmem:[#allocation57_spill] sm:$0xff] %v4726_v42  ;;  %v547_v53 = vrot.slane %v4718_v23, 1  ;;  %v539_v29 = vrot.slane %v4726_v42, 1  ;;  %v516_v23 = vsel %vm273_vm0, %v511_v41, %v515_v56  ;;  %v555_v42 = vrot.slane %v4743_v54, 1  ;;  %v4775_v56 = vld [vmem:[%s7444_s0 + $0x90] sm:$0xff]  }
  0x3b   :  { %1334 = vrot.lane.b32.xlu1 %v492_v19, %s4205_s7  ;;  %v4118_v19 = vld [vmem:[%s7444_s0 + $0x12c] sm:$0xff]   ;;  %7648 = vst [vmem:[#allocation62_spill] sm:$0xff] %v4755_v36 }
  0x3c   :  { %1332 = vrot.lane.b32.xlu0 %v484_v34, %s4205_s7  ;;  %v535_v34 = vor.u32 %v4723_v0, %v531_v51  ;;  %v551_v0 = vor.u32 %v4740_v35, %v547_v53  ;;  %v4764_v21 = vshrl.u32 %v4118_v19, 16  ;;  %v543_v41 = vor.u32 %v4755_v36, %v539_v29 }
  0x3d   :  { %v4785_v54 = vrot.slane %v4118_v19, 1  ;;  %v559_v10 = vor.u32 %v4767_v32, %v555_v42 }
  0x3e   :  { %v540_v8 = vsel %vm273_vm0, %v535_v34, %v539_v29  ;;  %7649 = vst [vmem:[#allocation63_spill] sm:$0xff] %v4764_v21  ;;  %v532_v34 = vsel %vm273_vm0, %v527_v43, %v531_v51  ;;  %v654_v29 = vrot.slane %v4119_v11, 1  ;;  %v7568_v51 = vrot.slane %v4775_v56, 1 }
  0x3f   :  { %1338 = vrot.lane.b32.xlu1 %v508_v16, %s4205_s7  ;;  %v4751_v16 = vshll.u32 %v4118_v19, 16  ;;  %v548_v19 = vsel %vm273_vm0, %v543_v41, %v547_v53  ;;  %v582_v43 = vrot.slane %v4240_v2, 1  ;;  %v580_v41 = vrot.slane %v4277_v13, 1 }
  0x40   :  { %1336 = vrot.lane.b32.xlu0 %v500_v58, %s4205_s7  ;;  %v569_v58 = vshll.u32 %v4119_v11, 16  ;;  %v4805_v11 = vsel %vm578_vm1, %v4785_v54, %v654_v29 }
  0x41   :  { %7647 = vst [vmem:[#allocation61_spill] sm:$0xff] %v4751_v16  ;;  %v563_v27 = vrot.slane %v4751_v16, 1  ;;  %v556_v16 = vsel %vm273_vm0, %v551_v0, %v555_v42  ;;  %v4798_v0 = vcombine.low %v3525_v61, %v4476_v4  ;;  %v4810_v42 = vrot.slane %v4529_v49, 1 }
  0x42   :  { %v571_v57 = vrot.slane %v569_v58, 1 }
  0x43   :  { %1342 = vrot.lane.b32.xlu1 %v524_v26, %s4205_s7  ;;  %v656_v26 = vld [vmem:[%s7444_s0 + $0x8] sm:$0xe]  ;;  %v567_v35 = vor.u32 %v4764_v21, %v563_v27  ;;  %v692_v53 = vrot.slane %v4798_v0, 1 }
  0x44   :  { %1340 = vrot.lane.b32.xlu0 %v516_v23, %s4205_s7  ;;  %v573_v23 = vld [vmem:[%s7444_s0] sm:$0xe]  ;;  %v3529_v36 = vcombine.low %v656_v26, %v4261_v7 }
  0x45   :  { %v572_v26 = vsel %vm273_vm0, %v567_v35, %v571_v57  ;;  %v584_v35 = vrot.slane %v4245_v3, 1  ;;  %v586_v57 = vrot.slane %v4274_v12, 1 }
  0x46   :  { %v675_v7 = vrot.slane %v3529_v36, 1 }
  0x47   :  { %1346 = vrot.lane.b32.xlu1 %v540_v8, %s4205_s7  ;;  %v4794_v8 = vrot.slane %v4448_v38, 1  ;;  %v3523_v38 = vcombine.low %v573_v23, %v4253_v5  ;;  %v4826_v5 = vsel %vm578_vm1, %v692_v53, %v4810_v42  ;;  %v583_v23 = vsel %vm578_vm1, %v580_v41, %v582_v43 }
  0x48   :  { %1344 = vrot.lane.b32.xlu0 %v532_v34, %s4205_s7  ;;  %v4822_v61 = vsel %vm578_vm1, %v675_v7, %v582_v43  ;;  %v588_v7 = vrot.slane %v4285_v15, 1  ;;  %v4846_v3 = vsel %vm578_vm1, %v582_v43, %v584_v35  ;;  %v596_v43 = vrot.slane %v4343_v44, 1 }
  0x49   :  { %v4816_v58 = vsel %vm578_vm1, %v4794_v8, %v7568_v51  ;;  %v579_v34 = vrot.slane %v3523_v38, 1  ;;  %v594_v38 = vrot.slane %v4330_v39, 1  ;;  %v598_v53 = vrot.slane %v4352_v47, 1 }
  0x4a   :  { %v4858_v15 = vsel %vm578_vm1, %v586_v57, %v588_v7  ;;  %v7651_v39 = vshrl.u32 %v4240_v2, 16  ;;  %v705_v47 = vshrl.u32 %v3529_v36, 16 }
  0x4b   :  { %1350 = vrot.lane.b32.xlu1 %v556_v16, %s4205_s7  ;;  %v564_v16 = vsel %vm273_vm0, %v559_v10, %v563_v27  ;;  %v581_v29 = vsel %vm578_vm1, %v579_v34, %v580_v41  ;;  %v590_v10 = vrot.slane %v4303_v25, 1  ;;  %v592_v27 = vrot.slane %v4314_v28, 1  ;;  %v4868_v28 = vld [vmem:[%s7444_s0 + $0x134] sm:$0xff]  }
  0x4c   :  { %1348 = vrot.lane.b32.xlu0 %v548_v19, %s4205_s7  ;;  %v4838_v19 = vsel %vm578_vm1, %v584_v35, %v586_v57  ;;  %v7567_v44 = vrot.slane %v4868_v28, 1  ;;  %v4881_v34 = vsel %vm578_vm1, %v596_v43, %v598_v53  ;;  %v602_v35 = vrot.slane %v4383_v60, 1 }
  0x4d   :  { %v4849_v12 = vsel %vm578_vm1, %v588_v7, %v590_v10  ;;  %v4861_v25 = vsel %vm578_vm1, %v592_v27, %v594_v38  ;;  %v4877_v41 = vsel %vm578_vm1, %v590_v10, %v592_v27  ;;  %v604_v60 = vrot.slane %v4391_v62, 1 }
  0x4e   :  { %v4889_v57 = vsel %vm578_vm1, %v4785_v54, %v7567_v44 }
  0x4f   :  { %1354 = vrot.lane.b32.xlu1 %v572_v26, %s4205_s7  ;;  %v712_v26 = vrot.slane %v7651_v39, 1 }
  0x50   :  { %1352 = vrot.lane.b32.xlu0 %v564_v16, %s4205_s7  ;;  %v708_v16 = vshll.u32 %v3529_v36, 16  ;;  %v707_v36 = vrot.slane %v705_v47, 1  ;;  %s4210_s7 = smov 18  }
  0x52   :  { %v710_v10 = vrot.slane %v708_v16, 2 }
  0x53   :  { %1358 = vrot.lane.b32.xlu1 %v583_v23, %s4206_s30  ;;  %v600_v23 = vrot.slane %v4364_v52, 1  ;;  %v4898_v52 = vsel %vm578_vm1, %v594_v38, %v596_v43  ;;  %v610_v43 = vrot.slane %v4437_v33, 1 }
  0x54   :  { %1356 = vrot.lane.b32.xlu0 %v581_v29, %s4206_s30  ;;  %v7652_v29 = vshll.u32 %v4240_v2, 16  ;;  %v711_v44 = vor.u32 %v710_v10, %v707_v36  ;;  %v626_v10 = vrot.slane %v4540_v9, 1 }
  0x55   :  { %v4904_v39 = vsel %vm578_vm1, %v600_v23, %v602_v35  ;;  %v4916_v62 = vsel %vm578_vm1, %v598_v53, %v600_v23  ;;  %v614_v53 = vrot.slane %v4460_v50, 1  ;;  %v620_v50 = vrot.slane %v4493_v40, 1 }
  0x56   :  { %v713_v7 = vrot.slane %v7652_v29, 2  ;;  %v606_v29 = vrot.slane %v4401_v1, 1  ;;  %v608_v1 = vrot.slane %v4415_v18, 1  ;;  %v3522_v18 = vld [vmem:[%s7444_s0 + $0xa4] sm:$0xe] }
  0x57   :  { %1362 = vrot.lane.b32.xlu1 %v4838_v19, %s4206_s30  ;;  %v3524_v16 = vcombine.low %v3522_v18, %v4498_v59  ;;  %v615_v23 = vsel %vm578_vm1, %v4794_v8, %v614_v53  ;;  %v623_v36 = vsel %vm578_vm1, %v620_v50, %v4810_v42  ;;  %v624_v59 = vrot.slane %v4515_v31, 1 }
  0x58   :  { %1360 = vrot.lane.b32.xlu0 %v4846_v3, %s4206_s30  ;;  %v4901_v27 = vor.u32 %v713_v7, %v712_v26  ;;  %v4919_v38 = vsel %vm578_vm1, %v604_v60, %v606_v29  ;;  %v4928_v26 = vsel %vm578_vm1, %v602_v35, %v604_v60  ;;  %v4942_v33 = vsel %vm578_vm1, %v606_v29, %v608_v1 }
  0x59   :  { %v4953_v35 = vsel %vm578_vm1, %v610_v43, %v4794_v8  ;;  %v619_v7 = vrot.slane %v3524_v16, 1  ;;  %v4964_v29 = vsel %vm578_vm1, %v624_v59, %v626_v10  ;;  %v628_v8 = vrot.slane %v4552_v17, 1 }
  0x5a   :  { %v4911_v47 = vsel %vm703_vm2, %v711_v44, %v4901_v27  ;;  %v4931_v44 = vsel %vm578_vm1, %v608_v1, %v610_v43  ;;  %v630_v1 = vrot.slane %v4578_v46, 1  ;;  %v4973_v9 = vsel %vm578_vm1, %v4810_v42, %v624_v59 }
  0x5b   :  { %1366 = vrot.lane.b32.xlu1 %v4849_v12, %s4206_s30  ;;  %v621_v60 = vsel %vm578_vm1, %v619_v7, %v620_v50  ;;  %v632_v53 = vrot.slane %v4583_v20, 1  ;;  %v634_v18 = vrot.slane %v4607_v6, 1  ;;  %v4987_v46 = vsel %vm578_vm1, %v626_v10, %v628_v8 }
  0x5c   :  { %1364 = vrot.lane.b32.xlu0 %v4858_v15, %s4206_s30  ;;  %v4976_v43 = vsel %vm578_vm1, %v628_v8, %v630_v1  ;;  %v636_v20 = vrot.slane %v4598_v37, 1  ;;  %v638_v6 = vrot.slane %v4621_v45, 1  ;;  %v640_v37 = vrot.slane %v4633_v55, 1 }
  0x5d   :  { %v4992_v42 = vsel %vm578_vm1, %v632_v53, %v634_v18  ;;  %v5003_v50 = vsel %vm578_vm1, %v630_v1, %v632_v53  ;;  %v642_v45 = vrot.slane %v4660_v24, 1  ;;  %v644_v55 = vrot.slane %v4671_v48, 1 }
  0x5e   :  { %v5019_v10 = vsel %vm578_vm1, %v634_v18, %v636_v20  ;;  %v646_v24 = vrot.slane %v4698_v63, 1  ;;  %v5035_v53 = vsel %vm578_vm1, %v638_v6, %v640_v37  ;;  %v648_v48 = vrot.slane %v4692_v30, 1 }
  0x5f   :  { %1370 = vrot.lane.b32.xlu1 %v4861_v25, %s4206_s30  ;;  %v5024_v8 = vsel %vm578_vm1, %v640_v37, %v642_v45  ;;  %v650_v63 = vrot.slane %v4715_v22, 1 }
  0x60   :  { %1368 = vrot.lane.b32.xlu0 %v4877_v41, %s4206_s30  ;;  %v5065_v22 = vsel %vm578_vm1, %v646_v24, %v648_v48 }
  0x61   :  { %v5056_v21 = vsel %vm578_vm1, %v648_v48, %v650_v63 }
  0x63   :  { %1374 = vrot.lane.b32.xlu1 %v4881_v34, %s4206_s30 }
  0x64   :  { %1372 = vrot.lane.b32.xlu0 %v4898_v52, %s4206_s30 }
  0x67   :  { %1378 = vrot.lane.b32.xlu1 %v4904_v39, %s4206_s30 }
  0x68   :  { %1376 = vrot.lane.b32.xlu0 %v4916_v62, %s4206_s30 }
  0x6b   :  { %1382 = vrot.lane.b32.xlu1 %v4919_v38, %s4206_s30 }
  0x6c   :  { %1380 = vrot.lane.b32.xlu0 %v4928_v26, %s4206_s30 }
  0x6f   :  { %1386 = vrot.lane.b32.xlu1 %v4931_v44, %s4206_s30 }
  0x70   :  { %1384 = vrot.lane.b32.xlu0 %v4942_v33, %s4206_s30 }
  0x73   :  { %1390 = vrot.lane.b32.xlu1 %v615_v23, %s4206_s30 }
  0x74   :  { %1388 = vrot.lane.b32.xlu0 %v4953_v35, %s4206_s30 }
  0x77   :  { %1394 = vrot.lane.b32.xlu1 %v623_v36, %s4206_s30  ;;  %v5008_v36 = vsel %vm578_vm1, %v636_v20, %v638_v6  ;;  %v5040_v20 = vsel %vm578_vm1, %v644_v55, %v646_v24  ;;  %v5051_v6 = vsel %vm578_vm1, %v642_v45, %v644_v55  ;;  %v5077_v55 = vsel %vm578_vm1, %v650_v63, %v4785_v54 }
  0x78   :  { %1392 = vrot.lane.b32.xlu0 %v621_v60, %s4206_s30 }
  0x7b   :  { %1398 = vrot.lane.b32.xlu1 %v4964_v29, %s4206_s30 }
  0x7c   :  { %1396 = vrot.lane.b32.xlu0 %v4973_v9, %s4206_s30 }
  0x7d   :  { %v4980_v16 = vpop.permute.xlu1 %1288 }
  0x7e   :  { %v4989_v17 = vpop.permute.xlu0 %1284 }
  0x7f   :  { %1402 = vrot.lane.b32.xlu1 %v4976_v43, %s4206_s30 }
  0x80   :  { %1400 = vrot.lane.b32.xlu0 %v4987_v46, %s4206_s30 }
  0x81   :  { %v4996_v23 = vpop.permute.xlu1 %1290 }
  0x82   :  { %v5005_v7 = vpop.permute.xlu0 %1286 }
  0x83   :  { %1406 = vrot.lane.b32.xlu1 %v4992_v42, %s4206_s30 }
  0x84   :  { %1404 = vrot.lane.b32.xlu0 %v5003_v50, %s4206_s30 }
  0x85   :  { %v5012_v59 = vpop.permute.xlu1 %1294 }
  0x86   :  { %7653 = vst [vmem:[#allocation65_spill] sm:$0xff] %v5012_v59  ;;  %v5021_v60 = vpop.permute.xlu0 %1292  ;;  %v7798_v59 = vld [vmem:[#allocation22_spill] sm:$0xff] }
  0x87   :  { %1410 = vrot.lane.b32.xlu1 %v5008_v36, %s4206_s30  ;;  %7654 = vst [vmem:[#allocation66_spill] sm:$0xff] %v5021_v60 }
  0x88   :  { %1408 = vrot.lane.b32.xlu0 %v5019_v10, %s4206_s30 }
  0x89   :  { %v5028_v1 = vpop.permute.xlu1 %1298 }
  0x8a   :  { %7655 = vst [vmem:[#allocation67_spill] sm:$0xff] %v5028_v1  ;;  %v5037_v18 = vpop.permute.xlu0 %1296 }
  0x8b   :  { %1414 = vrot.lane.b32.xlu1 %v5024_v8, %s4206_s30  ;;  %7656 = vst [vmem:[#allocation68_spill] sm:$0xff] %v5037_v18 }
  0x8c   :  { %1412 = vrot.lane.b32.xlu0 %v5035_v53, %s4206_s30 }
  0x8d   :  { %v5044_v51 = vpop.permute.xlu1 %1302 }
  0x8e   :  { %7657 = vst [vmem:[#allocation69_spill] sm:$0xff] %v5044_v51  ;;  %v5053_v37 = vpop.permute.xlu0 %1300  ;;  %v936_v51 = vrot.slane %v4515_v31, 2 }
  0x8f   :  { %1418 = vrot.lane.b32.xlu1 %v5040_v20, %s4206_s30  ;;  %7658 = vst [vmem:[#allocation70_spill] sm:$0xff] %v5053_v37 }
  0x90   :  { %1416 = vrot.lane.b32.xlu0 %v5051_v6, %s4206_s30 }
  0x91   :  { %v5058_v18 = vpop.permute.xlu1 %1306 }
  0x92   :  { %7659 = vst [vmem:[#allocation71_spill] sm:$0xff] %v5058_v18  ;;  %v5067_v30 = vpop.permute.xlu0 %1304 }
  0x93   :  { %1422 = vrot.lane.b32.xlu1 %v5056_v21, %s4206_s30  ;;  %7660 = vst [vmem:[#allocation72_spill] sm:$0xff] %v5067_v30 }
  0x94   :  { %1420 = vrot.lane.b32.xlu0 %v5065_v22, %s4206_s30 }
  0x95   :  { %v5069_v45 = vpop.permute.xlu1 %1310 }
  0x96   :  { %7661 = vst [vmem:[#allocation73_spill] sm:$0xff] %v5069_v45  ;;  %v5079_v18 = vpop.permute.xlu0 %1308 }
  0x97   :  { %1426 = vrot.lane.b32.xlu1 %v4805_v11, %s4206_s30  ;;  %7662 = vst [vmem:[#allocation74_spill] sm:$0xff] %v5079_v18 }
  0x98   :  { %1424 = vrot.lane.b32.xlu0 %v5077_v55, %s4206_s30 }
  0x99   :  { %v5081_v37 = vpop.permute.xlu1 %1314 }
  0x9a   :  { %7663 = vst [vmem:[#allocation75_spill] sm:$0xff] %v5081_v37  ;;  %v5087_v24 = vpop.permute.xlu0 %1312 }
  0x9b   :  { %1430 = vrot.lane.b32.xlu1 %v4846_v3, %s4207_s8  ;;  %7664 = vst [vmem:[#allocation76_spill] sm:$0xff] %v5087_v24 }
  0x9c   :  { %1428 = vrot.lane.b32.xlu0 %v4822_v61, %s4207_s8 }
  0x9d   :  { %v5089_v48 = vpop.permute.xlu1 %1318 }
  0x9e   :  { %7665 = vst [vmem:[#allocation77_spill] sm:$0xff] %v5089_v48  ;;  %v5095_v54 = vpop.permute.xlu0 %1316 }
  0x9f   :  { %1434 = vrot.lane.b32.xlu1 %v4858_v15, %s4207_s8  ;;  %7666 = vst [vmem:[#allocation78_spill] sm:$0xff] %v5095_v54  ;;  %v7676_v54 = vrot.slane %v4775_v56, 1 }
  0xa0   :  { %1432 = vrot.lane.b32.xlu0 %v4838_v19, %s4207_s8 }
  0xa1   :  { %v5097_v11 = vpop.permute.xlu1 %1322 }
  0xa2   :  { %v5103_v3 = vpop.permute.xlu0 %1320 }
  0xa3   :  { %1438 = vrot.lane.b32.xlu1 %v4877_v41, %s4207_s8 }
  0xa4   :  { %1436 = vrot.lane.b32.xlu0 %v4849_v12, %s4207_s8 }
  0xa5   :  { %v5105_v63 = vpop.permute.xlu1 %1326 }
  0xa6   :  { %7667 = vst [vmem:[#allocation79_spill] sm:$0xff] %v5105_v63  ;;  %v5111_v61 = vpop.permute.xlu0 %1324 }
  0xa7   :  { %1442 = vrot.lane.b32.xlu1 %v4898_v52, %s4207_s8  ;;  %v4124_v52 = vld [vmem:[%s7444_s0 + $0x98] ss:$0 sps:$4 sm:$0x11]  }
  0xa8   :  { %1440 = vrot.lane.b32.xlu0 %v4861_v25, %s4207_s8 }
  0xa9   :  { %v5113_v15 = vpop.permute.xlu1 %1330 }
  0xaa   :  { %7668 = vst [vmem:[#allocation80_spill] sm:$0xff] %v5113_v15  ;;  %v5119_v19 = vpop.permute.xlu0 %1328 }
  0xab   :  { %1446 = vrot.lane.b32.xlu1 %v4916_v62, %s4207_s8  ;;  %7669 = vst [vmem:[#allocation81_spill] sm:$0xff] %v5119_v19 }
  0xac   :  { %1444 = vrot.lane.b32.xlu0 %v4881_v34, %s4207_s8  ;;  %v679_v34 = vrot.slane %v4124_v52, 1 }
  0xad   :  { %v5121_v41 = vpop.permute.xlu1 %1334 }
  0xae   :  { %7670 = vst [vmem:[#allocation82_spill] sm:$0xff] %v5121_v41  ;;  %v5127_v12 = vpop.permute.xlu0 %1332 }
  0xaf   :  { %1450 = vrot.lane.b32.xlu1 %v4928_v26, %s4207_s8  ;;  %7671 = vst [vmem:[#allocation83_spill] sm:$0xff] %v5127_v12 }
  0xb0   :  { %1448 = vrot.lane.b32.xlu0 %v4904_v39, %s4207_s8  ;;  %v680_v39 = vsel %vm578_vm1, %v7676_v54, %v679_v34  ;;  %v7688_v54 = vld [vmem:[#allocation2_spill] sm:$0xff] }
  0xb1   :  { %v5132_v25 = vpop.permute.xlu1 %1338  ;;  %v717_v34 = vrot.slane %v7688_v54, 2 }
  0xb2   :  { %7672 = vst [vmem:[#allocation84_spill] sm:$0xff] %v5132_v25  ;;  %v5138_v62 = vpop.permute.xlu0 %1336 }
  0xb3   :  { %1454 = vrot.lane.b32.xlu1 %v4942_v33, %s4207_s8  ;;  %7673 = vst [vmem:[#allocation85_spill] sm:$0xff] %v5138_v62 }
  0xb4   :  { %1452 = vrot.lane.b32.xlu0 %v4919_v38, %s4207_s8 }
  0xb5   :  { %v5140_v48 = vpop.permute.xlu1 %1342 }
  0xb6   :  { %7674 = vst [vmem:[#allocation86_spill] sm:$0xff] %v5140_v48  ;;  %v5146_v26 = vpop.permute.xlu0 %1340 }
  0xb7   :  { %1458 = vrot.lane.b32.xlu1 %v4953_v35, %s4207_s8  ;;  %7675 = vst [vmem:[#allocation87_spill] sm:$0xff] %v5146_v26 }
  0xb8   :  { %1456 = vrot.lane.b32.xlu0 %v4931_v44, %s4207_s8 }
  0xb9   :  { %v5151_v37 = vpop.permute.xlu1 %1346 }
  0xba   :  { %7677 = vst [vmem:[#allocation88_spill] sm:$0xff] %v5151_v37  ;;  %v5156_v33 = vpop.permute.xlu0 %1344  ;;  %v7694_v37 = vld [vmem:[#allocation5_spill] sm:$0xff] }
  0xbb   :  { %1462 = vrot.lane.b32.xlu1 %v680_v39, %s4207_s8  ;;  %7678 = vst [vmem:[#allocation89_spill] sm:$0xff] %v5156_v33 }
  0xbc   :  { %1460 = vrot.lane.b32.xlu0 %v4816_v58, %s4207_s8 }
  0xbd   :  { %v5158_v52 = vpop.permute.xlu1 %1350 }
  0xbe   :  { %7679 = vst [vmem:[#allocation90_spill] sm:$0xff] %v5158_v52  ;;  %v5164_v56 = vpop.permute.xlu0 %1348  ;;  %v7692_v52 = vld [vmem:[#allocation4_spill] sm:$0xff] }
  0xbf   :  { %1466 = vrot.lane.b32.xlu1 %v4973_v9, %s4207_s8  ;;  %7680 = vst [vmem:[#allocation91_spill] sm:$0xff] %v5164_v56  ;;  %v721_v24 = vrot.slane %v7692_v52, 2  ;;  %v7693_v56 = vld [vmem:[#allocation6_spill] sm:$0xff] }
  0xc0   :  { %1464 = vrot.lane.b32.xlu0 %v4826_v5, %s4207_s8  ;;  %v724_v45 = vrot.slane %v7693_v56, 1 }
  0xc1   :  { %v5166_v38 = vpop.permute.xlu1 %1354 }
  0xc2   :  { %7681 = vst [vmem:[#allocation92_spill] sm:$0xff] %v5166_v38  ;;  %v5172_v44 = vpop.permute.xlu0 %1352 }
  0xc3   :  { %1470 = vrot.lane.b32.xlu1 %v4987_v46, %s4207_s8  ;;  %7682 = vst [vmem:[#allocation93_spill] sm:$0xff] %v5172_v44 }
  0xc4   :  { %1468 = vrot.lane.b32.xlu0 %v4964_v29, %s4207_s8 }
  0xc5   :  { %v5174_v35 = vpop.permute.xlu1 %1358 }
  0xc6   :  { %v5180_v58 = vpop.permute.xlu0 %1356 }
  0xc7   :  { %1474 = vrot.lane.b32.xlu1 %v5003_v50, %s4207_s8 }
  0xc8   :  { %1472 = vrot.lane.b32.xlu0 %v4976_v43, %s4207_s8 }
  0xc9   :  { %v5182_v9 = vpop.permute.xlu1 %1362 }
  0xca   :  { %v5188_v5 = vpop.permute.xlu0 %1360 }
  0xcb   :  { %1478 = vrot.lane.b32.xlu1 %v5019_v10, %s4207_s8  ;;  %v4127_v10 = vld [vmem:[%s7444_s0 + $0x13c] ss:$0 sps:$4 sm:$0x11]  }
  0xcc   :  { %1476 = vrot.lane.b32.xlu0 %v4992_v42, %s4207_s8 }
  0xcd   :  { %v5190_v46 = vpop.permute.xlu1 %1366 }
  0xce   :  { %7683 = vst [vmem:[#allocation94_spill] sm:$0xff] %v5190_v46  ;;  %v5196_v29 = vpop.permute.xlu0 %1364 }
  0xcf   :  { %1482 = vrot.lane.b32.xlu1 %v5035_v53, %s4207_s8  ;;  %7684 = vst [vmem:[#allocation95_spill] sm:$0xff] %v5196_v29  ;;  %v716_v53 = vrot.slane %v4280_v14, 1 }
  0xd0   :  { %1480 = vrot.lane.b32.xlu0 %v5008_v36, %s4207_s8 }
  0xd1   :  { %v5198_v50 = vpop.permute.xlu1 %1370  ;;  %v718_v38 = vor.u32 %v717_v34, %v716_v53  ;;  %v801_v53 = vshll.u32 %v4798_v0, 16 }
  0xd2   :  { %7685 = vst [vmem:[#allocation96_spill] sm:$0xff] %v5198_v50  ;;  %v5204_v43 = vpop.permute.xlu0 %1368 }
  0xd3   :  { %1486 = vrot.lane.b32.xlu1 %v5051_v6, %s4207_s8  ;;  %7686 = vst [vmem:[#allocation97_spill] sm:$0xff] %v5204_v43  ;;  %v696_v6 = vrot.slane %v4127_v10, 1  ;;  %v7696_v10 = vrot.slane %v4868_v28, 1 }
  0xd4   :  { %1484 = vrot.lane.b32.xlu0 %v5024_v8, %s4207_s8  ;;  %v7691_v8 = vld [vmem:[#allocation7_spill] sm:$0xff] }
  0xd5   :  { %v5209_v42 = vpop.permute.xlu1 %1374  ;;  %v720_v44 = vrot.slane %v7691_v8, 1  ;;  %v697_v33 = vsel %vm578_vm1, %v7696_v10, %v696_v6  ;;  %v803_v6 = vrot.slane %v801_v53, 2  ;;  %v7699_v10 = vshrl.u32 %v4529_v49, 16 }
  0xd6   :  { %7687 = vst [vmem:[#allocation98_spill] sm:$0xff] %v5209_v42  ;;  %v5217_v36 = vpop.permute.xlu0 %1372 }
  0xd7   :  { %1490 = vrot.lane.b32.xlu1 %v5065_v22, %s4207_s8  ;;  %7689 = vst [vmem:[#allocation2_spill] sm:$0xff] %v5217_v36  ;;  %v725_v22 = vrot.slane %v7694_v37, 2  ;;  %v805_v30 = vrot.slane %v7699_v10, 1  ;;  %v4144_v10 = vld [vmem:[%s7444_s0 + $0xc] sm:$0xf] }
  0xd8   :  { %1488 = vrot.lane.b32.xlu0 %v5040_v20, %s4207_s8  ;;  %v798_v20 = vshrl.u32 %v4798_v0, 16  ;;  %v7700_v0 = vshll.u32 %v4529_v49, 16 }
  0xd9   :  { %v5219_v39 = vpop.permute.xlu1 %1378 }
  0xda   :  { %7690 = vst [vmem:[#allocation99_spill] sm:$0xff] %v5219_v39  ;;  %v5229_v18 = vpop.permute.xlu0 %1376  ;;  %v722_v39 = vor.u32 %v721_v24, %v720_v44  ;;  %v800_v28 = vrot.slane %v798_v20, 1  ;;  %v7703_v24 = vld [vmem:[#allocation8_spill] sm:$0xff] }
  0xdb   :  { %1494 = vrot.lane.b32.xlu1 %v5077_v55, %s4207_s8  ;;  %7695 = vst [vmem:[#allocation7_spill] sm:$0xff] %v5229_v18  ;;  %v719_v55 = vsel %vm703_vm2, %v4901_v27, %v718_v38  ;;  %v726_v18 = vor.u32 %v725_v22, %v724_v45  ;;  %v7702_v27 = vld [vmem:[#allocation13_spill] sm:$0xff] }
  0xdc   :  { %1492 = vrot.lane.b32.xlu0 %v5056_v21, %s4207_s8  ;;  %v887_v21 = vld [vmem:[%s7444_s0 + $0x8] sm:$0xc]  ;;  %v728_v45 = vrot.slane %v7702_v27, 1  ;;  %v804_v20 = vor.u32 %v803_v6, %v800_v28 }
  0xdd   :  { %v5236_v34 = vpop.permute.xlu1 %1382  ;;  %v727_v22 = vsel %vm703_vm2, %v722_v39, %v726_v18  ;;  %v7707_v28 = vld [vmem:[#allocation35_spill] sm:$0xff] }
  0xde   :  { %7697 = vst [vmem:[#allocation4_spill] sm:$0xff] %v5236_v34  ;;  %v5243_v48 = vpop.permute.xlu0 %1380  ;;  %v806_v34 = vrot.slane %v7700_v0, 2  ;;  %v3539_v0 = vcombine.low %v887_v21, %v4144_v10  ;;  %v894_v10 = vrot.slane %v4240_v2, 2 }
  0xdf   :  { %1498 = vrot.lane.b32.xlu1 %v697_v33, %s4207_s8  ;;  %7698 = vst [vmem:[#allocation6_spill] sm:$0xff] %v5243_v48  ;;  %v729_v33 = vrot.slane %v7703_v24, 2 }
  0xe0   :  { %1496 = vrot.lane.b32.xlu0 %v4889_v57, %s4207_s8  ;;  %v807_v53 = vor.u32 %v806_v34, %v805_v30  ;;  %v723_v57 = vsel %vm703_vm2, %v718_v38, %v722_v39  ;;  %v810_v30 = vrot.slane %v7707_v28, 2  ;;  %v893_v21 = vrot.slane %v3539_v0, 2  ;;  %v970_v38 = vld [vmem:[%s7444_s0 + $0x10] sm:$0xc] }
  0xe1   :  { %v5249_v26 = vpop.permute.xlu1 %1386 }
  0xe2   :  { %7701 = vst [vmem:[#allocation5_spill] sm:$0xff] %v5249_v26  ;;  %v5259_v44 = vpop.permute.xlu0 %1384  ;;  %v808_v6 = vsel %vm703_vm2, %v804_v20, %v807_v53  ;;  %v5297_v20 = vld [vmem:[%s7444_s0 + $0x14] sm:$0xf] }
  0xe3   :  { %1502 = vrot.lane.b32.xlu1 %v719_v55, %s4208_s15  ;;  %7704 = vst [vmem:[#allocation13_spill] sm:$0xff] %v5259_v44  ;;  %v5271_v55 = vor.u32 %v729_v33, %v728_v45  ;;  %v7706_v44 = vld [vmem:[#allocation36_spill] sm:$0xff]  ;;  %v3545_v0 = vcombine.low %v970_v38, %v5297_v20 }
  0xe4   :  { %1500 = vrot.lane.b32.xlu0 %v4911_v47, %s4208_s15  ;;  %v809_v48 = vrot.slane %v7706_v44, 1  ;;  %v3538_v47 = vld [vmem:[%s7444_s0 + $0xac] sm:$0xc]  ;;  %v3541_v38 = vld [vmem:[%s7444_s0 + $0xb4] sm:$0xc] }
  0xe5   :  { %v5265_v26 = vpop.permute.xlu1 %1390  ;;  %v731_v45 = vsel %vm703_vm2, %v726_v18, %v5271_v55  ;;  %v1019_v42 = vshrl.u32 %v3545_v0, 16 }
  0xe6   :  { %7705 = vst [vmem:[#allocation8_spill] sm:$0xff] %v5265_v26  ;;  %v5275_v34 = vpop.permute.xlu0 %1388  ;;  %v5291_v33 = vor.u32 %v810_v30, %v809_v48 }
  0xe7   :  { %1506 = vrot.lane.b32.xlu1 %v727_v22, %s4208_s15  ;;  %7708 = vst [vmem:[#allocation36_spill] sm:$0xff] %v5275_v34  ;;  %v3540_v22 = vcombine.low %v3538_v47, %v4476_v4  ;;  %v989_v47 = vrot.slane %v3545_v0, 2 }
  0xe8   :  { %1504 = vrot.lane.b32.xlu0 %v723_v57, %s4208_s15  ;;  %v895_v57 = vsel %vm892_vm3, %v893_v21, %v894_v10  ;;  %v812_v4 = vsel %vm703_vm2, %v807_v53, %v5291_v33  ;;  %v934_v21 = vrot.slane %v4529_v49, 2 }
  0xe9   :  { %v5285_v39 = vpop.permute.xlu1 %1394  ;;  %v933_v30 = vrot.slane %v3540_v22, 2 }
  0xea   :  { %v5300_v26 = vpop.permute.xlu0 %1392 }
  0xeb   :  { %1536 = vrot.lane.b32.xlu1 %v808_v6, %s4208_s15  ;;  %v5306_v6 = vld [vmem:[%s7444_s0 + $0x18] sm:$0xff]   ;;  %v935_v22 = vsel %vm892_vm3, %v933_v30, %v934_v21 }
  0xec   :  { %v896_v18 = vrot.slane %v5306_v6, 2  ;;  %1508 = vrot.lane.b32.xlu0 %v731_v45, %s4208_s15  ;;  %v1022_v45 = vshll.u32 %v3545_v0, 16  ;;  %v1030_v0 = vrot.slane %v7691_v8, 2  ;;  %v4134_v8 = vld [vmem:[%s7445_s1] sm:$0xff]  }
  0xed   :  { %v5309_v48 = vpop.permute.xlu1 %1398  ;;  %3993 = vmatprep.subr.bf16.mxu0 %v4134_v8  ;;  %4069 = vmatprep.subr.bf16.mxu1 %v4134_v8 }
  0xee   :  { %7709 = vst [vmem:[#allocation35_spill] sm:$0xff] %v5309_v48  ;;  %v5319_v34 = vpop.permute.xlu0 %1396  ;;  %v897_v36 = vsel %vm892_vm3, %v894_v10, %v896_v18  ;;  %v990_v62 = vsel %vm892_vm3, %v989_v47, %v896_v18  ;;  %v5333_v10 = vld [vmem:[%s7444_s0 + $0x20] sm:$0xff]   ;;  %v1024_v50 = vrot.slane %v1022_v45, 3  ;;  %3994 = vmatpush3.bf16.msra.mxu0 %v4134_v8  ;;  %4071 = vmatpush3.bf16.msra.mxu1 %v4134_v8 }
  0xef   :  { %1572 = vrot.lane.b32.xlu1 %v895_v57, %s4209_s26  ;;  %7710 = vst [vmem:[#allocation100_spill] sm:$0xff] %v5319_v34  ;;  %v7712_v57 = vld [vmem:[#allocation29_spill] sm:$0xff]  ;;  %v7716_v45 = vrot.slane %v5333_v10, 2 }
  0xf0   :  { %1538 = vrot.lane.b32.xlu0 %v812_v4, %s4208_s15  ;;  %v3548_v53 = vcombine.low %v3541_v38, %v7712_v57  ;;  %v1021_v4 = vrot.slane %v1019_v42, 2  ;;  %v1026_v38 = vrot.slane %v4280_v14, 2  ;;  %v937_v57 = vsel %vm892_vm3, %v934_v21, %v936_v51  ;;  %v1201_v14 = vld [vmem:[%s7444_s0 + $0x10] sm:$0x8] }
  0xf1   :  { %v5322_v25 = vpop.permute.xlu1 %1402 }
  0xf2   :  { %7711 = vst [vmem:[#allocation101_spill] sm:$0xff] %v5322_v25  ;;  %v5336_v43 = vpop.permute.xlu0 %1400  ;;  %v1006_v31 = vrot.slane %v3548_v53, 2  ;;  %v1112_v47 = vshrl.u32 %v3548_v53, 16  ;;  %v1115_v42 = vshll.u32 %v3548_v53, 16 }
  0xf3   :  { %1574 = vrot.lane.b32.xlu1 %v897_v36, %s4209_s26  ;;  %7713 = vst [vmem:[#allocation29_spill] sm:$0xff] %v5336_v43  ;;  %v1027_v36 = vrot.slane %v7688_v54, 3 }
  0xf4   :  { %1608 = vrot.lane.b32.xlu0 %v935_v22, %s4209_s26  ;;  %v5354_v22 = vsel %vm892_vm3, %v896_v18, %v7716_v45  ;;  %v1007_v53 = vsel %vm892_vm3, %v1006_v31, %v936_v51  ;;  %v5367_v18 = vld [vmem:[%s7444_s0 + $0xc4] sm:$0xff]   ;;  %v1117_v31 = vrot.slane %v1115_v42, 3  ;;  %v1120_v45 = vrot.slane %v7707_v28, 3 }
  0xf5   :  { %v5340_v30 = vpop.permute.xlu1 %1406  ;;  %v1028_v41 = vor.u32 %v1027_v36, %v1026_v38  ;;  %v4211_v38 = vmov 65535   ;;  %v7721_v42 = vld [vmem:[#allocation42_spill] sm:$0xff] }
  0xf6   :  { %7714 = vst [vmem:[#allocation102_spill] sm:$0xff] %v5340_v30  ;;  %v5349_v54 = vpop.permute.xlu0 %1404  ;;  %v1025_v30 = vor.u32 %v1024_v50, %v1021_v4  ;;  %v1114_v4 = vrot.slane %v1112_v47, 2  ;;  %v2541_v36 = vsel %vm1206_vm5, 4294967295, %v4211_v38 }
  0xf7   :  { %1644 = vrot.lane.b32.xlu1 %v990_v62, %s4210_s7  ;;  %7715 = vst [vmem:[#allocation103_spill] sm:$0xff] %v5349_v54  ;;  %v1031_v62 = vrot.slane %v7692_v52, 3  ;;  %v4135_v52 = vld [vmem:[%s7445_s1 + $0x8] sm:$0x3f]   ;;  %v2542_v50 = vsel %vm892_vm3, %v2541_v36, 0  ;;  %v3555_v54 = vcombine.low %v1201_v14, %v5297_v20  ;;  %s4212_s1 = smov 21  }
  0xf8   :  { %1610 = vrot.lane.b32.xlu0 %v937_v57, %s4209_s26  ;;  %v1119_v57 = vrot.slane %v7706_v44, 2  ;;  %v2544_v38 = vand.u32 %v4135_v52, %v2542_v50  ;;  %v7720_v44 = vrot.slane %v5367_v18, 2  ;;  %v1123_v20 = vrot.slane %v7721_v42, 2  ;;  %v7722_v14 = vld [vmem:[#allocation37_spill] sm:$0xff]  ;;  %v3554_v52 = vld [vmem:[%s7444_s0 + $0xb4] sm:$0x8] }
  0xf9   :  { %v5360_v21 = vpop.permute.xlu1 %1410  ;;  %v5382_v1 = vor.u32 %v1031_v62, %v1030_v0  ;;  %v1118_v0 = vor.u32 %v1117_v31, %v1114_v4  ;;  %v1124_v62 = vrot.slane %v7722_v14, 3 }
  0xfa   :  { %7717 = vst [vmem:[#allocation104_spill] sm:$0xff] %v5360_v21  ;;  %v5379_v47 = vpop.permute.xlu0 %1408  ;;  %v1029_v21 = vsel %vm1017_vm4, %v1025_v30, %v1028_v41  ;;  %v5391_v28 = vsel %vm892_vm3, %v936_v51, %v7720_v44  ;;  %3995 = vmatprep.subr.bf16.mxu0 %v2544_v38  ;;  %v1121_v30 = vor.u32 %v1120_v45, %v1119_v57  ;;  %v1208_v51 = vrot.slane %v5306_v6, 3 }
  0xfb   :  { %1646 = vrot.lane.b32.xlu1 %v5354_v22, %s4210_s7  ;;  %7718 = vst [vmem:[#allocation105_spill] sm:$0xff] %v5379_v47  ;;  %3996 = vmatpush3.bf16.msra.mxu0 %v2544_v38  ;;  %v1033_v8 = vsel %vm1017_vm4, %v1028_v41, %v5382_v1  ;;  %v5410_v36 = vor.u32 %v1124_v62, %v1123_v20  ;;  %v4149_v41 = vld [vmem:[%s7444_s0 + $0xb8] sm:$0xf]  ;;  %v7571_v45 = vrot.slane %v5333_v10, 3  ;;  %v814_v44 = vrot.slane %v7722_v14, 2  ;;  %v5430_v62 = vld [vmem:[%s7444_s0 + $0xbc] sm:$0xff]  }
  0xfc   :  { %1680 = vrot.lane.b32.xlu0 %v1007_v53, %s4210_s7  ;;  %v1207_v53 = vrot.slane %v3555_v54, 3  ;;  %4070 = vmatprep.subr.bf16.mxu1 %v2544_v38  ;;  %v1122_v4 = vsel %vm1017_vm4, %v1118_v0, %v1121_v30  ;;  %v3556_v54 = vcombine.low %v3554_v52, %v4149_v41  ;;  %7727 = vst [vmem:[#allocation109_spill] sm:$0xff] %v5430_v62  ;;  %v7572_v41 = vrot.slane %v5367_v18, 3 }
  0xfd   :  { %v5385_v12 = vpop.permute.xlu1 %1414  ;;  %4072 = vmatpush3.bf16.msra.mxu1 %v2544_v38  ;;  %v813_v38 = vrot.slane %v7721_v42, 1  ;;  %v1126_v0 = vsel %vm1017_vm4, %v1121_v30, %v5410_v36  ;;  %v1248_v42 = vrot.slane %v5430_v62, 3  ;;  %v1211_v14 = vsel %vm1206_vm5, %v1208_v51, %v7571_v45 }
  0xfe   :  { %7719 = vst [vmem:[#allocation106_spill] sm:$0xff] %v5385_v12  ;;  %v5396_v50 = vpop.permute.xlu0 %1412  ;;  %v1209_v57 = vsel %vm1206_vm5, %v1207_v53, %v1208_v51  ;;  %v1247_v20 = vrot.slane %v3556_v54, 3  ;;  %v7730_v54 = vld [vmem:[#allocation39_spill] sm:$0xff] }
  0xff   :  { %1716 = vrot.lane.b32.xlu1 %v1029_v21, %s4212_s1  ;;  %7723 = vst [vmem:[#allocation42_spill] sm:$0xff] %v5396_v50  ;;  %v815_v52 = vor.u32 %v814_v44, %v813_v38  ;;  %v1251_v44 = vsel %vm1206_vm5, %v1248_v42, %v7572_v41  ;;  %v5494_v41 = vld [vmem:[%s7444_s0 + $0x30] sm:$0xff]  }
 0x100   :  { %1682 = vrot.lane.b32.xlu0 %v5391_v28, %s4210_s7  ;;  %v1249_v30 = vsel %vm1206_vm5, %v1247_v20, %v1248_v42 }
 0x101   :  { %v5404_v21 = vpop.permute.xlu1 %1418  ;;  %v816_v51 = vsel %vm703_vm2, %v5291_v33, %v815_v52 }
 0x102   :  { %7724 = vst [vmem:[#allocation37_spill] sm:$0xff] %v5404_v21  ;;  %v5415_v31 = vpop.permute.xlu0 %1416 }
 0x103   :  { %1718 = vrot.lane.b32.xlu1 %v1033_v8, %s4212_s1  ;;  %7725 = vst [vmem:[#allocation107_spill] sm:$0xff] %v5415_v31  ;;  %v7740_v31 = vrot.slane %v5367_v18, 2 }
 0x104   :  { %1752 = vrot.lane.b32.xlu0 %v1122_v4, %s4212_s1 }
 0x105   :  { %v5421_v8 = vpop.permute.xlu1 %1422 }
 0x106   :  { %7726 = vst [vmem:[#allocation108_spill] sm:$0xff] %v5421_v8  ;;  %v5433_v53 = vpop.permute.xlu0 %1420  ;;  %v7731_v8 = vld [vmem:[#allocation38_spill] sm:$0xff] }
 0x107   :  { %1788 = vrot.lane.b32.xlu1 %v1209_v57, %s4213_s18  ;;  %7728 = vst [vmem:[#allocation110_spill] sm:$0xff] %v5433_v53  ;;  %v817_v57 = vrot.slane %v7730_v54, 1  ;;  %v818_v21 = vrot.slane %v7731_v8, 2 }
 0x108   :  { %1754 = vrot.lane.b32.xlu0 %v1126_v0, %s4212_s1 }
 0x109   :  { %v5438_v4 = vpop.permute.xlu1 %1426  ;;  %v5457_v0 = vor.u32 %v818_v21, %v817_v57 }
 0x10a   :  { %7729 = vst [vmem:[#allocation111_spill] sm:$0xff] %v5438_v4  ;;  %v5446_v53 = vpop.permute.xlu0 %1424  ;;  %v1035_v4 = vrot.slane %v7694_v37, 3  ;;  %v1038_v37 = vrot.slane %v7702_v27, 2  ;;  %v1128_v27 = vrot.slane %v7731_v8, 3 }
 0x10b   :  { %1790 = vrot.lane.b32.xlu1 %v1211_v14, %s4213_s18  ;;  %7732 = vst [vmem:[#allocation39_spill] sm:$0xff] %v5446_v53  ;;  %v5464_v14 = vld [vmem:[%s7444_s0 + $0x28] sm:$0xff]   ;;  %v820_v21 = vsel %vm703_vm2, %v815_v52, %v5457_v0 }
 0x10c   :  { %1824 = vrot.lane.b32.xlu0 %v1249_v30, %s4213_s18  ;;  %7733 = vst [vmem:[#allocation38_spill] sm:$0xff] %v5464_v14  ;;  %v900_v33 = vrot.slane %v5464_v14, 2  ;;  %v7735_v30 = vrot.slane %v5333_v10, 2 }
 0x10d   :  { %v5450_v38 = vpop.permute.xlu1 %1430 }
 0x10e   :  { %v5459_v20 = vpop.permute.xlu0 %1428  ;;  %v901_v57 = vsel %vm892_vm3, %v7735_v30, %v900_v33  ;;  %v7575_v30 = vrot.slane %v5494_v41, 2 }
 0x10f   :  { %1540 = vrot.lane.b32.xlu1 %v816_v51, %s4208_s15 }
 0x110   :  { %1826 = vrot.lane.b32.xlu0 %v1251_v44, %s4213_s18  ;;  %v5486_v44 = vld [vmem:[%s7444_s0 + $0xcc] sm:$0xff]   ;;  %v5512_v47 = vsel %vm892_vm3, %v900_v33, %v7575_v30 }
 0x111   :  { %v5467_v45 = vpop.permute.xlu1 %1434  ;;  %7737 = vst [vmem:[#allocation114_spill] sm:$0xff] %v5486_v44 }
 0x112   :  { %7734 = vst [vmem:[#allocation112_spill] sm:$0xff] %v5467_v45  ;;  %v5474_v42 = vpop.permute.xlu0 %1432 }
 0x113   :  { %1576 = vrot.lane.b32.xlu1 %v5354_v22, %s4209_s26  ;;  %v940_v22 = vrot.slane %v5486_v44, 2 }
 0x114   :  { %1542 = vrot.lane.b32.xlu0 %v820_v21, %s4208_s15  ;;  %v1034_v21 = vrot.slane %v7693_v56, 2 }
 0x115   :  { %v5479_v51 = vpop.permute.xlu1 %1438  ;;  %v941_v12 = vsel %vm892_vm3, %v7740_v31, %v940_v22 }
 0x116   :  { %7736 = vst [vmem:[#allocation113_spill] sm:$0xff] %v5479_v51  ;;  %v5489_v52 = vpop.permute.xlu0 %1436  ;;  %v1036_v56 = vor.u32 %v1035_v4, %v1034_v21  ;;  %v1127_v4 = vrot.slane %v7730_v54, 2 }
 0x117   :  { %1578 = vrot.lane.b32.xlu1 %v901_v57, %s4209_s26  ;;  %7738 = vst [vmem:[#allocation115_spill] sm:$0xff] %v5489_v52 }
 0x118   :  { %1612 = vrot.lane.b32.xlu0 %v5391_v28, %s4209_s26  ;;  %v5524_v28 = vld [vmem:[%s7444_s0 + $0xd4] sm:$0xff]   ;;  %v1129_v54 = vor.u32 %v1128_v27, %v1127_v4  ;;  %v7750_v27 = vrot.slane %v5333_v10, 3 }
 0x119   :  { %v5499_v53 = vpop.permute.xlu1 %1442  ;;  %v7576_v31 = vrot.slane %v5524_v28, 2 }
 0x11a   :  { %7739 = vst [vmem:[#allocation116_spill] sm:$0xff] %v5499_v53  ;;  %v5507_v50 = vpop.permute.xlu0 %1440  ;;  %v1039_v53 = vrot.slane %v7703_v24, 3  ;;  %v1037_v24 = vsel %vm1017_vm4, %v5382_v1, %v1036_v56 }
 0x11b   :  { %1648 = vrot.lane.b32.xlu1 %v901_v57, %s4210_s7  ;;  %7741 = vst [vmem:[#allocation117_spill] sm:$0xff] %v5507_v50  ;;  %v943_v30 = vsel %vm892_vm3, %v940_v22, %v7576_v31  ;;  %v7746_v50 = vld [vmem:[#allocation40_spill] sm:$0xff] }
 0x11c   :  { %1614 = vrot.lane.b32.xlu0 %v941_v12, %s4209_s26  ;;  %v5533_v57 = vor.u32 %v1039_v53, %v1038_v37  ;;  %v1212_v53 = vrot.slane %v5464_v14, 3 }
 0x11d   :  { %v5516_v32 = vpop.permute.xlu1 %1446 }
 0x11e   :  { %7742 = vst [vmem:[#allocation118_spill] sm:$0xff] %v5516_v32  ;;  %v5529_v33 = vpop.permute.xlu0 %1444  ;;  %v7745_v32 = vld [vmem:[#allocation46_spill] sm:$0xff]  ;;  %v1041_v1 = vsel %vm1017_vm4, %v1036_v56, %v5533_v57  ;;  %v7577_v56 = vrot.slane %v5494_v41, 3 }
 0x11f   :  { %1650 = vrot.lane.b32.xlu1 %v5512_v47, %s4210_s7  ;;  %7743 = vst [vmem:[#allocation119_spill] sm:$0xff] %v5529_v33  ;;  %v1131_v8 = vrot.slane %v7745_v32, 2  ;;  %v1132_v33 = vrot.slane %v7746_v50, 3  ;;  %v821_v31 = vrot.slane %v7745_v32, 1 }
 0x120   :  { %1684 = vrot.lane.b32.xlu0 %v941_v12, %s4210_s7  ;;  %v1130_v12 = vsel %vm1017_vm4, %v5410_v36, %v1129_v54 }
 0x121   :  { %v5535_v21 = vpop.permute.xlu1 %1450  ;;  %v5555_v22 = vor.u32 %v1132_v33, %v1131_v8  ;;  %v1252_v33 = vrot.slane %v5486_v44, 3  ;;  %v1215_v8 = vsel %vm1206_vm5, %v1212_v53, %v7577_v56  ;;  %v7773_v44 = vld [vmem:[#allocation45_spill] sm:$0xff] }
 0x122   :  { %7744 = vst [vmem:[#allocation120_spill] sm:$0xff] %v5535_v21  ;;  %v5544_v52 = vpop.permute.xlu0 %1448  ;;  %v1140_v15 = vrot.slane %v7773_v44, 3 }
 0x123   :  { %1720 = vrot.lane.b32.xlu1 %v1037_v24, %s4212_s1  ;;  %7747 = vst [vmem:[#allocation46_spill] sm:$0xff] %v5544_v52  ;;  %v1213_v24 = vsel %vm1206_vm5, %v7750_v27, %v1212_v53  ;;  %v1134_v36 = vsel %vm1017_vm4, %v1129_v54, %v5555_v22  ;;  %v7754_v27 = vld [vmem:[#allocation41_spill] sm:$0xff]  ;;  %v7756_v54 = vrot.slane %v5367_v18, 3 }
 0x124   :  { %1686 = vrot.lane.b32.xlu0 %v943_v30, %s4210_s7  ;;  %v7758_v53 = vld [vmem:[#allocation9_spill] sm:$0xff]  ;;  %v1136_v51 = vrot.slane %v7754_v27, 3 }
 0x125   :  { %v5549_v37 = vpop.permute.xlu1 %1454 }
 0x126   :  { %7748 = vst [vmem:[#allocation40_spill] sm:$0xff] %v5549_v37  ;;  %v5557_v4 = vpop.permute.xlu0 %1452  ;;  %v822_v37 = vrot.slane %v7746_v50, 2 }
 0x127   :  { %1722 = vrot.lane.b32.xlu1 %v1041_v1, %s4212_s1  ;;  %7749 = vst [vmem:[#allocation121_spill] sm:$0xff] %v5557_v4  ;;  %v7753_v1 = vld [vmem:[#allocation44_spill] sm:$0xff] }
 0x128   :  { %1756 = vrot.lane.b32.xlu0 %v1130_v12, %s4212_s1  ;;  %v823_v32 = vor.u32 %v822_v37, %v821_v31  ;;  %v825_v50 = vrot.slane %v7753_v1, 1  ;;  %v1253_v12 = vsel %vm1206_vm5, %v7756_v54, %v1252_v33  ;;  %v733_v31 = vrot.slane %v7758_v53, 2 }
 0x129   :  { %v5565_v21 = vpop.permute.xlu1 %1458 }
 0x12a   :  { %7751 = vst [vmem:[#allocation122_spill] sm:$0xff] %v5565_v21  ;;  %v5572_v10 = vpop.permute.xlu0 %1456  ;;  %v826_v21 = vrot.slane %v7754_v27, 2  ;;  %v824_v56 = vsel %vm703_vm2, %v5457_v0, %v823_v32 }
 0x12b   :  { %1792 = vrot.lane.b32.xlu1 %v1213_v24, %s4213_s18  ;;  %7752 = vst [vmem:[#allocation123_spill] sm:$0xff] %v5572_v10  ;;  %v7578_v24 = vrot.slane %v5524_v28, 3  ;;  %v7757_v10 = vld [vmem:[#allocation10_spill] sm:$0xff] }
 0x12c   :  { %1758 = vrot.lane.b32.xlu0 %v1134_v36, %s4212_s1  ;;  %v732_v52 = vrot.slane %v7757_v10, 1  ;;  %v1042_v25 = vrot.slane %v7757_v10, 2 }
 0x12d   :  { %v5579_v4 = vpop.permute.xlu1 %1462  ;;  %v1255_v18 = vsel %vm1206_vm5, %v1252_v33, %v7578_v24 }
 0x12e   :  { %7755 = vst [vmem:[#allocation44_spill] sm:$0xff] %v5579_v4  ;;  %v5589_v37 = vpop.permute.xlu0 %1460  ;;  %v5593_v4 = vor.u32 %v826_v21, %v825_v50  ;;  %v5630_v50 = vld [vmem:[%s7444_s0 + $0x38] sm:$0xff]  }
 0x12f   :  { %1794 = vrot.lane.b32.xlu1 %v1215_v8, %s4213_s18  ;;  %7759 = vst [vmem:[#allocation41_spill] sm:$0xff] %v5589_v37  ;;  %v5602_v8 = vor.u32 %v733_v31, %v732_v52  ;;  %v5620_v52 = vld [vmem:[%s7444_s0 + $0xdc] sm:$0xff]   ;;  %7763 = vst [vmem:[#allocation125_spill] sm:$0xff] %v5630_v50  ;;  %v7765_v31 = vrot.slane %v5524_v28, 2 }
 0x130   :  { %1828 = vrot.lane.b32.xlu0 %v1253_v12, %s4213_s18  ;;  %v828_v37 = vsel %vm703_vm2, %v823_v32, %v5593_v4  ;;  %v944_v33 = vrot.slane %v5620_v52, 2 }
 0x131   :  { %v5595_v36 = vpop.permute.xlu1 %1466  ;;  %v735_v21 = vsel %vm703_vm2, %v5271_v55, %v5602_v8  ;;  %v904_v55 = vrot.slane %v5630_v50, 2 }
 0x132   :  { %v5604_v54 = vpop.permute.xlu0 %1464 }
 0x133   :  { %1544 = vrot.lane.b32.xlu1 %v824_v56, %s4208_s15 }
 0x134   :  { %1830 = vrot.lane.b32.xlu0 %v1255_v18, %s4213_s18 }
 0x135   :  { %v5608_v0 = vpop.permute.xlu1 %1470 }
 0x136   :  { %7760 = vst [vmem:[#allocation10_spill] sm:$0xff] %v5608_v0  ;;  %v5615_v56 = vpop.permute.xlu0 %1468 }
 0x137   :  { %1546 = vrot.lane.b32.xlu1 %v828_v37, %s4208_s15  ;;  %7761 = vst [vmem:[#allocation9_spill] sm:$0xff] %v5615_v56  ;;  %v945_v37 = vsel %vm892_vm3, %v7765_v31, %v944_v33  ;;  %v1043_v31 = vrot.slane %v7758_v53, 3  ;;  %v7797_v56 = vld [vmem:[#allocation47_spill] sm:$0xff] }
 0x138   :  { %1510 = vrot.lane.b32.xlu0 %v735_v21, %s4208_s15  ;;  %v1148_v62 = vrot.slane %v7797_v56, 3 }
 0x139   :  { %v5623_v32 = vpop.permute.xlu1 %1474  ;;  %v1044_v53 = vor.u32 %v1043_v31, %v1042_v25 }
 0x13a   :  { %7762 = vst [vmem:[#allocation124_spill] sm:$0xff] %v5623_v32  ;;  %v5633_v12 = vpop.permute.xlu0 %1472  ;;  %v5651_v32 = vld [vmem:[%s7444_s0 + $0xe4] sm:$0xff]  }
 0x13b   :  { %1616 = vrot.lane.b32.xlu1 %v943_v30, %s4209_s26  ;;  %7764 = vst [vmem:[#allocation126_spill] sm:$0xff] %v5633_v12  ;;  %v7767_v30 = vrot.slane %v5494_v41, 2  ;;  %v7771_v27 = vrot.slane %v5651_v32, 2  ;;  %v1045_v25 = vsel %vm1017_vm4, %v5533_v57, %v1044_v53  ;;  %v1216_v57 = vrot.slane %v5630_v50, 3 }
 0x13c   :  { %1580 = vrot.lane.b32.xlu0 %v5512_v47, %s4209_s26 }
 0x13d   :  { %v5638_v18 = vpop.permute.xlu1 %1478  ;;  %v905_v21 = vsel %vm892_vm3, %v7767_v30, %v904_v55  ;;  %v5663_v30 = vld [vmem:[%s7444_s0 + $0x40] sm:$0xff]  }
 0x13e   :  { %7766 = vst [vmem:[#allocation127_spill] sm:$0xff] %v5638_v18  ;;  %v5646_v24 = vpop.permute.xlu0 %1476  ;;  %v1135_v18 = vrot.slane %v7753_v1, 2 }
 0x13f   :  { %1618 = vrot.lane.b32.xlu1 %v945_v37, %s4209_s26  ;;  %7768 = vst [vmem:[#allocation128_spill] sm:$0xff] %v5646_v24  ;;  %v7580_v24 = vrot.slane %v5663_v30, 2 }
 0x140   :  { %1582 = vrot.lane.b32.xlu0 %v905_v21, %s4209_s26  ;;  %v1137_v29 = vor.u32 %v1136_v51, %v1135_v18  ;;  %v7776_v51 = vld [vmem:[#allocation11_spill] sm:$0xff] }
 0x141   :  { %v5656_v47 = vpop.permute.xlu1 %1482  ;;  %v5685_v10 = vsel %vm892_vm3, %v904_v55, %v7580_v24  ;;  %v1047_v18 = vrot.slane %v7776_v51, 3 }
 0x142   :  { %7769 = vst [vmem:[#allocation129_spill] sm:$0xff] %v5656_v47  ;;  %v5668_v1 = vpop.permute.xlu0 %1480  ;;  %v5673_v47 = vsel %vm892_vm3, %v944_v33, %v7771_v27  ;;  %v7775_v33 = vld [vmem:[#allocation17_spill] sm:$0xff] }
 0x143   :  { %1688 = vrot.lane.b32.xlu1 %v945_v37, %s4210_s7  ;;  %7770 = vst [vmem:[#allocation130_spill] sm:$0xff] %v5668_v1  ;;  %v7772_v37 = vld [vmem:[#allocation50_spill] sm:$0xff]  ;;  %v1046_v27 = vrot.slane %v7775_v33, 2 }
 0x144   :  { %v1139_v46 = vrot.slane %v7772_v37, 2  ;;  %1652 = vrot.lane.b32.xlu0 %v905_v21, %s4210_s7 }
 0x145   :  { %v5677_v12 = vpop.permute.xlu1 %1486  ;;  %v5702_v55 = vor.u32 %v1047_v18, %v1046_v27  ;;  %v7782_v27 = vrot.slane %v5524_v28, 3  ;;  %v7582_v28 = vrot.slane %v5663_v30, 3 }
 0x146   :  { %7774 = vst [vmem:[#allocation50_spill] sm:$0xff] %v5677_v12  ;;  %v5689_v1 = vpop.permute.xlu0 %1484  ;;  %v1138_v12 = vsel %vm1017_vm4, %v5555_v22, %v1137_v29  ;;  %v5693_v60 = vor.u32 %v1140_v15, %v1139_v46  ;;  %v1256_v15 = vrot.slane %v5620_v52, 3  ;;  %v829_v52 = vrot.slane %v7772_v37, 1 }
 0x147   :  { %1690 = vrot.lane.b32.xlu1 %v5673_v47, %s4210_s7  ;;  %7777 = vst [vmem:[#allocation45_spill] sm:$0xff] %v5689_v1  ;;  %v1049_v22 = vsel %vm1017_vm4, %v1044_v53, %v5702_v55  ;;  %v7790_v1 = vld [vmem:[#allocation12_spill] sm:$0xff] }
 0x148   :  { %1654 = vrot.lane.b32.xlu0 %v5685_v10, %s4210_s7  ;;  %v1142_v24 = vsel %vm1017_vm4, %v1137_v29, %v5693_v60  ;;  %v1257_v18 = vsel %vm1206_vm5, %v7782_v27, %v1256_v15  ;;  %v736_v27 = vrot.slane %v7775_v33, 1  ;;  %v737_v29 = vrot.slane %v7776_v51, 2 }
 0x149   :  { %v5695_v21 = vpop.permute.xlu1 %1490  ;;  %v1219_v33 = vsel %vm1206_vm5, %v1216_v57, %v7582_v28  ;;  %v5811_v28 = vld [vmem:[%s7444_s0 + $0xf4] sm:$0xff]  }
 0x14a   :  { %7778 = vst [vmem:[#allocation17_spill] sm:$0xff] %v5695_v21  ;;  %v5704_v31 = vpop.permute.xlu0 %1488  ;;  %v738_v51 = vor.u32 %v737_v29, %v736_v27 }
 0x14b   :  { %1760 = vrot.lane.b32.xlu1 %v1138_v12, %s4212_s1  ;;  %7779 = vst [vmem:[#allocation11_spill] sm:$0xff] %v5704_v31 }
 0x14c   :  { %1724 = vrot.lane.b32.xlu0 %v1045_v25, %s4212_s1 }
 0x14d   :  { %v5709_v46 = vpop.permute.xlu1 %1494 }
 0x14e   :  { %7780 = vst [vmem:[#allocation131_spill] sm:$0xff] %v5709_v46  ;;  %v5716_v12 = vpop.permute.xlu0 %1492  ;;  %v830_v46 = vrot.slane %v7773_v44, 2  ;;  %v7786_v44 = vrot.slane %v5651_v32, 3 }
 0x14f   :  { %1762 = vrot.lane.b32.xlu1 %v1142_v24, %s4212_s1  ;;  %7781 = vst [vmem:[#allocation132_spill] sm:$0xff] %v5716_v12  ;;  %v7784_v24 = vrot.slane %v5494_v41, 3 }
 0x150   :  { %1726 = vrot.lane.b32.xlu0 %v1049_v22, %s4212_s1  ;;  %v1259_v37 = vsel %vm1206_vm5, %v1256_v15, %v7786_v44  ;;  %v7787_v22 = vld [vmem:[#allocation48_spill] sm:$0xff]  ;;  %v741_v15 = vrot.slane %v7790_v1, 2 }
 0x151   :  { %v5724_v25 = vpop.permute.xlu1 %1498  ;;  %v1217_v53 = vsel %vm1206_vm5, %v7784_v24, %v1216_v57  ;;  %v833_v21 = vrot.slane %v7787_v22, 1  ;;  %v7789_v24 = vld [vmem:[#allocation14_spill] sm:$0xff]  ;;  %v739_v57 = vsel %vm703_vm2, %v5602_v8, %v738_v51  ;;  %v5779_v8 = vld [vmem:[%s7444_s0 + $0xec] sm:$0xff]  }
 0x152   :  { %7783 = vst [vmem:[#allocation133_spill] sm:$0xff] %v5724_v25  ;;  %v5734_v12 = vpop.permute.xlu0 %1496  ;;  %v831_v25 = vor.u32 %v830_v46, %v829_v52  ;;  %v1050_v43 = vrot.slane %v7789_v24, 2 }
 0x153   :  { %1832 = vrot.lane.b32.xlu1 %v1257_v18, %s4213_s18  ;;  %7785 = vst [vmem:[#allocation134_spill] sm:$0xff] %v5734_v12  ;;  %v7788_v18 = vld [vmem:[#allocation43_spill] sm:$0xff]  ;;  %v740_v12 = vrot.slane %v7789_v24, 1  ;;  %v1054_v24 = vrot.slane %v7798_v59, 2 }
 0x154   :  { %v834_v31 = vrot.slane %v7788_v18, 2  ;;  %1796 = vrot.lane.b32.xlu0 %v1217_v53, %s4213_s18  ;;  %v832_v52 = vsel %vm703_vm2, %v5593_v4, %v831_v25  ;;  %v1144_v14 = vrot.slane %v7788_v18, 3 }
 0x155   :  { %v5741_v41 = vpop.permute.xlu1 %1502  ;;  %v5762_v29 = vor.u32 %v741_v15, %v740_v12  ;;  %v7793_v15 = vrot.slane %v5651_v32, 2 }
 0x156   :  { %v5750_v46 = vpop.permute.xlu0 %1500  ;;  %v5754_v44 = vor.u32 %v834_v31, %v833_v21  ;;  %v948_v31 = vrot.slane %v5779_v8, 2 }
 0x157   :  { %1834 = vrot.lane.b32.xlu1 %v1259_v37, %s4213_s18  ;;  %v743_v4 = vsel %vm703_vm2, %v738_v51, %v5762_v29 }
 0x158   :  { %1798 = vrot.lane.b32.xlu0 %v1219_v33, %s4213_s18  ;;  %v836_v27 = vsel %vm703_vm2, %v831_v25, %v5754_v44  ;;  %v5790_v25 = vld [vmem:[%s7444_s0 + $0x48] sm:$0xff]  }
 0x159   :  { %v5756_v50 = vpop.permute.xlu1 %1506  ;;  %v908_v33 = vrot.slane %v5790_v25, 2 }
 0x15a   :  { %7791 = vst [vmem:[#allocation48_spill] sm:$0xff] %v5756_v50  ;;  %v5764_v53 = vpop.permute.xlu0 %1504  ;;  %v7799_v50 = vld [vmem:[#allocation15_spill] sm:$0xff] }
 0x15b   :  { %1548 = vrot.lane.b32.xlu1 %v832_v52, %s4208_s15  ;;  %v949_v52 = vsel %vm892_vm3, %v7793_v15, %v948_v31  ;;  %v1051_v15 = vrot.slane %v7790_v1, 3  ;;  %v1055_v1 = vrot.slane %v7799_v50, 3 }
 0x15c   :  { %1512 = vrot.lane.b32.xlu0 %v739_v57, %s4208_s15 }
 0x15d   :  { %v5768_v37 = vpop.permute.xlu1 %1536  ;;  %v5855_v49 = vor.u32 %v1055_v1, %v1054_v24  ;;  %v7802_v24 = vld [vmem:[#allocation32_spill] sm:$0xff]  ;;  %v1220_v1 = vrot.slane %v5790_v25, 3  ;;  %v838_v25 = vrot.slane %v7797_v56, 2 }
 0x15e   :  { %v5774_v21 = vpop.permute.xlu0 %1508 }
 0x15f   :  { %1550 = vrot.lane.b32.xlu1 %v836_v27, %s4208_s15  ;;  %7792 = vst [vmem:[#allocation43_spill] sm:$0xff] %v5774_v21  ;;  %v1143_v21 = vrot.slane %v7787_v22, 2  ;;  %v7795_v22 = vrot.slane %v5811_v28, 2 }
 0x160   :  { %1514 = vrot.lane.b32.xlu0 %v743_v4, %s4208_s15 }
 0x161   :  { %v5782_v12 = vpop.permute.xlu1 %1572  ;;  %v5831_v18 = vsel %vm892_vm3, %v948_v31, %v7795_v22  ;;  %v1145_v0 = vor.u32 %v1144_v14, %v1143_v21  ;;  %v1052_v14 = vor.u32 %v1051_v15, %v1050_v43 }
 0x162   :  { %v5793_v51 = vpop.permute.xlu0 %1538 }
 0x163   :  { %1620 = vrot.lane.b32.xlu1 %v5673_v47, %s4209_s26  ;;  %v7794_v47 = vrot.slane %v5663_v30, 2  ;;  %v1146_v22 = vsel %vm1017_vm4, %v5693_v60, %v1145_v0  ;;  %v1053_v60 = vsel %vm1017_vm4, %v5702_v55, %v1052_v14 }
 0x164   :  { %1584 = vrot.lane.b32.xlu0 %v5685_v10, %s4209_s26 }
 0x165   :  { %v5798_v57 = vpop.permute.xlu1 %1574  ;;  %v909_v27 = vsel %vm892_vm3, %v7794_v47, %v908_v33  ;;  %v5821_v47 = vld [vmem:[%s7444_s0 + $0x50] sm:$0xff]  }
 0x166   :  { %v5806_v4 = vpop.permute.xlu0 %1608  ;;  %v7800_v34 = vrot.slane %v5821_v47, 2 }
 0x167   :  { %1622 = vrot.lane.b32.xlu1 %v949_v52, %s4209_s26 }
 0x168   :  { %1586 = vrot.lane.b32.xlu0 %v909_v27, %s4209_s26  ;;  %v5845_v31 = vsel %vm892_vm3, %v908_v33, %v7800_v34  ;;  %v7801_v34 = vld [vmem:[#allocation3_spill] sm:$0xff]  ;;  %v1864_v33 = vsel %vm1860_vm6, %v4277_v13, %v5005_v7  ;;  %v1898_v13 = vsel %vm1860_vm6, %v7802_v24, %v5103_v3 }
 0x169   :  { %v1645_v10 = vpop.permute.xlu1 %1644  ;;  %v1862_v43 = vsel %vm1860_vm6, %v7801_v34, %v4989_v17  ;;  %v1260_v17 = vrot.slane %v5779_v8, 3  ;;  %v1262_v8 = vrot.slane %v5811_v28, 3 }
 0x16a   :  { %v5826_v19 = vpop.permute.xlu0 %1610 }
 0x16b   :  { %1692 = vrot.lane.b32.xlu1 %v949_v52, %s4210_s7  ;;  %v7796_v52 = vld [vmem:[#allocation54_spill] sm:$0xff] }
 0x16c   :  { %v1147_v48 = vrot.slane %v7796_v52, 2  ;;  %1656 = vrot.lane.b32.xlu0 %v909_v27, %s4210_s7 }
 0x16d   :  { %v5835_v63 = vpop.permute.xlu1 %1646 }
 0x16e   :  { %v5847_v21 = vpop.permute.xlu0 %1680  ;;  %v5851_v27 = vor.u32 %v1148_v62, %v1147_v48  ;;  %v1935_v48 = vsel %vm1933_vm7, %v1862_v43, %v5180_v58 }
 0x16f   :  { %1694 = vrot.lane.b32.xlu1 %v5831_v18, %s4210_s7  ;;  %v2008_v7 = vsel %vm2006_vm8, %v1935_v48, %v5459_v20  ;;  %v837_v20 = vrot.slane %v7796_v52, 1  ;;  %v7804_v48 = vrot.slane %v5663_v30, 3 }
 0x170   :  { %1658 = vrot.lane.b32.xlu0 %v5845_v31, %s4210_s7  ;;  %v1150_v15 = vsel %vm1017_vm4, %v1145_v0, %v5851_v27  ;;  %v2081_v58 = vsel %vm2079_vm9, %v2008_v7, %v5750_v46  ;;  %v1057_v0 = vsel %vm1017_vm4, %v1052_v14, %v5855_v49  ;;  %v1937_v46 = vsel %vm1933_vm7, %v1864_v33, %v5174_v35 }
 0x171   :  { %v1717_v45 = vpop.permute.xlu1 %1716  ;;  %v2154_v3 = vsel %vm2152_vm10, %v2081_v58, %v5782_v12  ;;  %v7803_v14 = vrot.slane %v5651_v32, 3  ;;  %v1971_v12 = vsel %vm1933_vm7, %v1898_v13, %v5300_v26  ;;  %v1221_v35 = vsel %vm1206_vm5, %v7804_v48, %v1220_v1  ;;  %v7805_v13 = vld [vmem:[#allocation51_spill] sm:$0xff]  ;;  %v7806_v58 = vld [vmem:[#allocation49_spill] sm:$0xff] }
 0x172   :  { %v5868_v62 = vpop.permute.xlu0 %1682  ;;  %v1263_v26 = vsel %vm1206_vm5, %v1260_v17, %v1262_v8  ;;  %v839_v30 = vor.u32 %v838_v25, %v837_v20  ;;  %v745_v33 = vrot.slane %v7799_v50, 2  ;;  %v841_v7 = vrot.slane %v7805_v13, 1  ;;  %v7808_v25 = vld [vmem:[#allocation16_spill] sm:$0xff] }
 0x173   :  { %1764 = vrot.lane.b32.xlu1 %v1146_v22, %s4212_s1  ;;  %v2227_v22 = vsel %vm2225_vm11, %v2154_v3, %v1645_v10  ;;  %v1261_v43 = vsel %vm1206_vm5, %v7803_v14, %v1260_v17 }
 0x174   :  { %1728 = vrot.lane.b32.xlu0 %v1053_v60, %s4212_s1  ;;  %v2010_v60 = vsel %vm2006_vm8, %v1937_v46, %v5450_v38  ;;  %v2300_v52 = vsel %vm2298_vm12, %v2227_v22, %v1717_v45  ;;  %v1222_v38 = vrot.slane %v5821_v47, 3 }
 0x175   :  { %v1719_v55 = vpop.permute.xlu1 %1718  ;;  %v2083_v10 = vsel %vm2079_vm9, %v2010_v60, %v5741_v41  ;;  %v744_v41 = vrot.slane %v7798_v59, 1 }
 0x176   :  { %v1753_v34 = vpop.permute.xlu0 %1752  ;;  %v2156_v45 = vsel %vm2152_vm10, %v2083_v10, %v5798_v57  ;;  %v842_v57 = vrot.slane %v7806_v58, 2  ;;  %v5982_v10 = vld [vmem:[%s7444_s0 + $0xfc] sm:$0xff]  }
 0x177   :  { %1766 = vrot.lane.b32.xlu1 %v1150_v15, %s4212_s1  ;;  %v2044_v15 = vsel %vm2006_vm8, %v1971_v12, %v5604_v54  ;;  %v2229_v17 = vsel %vm2225_vm11, %v2156_v45, %v5835_v63  ;;  %v5993_v45 = vld [vmem:[%s7444_s0 + $0x58] sm:$0xff]  }
 0x178   :  { %1730 = vrot.lane.b32.xlu0 %v1057_v0, %s4212_s1  ;;  %v1900_v0 = vsel %vm1860_vm6, %v4493_v40, %v5097_v11  ;;  %v2117_v59 = vsel %vm2079_vm9, %v2044_v15, %v5768_v37  ;;  %v2302_v50 = vsel %vm2298_vm12, %v2229_v17, %v1719_v55  ;;  %v1223_v40 = vsel %vm1206_vm5, %v1220_v1, %v1222_v38 }
 0x179   :  { %v1789_v56 = vpop.permute.xlu1 %1788  ;;  %v1973_v54 = vsel %vm1933_vm7, %v1900_v0, %v5285_v39  ;;  %v2190_v63 = vsel %vm2152_vm10, %v2117_v59, %v5806_v4  ;;  %v746_v37 = vor.u32 %v745_v33, %v744_v41  ;;  %v7807_v39 = vld [vmem:[#allocation18_spill] sm:$0xff]  ;;  %v749_v4 = vrot.slane %v7808_v25, 2 }
 0x17a   :  { %v2373_v32 = vsel %vm2371_vm13, %v2300_v52, %v1789_v56  ;;  %v1755_v24 = vpop.permute.xlu0 %1754  ;;  %v2263_v11 = vsel %vm2225_vm11, %v2190_v63, %v5847_v21  ;;  %v748_v55 = vrot.slane %v7807_v39, 1  ;;  %v2046_v46 = vsel %vm2006_vm8, %v1973_v54, %v5595_v36 }
 0x17b   :  { %1836 = vrot.lane.b32.xlu1 %v1261_v43, %s4213_s18  ;;  %3997 = vmatprep.mubr.msk.bf16.mxu0 %vm2466_vm14, %v2373_v32  ;;  %v2336_v22 = vsel %vm2298_vm12, %v2263_v11, %v1753_v34  ;;  %v840_v1 = vsel %vm703_vm2, %v5754_v44, %v839_v30  ;;  %v5950_v43 = vor.u32 %v842_v57, %v841_v7  ;;  %v952_v32 = vrot.slane %v5982_v10, 2  ;;  %v6012_v57 = vld [vmem:[%s7444_s0 + $0x104] sm:$0xff]  }
 0x17c   :  { %1800 = vrot.lane.b32.xlu0 %v1221_v35, %s4213_s18  ;;  %v2119_v21 = vsel %vm2079_vm9, %v2046_v46, %v5793_v51  ;;  %v747_v44 = vsel %vm703_vm2, %v5762_v29, %v746_v37  ;;  %v5966_v51 = vor.u32 %v749_v4, %v748_v55  ;;  %v7809_v33 = vrot.slane %v5811_v28, 2  ;;  %v7811_v11 = vld [vmem:[#allocation58_spill] sm:$0xff]  ;;  %v7812_v55 = vld [vmem:[#allocation52_spill] sm:$0xff] }
 0x17d   :  { %v1791_v3 = vpop.permute.xlu1 %1790  ;;  %v2192_v52 = vsel %vm2152_vm10, %v2119_v21, %v5826_v19  ;;  %v844_v19 = vsel %vm703_vm2, %v839_v30, %v5950_v43  ;;  %v912_v30 = vrot.slane %v5993_v45, 2  ;;  %v954_v0 = vrot.slane %v6012_v57, 2  ;;  %v7814_v21 = vld [vmem:[#allocation20_spill] sm:$0xff] }
 0x17e   :  { %v2375_v20 = vsel %vm2371_vm13, %v2302_v50, %v1791_v3  ;;  %v1825_v14 = vpop.permute.xlu0 %1824  ;;  %v2265_v36 = vsel %vm2225_vm11, %v2192_v52, %v5868_v62  ;;  %v751_v29 = vsel %vm703_vm2, %v746_v37, %v5966_v51  ;;  %v953_v15 = vsel %vm892_vm3, %v7809_v33, %v952_v32  ;;  %v6022_v3 = vld [vmem:[%s7444_s0 + $0x60] sm:$0xff]  }
 0x17f   :  { %1838 = vrot.lane.b32.xlu1 %v1263_v26, %s4213_s18  ;;  %3998 = vmatmul.mubr.msk.bf16.vlgmr.msra.gmra.mrb[0].mxu0 %vm2466_vm14, %v2375_v20  ;;  %v2409_v12 = vsel %vm2371_vm13, %v2336_v22, %v1825_v14  ;;  %v2338_v34 = vsel %vm2298_vm12, %v2265_v36, %v1755_v24  ;;  %v1151_v59 = vrot.slane %v7805_v13, 2  ;;  %v1152_v50 = vrot.slane %v7806_v58, 3  ;;  %v7813_v14 = vld [vmem:[#allocation25_spill] sm:$0xff] }
 0x180   :  { %1802 = vrot.lane.b32.xlu0 %v1223_v40, %s4213_s18  ;;  %4033 = vmatprep.mubr.msk.bf16.mxu1 %vm2466_vm14, %v2409_v12  ;;  %v914_v54 = vrot.slane %v6022_v3, 2  ;;  %v1058_v63 = vrot.slane %v7807_v39, 2  ;;  %v1059_v20 = vrot.slane %v7808_v25, 3  ;;  %v6032_v13 = vsel %vm892_vm3, %v952_v32, %v954_v0 }
 0x181   :  { %v5955_v60 = vpop.permute.xlu1 %1540  ;;  %v1153_v58 = vor.u32 %v1152_v50, %v1151_v59  ;;  %v1155_v37 = vrot.slane %v7811_v11, 2  ;;  %v1156_v4 = vrot.slane %v7812_v55, 3  ;;  %v1866_v22 = vsel %vm1860_vm6, %v4240_v2, %v4980_v16 }
 0x182   :  { %v1827_v56 = vpop.permute.xlu0 %1826  ;;  %v6045_v39 = vsel %vm892_vm3, %v912_v30, %v914_v54  ;;  %v1060_v25 = vor.u32 %v1059_v20, %v1058_v63  ;;  %v1063_v12 = vrot.slane %v7814_v21, 3  ;;  %v1939_v52 = vsel %vm1933_vm7, %v1866_v22, %v5188_v5 }
 0x183   :  { %1552 = vrot.lane.b32.xlu1 %v840_v1, %s4208_s15  ;;  %v2411_v48 = vsel %vm2371_vm13, %v2338_v34, %v1827_v56  ;;  %v1062_v1 = vrot.slane %v7813_v14, 2  ;;  %v1154_v2 = vsel %vm1017_vm4, %v5851_v27, %v1153_v58  ;;  %v6055_v16 = vor.u32 %v1156_v4, %v1155_v37  ;;  %v7820_v37 = vld [vmem:[#allocation109_spill] sm:$0xff] }
 0x184   :  { %1516 = vrot.lane.b32.xlu0 %v747_v44, %s4208_s15  ;;  %4034 = vmatmul.mubr.msk.bf16.vlgmr.msra.gmra.mrb[0].mxu1 %vm2466_vm14, %v2411_v48  ;;  %v2012_v44 = vsel %vm2006_vm8, %v1939_v52, %v5474_v42  ;;  %v1868_v5 = vsel %vm1860_vm6, %v5306_v6, %v4996_v23  ;;  %v1061_v27 = vsel %vm1017_vm4, %v5855_v49, %v1060_v25  ;;  %v1264_v23 = vrot.slane %v5982_v10, 3  ;;  %v7815_v6 = vld [vmem:[#allocation33_spill] sm:$0xff] }
 0x185   :  { %v1577_v35 = vpop.permute.xlu1 %1576  ;;  %v2085_v56 = vsel %vm2079_vm9, %v2012_v44, %v5764_v53  ;;  %v6070_v48 = vor.u32 %v1063_v12, %v1062_v1  ;;  %v1941_v42 = vsel %vm1933_vm7, %v1868_v5, %v5182_v9  ;;  %v1158_v32 = vsel %vm1017_vm4, %v1153_v58, %v6055_v16  ;;  %v7819_v58 = vld [vmem:[#allocation79_spill] sm:$0xff] }
 0x186   :  { %v5977_v62 = vpop.permute.xlu0 %1542  ;;  %v1224_v9 = vrot.slane %v5993_v45, 3  ;;  %v845_v63 = vrot.slane %v7811_v11, 1  ;;  %v846_v20 = vrot.slane %v7812_v55, 2  ;;  %v1904_v4 = vsel %vm1860_vm6, %v7820_v37, %v7819_v58  ;;  %v7822_v12 = vld [vmem:[#allocation35_spill] sm:$0xff] }
 0x187   :  { %1554 = vrot.lane.b32.xlu1 %v844_v19, %s4208_s15  ;;  %v2158_v19 = vsel %vm2152_vm10, %v2085_v56, %v1577_v35  ;;  %v1902_v35 = vsel %vm1860_vm6, %v7815_v6, %v5111_v61  ;;  %v1266_v61 = vrot.slane %v6012_v57, 3  ;;  %v1065_v45 = vsel %vm1017_vm4, %v1060_v25, %v6070_v48  ;;  %v7823_v56 = vld [vmem:[#allocation10_spill] sm:$0xff] }
 0x188   :  { %1518 = vrot.lane.b32.xlu0 %v751_v29, %s4208_s15  ;;  %v1265_v25 = vsel %vm1206_vm5, %v1262_v8, %v1264_v23  ;;  %v1977_v52 = vsel %vm1933_vm7, %v1904_v4, %v7822_v12  ;;  %v1225_v44 = vsel %vm1206_vm5, %v1222_v38, %v1224_v9  ;;  %v752_v38 = vrot.slane %v7813_v14, 1  ;;  %v6192_v4 = vld [vmem:[%s7444_s0 + $0x68] sm:$0xff]   ;;  %v6211_v12 = vld [vmem:[%s7444_s0 + $0x114] sm:$0xff]  }
 0x189   :  { %v5985_v26 = vpop.permute.xlu1 %1578  ;;  %v1267_v8 = vsel %vm1206_vm5, %v1264_v23, %v1266_v61  ;;  %v2050_v5 = vsel %vm2006_vm8, %v1977_v52, %v7823_v56  ;;  %v958_v52 = vrot.slane %v6211_v12, 2 }
 0x18a   :  { %v5996_v41 = vpop.permute.xlu0 %1612 }
 0x18b   :  { %1624 = vrot.lane.b32.xlu1 %v5831_v18, %s4209_s26  ;;  %v7810_v18 = vrot.slane %v5821_v47, 2  ;;  %v847_v47 = vor.u32 %v846_v20, %v845_v63 }
 0x18c   :  { %1588 = vrot.lane.b32.xlu0 %v5845_v31, %s4209_s26 }
 0x18d   :  { %v1649_v17 = vpop.permute.xlu1 %1648  ;;  %v913_v24 = vsel %vm892_vm3, %v7810_v18, %v912_v30  ;;  %v7816_v30 = vld [vmem:[#allocation112_spill] sm:$0xff] }
 0x18e   :  { %v6007_v7 = vpop.permute.xlu0 %1614  ;;  %v2231_v53 = vsel %vm2225_vm11, %v2158_v19, %v1649_v17  ;;  %v2014_v49 = vsel %vm2006_vm8, %v1941_v42, %v7816_v30  ;;  %v7817_v18 = vld [vmem:[#allocation100_spill] sm:$0xff]  ;;  %v7826_v30 = vld [vmem:[#allocation23_spill] sm:$0xff] }
 0x18f   :  { %1626 = vrot.lane.b32.xlu1 %v953_v15, %s4209_s26  ;;  %v1975_v17 = vsel %vm1933_vm7, %v1902_v35, %v7817_v18  ;;  %v7824_v42 = vld [vmem:[#allocation56_spill] sm:$0xff] }
 0x190   :  { %1590 = vrot.lane.b32.xlu0 %v913_v24, %s4209_s26 }
 0x191   :  { %v1651_v31 = vpop.permute.xlu1 %1650 }
 0x192   :  { %v6027_v40 = vpop.permute.xlu0 %1684 }
 0x193   :  { %1696 = vrot.lane.b32.xlu1 %v953_v15, %s4210_s7 }
 0x194   :  { %1660 = vrot.lane.b32.xlu0 %v913_v24, %s4210_s7  ;;  %v7818_v24 = vld [vmem:[#allocation48_spill] sm:$0xff] }
 0x195   :  { %v1721_v46 = vpop.permute.xlu1 %1720  ;;  %v2087_v59 = vsel %vm2079_vm9, %v2014_v49, %v7818_v24  ;;  %v756_v49 = vrot.slane %v7826_v30, 1 }
 0x196   :  { %v6051_v36 = vpop.permute.xlu0 %1686  ;;  %v2304_v33 = vsel %vm2298_vm12, %v2231_v53, %v1721_v46  ;;  %v2160_v50 = vsel %vm2152_vm10, %v2087_v59, %v5985_v26  ;;  %v7821_v46 = vld [vmem:[#allocation9_spill] sm:$0xff]  ;;  %v849_v53 = vrot.slane %v7824_v42, 1 }
 0x197   :  { %1698 = vrot.lane.b32.xlu1 %v6032_v13, %s4210_s7  ;;  %v2048_v22 = vsel %vm2006_vm8, %v1975_v17, %v7821_v46  ;;  %v2233_v26 = vsel %vm2225_vm11, %v2160_v50, %v1651_v31  ;;  %v848_v17 = vsel %vm703_vm2, %v5950_v43, %v847_v47  ;;  %v916_v46 = vrot.slane %v6192_v4, 2 }
 0x198   :  { %1662 = vrot.lane.b32.xlu0 %v6045_v39, %s4210_s7  ;;  %v2121_v11 = vsel %vm2079_vm9, %v2048_v22, %v5955_v60  ;;  %v1226_v60 = vrot.slane %v6022_v3, 3 }
 0x199   :  { %v1723_v34 = vpop.permute.xlu1 %1722  ;;  %v2194_v31 = vsel %vm2152_vm10, %v2121_v11, %v5996_v41  ;;  %v753_v41 = vrot.slane %v7814_v21, 2 }
 0x19a   :  { %v1757_v29 = vpop.permute.xlu0 %1756  ;;  %v2306_v55 = vsel %vm2298_vm12, %v2233_v26, %v1723_v34  ;;  %v2267_v34 = vsel %vm2225_vm11, %v2194_v31, %v6027_v40  ;;  %v2123_v40 = vsel %vm2079_vm9, %v2050_v5, %v5977_v62  ;;  %v1227_v21 = vsel %vm1206_vm5, %v1224_v9, %v1226_v60  ;;  %v7830_v5 = vld [vmem:[#allocation30_spill] sm:$0xff] }
 0x19b   :  { %1768 = vrot.lane.b32.xlu1 %v1154_v2, %s4212_s1  ;;  %v2340_v19 = vsel %vm2298_vm12, %v2267_v34, %v1757_v29  ;;  %v2196_v14 = vsel %vm2152_vm10, %v2123_v40, %v6007_v7  ;;  %v754_v62 = vor.u32 %v753_v41, %v752_v38  ;;  %v7828_v34 = vld [vmem:[#allocation62_spill] sm:$0xff]  ;;  %v7829_v38 = vld [vmem:[#allocation57_spill] sm:$0xff] }
 0x19c   :  { %1732 = vrot.lane.b32.xlu0 %v1061_v27, %s4212_s1  ;;  %v2269_v29 = vsel %vm2225_vm11, %v2196_v14, %v6051_v36  ;;  %v1164_v41 = vrot.slane %v7829_v38, 3  ;;  %v7833_v14 = vld [vmem:[#allocation29_spill] sm:$0xff] }
 0x19d   :  { %v1793_v15 = vpop.permute.xlu1 %1792  ;;  %v755_v36 = vsel %vm703_vm2, %v5966_v51, %v754_v62  ;;  %v6181_v51 = vld [vmem:[%s7444_s0 + $0x10c] sm:$0xff]  }
 0x19e   :  { %v2377_v10 = vsel %vm2371_vm13, %v2304_v33, %v1793_v15  ;;  %v1759_v1 = vpop.permute.xlu0 %1758  ;;  %v7827_v33 = vld [vmem:[#allocation19_spill] sm:$0xff]  ;;  %v956_v58 = vrot.slane %v6181_v51, 2 }
 0x19f   :  { %1770 = vrot.lane.b32.xlu1 %v1158_v32, %s4212_s1  ;;  %4001 = vmatprep.mubr.msk.bf16.mxu0 %vm2466_vm14, %v2377_v10  ;;  %v7825_v32 = vld [vmem:[#allocation53_spill] sm:$0xff]  ;;  %v757_v15 = vrot.slane %v7827_v33, 2  ;;  %v2342_v7 = vsel %vm2298_vm12, %v2269_v29, %v1759_v1 }
 0x1a0   :  { %1734 = vrot.lane.b32.xlu0 %v1065_v45, %s4212_s1  ;;  %v850_v23 = vrot.slane %v7825_v32, 2  ;;  %v957_v26 = vsel %vm892_vm3, %v954_v0, %v956_v58  ;;  %v1159_v0 = vrot.slane %v7824_v42, 2  ;;  %v1160_v11 = vrot.slane %v7825_v32, 3  ;;  %v7832_v32 = vld [vmem:[#allocation81_spill] sm:$0xff] }
 0x1a1   :  { %v1795_v2 = vpop.permute.xlu1 %1794  ;;  %v6166_v10 = vor.u32 %v757_v15, %v756_v49  ;;  %v7834_v49 = vld [vmem:[#allocation65_spill] sm:$0xff] }
 0x1a2   :  { %v2379_v28 = vsel %vm2371_vm13, %v2306_v55, %v1795_v2  ;;  %v1829_v27 = vpop.permute.xlu0 %1828  ;;  %v6156_v24 = vor.u32 %v850_v23, %v849_v53  ;;  %v1066_v2 = vrot.slane %v7826_v30, 2  ;;  %v4171_v53 = vld [vmem:[%s7444_s0 + $0xc4] sm:$0xff]  }
 0x1a3   :  { %1840 = vrot.lane.b32.xlu1 %v1265_v25, %s4213_s18  ;;  %4002 = vmatmul.mubr.msk.bf16.gmra.mrb[4].mxu0 %vm2466_vm14, %v2379_v28  ;;  %v2413_v6 = vsel %vm2371_vm13, %v2340_v19, %v1829_v27  ;;  %v759_v63 = vsel %vm703_vm2, %v754_v62, %v6166_v10  ;;  %v6233_v28 = vsel %vm892_vm3, %v956_v58, %v958_v52  ;;  %v1070_v19 = vrot.slane %v7830_v5, 2  ;;  %v7831_v27 = vld [vmem:[#allocation21_spill] sm:$0xff]  ;;  %v7839_v58 = vld [vmem:[#allocation114_spill] sm:$0xff] }
 0x1a4   :  { %1804 = vrot.lane.b32.xlu0 %v1225_v44, %s4213_s18  ;;  %4037 = vmatprep.mubr.msk.bf16.mxu1 %vm2466_vm14, %v2413_v6  ;;  %v852_v43 = vsel %vm703_vm2, %v847_v47, %v6156_v24  ;;  %v1067_v44 = vrot.slane %v7827_v33, 3  ;;  %v1163_v47 = vrot.slane %v7828_v34, 2  ;;  %v1071_v42 = vrot.slane %v7831_v27, 3  ;;  %v7835_v33 = vld [vmem:[#allocation38_spill] sm:$0xff] }
 0x1a5   :  { %v6139_v35 = vpop.permute.xlu1 %1544  ;;  %v1906_v23 = vsel %vm1860_vm6, %v4171_v53, %v7832_v32  ;;  %v1872_v15 = vsel %vm1860_vm6, %v7835_v33, %v7834_v49  ;;  %v7843_v53 = vld [vmem:[#allocation113_spill] sm:$0xff]  ;;  %v7846_v33 = vld [vmem:[#allocation43_spill] sm:$0xff] }
 0x1a6   :  { %v1831_v18 = vpop.permute.xlu0 %1830  ;;  %v1068_v6 = vor.u32 %v1067_v44, %v1066_v2  ;;  %v6256_v30 = vor.u32 %v1164_v41, %v1163_v47  ;;  %v7842_v44 = vld [vmem:[#allocation101_spill] sm:$0xff] }
 0x1a7   :  { %1842 = vrot.lane.b32.xlu1 %v1267_v8, %s4213_s18  ;;  %v2415_v9 = vsel %vm2371_vm13, %v2342_v7, %v1831_v18  ;;  %v1161_v8 = vor.u32 %v1160_v11, %v1159_v0  ;;  %v4172_v7 = vld [vmem:[%s7444_s0 + $0x20] sm:$0xff]   ;;  %v7841_v0 = vld [vmem:[#allocation95_spill] sm:$0xff] }
 0x1a8   :  { %1806 = vrot.lane.b32.xlu0 %v1227_v21, %s4213_s18  ;;  %4038 = vmatmul.mubr.msk.bf16.gmra.mrb[4].mxu1 %vm2466_vm14, %v2415_v9  ;;  %v1979_v21 = vsel %vm1933_vm7, %v1906_v23, %v7833_v14  ;;  %v7836_v18 = vld [vmem:[#allocation66_spill] sm:$0xff]  ;;  %v7844_v23 = vld [vmem:[#allocation115_spill] sm:$0xff] }
 0x1a9   :  { %v6159_v59 = vpop.permute.xlu1 %1546  ;;  %v1162_v62 = vsel %vm1017_vm4, %v6055_v16, %v1161_v8  ;;  %v7837_v9 = vld [vmem:[#allocation126_spill] sm:$0xff]  ;;  %v7838_v16 = vld [vmem:[#allocation80_spill] sm:$0xff]  ;;  %v1166_v49 = vsel %vm1017_vm4, %v1161_v8, %v6256_v30 }
 0x1aa   :  { %v6168_v50 = vpop.permute.xlu0 %1510 }
 0x1ab   :  { %1556 = vrot.lane.b32.xlu1 %v848_v17, %s4208_s15  ;;  %v1870_v17 = vsel %vm1860_vm6, %v4172_v7, %v7836_v18 }
 0x1ac   :  { %1520 = vrot.lane.b32.xlu0 %v755_v36, %s4208_s15  ;;  %v2052_v36 = vsel %vm2006_vm8, %v1979_v21, %v7837_v9  ;;  %v1943_v11 = vsel %vm1933_vm7, %v1870_v17, %v7841_v0  ;;  %v1228_v17 = vrot.slane %v6192_v4, 3 }
 0x1ad   :  { %v1617_v45 = vpop.permute.xlu1 %1616  ;;  %v2125_v2 = vsel %vm2079_vm9, %v2052_v36, %v6139_v35  ;;  %v2016_v35 = vsel %vm2006_vm8, %v1943_v11, %v7844_v23  ;;  %v7848_v11 = vld [vmem:[#allocation55_spill] sm:$0xff] }
 0x1ae   :  { %v6176_v20 = vpop.permute.xlu0 %1580  ;;  %v2198_v41 = vsel %vm2152_vm10, %v2125_v2, %v1617_v45  ;;  %v7845_v45 = vld [vmem:[#allocation124_spill] sm:$0xff] }
 0x1af   :  { %1558 = vrot.lane.b32.xlu1 %v852_v43, %s4208_s15 }
 0x1b0   :  { %1522 = vrot.lane.b32.xlu0 %v759_v63, %s4208_s15  ;;  %v6268_v63 = vor.u32 %v1071_v42, %v1070_v19  ;;  %v1069_v19 = vsel %vm1017_vm4, %v6070_v48, %v1068_v6  ;;  %v1268_v42 = vrot.slane %v6181_v51, 3  ;;  %v2089_v48 = vsel %vm2079_vm9, %v2016_v35, %v7846_v33 }
 0x1b1   :  { %v6184_v37 = vpop.permute.xlu1 %1618 }
 0x1b2   :  { %v6195_v22 = vpop.permute.xlu0 %1582  ;;  %v1073_v7 = vsel %vm1017_vm4, %v1068_v6, %v6268_v63 }
 0x1b3   :  { %1628 = vrot.lane.b32.xlu1 %v6032_v13, %s4209_s26  ;;  %v917_v13 = vsel %vm892_vm3, %v914_v54, %v916_v46  ;;  %v6223_v54 = vld [vmem:[%s7444_s0 + $0x70] sm:$0xff]  }
 0x1b4   :  { %1592 = vrot.lane.b32.xlu0 %v6045_v39, %s4209_s26  ;;  %v918_v55 = vrot.slane %v6223_v54, 2 }
 0x1b5   :  { %v1689_v1 = vpop.permute.xlu1 %1688 }
 0x1b6   :  { %v6206_v25 = vpop.permute.xlu0 %1652  ;;  %v6250_v40 = vsel %vm892_vm3, %v916_v46, %v918_v55  ;;  %v1908_v46 = vsel %vm1860_vm6, %v7839_v58, %v7838_v16  ;;  %v2271_v14 = vsel %vm2225_vm11, %v2198_v41, %v1689_v1  ;;  %v2162_v1 = vsel %vm2152_vm10, %v2089_v48, %v6176_v20 }
 0x1b7   :  { %1630 = vrot.lane.b32.xlu1 %v957_v26, %s4209_s26  ;;  %v1981_v47 = vsel %vm1933_vm7, %v1908_v46, %v7842_v44  ;;  %v1270_v20 = vrot.slane %v6211_v12, 3 }
 0x1b8   :  { %1594 = vrot.lane.b32.xlu0 %v917_v13, %s4209_s26 }
 0x1b9   :  { %v6216_v39 = vpop.permute.xlu1 %1690 }
 0x1ba   :  { %v6228_v31 = vpop.permute.xlu0 %1654 }
 0x1bb   :  { %1700 = vrot.lane.b32.xlu1 %v957_v26, %s4210_s7  ;;  %v7840_v26 = vld [vmem:[#allocation94_spill] sm:$0xff] }
 0x1bc   :  { %1664 = vrot.lane.b32.xlu0 %v917_v13, %s4210_s7  ;;  %v1945_v13 = vsel %vm1933_vm7, %v1872_v15, %v7840_v26 }
 0x1bd   :  { %v1761_v56 = vpop.permute.xlu1 %1760  ;;  %v2018_v32 = vsel %vm2006_vm8, %v1945_v13, %v7843_v53  ;;  %v7847_v13 = vld [vmem:[#allocation59_spill] sm:$0xff] }
 0x1be   :  { %v1725_v29 = vpop.permute.xlu0 %1724  ;;  %v2344_v51 = vsel %vm2298_vm12, %v2271_v14, %v1761_v56  ;;  %v2235_v56 = vsel %vm2225_vm11, %v2162_v1, %v6206_v25  ;;  %v854_v25 = vrot.slane %v7829_v38, 2  ;;  %v2091_v16 = vsel %vm2079_vm9, %v2018_v32, %v6168_v50 }
 0x1bf   :  { %1702 = vrot.lane.b32.xlu1 %v6233_v28, %s4210_s7  ;;  %v2308_v4 = vsel %vm2298_vm12, %v2235_v56, %v1725_v29  ;;  %v2164_v46 = vsel %vm2152_vm10, %v2091_v16, %v6195_v22  ;;  %v1230_v50 = vrot.slane %v6223_v54, 3  ;;  %v1271_v22 = vsel %vm1206_vm5, %v1268_v42, %v1270_v20 }
 0x1c0   :  { %1666 = vrot.lane.b32.xlu0 %v6250_v40, %s4210_s7  ;;  %v2237_v38 = vsel %vm2225_vm11, %v2164_v46, %v6228_v31  ;;  %v760_v29 = vrot.slane %v7830_v5, 1  ;;  %v857_v0 = vrot.slane %v7847_v13, 1  ;;  %v858_v31 = vrot.slane %v7848_v11, 2 }
 0x1c1   :  { %v1763_v43 = vpop.permute.xlu1 %1762  ;;  %v1231_v5 = vsel %vm1206_vm5, %v1228_v17, %v1230_v50 }
 0x1c2   :  { %v1727_v21 = vpop.permute.xlu0 %1726  ;;  %v6364_v23 = vor.u32 %v858_v31, %v857_v0  ;;  %v7856_v0 = vld [vmem:[#allocation103_spill] sm:$0xff] }
 0x1c3   :  { %1772 = vrot.lane.b32.xlu1 %v1162_v62, %s4212_s1  ;;  %v2054_v62 = vsel %vm2006_vm8, %v1981_v47, %v7845_v45  ;;  %v2310_v3 = vsel %vm2298_vm12, %v2237_v38, %v1727_v21  ;;  %v7849_v47 = vld [vmem:[#allocation26_spill] sm:$0xff] }
 0x1c4   :  { %v2127_v18 = vsel %vm2079_vm9, %v2054_v62, %v6159_v59  ;;  %1736 = vrot.lane.b32.xlu0 %v1069_v19, %s4212_s1  ;;  %v1269_v59 = vsel %vm1206_vm5, %v1266_v61, %v1268_v42  ;;  %v764_v41 = vrot.slane %v7849_v47, 1  ;;  %v7850_v19 = vld [vmem:[#allocation24_spill] sm:$0xff] }
 0x1c5   :  { %v1833_v15 = vpop.permute.xlu1 %1832  ;;  %v2200_v9 = vsel %vm2152_vm10, %v2127_v18, %v6184_v37  ;;  %v853_v37 = vrot.slane %v7828_v34, 1  ;;  %v1229_v34 = vsel %vm1206_vm5, %v1226_v60, %v1228_v17  ;;  %v765_v42 = vrot.slane %v7850_v19, 2 }
 0x1c6   :  { %v2417_v8 = vsel %vm2371_vm13, %v2344_v51, %v1833_v15  ;;  %v2273_v6 = vsel %vm2225_vm11, %v2200_v9, %v6216_v39  ;;  %v1797_v36 = vpop.permute.xlu0 %1796  ;;  %v6398_v15 = vld [vmem:[%s7444_s0 + $0x78] sm:$0xff]   ;;  %v6417_v9 = vld [vmem:[%s7444_s0 + $0x124] sm:$0xff]  }
 0x1c7   :  { %1774 = vrot.lane.b32.xlu1 %v1166_v49, %s4212_s1  ;;  %4041 = vmatprep.mubr.msk.bf16.mxu1 %vm2466_vm14, %v2417_v8  ;;  %v2346_v58 = vsel %vm2298_vm12, %v2273_v6, %v1763_v43  ;;  %v2381_v57 = vsel %vm2371_vm13, %v2308_v4, %v1797_v36  ;;  %v761_v43 = vrot.slane %v7831_v27, 2  ;;  %v855_v26 = vor.u32 %v854_v25, %v853_v37 }
 0x1c8   :  { %1738 = vrot.lane.b32.xlu0 %v1073_v7, %s4212_s1  ;;  %4005 = vmatprep.mubr.msk.bf16.mxu0 %vm2466_vm14, %v2381_v57  ;;  %v6372_v21 = vor.u32 %v765_v42, %v764_v41  ;;  %v920_v7 = vrot.slane %v6398_v15, 2  ;;  %v962_v56 = vrot.slane %v6417_v9, 2  ;;  %v1074_v4 = vrot.slane %v7849_v47, 2  ;;  %v7858_v47 = vld [vmem:[#allocation125_spill] sm:$0xff]  ;;  %v7859_v42 = vld [vmem:[#allocation68_spill] sm:$0xff] }
 0x1c9   :  { %v1835_v61 = vpop.permute.xlu1 %1834  ;;  %v762_v27 = vor.u32 %v761_v43, %v760_v29  ;;  %v856_v32 = vsel %vm703_vm2, %v6156_v24, %v855_v26  ;;  %v860_v45 = vsel %vm703_vm2, %v855_v26, %v6364_v23  ;;  %v1075_v36 = vrot.slane %v7850_v19, 3  ;;  %v4177_v43 = vld [vmem:[%s7444_s0 + $0xd4] sm:$0xff]  }
 0x1ca   :  { %v2419_v39 = vsel %vm2371_vm13, %v2346_v58, %v1835_v61  ;;  %v1799_v60 = vpop.permute.xlu0 %1798  ;;  %v7851_v58 = vld [vmem:[#allocation64_spill] sm:$0xff] }
 0x1cb   :  { %1844 = vrot.lane.b32.xlu1 %v1269_v59, %s4213_s18  ;;  %4042 = vmatmul.mubr.msk.bf16.gmra.mrb[8].mxu1 %vm2466_vm14, %v2419_v39  ;;  %v2383_v2 = vsel %vm2371_vm13, %v2310_v3, %v1799_v60  ;;  %v763_v14 = vsel %vm703_vm2, %v6166_v10, %v762_v27  ;;  %v767_v24 = vsel %vm703_vm2, %v762_v27, %v6372_v21  ;;  %v6387_v10 = vld [vmem:[%s7444_s0 + $0x11c] sm:$0xff]   ;;  %v1168_v59 = vrot.slane %v7848_v11, 3  ;;  %v7852_v61 = vld [vmem:[#allocation60_spill] sm:$0xff]  ;;  %v7855_v3 = vld [vmem:[#allocation83_spill] sm:$0xff] }
 0x1cc   :  { %1808 = vrot.lane.b32.xlu0 %v1229_v34, %s4213_s18  ;;  %4006 = vmatmul.mubr.msk.bf16.gmra.mrb[8].mxu0 %vm2466_vm14, %v2383_v2  ;;  %v960_v48 = vrot.slane %v6387_v10, 2  ;;  %v1171_v57 = vrot.slane %v7851_v58, 2  ;;  %v1172_v46 = vrot.slane %v7852_v61, 3  ;;  %v7853_v34 = vld [vmem:[#allocation34_spill] sm:$0xff]  ;;  %v1910_v60 = vsel %vm1860_vm6, %v4177_v43, %v7855_v3  ;;  %v7857_v27 = vld [vmem:[#allocation67_spill] sm:$0xff]  ;;  %v4178_v19 = vld [vmem:[%s7444_s0 + $0x30] sm:$0xff]  }
 0x1cd   :  { %v6350_v44 = vpop.permute.xlu1 %1548  ;;  %v1078_v38 = vrot.slane %v7853_v34, 2  ;;  %v1983_v11 = vsel %vm1933_vm7, %v1910_v60, %v7856_v0  ;;  %v1876_v41 = vsel %vm1860_vm6, %v7858_v47, %v7857_v27  ;;  %v1272_v43 = vrot.slane %v6387_v10, 3  ;;  %v7865_v3 = vld [vmem:[#allocation116_spill] sm:$0xff]  ;;  %v7866_v0 = vld [vmem:[#allocation117_spill] sm:$0xff] }
 0x1ce   :  { %v6360_v53 = vpop.permute.xlu0 %1512  ;;  %v961_v1 = vsel %vm892_vm3, %v958_v52, %v960_v48  ;;  %v1167_v52 = vrot.slane %v7847_v13, 2  ;;  %v6439_v25 = vsel %vm892_vm3, %v960_v48, %v962_v56  ;;  %v1076_v13 = vor.u32 %v1075_v36, %v1074_v4 }
 0x1cf   :  { %1846 = vrot.lane.b32.xlu1 %v1271_v22, %s4213_s18  ;;  %v7854_v22 = vld [vmem:[#allocation27_spill] sm:$0xff] }
 0x1d0   :  { %1810 = vrot.lane.b32.xlu0 %v1231_v5, %s4213_s18  ;;  %v1169_v16 = vor.u32 %v1168_v59, %v1167_v52  ;;  %v1079_v29 = vrot.slane %v7854_v22, 3  ;;  %v6462_v5 = vor.u32 %v1172_v46, %v1171_v57  ;;  %v7863_v59 = vld [vmem:[#allocation97_spill] sm:$0xff]  ;;  %v7864_v57 = vld [vmem:[#allocation102_spill] sm:$0xff] }
 0x1d1   :  { %v6366_v35 = vpop.permute.xlu1 %1550 }
 0x1d2   :  { %v6374_v49 = vpop.permute.xlu0 %1514  ;;  %v1170_v2 = vsel %vm1017_vm4, %v6256_v30, %v1169_v16  ;;  %v6474_v48 = vor.u32 %v1079_v29, %v1078_v38  ;;  %v4179_v30 = vld [vmem:[%s7444_s0 + $0xdc] sm:$0xff]   ;;  %v1077_v29 = vsel %vm1017_vm4, %v6268_v63, %v1076_v13  ;;  %v1174_v47 = vsel %vm1017_vm4, %v1169_v16, %v6462_v5 }
 0x1d3   :  { %1560 = vrot.lane.b32.xlu1 %v856_v32, %s4208_s15  ;;  %v1874_v32 = vsel %vm1860_vm6, %v4178_v19, %v7859_v42 }
 0x1d4   :  { %1524 = vrot.lane.b32.xlu0 %v763_v14, %s4208_s15  ;;  %v7860_v14 = vld [vmem:[#allocation128_spill] sm:$0xff]  ;;  %v1947_v4 = vsel %vm1933_vm7, %v1874_v32, %v7863_v59  ;;  %v1081_v19 = vsel %vm1017_vm4, %v1076_v13, %v6474_v48  ;;  %v1232_v32 = vrot.slane %v6398_v15, 3  ;;  %v7869_v59 = vld [vmem:[#allocation61_spill] sm:$0xff] }
 0x1d5   :  { %v1621_v62 = vpop.permute.xlu1 %1620 }
 0x1d6   :  { %v6382_v33 = vpop.permute.xlu0 %1584 }
 0x1d7   :  { %1562 = vrot.lane.b32.xlu1 %v860_v45, %s4208_s15  ;;  %v2056_v45 = vsel %vm2006_vm8, %v1983_v11, %v7860_v14 }
 0x1d8   :  { %1526 = vrot.lane.b32.xlu0 %v767_v24, %s4208_s15  ;;  %v2129_v36 = vsel %vm2079_vm9, %v2056_v45, %v6350_v44  ;;  %v2020_v44 = vsel %vm2006_vm8, %v1947_v4, %v7866_v0 }
 0x1d9   :  { %v6390_v51 = vpop.permute.xlu1 %1622  ;;  %v2202_v38 = vsel %vm2152_vm10, %v2129_v36, %v1621_v62  ;;  %v7867_v62 = vld [vmem:[#allocation127_spill] sm:$0xff]  ;;  %v2093_v63 = vsel %vm2079_vm9, %v2020_v44, %v6360_v53 }
 0x1da   :  { %v6401_v18 = vpop.permute.xlu0 %1586 }
 0x1db   :  { %1632 = vrot.lane.b32.xlu1 %v6233_v28, %s4209_s26  ;;  %v921_v28 = vsel %vm892_vm3, %v918_v55, %v920_v7  ;;  %v6429_v55 = vld [vmem:[%s7444_s0 + $0x80] sm:$0xff]  }
 0x1dc   :  { %1596 = vrot.lane.b32.xlu0 %v6250_v40, %s4209_s26  ;;  %v922_v6 = vrot.slane %v6429_v55, 2 }
 0x1dd   :  { %v1693_v8 = vpop.permute.xlu1 %1692 }
 0x1de   :  { %v6412_v17 = vpop.permute.xlu0 %1656  ;;  %v6456_v26 = vsel %vm892_vm3, %v920_v7, %v922_v6  ;;  %v7861_v7 = vld [vmem:[#allocation82_spill] sm:$0xff]  ;;  %v2275_v11 = vsel %vm2225_vm11, %v2202_v38, %v1693_v8  ;;  %v2166_v8 = vsel %vm2152_vm10, %v2093_v63, %v6382_v33  ;;  %v1274_v33 = vrot.slane %v6417_v9, 3  ;;  %v7871_v38 = vld [vmem:[#allocation28_spill] sm:$0xff] }
 0x1df   :  { %1634 = vrot.lane.b32.xlu1 %v961_v1, %s4209_s26 }
 0x1e0   :  { %1598 = vrot.lane.b32.xlu0 %v921_v28, %s4209_s26 }
 0x1e1   :  { %v6422_v40 = vpop.permute.xlu1 %1694 }
 0x1e2   :  { %v6434_v37 = vpop.permute.xlu0 %1658 }
 0x1e3   :  { %1704 = vrot.lane.b32.xlu1 %v961_v1, %s4210_s7  ;;  %v1912_v1 = vsel %vm1860_vm6, %v4179_v30, %v7861_v7 }
 0x1e4   :  { %1668 = vrot.lane.b32.xlu0 %v921_v28, %s4210_s7  ;;  %v7862_v28 = vld [vmem:[#allocation96_spill] sm:$0xff]  ;;  %v1985_v46 = vsel %vm1933_vm7, %v1912_v1, %v7864_v57  ;;  %v7870_v57 = vld [vmem:[#allocation31_spill] sm:$0xff] }
 0x1e5   :  { %v1765_v39 = vpop.permute.xlu1 %1764  ;;  %v1949_v52 = vsel %vm1933_vm7, %v1876_v41, %v7862_v28  ;;  %v7868_v28 = vld [vmem:[#allocation63_spill] sm:$0xff] }
 0x1e6   :  { %v1729_v31 = vpop.permute.xlu0 %1728  ;;  %v2022_v60 = vsel %vm2006_vm8, %v1949_v52, %v7865_v3  ;;  %v2348_v10 = vsel %vm2298_vm12, %v2275_v11, %v1765_v39  ;;  %v2239_v39 = vsel %vm2225_vm11, %v2166_v8, %v6412_v17  ;;  %v862_v17 = vrot.slane %v7852_v61, 2 }
 0x1e7   :  { %1706 = vrot.lane.b32.xlu1 %v6439_v25, %s4210_s7  ;;  %v2312_v15 = vsel %vm2298_vm12, %v2239_v39, %v1729_v31  ;;  %v2095_v45 = vsel %vm2079_vm9, %v2022_v60, %v6374_v49  ;;  %v1234_v49 = vrot.slane %v6429_v55, 3  ;;  %v768_v31 = vrot.slane %v7853_v34, 1 }
 0x1e8   :  { %1670 = vrot.lane.b32.xlu0 %v6456_v26, %s4210_s7  ;;  %v2168_v7 = vsel %vm2152_vm10, %v2095_v45, %v6401_v18  ;;  %v1275_v18 = vsel %vm1206_vm5, %v1272_v43, %v1274_v33  ;;  %v865_v52 = vrot.slane %v7868_v28, 1  ;;  %v1176_v39 = vrot.slane %v7869_v59, 3 }
 0x1e9   :  { %v1767_v24 = vpop.permute.xlu1 %1766  ;;  %v2241_v61 = vsel %vm2225_vm11, %v2168_v7, %v6434_v37  ;;  %v866_v37 = vrot.slane %v7869_v59, 2  ;;  %v1235_v34 = vsel %vm1206_vm5, %v1232_v32, %v1234_v49  ;;  %v4186_v59 = vld [vmem:[%s7444_s0 + $0xe4] sm:$0xff]  }
 0x1ea   :  { %v1731_v27 = vpop.permute.xlu0 %1730 }
 0x1eb   :  { %1776 = vrot.lane.b32.xlu1 %v1170_v2, %s4212_s1  ;;  %v2058_v2 = vsel %vm2006_vm8, %v1985_v46, %v7867_v62  ;;  %v2314_v54 = vsel %vm2298_vm12, %v2241_v61, %v1731_v27  ;;  %v772_v46 = vrot.slane %v7870_v57, 1  ;;  %v6572_v60 = vor.u32 %v866_v37, %v865_v52  ;;  %v7874_v37 = vld [vmem:[#allocation85_spill] sm:$0xff] }
 0x1ec   :  { %v2131_v42 = vsel %vm2079_vm9, %v2058_v2, %v6366_v35  ;;  %1740 = vrot.lane.b32.xlu0 %v1077_v29, %s4212_s1  ;;  %v1273_v35 = vsel %vm1206_vm5, %v1270_v20, %v1272_v43  ;;  %v773_v29 = vrot.slane %v7871_v38, 2 }
 0x1ed   :  { %v1837_v41 = vpop.permute.xlu1 %1836  ;;  %v2204_v53 = vsel %vm2152_vm10, %v2131_v42, %v6390_v51  ;;  %v861_v51 = vrot.slane %v7851_v58, 1  ;;  %v1233_v58 = vsel %vm1206_vm5, %v1230_v50, %v1232_v32  ;;  %v6625_v32 = vld [vmem:[%s7444_s0 + $0x134] sm:$0xff]  }
 0x1ee   :  { %v2421_v16 = vsel %vm2371_vm13, %v2348_v10, %v1837_v41  ;;  %v2277_v13 = vsel %vm2225_vm11, %v2204_v53, %v6422_v40  ;;  %v1801_v14 = vpop.permute.xlu0 %1800  ;;  %v6580_v11 = vor.u32 %v773_v29, %v772_v46  ;;  %v6608_v41 = vld [vmem:[%s7444_s0 + $0x88] sm:$0xff]   ;;  %v6628_v53 = vrot.slane %v6625_v32, 2 }
 0x1ef   :  { %1778 = vrot.lane.b32.xlu1 %v1174_v47, %s4212_s1  ;;  %4045 = vmatprep.mubr.msk.bf16.mxu1 %vm2466_vm14, %v2421_v16  ;;  %v2350_v30 = vsel %vm2298_vm12, %v2277_v13, %v1767_v24  ;;  %v2385_v12 = vsel %vm2371_vm13, %v2312_v15, %v1801_v14  ;;  %v769_v24 = vrot.slane %v7854_v22, 2  ;;  %v863_v1 = vor.u32 %v862_v17, %v861_v51 }
 0x1f0   :  { %1742 = vrot.lane.b32.xlu0 %v1081_v19, %s4212_s1  ;;  %4009 = vmatprep.mubr.msk.bf16.mxu0 %vm2466_vm14, %v2385_v12  ;;  %v924_v19 = vrot.slane %v6608_v41, 2  ;;  %v873_v13 = vshll.u32 %v6625_v32, 16  ;;  %v1082_v12 = vrot.slane %v7870_v57, 2  ;;  %v7875_v57 = vld [vmem:[#allocation105_spill] sm:$0xff]  ;;  %v1278_v9 = vrot.slane %v6625_v32, 3 }
 0x1f1   :  { %v1839_v20 = vpop.permute.xlu1 %1838  ;;  %v770_v22 = vor.u32 %v769_v24, %v768_v31  ;;  %v864_v3 = vsel %vm703_vm2, %v6364_v23, %v863_v1  ;;  %v868_v47 = vsel %vm703_vm2, %v863_v1, %v6572_v60  ;;  %v4184_v24 = vld [vmem:[%s7444_s0 + $0x48] sm:$0xff]   ;;  %v4185_v1 = vld [vmem:[%s7444_s0 + $0x40] sm:$0xff]  }
 0x1f2   :  { %v2423_v40 = vsel %vm2371_vm13, %v2350_v30, %v1839_v20  ;;  %v1803_v50 = vpop.permute.xlu0 %1802  ;;  %v1083_v20 = vrot.slane %v7871_v38, 3 }
 0x1f3   :  { %1848 = vrot.lane.b32.xlu1 %v1273_v35, %s4213_s18  ;;  %4046 = vmatmul.mubr.msk.bf16.gmra.mrb[12].mxu1 %vm2466_vm14, %v2423_v40  ;;  %v2387_v4 = vsel %vm2371_vm13, %v2314_v54, %v1803_v50  ;;  %v771_v44 = vsel %vm703_vm2, %v6372_v21, %v770_v22  ;;  %v775_v23 = vsel %vm703_vm2, %v770_v22, %v6580_v11  ;;  %v6597_v21 = vld [vmem:[%s7444_s0 + $0x12c] sm:$0xff]   ;;  %v7872_v54 = vld [vmem:[#allocation69_spill] sm:$0xff] }
 0x1f4   :  { %1812 = vrot.lane.b32.xlu0 %v1233_v58, %s4213_s18  ;;  %4010 = vmatmul.mubr.msk.bf16.gmra.mrb[12].mxu0 %vm2466_vm14, %v2387_v4  ;;  %v964_v63 = vrot.slane %v6597_v21, 2  ;;  %v1180_v58 = vrot.slane %v873_v13, 3  ;;  %v1880_v50 = vsel %vm1860_vm6, %v4184_v24, %v7872_v54  ;;  %v1914_v4 = vsel %vm1860_vm6, %v4186_v59, %v7874_v37  ;;  %v7881_v24 = vld [vmem:[#allocation118_spill] sm:$0xff]  ;;  %v7882_v54 = vld [vmem:[#allocation119_spill] sm:$0xff] }
 0x1f5   :  { %v6558_v36 = vpop.permute.xlu1 %1552  ;;  %v1084_v22 = vor.u32 %v1083_v20, %v1082_v12  ;;  %v1987_v46 = vsel %vm1933_vm7, %v1914_v4, %v7875_v57  ;;  %v7879_v20 = vld [vmem:[#allocation2_spill] sm:$0xff] }
 0x1f6   :  { %v6568_v43 = vpop.permute.xlu0 %1516  ;;  %v965_v8 = vsel %vm892_vm3, %v962_v56, %v964_v63  ;;  %v1175_v56 = vrot.slane %v7868_v28, 2  ;;  %v6652_v45 = vsel %vm892_vm3, %v964_v63, %v6628_v53  ;;  %v7873_v28 = vld [vmem:[#allocation70_spill] sm:$0xff] }
 0x1f7   :  { %1850 = vrot.lane.b32.xlu1 %v1275_v18, %s4213_s18  ;;  %v1878_v52 = vsel %vm1860_vm6, %v4185_v1, %v7873_v28  ;;  %v1085_v28 = vsel %vm1017_vm4, %v6474_v48, %v1084_v22 }
 0x1f8   :  { %1814 = vrot.lane.b32.xlu0 %v1235_v34, %s4213_s18  ;;  %v1177_v30 = vor.u32 %v1176_v39, %v1175_v56  ;;  %v1276_v56 = vrot.slane %v6597_v21, 3  ;;  %v1236_v39 = vrot.slane %v6608_v41, 3 }
 0x1f9   :  { %v6574_v0 = vpop.permute.xlu1 %1554 }
 0x1fa   :  { %v6582_v27 = vpop.permute.xlu0 %1518  ;;  %v1178_v29 = vsel %vm1017_vm4, %v6462_v5, %v1177_v30  ;;  %v7878_v5 = vld [vmem:[#allocation98_spill] sm:$0xff] }
 0x1fb   :  { %1564 = vrot.lane.b32.xlu1 %v864_v3, %s4208_s15  ;;  %v1953_v12 = vsel %vm1933_vm7, %v1880_v50, %v7878_v5 }
 0x1fc   :  { %1528 = vrot.lane.b32.xlu0 %v771_v44, %s4208_s15  ;;  %v2026_v21 = vsel %vm2006_vm8, %v1953_v12, %v7881_v24 }
 0x1fd   :  { %v6586_v62 = vpop.permute.xlu1 %1624 }
 0x1fe   :  { %v6592_v2 = vpop.permute.xlu0 %1588 }
 0x1ff   :  { %1566 = vrot.lane.b32.xlu1 %v868_v47, %s4208_s15  ;;  %v4187_v47 = vld [vmem:[%s7444_s0 + $0xec] sm:$0xff]  }
 0x200   :  { %1530 = vrot.lane.b32.xlu0 %v775_v23, %s4208_s15  ;;  %v7876_v23 = vld [vmem:[#allocation84_spill] sm:$0xff] }
 0x201   :  { %v6600_v10 = vpop.permute.xlu1 %1626  ;;  %v1916_v63 = vsel %vm1860_vm6, %v4187_v47, %v7876_v23 }
 0x202   :  { %v6611_v42 = vpop.permute.xlu0 %1590 }
 0x203   :  { %1636 = vrot.lane.b32.xlu1 %v6439_v25, %s4209_s26  ;;  %v925_v25 = vsel %vm892_vm3, %v922_v6, %v924_v19  ;;  %v6639_v6 = vld [vmem:[%s7444_s0 + $0x90] sm:$0xff]  }
 0x204   :  { %1600 = vrot.lane.b32.xlu0 %v6456_v26, %s4209_s26  ;;  %v870_v26 = vshrl.u32 %v6625_v32, 16  ;;  %v777_v15 = vshrl.u32 %v6639_v6, 16  ;;  %v780_v14 = vshll.u32 %v6639_v6, 16  ;;  %v6647_v17 = vrot.slane %v6639_v6, 2 }
 0x205   :  { %v1697_v16 = vpop.permute.xlu1 %1696  ;;  %v1238_v5 = vrot.slane %v6639_v6, 3 }
 0x206   :  { %v6632_v35 = vpop.permute.xlu0 %1660  ;;  %v1179_v40 = vrot.slane %v870_v26, 2  ;;  %v1086_v61 = vrot.slane %v777_v15, 2  ;;  %v1087_v18 = vrot.slane %v780_v14, 3  ;;  %v6686_v34 = vsel %vm892_vm3, %v924_v19, %v6647_v17  ;;  %v7877_v19 = vld [vmem:[#allocation130_spill] sm:$0xff] }
 0x207   :  { %1638 = vrot.lane.b32.xlu1 %v965_v8, %s4209_s26 }
 0x208   :  { %1602 = vrot.lane.b32.xlu0 %v925_v25, %s4209_s26  ;;  %v6692_v3 = vor.u32 %v1180_v58, %v1179_v40  ;;  %v6694_v44 = vor.u32 %v1087_v18, %v1086_v61  ;;  %v1951_v40 = vsel %vm1933_vm7, %v1878_v52, %v7879_v20  ;;  %v7880_v58 = vld [vmem:[#allocation104_spill] sm:$0xff]  ;;  %v7883_v52 = vld [vmem:[#allocation129_spill] sm:$0xff] }
 0x209   :  { %v6643_v51 = vpop.permute.xlu1 %1698  ;;  %v1989_v61 = vsel %vm1933_vm7, %v1916_v63, %v7880_v58  ;;  %v2024_v1 = vsel %vm2006_vm8, %v1951_v40, %v7882_v54 }
 0x20a   :  { %v6656_v7 = vpop.permute.xlu0 %1662  ;;  %v1182_v4 = vsel %vm1017_vm4, %v1177_v30, %v6692_v3  ;;  %v1089_v57 = vsel %vm1017_vm4, %v1084_v22, %v6694_v44  ;;  %v2097_v48 = vsel %vm2079_vm9, %v2024_v1, %v6568_v43  ;;  %v1237_v30 = vsel %vm1206_vm5, %v1234_v49, %v1236_v39 }
 0x20b   :  { %1708 = vrot.lane.b32.xlu1 %v965_v8, %s4210_s7  ;;  %v2060_v8 = vsel %vm2006_vm8, %v1987_v46, %v7877_v19  ;;  %v2170_v47 = vsel %vm2152_vm10, %v2097_v48, %v6592_v2  ;;  %v872_v49 = vrot.slane %v870_v26, 1  ;;  %v6767_v2 = vld [vmem:[%s7444_s0 + $0x98] ss:$0 sps:$4 sm:$0x33]   ;;  %v2099_v26 = vsel %vm2079_vm9, %v2026_v21, %v6582_v27 }
 0x20c   :  { %1672 = vrot.lane.b32.xlu0 %v925_v25, %s4210_s7  ;;  %v2133_v18 = vsel %vm2079_vm9, %v2060_v8, %v6558_v36  ;;  %v2062_v36 = vsel %vm2006_vm8, %v1989_v61, %v7883_v52  ;;  %v2243_v55 = vsel %vm2225_vm11, %v2170_v47, %v6632_v35  ;;  %v1279_v27 = vsel %vm1206_vm5, %v1276_v56, %v1278_v9 }
 0x20d   :  { %v1769_v31 = vpop.permute.xlu1 %1768  ;;  %v2206_v50 = vsel %vm2152_vm10, %v2133_v18, %v6586_v62  ;;  %v6734_v62 = vld [vmem:[%s7444_s0 + $0x13c] ss:$0 sps:$4 sm:$0x33]   ;;  %v2135_v22 = vsel %vm2079_vm9, %v2062_v36, %v6574_v0  ;;  %v875_v0 = vrot.slane %v873_v13, 2  ;;  %v786_v20 = vshrl.u32 %v6767_v2, 16 }
 0x20e   :  { %v1733_v38 = vpop.permute.xlu0 %1732  ;;  %v2279_v59 = vsel %vm2225_vm11, %v2206_v50, %v1697_v16  ;;  %v1277_v16 = vsel %vm1206_vm5, %v1274_v33, %v1276_v56  ;;  %v2208_v33 = vsel %vm2152_vm10, %v2135_v22, %v6600_v10  ;;  %v879_v23 = vshrl.u32 %v6734_v62, 16 }
 0x20f   :  { %1710 = vrot.lane.b32.xlu1 %v6652_v45, %s4210_s7  ;;  %v2352_v46 = vsel %vm2298_vm12, %v2279_v59, %v1769_v31  ;;  %v2281_v10 = vsel %vm2225_vm11, %v2208_v33, %v6643_v51  ;;  %v2316_v35 = vsel %vm2298_vm12, %v2243_v55, %v1733_v38  ;;  %v882_v63 = vshll.u32 %v6734_v62, 16  ;;  %v6859_v55 = vld [vmem:[%s7444_s0 + $0x144] ss:$0 sps:$4 sm:$0x77]  }
 0x210   :  { %1674 = vrot.lane.b32.xlu0 %v6686_v34, %s4210_s7  ;;  %v2172_v51 = vsel %vm2152_vm10, %v2099_v26, %v6611_v42  ;;  %v782_v42 = vrot.slane %v780_v14, 2  ;;  %v789_v40 = vshll.u32 %v6767_v2, 16  ;;  %v876_v61 = vor.u32 %v875_v0, %v872_v49 }
 0x211   :  { %v1771_v25 = vpop.permute.xlu1 %1770  ;;  %v2245_v12 = vsel %vm2225_vm11, %v2172_v51, %v6656_v7  ;;  %v881_v18 = vrot.slane %v879_v23, 1  ;;  %v1239_v14 = vsel %vm1206_vm5, %v1236_v39, %v1238_v5  ;;  %v788_v54 = vrot.slane %v786_v20, 1 }
 0x212   :  { %v1735_v37 = vpop.permute.xlu0 %1734  ;;  %v2354_v13 = vsel %vm2298_vm12, %v2281_v10, %v1771_v25  ;;  %v779_v25 = vrot.slane %v777_v15, 1  ;;  %v884_v15 = vrot.slane %v882_v63, 2  ;;  %v791_v1 = vrot.slane %v789_v40, 2 }
 0x213   :  { %1780 = vrot.lane.b32.xlu1 %v1178_v29, %s4212_s1  ;;  %v2318_v58 = vsel %vm2298_vm12, %v2245_v12, %v1735_v37 }
 0x214   :  { %1744 = vrot.lane.b32.xlu0 %v1085_v28, %s4212_s1  ;;  %v783_v21 = vor.u32 %v782_v42, %v779_v25  ;;  %v877_v28 = vsel %vm703_vm2, %v6572_v60, %v876_v61  ;;  %v885_v52 = vor.u32 %v884_v15, %v881_v18  ;;  %v792_v59 = vor.u32 %v791_v1, %v788_v54  ;;  %v7884_v15 = vld [vmem:[#allocation87_spill] sm:$0xff] }
 0x215   :  { %v1841_v29 = vpop.permute.xlu1 %1840 }
 0x216   :  { %v2425_v43 = vsel %vm2371_vm13, %v2352_v46, %v1841_v29  ;;  %v1805_v31 = vpop.permute.xlu0 %1804  ;;  %v784_v41 = vsel %vm703_vm2, %v6580_v11, %v783_v21  ;;  %v886_v37 = vsel %vm703_vm2, %v876_v61, %v885_v52  ;;  %v793_v60 = vsel %vm703_vm2, %v783_v21, %v792_v59 }
 0x217   :  { %1782 = vrot.lane.b32.xlu1 %v1182_v4, %s4212_s1  ;;  %4049 = vmatprep.mubr.msk.bf16.mxu1 %vm2466_vm14, %v2425_v43  ;;  %v2389_v19 = vsel %vm2371_vm13, %v2316_v35, %v1805_v31  ;;  %v968_v11 = vrot.slane %v6734_v62, 2  ;;  %v928_v29 = vrot.slane %v6767_v2, 2  ;;  %v4140_v62 = vld [vmem:[%s7444_s0 + $0x144] ss:$0 sps:$4 sm:$0x33]  }
 0x218   :  { %1746 = vrot.lane.b32.xlu0 %v1089_v57, %s4212_s1  ;;  %4013 = vmatprep.mubr.msk.bf16.mxu0 %vm2466_vm14, %v2389_v19  ;;  %v6830_v57 = vld [vmem:[%s7444_s0 + $0x13c] sm:$0xff]   ;;  %v1010_v35 = vrot.slane %v4140_v62, 2  ;;  %v1193_v19 = vshrl.u32 %v6859_v55, 16 }
 0x219   :  { %v1843_v8 = vpop.permute.xlu1 %1842  ;;  %v969_v47 = vsel %vm892_vm3, %v6628_v53, %v968_v11  ;;  %v1184_v43 = vshrl.u32 %v6830_v57, 16  ;;  %v1187_v33 = vshll.u32 %v6830_v57, 16  ;;  %v929_v49 = vsel %vm892_vm3, %v6647_v17, %v928_v29  ;;  %v4141_v2 = vld [vmem:[%s7444_s0 + $0xa0] ss:$0 sps:$4 sm:$0x33]   ;;  %v7886_v11 = vld [vmem:[#allocation72_spill] sm:$0xff] }
 0x21a   :  { %v2427_v38 = vsel %vm2371_vm13, %v2354_v13, %v1843_v8  ;;  %v1807_v56 = vpop.permute.xlu0 %1806  ;;  %v1196_v8 = vshll.u32 %v6859_v55, 16 }
 0x21b   :  { %1852 = vrot.lane.b32.xlu1 %v1277_v16, %s4213_s18  ;;  %4050 = vmatmul.mubr.msk.bf16.gmra.mrb[16].mxu1 %vm2466_vm14, %v2427_v38  ;;  %v2391_v24 = vsel %vm2371_vm13, %v2318_v58, %v1807_v56  ;;  %v6842_v16 = vld [vmem:[%s7444_s0 + $0x98] sm:$0xff]   ;;  %v1186_v26 = vrot.slane %v1184_v43, 2  ;;  %v1189_v13 = vrot.slane %v1187_v33, 3  ;;  %v993_v38 = vrot.slane %v4141_v2, 2  ;;  %v7888_v33 = vld [vmem:[#allocation71_spill] sm:$0xff] }
 0x21c   :  { %1816 = vrot.lane.b32.xlu0 %v1237_v30, %s4213_s18  ;;  %4014 = vmatmul.mubr.msk.bf16.gmra.mrb[16].mxu0 %vm2466_vm14, %v2391_v24  ;;  %v1008_v30 = vrot.slane %v6830_v57, 2  ;;  %v991_v0 = vrot.slane %v6842_v16, 2  ;;  %v1091_v31 = vshrl.u32 %v6842_v16, 16  ;;  %v1094_v23 = vshll.u32 %v6842_v16, 16  ;;  %v4190_v43 = vld [vmem:[%s7444_s0 + $0x58] sm:$0xff]  }
 0x21d   :  { %v6799_v7 = vpop.permute.xlu1 %1556  ;;  %v1190_v58 = vor.u32 %v1189_v13, %v1186_v26  ;;  %v1195_v56 = vrot.slane %v1193_v19, 2  ;;  %v1198_v61 = vrot.slane %v1196_v8, 3 }
 0x21e   :  { %v6809_v50 = vpop.permute.xlu0 %1520  ;;  %v1009_v10 = vsel %vm892_vm3, %v6628_v53, %v1008_v30  ;;  %v992_v53 = vsel %vm892_vm3, %v6647_v17, %v991_v0  ;;  %v1096_v25 = vrot.slane %v1094_v23, 3  ;;  %v1011_v40 = vsel %vm892_vm3, %v1008_v30, %v1010_v35  ;;  %v4188_v17 = vld [vmem:[%s7444_s0 + $0xf4] sm:$0xff]   ;;  %v7891_v23 = vld [vmem:[#allocation106_spill] sm:$0xff] }
 0x21f   :  { %1854 = vrot.lane.b32.xlu1 %v1279_v27, %s4213_s18  ;;  %v1093_v27 = vrot.slane %v1091_v31, 2  ;;  %v1918_v24 = vsel %vm1860_vm6, %v4188_v17, %v7884_v15  ;;  %v1191_v59 = vsel %vm1017_vm4, %v6692_v3, %v1190_v58  ;;  %v7887_v30 = vld [vmem:[#allocation45_spill] sm:$0xff]  ;;  %v7895_v15 = vld [vmem:[#allocation120_spill] sm:$0xff] }
 0x220   :  { %1818 = vrot.lane.b32.xlu0 %v1239_v14, %s4213_s18  ;;  %v994_v14 = vsel %vm892_vm3, %v991_v0, %v993_v38  ;;  %v4191_v3 = vld [vmem:[%s7444_s0 + $0xfc] sm:$0xff]  }
 0x221   :  { %v6813_v36 = vpop.permute.xlu1 %1558  ;;  %v1097_v21 = vor.u32 %v1096_v25, %v1093_v27  ;;  %v7889_v0 = vld [vmem:[#allocation86_spill] sm:$0xff] }
 0x222   :  { %v6819_v39 = vpop.permute.xlu0 %1522  ;;  %v1920_v2 = vsel %vm1860_vm6, %v4191_v3, %v7889_v0 }
 0x223   :  { %1568 = vrot.lane.b32.xlu1 %v877_v28, %s4208_s15  ;;  %v7885_v28 = vld [vmem:[#allocation42_spill] sm:$0xff]  ;;  %v1993_v26 = vsel %vm1933_vm7, %v1920_v2, %v7891_v23  ;;  %v1098_v19 = vsel %vm1017_vm4, %v6694_v44, %v1097_v21 }
 0x224   :  { %1532 = vrot.lane.b32.xlu0 %v784_v41, %s4208_s15  ;;  %v1991_v52 = vsel %vm1933_vm7, %v1918_v24, %v7885_v28 }
 0x225   :  { %v6822_v4 = vpop.permute.xlu1 %1628  ;;  %v2064_v62 = vsel %vm2006_vm8, %v1991_v52, %v7887_v30  ;;  %v7010_v30 = vld [vmem:[%s7446_s2] ss:$0 sm:$0xff] }
 0x226   :  { %v6832_v48 = vpop.permute.xlu0 %1592  ;;  %v2137_v31 = vsel %vm2079_vm9, %v2064_v62, %v6799_v7 }
 0x227   :  { %1570 = vrot.lane.b32.xlu1 %v886_v37, %s4208_s15  ;;  %v1199_v37 = vor.u32 %v1198_v61, %v1195_v56  ;;  %v2210_v13 = vsel %vm2152_vm10, %v2137_v31, %v6822_v4  ;;  %v7894_v4 = vld [vmem:[#allocation50_spill] sm:$0xff] }
 0x228   :  { %1534 = vrot.lane.b32.xlu0 %v793_v60, %s4208_s15  ;;  %v4189_v60 = vld [vmem:[%s7444_s0 + $0x50] sm:$0xff]   ;;  %v2066_v56 = vsel %vm2006_vm8, %v1993_v26, %v7894_v4 }
 0x229   :  { %v6835_v46 = vpop.permute.xlu1 %1630  ;;  %v1882_v29 = vsel %vm1860_vm6, %v4189_v60, %v7886_v11  ;;  %v1200_v25 = vsel %vm1017_vm4, %v1190_v58, %v1199_v37  ;;  %v2139_v58 = vsel %vm2079_vm9, %v2066_v56, %v6813_v36  ;;  %v1240_v36 = vrot.slane %v6842_v16, 3 }
 0x22a   :  { %v6850_v22 = vpop.permute.xlu0 %1594 }
 0x22b   :  { %1640 = vrot.lane.b32.xlu1 %v6652_v45, %s4209_s26 }
 0x22c   :  { %1604 = vrot.lane.b32.xlu0 %v6686_v34, %s4209_s26  ;;  %v6877_v34 = vld [vmem:[%s7444_s0 + $0xa0] ss:$0 sps:$4 sm:$0x77]  }
 0x22d   :  { %v1701_v45 = vpop.permute.xlu1 %1700  ;;  %v1100_v12 = vshrl.u32 %v6877_v34, 16  ;;  %v1103_v42 = vshll.u32 %v6877_v34, 16 }
 0x22e   :  { %v6879_v63 = vpop.permute.xlu0 %1664  ;;  %v2283_v27 = vsel %vm2225_vm11, %v2210_v13, %v1701_v45 }
 0x22f   :  { %1642 = vrot.lane.b32.xlu1 %v969_v47, %s4209_s26  ;;  %v1102_v54 = vrot.slane %v1100_v12, 2  ;;  %v1105_v1 = vrot.slane %v1103_v42, 3  ;;  %v1280_v12 = vrot.slane %v6830_v57, 3  ;;  %v7893_v42 = vld [vmem:[#allocation99_spill] sm:$0xff] }
 0x230   :  { %1606 = vrot.lane.b32.xlu0 %v929_v49, %s4209_s26  ;;  %v1884_v49 = vsel %vm1860_vm6, %v4190_v43, %v7888_v33 }
 0x231   :  { %v6883_v51 = vpop.permute.xlu1 %1702  ;;  %v1106_v8 = vor.u32 %v1105_v1, %v1102_v54 }
 0x232   :  { %v6891_v20 = vpop.permute.xlu0 %1666 }
 0x233   :  { %1712 = vrot.lane.b32.xlu1 %v1009_v10, %s4210_s7  ;;  %v7890_v10 = vld [vmem:[#allocation7_spill] sm:$0xff] }
 0x234   :  { %1676 = vrot.lane.b32.xlu0 %v992_v53, %s4210_s7  ;;  %v1955_v35 = vsel %vm1933_vm7, %v1882_v29, %v7890_v10  ;;  %v7892_v53 = vld [vmem:[#allocation46_spill] sm:$0xff] }
 0x235   :  { %v1773_v18 = vpop.permute.xlu1 %1772  ;;  %v2028_v38 = vsel %vm2006_vm8, %v1955_v35, %v7892_v53 }
 0x236   :  { %v1737_v41 = vpop.permute.xlu0 %1736  ;;  %v2101_v44 = vsel %vm2079_vm9, %v2028_v38, %v6809_v50  ;;  %v2356_v61 = vsel %vm2298_vm12, %v2283_v27, %v1773_v18  ;;  %v1107_v18 = vsel %vm1017_vm4, %v1097_v21, %v1106_v8 }
 0x237   :  { %1714 = vrot.lane.b32.xlu1 %v1011_v40, %s4210_s7  ;;  %v1957_v40 = vsel %vm1933_vm7, %v1884_v49, %v7893_v42  ;;  %v2174_v57 = vsel %vm2152_vm10, %v2101_v44, %v6832_v48 }
 0x238   :  { %1678 = vrot.lane.b32.xlu0 %v994_v14, %s4210_s7  ;;  %v2030_v45 = vsel %vm2006_vm8, %v1957_v40, %v7895_v15  ;;  %v2212_v14 = vsel %vm2152_vm10, %v2139_v58, %v6835_v46  ;;  %v2247_v50 = vsel %vm2225_vm11, %v2174_v57, %v6879_v63  ;;  %v1281_v46 = vsel %vm1206_vm5, %v1278_v9, %v1280_v12 }
 0x239   :  { %v1775_v47 = vpop.permute.xlu1 %1774  ;;  %v2285_v48 = vsel %vm2225_vm11, %v2212_v14, %v6883_v51  ;;  %v2320_v54 = vsel %vm2298_vm12, %v2247_v50, %v1737_v41  ;;  %v1282_v63 = vrot.slane %v6859_v55, 3  ;;  %v2103_v28 = vsel %vm2079_vm9, %v2030_v45, %v6819_v39 }
 0x23a   :  { %v1739_v7 = vpop.permute.xlu0 %1738  ;;  %v2358_v52 = vsel %vm2298_vm12, %v2285_v48, %v1775_v47  ;;  %v2176_v51 = vsel %vm2152_vm10, %v2103_v28, %v6850_v22  ;;  %v1241_v39 = vsel %vm1206_vm5, %v1238_v5, %v1240_v36  ;;  %v1242_v55 = vrot.slane %v6877_v34, 3 }
 0x23b   :  { %1784 = vrot.lane.b32.xlu1 %v1191_v59, %s4212_s1  ;;  %v2249_v9 = vsel %vm2225_vm11, %v2176_v51, %v6891_v20  ;;  %v1283_v59 = vsel %vm1206_vm5, %v1280_v12, %v1282_v63 }
 0x23c   :  { %1748 = vrot.lane.b32.xlu0 %v1098_v19, %s4212_s1  ;;  %v2322_v22 = vsel %vm2298_vm12, %v2249_v9, %v1739_v7  ;;  %v1243_v6 = vsel %vm1206_vm5, %v1240_v36, %v1242_v55  ;;  %v7896_v36 = vld [vmem:[#allocation89_spill] sm:$0xff]  ;;  %v4193_v55 = vld [vmem:[%s7444_s0 + $0x60] sm:$0xff]  }
 0x23d   :  { %v1845_v17 = vpop.permute.xlu1 %1844 }
 0x23e   :  { %v2429_v24 = vsel %vm2371_vm13, %v2356_v61, %v1845_v17  ;;  %v1809_v1 = vpop.permute.xlu0 %1808 }
 0x23f   :  { %1786 = vrot.lane.b32.xlu1 %v1200_v25, %s4212_s1  ;;  %4053 = vmatprep.mubr.msk.bf16.mxu1 %vm2466_vm14, %v2429_v24  ;;  %v2393_v21 = vsel %vm2371_vm13, %v2320_v54, %v1809_v1  ;;  %v7897_v1 = vld [vmem:[#allocation107_spill] sm:$0xff] }
 0x240   :  { %1750 = vrot.lane.b32.xlu0 %v1107_v18, %s4212_s1  ;;  %4017 = vmatprep.mubr.msk.bf16.mxu0 %vm2466_vm14, %v2393_v21  ;;  %v4192_v18 = vld [vmem:[%s7444_s0 + $0x104] sm:$0xff]  }
 0x241   :  { %v1847_v16 = vpop.permute.xlu1 %1846  ;;  %v1922_v48 = vsel %vm1860_vm6, %v4192_v18, %v7896_v36  ;;  %v7898_v21 = vld [vmem:[#allocation11_spill] sm:$0xff] }
 0x242   :  { %v2431_v32 = vsel %vm2371_vm13, %v2358_v52, %v1847_v16  ;;  %v1811_v41 = vpop.permute.xlu0 %1810 }
 0x243   :  { %1856 = vrot.lane.b32.xlu1 %v1281_v46, %s4213_s18  ;;  %4054 = vmatmul.mubr.msk.bf16.gmra.mrb[20].mxu1 %vm2466_vm14, %v2431_v32  ;;  %v2395_v37 = vsel %vm2371_vm13, %v2322_v22, %v1811_v41  ;;  %v1995_v46 = vsel %vm1933_vm7, %v1922_v48, %v7897_v1  ;;  %v7899_v22 = vld [vmem:[#allocation74_spill] sm:$0xff] }
 0x244   :  { %1820 = vrot.lane.b32.xlu0 %v1241_v39, %s4213_s18  ;;  %4018 = vmatmul.mubr.msk.bf16.gmra.mrb[20].mxu0 %vm2466_vm14, %v2395_v37  ;;  %v2068_v16 = vsel %vm2006_vm8, %v1995_v46, %v7898_v21  ;;  %v1886_v41 = vsel %vm1860_vm6, %v4193_v55, %v7899_v22 }
 0x245   :  { %v6990_v60 = vpop.permute.xlu1 %1560 }
 0x246   :  { %v6996_v5 = vpop.permute.xlu0 %1524 }
 0x247   :  { %1858 = vrot.lane.b32.xlu1 %v1283_v59, %s4213_s18  ;;  %v2141_v59 = vsel %vm2079_vm9, %v2068_v16, %v6990_v60 }
 0x248   :  { %1822 = vrot.lane.b32.xlu0 %v1243_v6, %s4213_s18  ;;  %v4194_v6 = vld [vmem:[%s7444_s0 + $0x10c] sm:$0xff]  }
 0x249   :  { %v6998_v34 = vpop.permute.xlu1 %1562 }
 0x24a   :  { %v7001_v20 = vpop.permute.xlu0 %1526 }
 0x24d   :  { %v7003_v11 = vpop.permute.xlu1 %1632 }
 0x24e   :  { %v7005_v29 = vpop.permute.xlu0 %1596 }
 0x251   :  { %v7012_v62 = vpop.permute.xlu1 %1634 }
 0x252   :  { %v3999_v47 = vpop.f32.mrb[0].mxu0  ;;  %v7015_v49 = vpop.permute.xlu0 %1598 }
 0x253   :  { %v2589_v43 = vadd.f32 %v3999_v47, %v7010_v30  ;;  %v2580_v33 = vpop.f32.mrb[1].mxu0  ;;  %v7900_v47 = vld [vmem:[#allocation88_spill] sm:$0xff] }
 0x254   :  { %v2581_v3 = vadd.f32 %v7010_v30, %v2580_v33  ;;  %v4000_v0 = vpop.f32.mrb[2].mxu0  ;;  %v7901_v33 = vld [vmem:[#allocation6_spill] sm:$0xff] }
 0x255   :  { %v2941_v2 = vmul.f32 0.1, %v2589_v43  ;;  %v2592_v10 = vadd.f32 %v4000_v0, %v7010_v30  ;;  %v1705_v35 = vpop.permute.xlu1 %1704  ;;  %v2583_v31 = vpop.f32.mrb[3].mxu0  ;;  %vm2869_vm15 = vcmp.gt.f32.partialorder %v2589_v43, 0.0  ;;  %v2214_v0 = vsel %vm2152_vm10, %v2141_v59, %v7003_v11 }
 0x256   :  { %v2939_v23 = vmul.f32 0.1, %v2581_v3  ;;  %v2584_v26 = vadd.f32 %v7010_v30, %v2583_v31  ;;  %vm2867_vm0 = vcmp.gt.f32.partialorder %v2581_v3, 0.0  ;;  %v7020_v8 = vpop.permute.xlu0 %1668 }
 0x257   :  { %vm2870_vm1 = vcmp.gt.f32.partialorder %v2592_v10, 0.0  ;;  %v2942_v13 = vmul.f32 0.1, %v2592_v10  ;;  %v3013_v53 = vsel %vm2869_vm15, %v2589_v43, %v2941_v2  ;;  %v4035_v27 = vpop.f32.mrb[0].mxu1  ;;  %v1924_v43 = vsel %vm1860_vm6, %v4194_v6, %v7900_v47  ;;  %v7902_v2 = vld [vmem:[#allocation37_spill] sm:$0xff] }
 0x258   :  { %vm2868_vm2 = vcmp.gt.f32.partialorder %v2584_v26, 0.0  ;;  %v2940_v19 = vmul.f32 0.1, %v2584_v26  ;;  %v3011_v25 = vsel %vm2867_vm0, %v2581_v3, %v2939_v23  ;;  %v2733_v40 = vadd.f32 %v4035_v27, %v7010_v30  ;;  %v2724_v4 = vpop.f32.mrb[1].mxu1  ;;  %v4195_v27 = vld [vmem:[%s7444_s0 + $0x68] sm:$0xff]  }
 0x259   :  { %v3014_v38 = vsel %vm2870_vm1, %v2592_v10, %v2942_v13  ;;  %v7022_v7 = vpop.permute.xlu1 %1706  ;;  %v2725_v44 = vadd.f32 %v7010_v30, %v2724_v4  ;;  %v4036_v61 = vpop.f32.mrb[2].mxu1  ;;  %v1959_v3 = vsel %vm1933_vm7, %v1886_v41, %v7901_v33  ;;  %v1997_v60 = vsel %vm1933_vm7, %v1924_v43, %v7902_v2  ;;  %v7903_v10 = vld [vmem:[#allocation121_spill] sm:$0xff]  ;;  %v7906_v4 = vld [vmem:[#allocation4_spill] sm:$0xff] }
 0x25a   :  { %v3748_v12 = vpack.c.bf16 %v3014_v38, %v3013_v53  ;;  %v3012_v42 = vsel %vm2868_vm2, %v2584_v26, %v2940_v19  ;;  %v2977_v17 = vmul.f32 0.1, %v2733_v40  ;;  %v2736_v15 = vadd.f32 %v4036_v61, %v7010_v30  ;;  %v2727_v45 = vpop.f32.mrb[3].mxu1  ;;  %v1671_v58 = vpop.permute.xlu0 %1670  ;;  %v7904_v13 = vld [vmem:[#allocation17_spill] sm:$0xff]  ;;  %v7907_v61 = vld [vmem:[#allocation40_spill] sm:$0xff] }
 0x25b   :  { %v3743_v56 = vpack.c.bf16 %v3012_v42, %v3011_v25  ;;  %vm2905_vm3 = vcmp.gt.f32.partialorder %v2733_v40, 0.0  ;;  %v2975_v57 = vmul.f32 0.1, %v2725_v44  ;;  %v2728_v24 = vadd.f32 %v7010_v30, %v2727_v45  ;;  %v7905_v25 = vld [vmem:[#allocation73_spill] sm:$0xff] }
 0x25c   :  { %3920 = vst [vmem:[%s7447_s3 + $0x8] sm:$0xff] %v3748_v12   ;;  %vm2903_vm4 = vcmp.gt.f32.partialorder %v2725_v44, 0.0  ;;  %vm2906_vm5 = vcmp.gt.f32.partialorder %v2736_v15, 0.0  ;;  %v2978_v50 = vmul.f32 0.1, %v2736_v15  ;;  %v3049_v63 = vsel %vm2905_vm3, %v2733_v40, %v2977_v17 }
 0x25d   :  { %3744 = vst [vmem:[%s7447_s3] sm:$0xff] %v3743_v56   ;;  %v1777_v14 = vpop.permute.xlu1 %1776  ;;  %vm2904_vm15 = vcmp.gt.f32.partialorder %v2728_v24, 0.0  ;;  %v2976_v54 = vmul.f32 0.1, %v2728_v24  ;;  %v3047_v51 = vsel %vm2903_vm4, %v2725_v44, %v2975_v57  ;;  %v2032_v31 = vsel %vm2006_vm8, %v1959_v3, %v7903_v10 }
 0x25e   :  { %v3050_v28 = vsel %vm2906_vm5, %v2736_v15, %v2978_v50  ;;  %v1741_v52 = vpop.permute.xlu0 %1740  ;;  %v2287_v23 = vsel %vm2225_vm11, %v2214_v0, %v1705_v35  ;;  %v2070_v11 = vsel %vm2006_vm8, %v1997_v60, %v7904_v13  ;;  %v2105_v19 = vsel %vm2079_vm9, %v2032_v31, %v6996_v5 }
 0x25f   :  { %v3838_v32 = vpack.c.bf16 %v3050_v28, %v3049_v63  ;;  %v3048_v9 = vsel %vm2904_vm15, %v2728_v24, %v2976_v54  ;;  %v2360_v53 = vsel %vm2298_vm12, %v2287_v23, %v1777_v14  ;;  %v1888_v35 = vsel %vm1860_vm6, %v4195_v27, %v7905_v25 }
 0x260   :  { %v3833_v37 = vpack.c.bf16 %v3048_v9, %v3047_v51  ;;  %v2143_v12 = vsel %vm2079_vm9, %v2070_v11, %v6998_v34  ;;  %v2178_v42 = vsel %vm2152_vm10, %v2105_v19, %v7005_v29  ;;  %v1961_v5 = vsel %vm1933_vm7, %v1888_v35, %v7906_v4 }
 0x261   :  { %v1779_v39 = vpop.permute.xlu1 %1778  ;;  %3938 = vst [vmem:[%s7447_s3 + $0x98] sm:$0xff] %v3838_v32   ;;  %v2216_v56 = vsel %vm2152_vm10, %v2143_v12, %v7012_v62  ;;  %v2251_v44 = vsel %vm2225_vm11, %v2178_v42, %v7020_v8  ;;  %v2034_v17 = vsel %vm2006_vm8, %v1961_v5, %v7907_v61 }
 0x262   :  { %3937 = vst [vmem:[%s7447_s3 + $0x90] sm:$0xff] %v3833_v37   ;;  %v1743_v26 = vpop.permute.xlu0 %1742  ;;  %v2289_v34 = vsel %vm2225_vm11, %v2216_v56, %v7022_v7  ;;  %v2324_v29 = vsel %vm2298_vm12, %v2251_v44, %v1741_v52  ;;  %v2107_v45 = vsel %vm2079_vm9, %v2034_v17, %v7001_v20  ;;  %v4196_v17 = vld [vmem:[%s7444_s0 + $0x114] sm:$0xff]  }
 0x263   :  { %v2362_v57 = vsel %vm2298_vm12, %v2289_v34, %v1779_v39  ;;  %v2180_v8 = vsel %vm2152_vm10, %v2107_v45, %v7015_v49  ;;  %v7908_v34 = vld [vmem:[#allocation91_spill] sm:$0xff] }
 0x264   :  { %v2253_v7 = vsel %vm2225_vm11, %v2180_v8, %v1671_v58 }
 0x265   :  { %v1849_v38 = vpop.permute.xlu1 %1848  ;;  %v2326_v50 = vsel %vm2298_vm12, %v2253_v7, %v1743_v26  ;;  %v7911_v7 = vld [vmem:[#allocation76_spill] sm:$0xff] }
 0x266   :  { %v2433_v40 = vsel %vm2371_vm13, %v2360_v53, %v1849_v38  ;;  %v1813_v15 = vpop.permute.xlu0 %1812 }
 0x267   :  { %4057 = vmatprep.mubr.msk.bf16.mxu1 %vm2466_vm14, %v2433_v40  ;;  %v2397_v62 = vsel %vm2371_vm13, %v2324_v29, %v1813_v15  ;;  %v1926_v29 = vsel %vm1860_vm6, %v4196_v17, %v7908_v34  ;;  %v7909_v15 = vld [vmem:[#allocation110_spill] sm:$0xff] }
 0x268   :  { %4021 = vmatprep.mubr.msk.bf16.mxu0 %vm2466_vm14, %v2397_v62  ;;  %v1999_v45 = vsel %vm1933_vm7, %v1926_v29, %v7909_v15  ;;  %v7910_v62 = vld [vmem:[#allocation132_spill] sm:$0xff] }
 0x269   :  { %v1851_v24 = vpop.permute.xlu1 %1850 }
 0x26a   :  { %v2435_v14 = vsel %vm2371_vm13, %v2362_v57, %v1851_v24  ;;  %v1815_v18 = vpop.permute.xlu0 %1814  ;;  %v2072_v24 = vsel %vm2006_vm8, %v1999_v45, %v7910_v62 }
 0x26b   :  { %4058 = vmatmul.mubr.msk.bf16.gmra.mrb[24].mxu1 %vm2466_vm14, %v2435_v14  ;;  %v2399_v20 = vsel %vm2371_vm13, %v2326_v50, %v1815_v18  ;;  %v4197_v14 = vld [vmem:[%s7444_s0 + $0x70] sm:$0xff]  }
 0x26c   :  { %4022 = vmatmul.mubr.msk.bf16.gmra.mrb[24].mxu0 %vm2466_vm14, %v2399_v20  ;;  %v1890_v50 = vsel %vm1860_vm6, %v4197_v14, %v7911_v7  ;;  %v4198_v20 = vld [vmem:[%s7444_s0 + $0x11c] sm:$0xff]  }
 0x26d   :  { %v7109_v36 = vpop.permute.xlu1 %1564 }
 0x26e   :  { %v7112_v48 = vpop.permute.xlu0 %1528  ;;  %v2145_v18 = vsel %vm2079_vm9, %v2072_v24, %v7109_v36 }
 0x271   :  { %v7114_v49 = vpop.permute.xlu1 %1566 }
 0x272   :  { %v7116_v54 = vpop.permute.xlu0 %1530 }
 0x275   :  { %v7118_v1 = vpop.permute.xlu1 %1636 }
 0x276   :  { %v4003_v58 = vpop.f32.mrb[4].mxu0  ;;  %v7121_v28 = vpop.permute.xlu0 %1600 }
 0x277   :  { %v2605_v46 = vadd.f32 %v4003_v58, %v7010_v30  ;;  %v2596_v63 = vpop.f32.mrb[5].mxu0  ;;  %v7912_v58 = vld [vmem:[#allocation90_spill] sm:$0xff] }
 0x278   :  { %v2597_v52 = vadd.f32 %v7010_v30, %v2596_v63  ;;  %v4004_v21 = vpop.f32.mrb[6].mxu0  ;;  %v7913_v63 = vld [vmem:[#allocation13_spill] sm:$0xff] }
 0x279   :  { %v2945_v16 = vmul.f32 0.1, %v2605_v46  ;;  %v2608_v51 = vadd.f32 %v4004_v21, %v7010_v30  ;;  %v7125_v32 = vpop.permute.xlu1 %1638  ;;  %v2599_v9 = vpop.f32.mrb[7].mxu0  ;;  %vm2873_vm0 = vcmp.gt.f32.partialorder %v2605_v46, 0.0  ;;  %v2218_v21 = vsel %vm2152_vm10, %v2145_v18, %v7118_v1  ;;  %v4199_v1 = vld [vmem:[%s7444_s0 + $0x78] sm:$0xff]  }
 0x27a   :  { %v2943_v39 = vmul.f32 0.1, %v2597_v52  ;;  %v2600_v55 = vadd.f32 %v7010_v30, %v2599_v9  ;;  %vm2871_vm1 = vcmp.gt.f32.partialorder %v2597_v52, 0.0  ;;  %v7128_v59 = vpop.permute.xlu0 %1602  ;;  %v7915_v9 = vld [vmem:[#allocation123_spill] sm:$0xff] }
 0x27b   :  { %vm2874_vm2 = vcmp.gt.f32.partialorder %v2608_v51, 0.0  ;;  %v2946_v22 = vmul.f32 0.1, %v2608_v51  ;;  %v3017_v37 = vsel %vm2873_vm0, %v2605_v46, %v2945_v16  ;;  %v4039_v47 = vpop.f32.mrb[4].mxu1  ;;  %v1928_v46 = vsel %vm1860_vm6, %v4198_v20, %v7912_v58  ;;  %v7914_v16 = vld [vmem:[#allocation108_spill] sm:$0xff] }
 0x27c   :  { %vm2872_vm3 = vcmp.gt.f32.partialorder %v2600_v55, 0.0  ;;  %v2944_v41 = vmul.f32 0.1, %v2600_v55  ;;  %v3015_v33 = vsel %vm2871_vm1, %v2597_v52, %v2943_v39  ;;  %v2749_v2 = vadd.f32 %v4039_v47, %v7010_v30  ;;  %v2740_v60 = vpop.f32.mrb[5].mxu1 }
 0x27d   :  { %v3018_v6 = vsel %vm2874_vm2, %v2608_v51, %v2946_v22  ;;  %v1709_v43 = vpop.permute.xlu1 %1708  ;;  %v2741_v31 = vadd.f32 %v7010_v30, %v2740_v60  ;;  %v4040_v23 = vpop.f32.mrb[6].mxu1  ;;  %v1963_v52 = vsel %vm1933_vm7, %v1890_v50, %v7913_v63  ;;  %v2001_v51 = vsel %vm1933_vm7, %v1928_v46, %v7914_v16  ;;  %v7916_v22 = vld [vmem:[#allocation131_spill] sm:$0xff]  ;;  %v7918_v60 = vld [vmem:[#allocation5_spill] sm:$0xff] }
 0x27e   :  { %v3758_v3 = vpack.c.bf16 %v3018_v6, %v3017_v37  ;;  %v3016_v0 = vsel %vm2872_vm3, %v2600_v55, %v2944_v41  ;;  %v2981_v26 = vmul.f32 0.1, %v2749_v2  ;;  %v2752_v13 = vadd.f32 %v4040_v23, %v7010_v30  ;;  %v2743_v11 = vpop.f32.mrb[7].mxu1  ;;  %v1673_v19 = vpop.permute.xlu0 %1672  ;;  %v7919_v23 = vld [vmem:[#allocation122_spill] sm:$0xff] }
 0x27f   :  { %v3753_v10 = vpack.c.bf16 %v3016_v0, %v3015_v33  ;;  %vm2909_vm4 = vcmp.gt.f32.partialorder %v2749_v2, 0.0  ;;  %v2979_v53 = vmul.f32 0.1, %v2741_v31  ;;  %v2744_v38 = vadd.f32 %v7010_v30, %v2743_v11  ;;  %v7917_v33 = vld [vmem:[#allocation75_spill] sm:$0xff] }
 0x280   :  { %3922 = vst [vmem:[%s7447_s3 + $0x18] sm:$0xff] %v3758_v3   ;;  %vm2907_vm5 = vcmp.gt.f32.partialorder %v2741_v31, 0.0  ;;  %vm2910_vm15 = vcmp.gt.f32.partialorder %v2752_v13, 0.0  ;;  %v2982_v25 = vmul.f32 0.1, %v2752_v13  ;;  %v3053_v12 = vsel %vm2909_vm4, %v2749_v2, %v2981_v26 }
 0x281   :  { %3921 = vst [vmem:[%s7447_s3 + $0x10] sm:$0xff] %v3753_v10   ;;  %v1711_v27 = vpop.permute.xlu1 %1710  ;;  %vm2908_vm0 = vcmp.gt.f32.partialorder %v2744_v38, 0.0  ;;  %v2980_v35 = vmul.f32 0.1, %v2744_v38  ;;  %v3051_v4 = vsel %vm2907_vm5, %v2741_v31, %v2979_v53  ;;  %v2036_v39 = vsel %vm2006_vm8, %v1963_v52, %v7915_v9 }
 0x282   :  { %v3054_v42 = vsel %vm2910_vm15, %v2752_v13, %v2982_v25  ;;  %v1675_v40 = vpop.permute.xlu0 %1674  ;;  %v2291_v36 = vsel %vm2225_vm11, %v2218_v21, %v1709_v43  ;;  %v2074_v41 = vsel %vm2006_vm8, %v2001_v51, %v7916_v22  ;;  %v2109_v37 = vsel %vm2079_vm9, %v2036_v39, %v7112_v48 }
 0x283   :  { %v3848_v5 = vpack.c.bf16 %v3054_v42, %v3053_v12  ;;  %v3052_v56 = vsel %vm2908_vm0, %v2744_v38, %v2980_v35  ;;  %v1892_v3 = vsel %vm1860_vm6, %v4199_v1, %v7917_v33  ;;  %v2147_v43 = vsel %vm2079_vm9, %v2074_v41, %v7114_v49 }
 0x284   :  { %v3843_v61 = vpack.c.bf16 %v3052_v56, %v3051_v4  ;;  %v2182_v0 = vsel %vm2152_vm10, %v2109_v37, %v7121_v28  ;;  %v1965_v48 = vsel %vm1933_vm7, %v1892_v3, %v7918_v60  ;;  %v2220_v10 = vsel %vm2152_vm10, %v2147_v43, %v7125_v32 }
 0x285   :  { %v1781_v44 = vpop.permute.xlu1 %1780  ;;  %3940 = vst [vmem:[%s7447_s3 + $0xa8] sm:$0xff] %v3848_v5   ;;  %v2255_v31 = vsel %vm2225_vm11, %v2182_v0, %v1673_v19  ;;  %v2038_v26 = vsel %vm2006_vm8, %v1965_v48, %v7919_v23  ;;  %v2293_v49 = vsel %vm2225_vm11, %v2220_v10, %v1711_v27 }
 0x286   :  { %3939 = vst [vmem:[%s7447_s3 + $0xa0] sm:$0xff] %v3843_v61   ;;  %v1745_v57 = vpop.permute.xlu0 %1744  ;;  %v2364_v6 = vsel %vm2298_vm12, %v2291_v36, %v1781_v44  ;;  %v2111_v11 = vsel %vm2079_vm9, %v2038_v26, %v7116_v54  ;;  %v4200_v26 = vld [vmem:[%s7444_s0 + $0x124] sm:$0xff]  }
 0x287   :  { %v2328_v13 = vsel %vm2298_vm12, %v2255_v31, %v1745_v57  ;;  %v2184_v19 = vsel %vm2152_vm10, %v2111_v11, %v7128_v59 }
 0x288   :  { %v2257_v27 = vsel %vm2225_vm11, %v2184_v19, %v1675_v40 }
 0x289   :  { %v1783_v8 = vpop.permute.xlu1 %1782 }
 0x28a   :  { %v1747_v55 = vpop.permute.xlu0 %1746  ;;  %v2366_v53 = vsel %vm2298_vm12, %v2293_v49, %v1783_v8  ;;  %v7920_v49 = vld [vmem:[#allocation93_spill] sm:$0xff] }
 0x28b   :  { %v2330_v35 = vsel %vm2298_vm12, %v2257_v27, %v1747_v55  ;;  %v7923_v27 = vld [vmem:[#allocation78_spill] sm:$0xff] }
 0x28d   :  { %v1853_v47 = vpop.permute.xlu1 %1852 }
 0x28e   :  { %v2437_v2 = vsel %vm2371_vm13, %v2364_v6, %v1853_v47  ;;  %v1817_v28 = vpop.permute.xlu0 %1816 }
 0x28f   :  { %4061 = vmatprep.mubr.msk.bf16.mxu1 %vm2466_vm14, %v2437_v2  ;;  %v2401_v38 = vsel %vm2371_vm13, %v2328_v13, %v1817_v28  ;;  %v1930_v13 = vsel %vm1860_vm6, %v4200_v26, %v7920_v49  ;;  %v7921_v28 = vld [vmem:[#allocation39_spill] sm:$0xff] }
 0x290   :  { %4025 = vmatprep.mubr.msk.bf16.mxu0 %vm2466_vm14, %v2401_v38  ;;  %v2003_v11 = vsel %vm1933_vm7, %v1930_v13, %v7921_v28  ;;  %v7922_v38 = vld [vmem:[#allocation134_spill] sm:$0xff] }
 0x291   :  { %v1855_v32 = vpop.permute.xlu1 %1854 }
 0x292   :  { %v2439_v25 = vsel %vm2371_vm13, %v2366_v53, %v1855_v32  ;;  %v1819_v12 = vpop.permute.xlu0 %1818  ;;  %v2076_v32 = vsel %vm2006_vm8, %v2003_v11, %v7922_v38 }
 0x293   :  { %4062 = vmatmul.mubr.msk.bf16.gmra.mrb[28].mxu1 %vm2466_vm14, %v2439_v25  ;;  %v2403_v54 = vsel %vm2371_vm13, %v2330_v35, %v1819_v12  ;;  %v4201_v25 = vld [vmem:[%s7444_s0 + $0x80] sm:$0xff]  }
 0x294   :  { %4026 = vmatmul.mubr.msk.bf16.gmra.mrb[28].mxu0 %vm2466_vm14, %v2403_v54  ;;  %v1894_v35 = vsel %vm1860_vm6, %v4201_v25, %v7923_v27  ;;  %v4202_v54 = vld [vmem:[%s7444_s0 + $0x12c] sm:$0xff]  }
 0x295   :  { %v7213_v42 = vpop.permute.xlu1 %1568 }
 0x296   :  { %v7216_v4 = vpop.permute.xlu0 %1532  ;;  %v2149_v12 = vsel %vm2079_vm9, %v2076_v32, %v7213_v42 }
 0x299   :  { %v7218_v59 = vpop.permute.xlu1 %1570 }
 0x29a   :  { %v7220_v5 = vpop.permute.xlu0 %1534 }
 0x29d   :  { %v7222_v56 = vpop.permute.xlu1 %1640 }
 0x29e   :  { %v4043_v40 = vpop.f32.mrb[8].mxu1  ;;  %v7225_v17 = vpop.permute.xlu0 %1604 }
 0x29f   :  { %v2765_v44 = vadd.f32 %v4043_v40, %v7010_v30  ;;  %v2756_v61 = vpop.f32.mrb[9].mxu1  ;;  %v4007_v29 = vpop.f32.mrb[8].mxu0  ;;  %v7924_v40 = vld [vmem:[#allocation92_spill] sm:$0xff] }
 0x2a0   :  { %v4044_v34 = vpop.f32.mrb[10].mxu1  ;;  %v2621_v62 = vadd.f32 %v4007_v29, %v7010_v30  ;;  %v2612_v24 = vpop.f32.mrb[9].mxu0  ;;  %v2757_v7 = vadd.f32 %v7010_v30, %v2756_v61  ;;  %v7925_v61 = vld [vmem:[#allocation36_spill] sm:$0xff]  ;;  %v2222_v29 = vsel %vm2152_vm10, %v2149_v12, %v7222_v56  ;;  %v4203_v56 = vld [vmem:[%s7444_s0 + $0x88] sm:$0xff]  }
 0x2a1   :  { %vm2913_vm1 = vcmp.gt.f32.partialorder %v2765_v44, 0.0  ;;  %v2985_v15 = vmul.f32 0.1, %v2765_v44  ;;  %v2768_v45 = vadd.f32 %v4044_v34, %v7010_v30  ;;  %v7228_v57 = vpop.permute.xlu1 %1642  ;;  %v2759_v8 = vpop.f32.mrb[11].mxu1  ;;  %v2613_v14 = vadd.f32 %v7010_v30, %v2612_v24 }
 0x2a2   :  { %v4008_v50 = vpop.f32.mrb[10].mxu0  ;;  %vm2877_vm3 = vcmp.gt.f32.partialorder %v2621_v62, 0.0  ;;  %v2949_v20 = vmul.f32 0.1, %v2621_v62  ;;  %v7234_v52 = vpop.permute.xlu0 %1606  ;;  %v2983_v55 = vmul.f32 0.1, %v2757_v7  ;;  %v2760_v41 = vadd.f32 %v7010_v30, %v2759_v8 }
 0x2a3   :  { %vm2914_vm2 = vcmp.gt.f32.partialorder %v2768_v45, 0.0  ;;  %v2986_v18 = vmul.f32 0.1, %v2768_v45  ;;  %v3057_v58 = vsel %vm2913_vm1, %v2765_v44, %v2985_v15  ;;  %v2624_v46 = vadd.f32 %v4008_v50, %v7010_v30  ;;  %v2615_v63 = vpop.f32.mrb[11].mxu0  ;;  %v7926_v15 = vld [vmem:[#allocation111_spill] sm:$0xff] }
 0x2a4   :  { %vm2875_vm4 = vcmp.gt.f32.partialorder %v2613_v14, 0.0  ;;  %v2947_v21 = vmul.f32 0.1, %v2613_v14  ;;  %v2616_v51 = vadd.f32 %v7010_v30, %v2615_v63  ;;  %v3021_v37 = vsel %vm2877_vm3, %v2621_v62, %v2949_v20  ;;  %v7927_v62 = vld [vmem:[#allocation41_spill] sm:$0xff] }
 0x2a5   :  { %v3058_v16 = vsel %vm2914_vm2, %v2768_v45, %v2986_v18  ;;  %v1713_v9 = vpop.permute.xlu1 %1712  ;;  %vm2878_vm5 = vcmp.gt.f32.partialorder %v2624_v46, 0.0  ;;  %v2950_v39 = vmul.f32 0.1, %v2624_v46  ;;  %vm2911_vm0 = vcmp.gt.f32.partialorder %v2757_v7, 0.0 }
 0x2a6   :  { %v3858_v36 = vpack.c.bf16 %v3058_v16, %v3057_v58  ;;  %vm2876_vm15 = vcmp.gt.f32.partialorder %v2616_v51, 0.0  ;;  %v2948_v22 = vmul.f32 0.1, %v2616_v51  ;;  %v3019_v6 = vsel %vm2875_vm4, %v2613_v14, %v2947_v21  ;;  %v1677_v1 = vpop.permute.xlu0 %1676  ;;  %v7928_v14 = vld [vmem:[#allocation133_spill] sm:$0xff] }
 0x2a7   :  { %v3022_v47 = vsel %vm2878_vm5, %v2624_v46, %v2950_v39  ;;  %vm2912_vm1 = vcmp.gt.f32.partialorder %v2760_v41, 0.0  ;;  %v2984_v43 = vmul.f32 0.1, %v2760_v41  ;;  %v3055_v60 = vsel %vm2911_vm0, %v2757_v7, %v2983_v55  ;;  %v7929_v58 = vld [vmem:[#allocation77_spill] sm:$0xff] }
 0x2a8   :  { %3942 = vst [vmem:[%s7447_s3 + $0xb8] sm:$0xff] %v3858_v36   ;;  %v3768_v33 = vpack.c.bf16 %v3022_v47, %v3021_v37  ;;  %v3020_v3 = vsel %vm2876_vm15, %v2616_v51, %v2948_v22  ;;  %v1932_v44 = vsel %vm1860_vm6, %v4202_v54, %v7924_v40  ;;  %v1967_v34 = vsel %vm1933_vm7, %v1894_v35, %v7925_v61  ;;  %v7930_v51 = vld [vmem:[#allocation8_spill] sm:$0xff] }
 0x2a9   :  { %v1715_v0 = vpop.permute.xlu1 %1714  ;;  %v3763_v2 = vpack.c.bf16 %v3020_v3, %v3019_v6  ;;  %v3056_v48 = vsel %vm2912_vm1, %v2760_v41, %v2984_v43  ;;  %v2005_v45 = vsel %vm1933_vm7, %v1932_v44, %v7926_v15  ;;  %v2040_v24 = vsel %vm2006_vm8, %v1967_v34, %v7927_v62  ;;  %v7931_v36 = vld [vmem:[#allocation44_spill] sm:$0xff] }
 0x2aa   :  { %3924 = vst [vmem:[%s7447_s3 + $0x28] sm:$0xff] %v3768_v33   ;;  %v3853_v10 = vpack.c.bf16 %v3056_v48, %v3055_v60  ;;  %v1679_v31 = vpop.permute.xlu0 %1678  ;;  %v2295_v42 = vsel %vm2225_vm11, %v2222_v29, %v1713_v9  ;;  %v2078_v7 = vsel %vm2006_vm8, %v2005_v45, %v7928_v14  ;;  %v2113_v50 = vsel %vm2079_vm9, %v2040_v24, %v7216_v4 }
 0x2ab   :  { %3923 = vst [vmem:[%s7447_s3 + $0x20] sm:$0xff] %v3763_v2   ;;  %v1896_v46 = vsel %vm1860_vm6, %v4203_v56, %v7929_v58  ;;  %v2151_v63 = vsel %vm2079_vm9, %v2078_v7, %v7218_v59  ;;  %v2186_v21 = vsel %vm2152_vm10, %v2113_v50, %v7225_v17 }
 0x2ac   :  { %3941 = vst [vmem:[%s7447_s3 + $0xb0] sm:$0xff] %v3853_v10   ;;  %v1969_v4 = vsel %vm1933_vm7, %v1896_v46, %v7930_v51  ;;  %v2224_v9 = vsel %vm2152_vm10, %v2151_v63, %v7228_v57  ;;  %v2259_v39 = vsel %vm2225_vm11, %v2186_v21, %v1677_v1 }
 0x2ad   :  { %v1785_v23 = vpop.permute.xlu1 %1784  ;;  %v2042_v55 = vsel %vm2006_vm8, %v1969_v4, %v7931_v36  ;;  %v2297_v59 = vsel %vm2225_vm11, %v2224_v9, %v1715_v0 }
 0x2ae   :  { %v1749_v53 = vpop.permute.xlu0 %1748  ;;  %v2368_v18 = vsel %vm2298_vm12, %v2295_v42, %v1785_v23  ;;  %v2115_v41 = vsel %vm2079_vm9, %v2042_v55, %v7220_v5 }
 0x2af   :  { %v2332_v22 = vsel %vm2298_vm12, %v2259_v39, %v1749_v53  ;;  %v2188_v47 = vsel %vm2152_vm10, %v2115_v41, %v7234_v52 }
 0x2b0   :  { %v2261_v33 = vsel %vm2225_vm11, %v2188_v47, %v1679_v31 }
 0x2b1   :  { %v1787_v19 = vpop.permute.xlu1 %1786 }
 0x2b2   :  { %v1751_v8 = vpop.permute.xlu0 %1750  ;;  %v2370_v37 = vsel %vm2298_vm12, %v2297_v59, %v1787_v19 }
 0x2b3   :  { %v2334_v3 = vsel %vm2298_vm12, %v2261_v33, %v1751_v8 }
 0x2b5   :  { %v1857_v20 = vpop.permute.xlu1 %1856 }
 0x2b6   :  { %v2441_v16 = vsel %vm2371_vm13, %v2368_v18, %v1857_v20  ;;  %v1821_v17 = vpop.permute.xlu0 %1820 }
 0x2b7   :  { %4065 = vmatprep.mubr.msk.bf16.mxu1 %vm2466_vm14, %v2441_v16  ;;  %v2405_v6 = vsel %vm2371_vm13, %v2332_v22, %v1821_v17 }
 0x2b8   :  { %4029 = vmatprep.mubr.msk.bf16.mxu0 %vm2466_vm14, %v2405_v6 }
 0x2b9   :  { %v1859_v57 = vpop.permute.xlu1 %1858 }
 0x2ba   :  { %v2443_v1 = vsel %vm2371_vm13, %v2370_v37, %v1859_v57  ;;  %v1823_v43 = vpop.permute.xlu0 %1822 }
 0x2bb   :  { %4066 = vmatmul.mubr.msk.bf16.gmra.mrb[32].mxu1 %vm2466_vm14, %v2443_v1  ;;  %v2407_v5 = vsel %vm2371_vm13, %v2334_v3, %v1823_v43 }
 0x2bc   :  { %4030 = vmatmul.mubr.msk.bf16.gmra.mrb[32].mxu0 %vm2466_vm14, %v2407_v5 }
 0x2c6   :  { %v4047_v0 = vpop.f32.mrb[12].mxu1 }
 0x2c7   :  { %v2781_v2 = vadd.f32 %v4047_v0, %v7010_v30  ;;  %v2772_v60 = vpop.f32.mrb[13].mxu1  ;;  %v4011_v10 = vpop.f32.mrb[12].mxu0 }
 0x2c8   :  { %v2773_v52 = vadd.f32 %v7010_v30, %v2772_v60  ;;  %v4048_v48 = vpop.f32.mrb[14].mxu1  ;;  %v2637_v49 = vadd.f32 %v4011_v10, %v7010_v30  ;;  %v2628_v13 = vpop.f32.mrb[13].mxu0 }
 0x2c9   :  { %vm2917_vm6 = vcmp.gt.f32.partialorder %v2781_v2, 0.0  ;;  %v2989_v23 = vmul.f32 0.1, %v2781_v2  ;;  %v2784_v31 = vadd.f32 %v4048_v48, %v7010_v30  ;;  %v2775_v26 = vpop.f32.mrb[15].mxu1  ;;  %v2629_v28 = vadd.f32 %v7010_v30, %v2628_v13  ;;  %v4012_v11 = vpop.f32.mrb[14].mxu0 }
 0x2ca   :  { %v2776_v38 = vadd.f32 %v7010_v30, %v2775_v26  ;;  %v2953_v32 = vmul.f32 0.1, %v2637_v49  ;;  %v2987_v25 = vmul.f32 0.1, %v2773_v52  ;;  %v2640_v27 = vadd.f32 %v4012_v11, %v7010_v30  ;;  %v2631_v35 = vpop.f32.mrb[15].mxu0 }
 0x2cb   :  { %vm2918_vm7 = vcmp.gt.f32.partialorder %v2784_v31, 0.0  ;;  %v2990_v53 = vmul.f32 0.1, %v2784_v31  ;;  %v3061_v19 = vsel %vm2917_vm6, %v2781_v2, %v2989_v23  ;;  %vm2881_vm8 = vcmp.gt.f32.partialorder %v2637_v49, 0.0 }
 0x2cc   :  { %v2951_v12 = vmul.f32 0.1, %v2629_v28  ;;  %v2632_v40 = vadd.f32 %v7010_v30, %v2631_v35  ;;  %vm2879_vm9 = vcmp.gt.f32.partialorder %v2629_v28, 0.0  ;;  %vm2882_vm10 = vcmp.gt.f32.partialorder %v2640_v27, 0.0 }
 0x2cd   :  { %v3062_v54 = vsel %vm2918_vm7, %v2784_v31, %v2990_v53  ;;  %v2954_v44 = vmul.f32 0.1, %v2640_v27  ;;  %vm2915_vm11 = vcmp.gt.f32.partialorder %v2773_v52, 0.0  ;;  %vm2916_vm13 = vcmp.gt.f32.partialorder %v2776_v38, 0.0 }
 0x2ce   :  { %v3868_v61 = vpack.c.bf16 %v3062_v54, %v3061_v19  ;;  %vm2880_vm12 = vcmp.gt.f32.partialorder %v2632_v40, 0.0  ;;  %v2952_v34 = vmul.f32 0.1, %v2632_v40  ;;  %v3025_v29 = vsel %vm2881_vm8, %v2637_v49, %v2953_v32 }
 0x2cf   :  { %v3026_v15 = vsel %vm2882_vm10, %v2640_v27, %v2954_v44  ;;  %v2988_v45 = vmul.f32 0.1, %v2776_v38  ;;  %v3023_v62 = vsel %vm2879_vm9, %v2629_v28, %v2951_v12  ;;  %v3059_v8 = vsel %vm2915_vm11, %v2773_v52, %v2987_v25 }
 0x2d0   :  { %3944 = vst [vmem:[%s7447_s3 + $0xc8] sm:$0xff] %v3868_v61   ;;  %v3778_v24 = vpack.c.bf16 %v3026_v15, %v3025_v29  ;;  %v3024_v42 = vsel %vm2880_vm12, %v2632_v40, %v2952_v34 }
 0x2d1   :  { %v3773_v14 = vpack.c.bf16 %v3024_v42, %v3023_v62  ;;  %v3060_v7 = vsel %vm2916_vm13, %v2776_v38, %v2988_v45 }
 0x2d2   :  { %3926 = vst [vmem:[%s7447_s3 + $0x38] sm:$0xff] %v3778_v24   ;;  %v3863_v50 = vpack.c.bf16 %v3060_v7, %v3059_v8 }
 0x2d3   :  { %3925 = vst [vmem:[%s7447_s3 + $0x30] sm:$0xff] %v3773_v14  }
 0x2d4   :  { %3943 = vst [vmem:[%s7447_s3 + $0xc0] sm:$0xff] %v3863_v50  }
 0x2ee   :  { %v4051_v18 = vpop.f32.mrb[16].mxu1 }
 0x2ef   :  { %v2797_v20 = vadd.f32 %v4051_v18, %v7010_v30  ;;  %v2788_v56 = vpop.f32.mrb[17].mxu1  ;;  %v4015_v63 = vpop.f32.mrb[16].mxu0 }
 0x2f0   :  { %v2789_v58 = vadd.f32 %v7010_v30, %v2788_v56  ;;  %v4052_v46 = vpop.f32.mrb[18].mxu1  ;;  %v2653_v4 = vadd.f32 %v4015_v63, %v7010_v30  ;;  %v2644_v9 = vpop.f32.mrb[17].mxu0 }
 0x2f1   :  { %vm2921_vm14 = vcmp.gt.f32.partialorder %v2797_v20, 0.0  ;;  %v2993_v21 = vmul.f32 0.1, %v2797_v20  ;;  %v2800_v16 = vadd.f32 %v4052_v46, %v7010_v30  ;;  %v2791_v51 = vpop.f32.mrb[19].mxu1  ;;  %v2645_v39 = vadd.f32 %v7010_v30, %v2644_v9  ;;  %v4016_v36 = vpop.f32.mrb[18].mxu0 }
 0x2f2   :  { %v2792_v59 = vadd.f32 %v7010_v30, %v2791_v51  ;;  %v2957_v22 = vmul.f32 0.1, %v2653_v4  ;;  %v2991_v41 = vmul.f32 0.1, %v2789_v58  ;;  %v2656_v37 = vadd.f32 %v4016_v36, %v7010_v30  ;;  %v2647_v6 = vpop.f32.mrb[19].mxu0 }
 0x2f3   :  { %vm2922_vm2 = vcmp.gt.f32.partialorder %v2800_v16, 0.0  ;;  %v2994_v55 = vmul.f32 0.1, %v2800_v16  ;;  %v3065_v17 = vsel %vm2921_vm14, %v2797_v20, %v2993_v21  ;;  %vm2885_vm3 = vcmp.gt.f32.partialorder %v2653_v4, 0.0 }
 0x2f4   :  { %v2955_v57 = vmul.f32 0.1, %v2645_v39  ;;  %v2648_v1 = vadd.f32 %v7010_v30, %v2647_v6  ;;  %vm2883_vm4 = vcmp.gt.f32.partialorder %v2645_v39, 0.0  ;;  %vm2886_vm5 = vcmp.gt.f32.partialorder %v2656_v37, 0.0 }
 0x2f5   :  { %v3066_v47 = vsel %vm2922_vm2, %v2800_v16, %v2994_v55  ;;  %v2958_v33 = vmul.f32 0.1, %v2656_v37  ;;  %vm2919_vm15 = vcmp.gt.f32.partialorder %v2789_v58, 0.0  ;;  %vm2920_vm1 = vcmp.gt.f32.partialorder %v2792_v59, 0.0 }
 0x2f6   :  { %v3878_v3 = vpack.c.bf16 %v3066_v47, %v3065_v17  ;;  %vm2884_vm0 = vcmp.gt.f32.partialorder %v2648_v1, 0.0  ;;  %v2956_v43 = vmul.f32 0.1, %v2648_v1  ;;  %v3029_v5 = vsel %vm2885_vm3, %v2653_v4, %v2957_v22 }
 0x2f7   :  { %v3030_v0 = vsel %vm2886_vm5, %v2656_v37, %v2958_v33  ;;  %v2992_v2 = vmul.f32 0.1, %v2792_v59  ;;  %v3027_v60 = vsel %vm2883_vm4, %v2645_v39, %v2955_v57  ;;  %v3063_v10 = vsel %vm2919_vm15, %v2789_v58, %v2991_v41 }
 0x2f8   :  { %3946 = vst [vmem:[%s7447_s3 + $0xd8] sm:$0xff] %v3878_v3   ;;  %v3788_v52 = vpack.c.bf16 %v3030_v0, %v3029_v5  ;;  %v3028_v48 = vsel %vm2884_vm0, %v2648_v1, %v2956_v43 }
 0x2f9   :  { %v3783_v23 = vpack.c.bf16 %v3028_v48, %v3027_v60  ;;  %v3064_v31 = vsel %vm2920_vm1, %v2792_v59, %v2992_v2 }
 0x2fa   :  { %3928 = vst [vmem:[%s7447_s3 + $0x48] sm:$0xff] %v3788_v52   ;;  %v3873_v26 = vpack.c.bf16 %v3064_v31, %v3063_v10 }
 0x2fb   :  { %3927 = vst [vmem:[%s7447_s3 + $0x40] sm:$0xff] %v3783_v23  }
 0x2fc   :  { %3945 = vst [vmem:[%s7447_s3 + $0xd0] sm:$0xff] %v3873_v26  }
 0x316   :  { %v4055_v49 = vpop.f32.mrb[20].mxu1 }
 0x317   :  { %v2813_v13 = vadd.f32 %v4055_v49, %v7010_v30  ;;  %v2804_v28 = vpop.f32.mrb[21].mxu1  ;;  %v4019_v38 = vpop.f32.mrb[20].mxu0 }
 0x318   :  { %v2805_v11 = vadd.f32 %v7010_v30, %v2804_v28  ;;  %v4056_v53 = vpop.f32.mrb[22].mxu1  ;;  %v2669_v27 = vadd.f32 %v4019_v38, %v7010_v30  ;;  %v2660_v35 = vpop.f32.mrb[21].mxu0 }
 0x319   :  { %vm2925_vm6 = vcmp.gt.f32.partialorder %v2813_v13, 0.0  ;;  %v2997_v32 = vmul.f32 0.1, %v2813_v13  ;;  %v2816_v19 = vadd.f32 %v4056_v53, %v7010_v30  ;;  %v2807_v25 = vpop.f32.mrb[23].mxu1  ;;  %v2661_v12 = vadd.f32 %v7010_v30, %v2660_v35  ;;  %v4020_v54 = vpop.f32.mrb[22].mxu0 }
 0x31a   :  { %v2808_v44 = vadd.f32 %v7010_v30, %v2807_v25  ;;  %v2961_v61 = vmul.f32 0.1, %v2669_v27  ;;  %v2995_v29 = vmul.f32 0.1, %v2805_v11  ;;  %v2672_v15 = vadd.f32 %v4020_v54, %v7010_v30  ;;  %v2663_v45 = vpop.f32.mrb[23].mxu0 }
 0x31b   :  { %vm2926_vm7 = vcmp.gt.f32.partialorder %v2816_v19, 0.0  ;;  %v2998_v40 = vmul.f32 0.1, %v2816_v19  ;;  %v3069_v34 = vsel %vm2925_vm6, %v2813_v13, %v2997_v32  ;;  %vm2889_vm8 = vcmp.gt.f32.partialorder %v2669_v27, 0.0 }
 0x31c   :  { %v2959_v62 = vmul.f32 0.1, %v2661_v12  ;;  %v2664_v42 = vadd.f32 %v7010_v30, %v2663_v45  ;;  %vm2887_vm9 = vcmp.gt.f32.partialorder %v2661_v12, 0.0  ;;  %vm2890_vm10 = vcmp.gt.f32.partialorder %v2672_v15, 0.0 }
 0x31d   :  { %v3070_v24 = vsel %vm2926_vm7, %v2816_v19, %v2998_v40  ;;  %v2962_v8 = vmul.f32 0.1, %v2672_v15  ;;  %vm2923_vm11 = vcmp.gt.f32.partialorder %v2805_v11, 0.0  ;;  %vm2924_vm13 = vcmp.gt.f32.partialorder %v2808_v44, 0.0 }
 0x31e   :  { %v3888_v14 = vpack.c.bf16 %v3070_v24, %v3069_v34  ;;  %vm2888_vm12 = vcmp.gt.f32.partialorder %v2664_v42, 0.0  ;;  %v2960_v7 = vmul.f32 0.1, %v2664_v42  ;;  %v3033_v50 = vsel %vm2889_vm8, %v2669_v27, %v2961_v61 }
 0x31f   :  { %v3034_v18 = vsel %vm2890_vm10, %v2672_v15, %v2962_v8  ;;  %v2996_v20 = vmul.f32 0.1, %v2808_v44  ;;  %v3031_v56 = vsel %vm2887_vm9, %v2661_v12, %v2959_v62  ;;  %v3067_v63 = vsel %vm2923_vm11, %v2805_v11, %v2995_v29  ;;  %v7406_v62 = vld [vmem:[%s7446_s2] ss:$0 sm:$0xff] }
 0x320   :  { %3948 = vst [vmem:[%s7447_s3 + $0xe8] sm:$0xff] %v3888_v14   ;;  %v3798_v58 = vpack.c.bf16 %v3034_v18, %v3033_v50  ;;  %v3032_v46 = vsel %vm2888_vm12, %v2664_v42, %v2960_v7 }
 0x321   :  { %v3793_v21 = vpack.c.bf16 %v3032_v46, %v3031_v56  ;;  %v3068_v16 = vsel %vm2924_vm13, %v2808_v44, %v2996_v20 }
 0x322   :  { %3930 = vst [vmem:[%s7447_s3 + $0x58] sm:$0xff] %v3798_v58   ;;  %v3883_v51 = vpack.c.bf16 %v3068_v16, %v3067_v63 }
 0x323   :  { %3929 = vst [vmem:[%s7447_s3 + $0x50] sm:$0xff] %v3793_v21  }
 0x324   :  { %3947 = vst [vmem:[%s7447_s3 + $0xe0] sm:$0xff] %v3883_v51  }
 0x33e   :  { %v4059_v4 = vpop.f32.mrb[24].mxu1 }
 0x33f   :  { %v2829_v9 = vadd.f32 %v4059_v4, %v7010_v30  ;;  %v2820_v39 = vpop.f32.mrb[25].mxu1  ;;  %v4023_v59 = vpop.f32.mrb[24].mxu0 }
 0x340   :  { %v2821_v36 = vadd.f32 %v7010_v30, %v2820_v39  ;;  %v4060_v55 = vpop.f32.mrb[26].mxu1  ;;  %v2685_v37 = vadd.f32 %v4023_v59, %v7010_v30  ;;  %v2676_v6 = vpop.f32.mrb[25].mxu0 }
 0x341   :  { %vm2929_vm14 = vcmp.gt.f32.partialorder %v2829_v9, 0.0  ;;  %v3001_v22 = vmul.f32 0.1, %v2829_v9  ;;  %v2832_v17 = vadd.f32 %v4060_v55, %v7010_v30  ;;  %v2823_v41 = vpop.f32.mrb[27].mxu1  ;;  %v2677_v57 = vadd.f32 %v7010_v30, %v2676_v6  ;;  %v4024_v47 = vpop.f32.mrb[26].mxu0 }
 0x342   :  { %v2824_v33 = vadd.f32 %v7010_v30, %v2823_v41  ;;  %v2965_v3 = vmul.f32 0.1, %v2685_v37  ;;  %v2999_v5 = vmul.f32 0.1, %v2821_v36  ;;  %v2688_v0 = vadd.f32 %v4024_v47, %v7010_v30  ;;  %v2679_v2 = vpop.f32.mrb[27].mxu0 }
 0x343   :  { %vm2930_vm2 = vcmp.gt.f32.partialorder %v2832_v17, 0.0  ;;  %v3002_v1 = vmul.f32 0.1, %v2832_v17  ;;  %v3073_v43 = vsel %vm2929_vm14, %v2829_v9, %v3001_v22  ;;  %vm2893_vm3 = vcmp.gt.f32.partialorder %v2685_v37, 0.0 }
 0x344   :  { %v2963_v60 = vmul.f32 0.1, %v2677_v57  ;;  %v2680_v48 = vadd.f32 %v7010_v30, %v2679_v2  ;;  %vm2891_vm4 = vcmp.gt.f32.partialorder %v2677_v57, 0.0  ;;  %vm2894_vm5 = vcmp.gt.f32.partialorder %v2688_v0, 0.0 }
 0x345   :  { %v3074_v52 = vsel %vm2930_vm2, %v2832_v17, %v3002_v1  ;;  %v2966_v10 = vmul.f32 0.1, %v2688_v0  ;;  %vm2927_vm15 = vcmp.gt.f32.partialorder %v2821_v36, 0.0  ;;  %vm2928_vm1 = vcmp.gt.f32.partialorder %v2824_v33, 0.0 }
 0x346   :  { %v3898_v23 = vpack.c.bf16 %v3074_v52, %v3073_v43  ;;  %vm2892_vm0 = vcmp.gt.f32.partialorder %v2680_v48, 0.0  ;;  %v2964_v31 = vmul.f32 0.1, %v2680_v48  ;;  %v3037_v26 = vsel %vm2893_vm3, %v2685_v37, %v2965_v3 }
 0x347   :  { %v3038_v49 = vsel %vm2894_vm5, %v2688_v0, %v2966_v10  ;;  %v3000_v13 = vmul.f32 0.1, %v2824_v33  ;;  %v3035_v28 = vsel %vm2891_vm4, %v2677_v57, %v2963_v60  ;;  %v3071_v38 = vsel %vm2927_vm15, %v2821_v36, %v2999_v5 }
 0x348   :  { %3950 = vst [vmem:[%s7447_s3 + $0xf8] sm:$0xff] %v3898_v23   ;;  %v3808_v11 = vpack.c.bf16 %v3038_v49, %v3037_v26  ;;  %v3036_v53 = vsel %vm2892_vm0, %v2680_v48, %v2964_v31 }
 0x349   :  { %v3803_v32 = vpack.c.bf16 %v3036_v53, %v3035_v28  ;;  %v3072_v19 = vsel %vm2928_vm1, %v2824_v33, %v3000_v13 }
 0x34a   :  { %3932 = vst [vmem:[%s7447_s3 + $0x68] sm:$0xff] %v3808_v11   ;;  %v3893_v25 = vpack.c.bf16 %v3072_v19, %v3071_v38 }
 0x34b   :  { %3931 = vst [vmem:[%s7447_s3 + $0x60] sm:$0xff] %v3803_v32  }
 0x34c   :  { %3949 = vst [vmem:[%s7447_s3 + $0xf0] sm:$0xff] %v3893_v25  }
 0x366   :  { %v4063_v27 = vpop.f32.mrb[28].mxu1 }
 0x367   :  { %v2845_v35 = vadd.f32 %v4063_v27, %v7010_v30  ;;  %v2836_v12 = vpop.f32.mrb[29].mxu1  ;;  %v4027_v44 = vpop.f32.mrb[28].mxu0 }
 0x368   :  { %v2837_v54 = vadd.f32 %v7010_v30, %v2836_v12  ;;  %v4064_v40 = vpop.f32.mrb[30].mxu1  ;;  %v2701_v15 = vadd.f32 %v4027_v44, %v7010_v30  ;;  %v2692_v45 = vpop.f32.mrb[29].mxu0 }
 0x369   :  { %vm2933_vm6 = vcmp.gt.f32.partialorder %v2845_v35, 0.0  ;;  %v3005_v61 = vmul.f32 0.1, %v2845_v35  ;;  %v2848_v34 = vadd.f32 %v4064_v40, %v7010_v30  ;;  %v2839_v29 = vpop.f32.mrb[31].mxu1  ;;  %v2693_v24 = vadd.f32 %v7406_v62, %v2692_v45  ;;  %v4028_v42 = vpop.f32.mrb[30].mxu0 }
 0x36a   :  { %v2840_v14 = vadd.f32 %v7406_v62, %v2839_v29  ;;  %v2969_v7 = vmul.f32 0.1, %v2701_v15  ;;  %v3003_v18 = vmul.f32 0.1, %v2837_v54  ;;  %v2704_v20 = vadd.f32 %v7406_v62, %v4028_v42  ;;  %v2695_v56 = vpop.f32.mrb[31].mxu0 }
 0x36b   :  { %vm2934_vm7 = vcmp.gt.f32.partialorder %v2848_v34, 0.0  ;;  %v3006_v8 = vmul.f32 0.1, %v2848_v34  ;;  %v3077_v50 = vsel %vm2933_vm6, %v2845_v35, %v3005_v61  ;;  %vm2897_vm8 = vcmp.gt.f32.partialorder %v2701_v15, 0.0 }
 0x36c   :  { %v2967_v30 = vmul.f32 0.1, %v2693_v24  ;;  %v2696_v46 = vadd.f32 %v7406_v62, %v2695_v56  ;;  %vm2895_vm9 = vcmp.gt.f32.partialorder %v2693_v24, 0.0  ;;  %vm2898_vm10 = vcmp.gt.f32.partialorder %v2704_v20, 0.0 }
 0x36d   :  { %v3078_v58 = vsel %vm2934_vm7, %v2848_v34, %v3006_v8  ;;  %v2970_v63 = vmul.f32 0.1, %v2704_v20  ;;  %vm2931_vm11 = vcmp.gt.f32.partialorder %v2837_v54, 0.0  ;;  %vm2932_vm13 = vcmp.gt.f32.partialorder %v2840_v14, 0.0 }
 0x36e   :  { %v3908_v21 = vpack.c.bf16 %v3078_v58, %v3077_v50  ;;  %vm2896_vm12 = vcmp.gt.f32.partialorder %v2696_v46, 0.0  ;;  %v2968_v16 = vmul.f32 0.1, %v2696_v46  ;;  %v3041_v51 = vsel %vm2897_vm8, %v2701_v15, %v2969_v7 }
 0x36f   :  { %v3042_v4 = vsel %vm2898_vm10, %v2704_v20, %v2970_v63  ;;  %v3004_v9 = vmul.f32 0.1, %v2840_v14  ;;  %v3039_v39 = vsel %vm2895_vm9, %v2693_v24, %v2967_v30  ;;  %v3075_v59 = vsel %vm2931_vm11, %v2837_v54, %v3003_v18 }
 0x370   :  { %3952 = vst [vmem:[%s7447_s3 + $0x108] sm:$0xff] %v3908_v21   ;;  %v3818_v36 = vpack.c.bf16 %v3042_v4, %v3041_v51  ;;  %v3040_v55 = vsel %vm2896_vm12, %v2696_v46, %v2968_v16 }
 0x371   :  { %v3813_v22 = vpack.c.bf16 %v3040_v55, %v3039_v39  ;;  %v3076_v17 = vsel %vm2932_vm13, %v2840_v14, %v3004_v9 }
 0x372   :  { %3934 = vst [vmem:[%s7447_s3 + $0x78] sm:$0xff] %v3818_v36   ;;  %v3903_v41 = vpack.c.bf16 %v3076_v17, %v3075_v59 }
 0x373   :  { %3933 = vst [vmem:[%s7447_s3 + $0x70] sm:$0xff] %v3813_v22  }
 0x374   :  { %3951 = vst [vmem:[%s7447_s3 + $0x100] sm:$0xff] %v3903_v41  }
 0x38e   :  { %v4067_v37 = vpop.f32.mrb[32].mxu1 }
 0x38f   :  { %v2861_v6 = vadd.f32 %v7406_v62, %v4067_v37  ;;  %v2852_v57 = vpop.f32.mrb[33].mxu1  ;;  %v4031_v33 = vpop.f32.mrb[32].mxu0 }
 0x390   :  { %v2853_v47 = vadd.f32 %v7406_v62, %v2852_v57  ;;  %v4068_v1 = vpop.f32.mrb[34].mxu1  ;;  %v2717_v0 = vadd.f32 %v7406_v62, %v4031_v33  ;;  %v2708_v2 = vpop.f32.mrb[33].mxu0 }
 0x391   :  { %vm2937_vm14 = vcmp.gt.f32.partialorder %v2861_v6, 0.0  ;;  %v3009_v3 = vmul.f32 0.1, %v2861_v6  ;;  %v2864_v43 = vadd.f32 %v7406_v62, %v4068_v1  ;;  %v2855_v5 = vpop.f32.mrb[35].mxu1  ;;  %v2709_v60 = vadd.f32 %v7406_v62, %v2708_v2  ;;  %v4032_v52 = vpop.f32.mrb[34].mxu0 }
 0x392   :  { %v2856_v10 = vadd.f32 %v7406_v62, %v2855_v5  ;;  %v2973_v23 = vmul.f32 0.1, %v2717_v0  ;;  %v3007_v26 = vmul.f32 0.1, %v2853_v47  ;;  %v2720_v49 = vadd.f32 %v7406_v62, %v4032_v52  ;;  %v2711_v13 = vpop.f32.mrb[35].mxu0 }
 0x393   :  { %vm2938_vm2 = vcmp.gt.f32.partialorder %v2864_v43, 0.0  ;;  %v3010_v48 = vmul.f32 0.1, %v2864_v43  ;;  %v3081_v31 = vsel %vm2937_vm14, %v2861_v6, %v3009_v3  ;;  %vm2901_vm3 = vcmp.gt.f32.partialorder %v2717_v0, 0.0 }
 0x394   :  { %v2971_v28 = vmul.f32 0.1, %v2709_v60  ;;  %v2712_v53 = vadd.f32 %v7406_v62, %v2711_v13  ;;  %vm2899_vm4 = vcmp.gt.f32.partialorder %v2709_v60, 0.0  ;;  %vm2902_vm5 = vcmp.gt.f32.partialorder %v2720_v49, 0.0 }
 0x395   :  { %v3082_v11 = vsel %vm2938_vm2, %v2864_v43, %v3010_v48  ;;  %v2974_v38 = vmul.f32 0.1, %v2720_v49  ;;  %vm2935_vm15 = vcmp.gt.f32.partialorder %v2853_v47, 0.0  ;;  %vm2936_vm1 = vcmp.gt.f32.partialorder %v2856_v10, 0.0 }
 0x396   :  { %v3918_v32 = vpack.c.bf16 %v3082_v11, %v3081_v31  ;;  %vm2900_vm0 = vcmp.gt.f32.partialorder %v2712_v53, 0.0  ;;  %v2972_v19 = vmul.f32 0.1, %v2712_v53  ;;  %v3045_v25 = vsel %vm2901_vm3, %v2717_v0, %v2973_v23 }
 0x397   :  { %v3046_v27 = vsel %vm2902_vm5, %v2720_v49, %v2974_v38  ;;  %v3008_v35 = vmul.f32 0.1, %v2856_v10  ;;  %v3043_v12 = vsel %vm2899_vm4, %v2709_v60, %v2971_v28  ;;  %v3079_v44 = vsel %vm2935_vm15, %v2853_v47, %v3007_v26 }
 0x398   :  { %3954 = vst [vmem:[%s7447_s3 + $0x118] sm:$0xff] %v3918_v32   ;;  %v3828_v54 = vpack.c.bf16 %v3046_v27, %v3045_v25  ;;  %v3044_v40 = vsel %vm2900_vm0, %v2712_v53, %v2972_v19 }
 0x399   :  { %v3823_v61 = vpack.c.bf16 %v3044_v40, %v3043_v12  ;;  %v3080_v34 = vsel %vm2936_vm1, %v2856_v10, %v3008_v35 }
 0x39a   :  { %3936 = vst [vmem:[%s7447_s3 + $0x88] sm:$0xff] %v3828_v54   ;;  %v3913_v29 = vpack.c.bf16 %v3080_v34, %v3079_v44 }
 0x39b   :  { %3935 = vst [vmem:[%s7447_s3 + $0x80] sm:$0xff] %v3823_v61  }
 0x39c   :  { %3953 = vst [vmem:[%s7447_s3 + $0x110] sm:$0xff] %v3913_v29  }

// kernel: a_call__.14
= control target key start
LH: loop header
LB: loop body
LE: loop exit
PB: predicated region body
PF: predicated region fallthrough
CT: control target
= control target key end

     0   :  { %vm386_vm0 = vcmask 1045504   ;;  %vm188_vm1 = vcmask 1046528   ;;  %s1738_s11 = smov 64   ;;  %s1739_s16 = smov 32   ;;  %vm91_vm2 = vsmask.f32 7424  ;;  %s2711_s0 = inlined_call_operand.vmem [shape: bf16[2,1,102,32], index: 0, kind: input, shape index: {}]   ;;  %s2712_s1 = inlined_call_operand.vmem [shape: bf16[288,128], index: 1, kind: input, shape index: {}]   ;;  %s2713_s2 = inlined_call_operand.vmem [shape: f32[1,128], index: 2, kind: input, shape index: {}]   ;;  %s2714_s3 = inlined_call_operand.vmem [shape: bf16[160,128], index: 3, kind: output, shape index: {}]  }
   0x1   :  { %v18_v0 = vld [vmem:[%s2711_s0 + $0xc] sm:$0xf]  ;;  %v19_v1 = vld [vmem:[%s2711_s0 + $0x10] sm:$0xf]  ;;  %v1770_v2 = vld [vmem:[%s2711_s0 + $0x14] sm:$0xf] }
   0x2   :  { %v1773_v3 = vcombine.low %v19_v1, %v1770_v2  ;;  %v412_v4 = vld [vmem:[%s2711_s0 + $0x8] sm:$0xc]  ;;  %v214_v6 = vld [vmem:[%s2711_s0 + $0x4] sm:$0xe]  ;;  %v1784_v7 = vcombine.low %v18_v0, %v19_v1  ;;  %v183_v13 = vld [vmem:[%s2711_s0] sm:$0xe] }
   0x3   :  { %v17_v5 = vld [vmem:[%s2711_s0 + $0x8] sm:$0xf]  ;;  %v1408_v8 = vcombine.low %v412_v4, %v18_v0  ;;  %v381_v9 = vld [vmem:[%s2711_s0 + $0x4] sm:$0xc]  ;;  %v15_v18 = vld [vmem:[%s2711_s0] sm:$0xf] }
   0x4   :  { %v1789_v10 = vcombine.low %v17_v5, %v18_v0  ;;  %v1791_v11 = vcombine.low %v214_v6, %v17_v5  ;;  %v16_v12 = vld [vmem:[%s2711_s0 + $0x4] sm:$0xf]  ;;  %v428_v14 = vrot.slane %v1773_v3, 2  ;;  %v1403_v15 = vcombine.low %v381_v9, %v17_v5  ;;  %v1719_v31 = vld [vmem:[%s2712_s1 + $0x48] sm:$0xff]   ;;  %v1832_v36 = vld [vmem:[%s2711_s0 + $0x1c] sm:$0xf] }
   0x5   :  { %v388_v16 = vrot.slane %v1784_v7, 2  ;;  %v1382_v17 = vcombine.low %v183_v13, %v16_v12  ;;  %v1716_v19 = vld [vmem:[%s2712_s1 + $0x40] sm:$0xff]   ;;  %v427_v20 = vrot.slane %v1408_v8, 2  ;;  %v1808_v22 = vcombine.low %v15_v18, %v16_v12  ;;  %v1720_v37 = vld [vmem:[%s2712_s1 + $0x8] sm:$0xff]   ;;  %v21_v42 = vld [vmem:[%s2711_s0 + $0x18] sm:$0xf] }
   0x6   :  { %v190_v21 = vrot.slane %v1789_v10, 1  ;;  %v100_v23 = vshll.u32 %v1789_v10, 16  ;;  %v1717_v24 = vld [vmem:[%s2712_s1] sm:$0xff]   ;;  %v387_v25 = vrot.slane %v1403_v15, 2  ;;  %1548 = vmatprep.subr.bf16.mxu0 %v1716_v19  ;;  %1660 = vmatprep.subr.bf16.mxu1 %v1716_v19  ;;  %v232_v30 = vrot.slane %v1791_v11, 1  ;;  %v1721_v43 = vld [vmem:[%s2712_s1 + $0x50] sm:$0xff]  }
   0x7   :  { %v189_v26 = vrot.slane %v1382_v17, 1  ;;  %v429_v27 = vsel %vm386_vm0, %v427_v20, %v428_v14  ;;  %v93_v28 = vshrl.u32 %v1808_v22, 16  ;;  %v95_v29 = vshll.u32 %v1808_v22, 16  ;;  %1549 = vmatpush3.bf16.msra.mxu0 %v1717_v24  ;;  %1668 = vmatpush3.bf16.msra.mxu1 %v1717_v24  ;;  %v1857_v51 = vld [vmem:[%s2711_s0 + $0x4c] sm:$0xf]  ;;  %s1740_s29 = smov 96  }
   0x8   :  { %654 = vrot.lane.b32.xlu1 %v429_v27, %s1738_s11  ;;  %v389_v32 = vsel %vm386_vm0, %v387_v25, %v388_v16  ;;  %v102_v33 = vrot.slane %v100_v23, 1  ;;  %v233_v34 = vrot.slane %v1784_v7, 1  ;;  %v108_v35 = vshll.u32 %v1773_v3, 16  ;;  %1550 = vmatprep.subr.bf16.mxu0 %v1719_v31  ;;  %v1365_v55 = vld [vmem:[%s2711_s0 + $0x50] sm:$0xf]  ;;  %v1723_v23 = vld [vmem:[%s2712_s1 + $0x58] sm:$0xff]  }
   0x9   :  { %634 = vrot.lane.b32.xlu0 %v389_v32, %s1739_s16  ;;  %v191_v38 = vsel %vm188_vm1, %v189_v26, %v190_v21  ;;  %v97_v39 = vrot.slane %v95_v29, 1  ;;  %v112_v40 = vshrl.u32 %v1773_v3, 16  ;;  %v465_v41 = vshrl.u32 %v1408_v8, 16  ;;  %1661 = vmatprep.subr.bf16.mxu1 %v1719_v31  ;;  %v1366_v61 = vld [vmem:[%s2711_s0 + $0x54] sm:$0xf]  ;;  %v1724_v29 = vld [vmem:[%s2712_s1 + $0x18] sm:$0xff]  }
   0xa   :  { %v468_v44 = vshll.u32 %v1408_v8, 16  ;;  %v473_v45 = vrot.slane %v108_v35, 3  ;;  %v104_v46 = vshrl.u32 %v1789_v10, 16  ;;  %v1852_v50 = vcombine.low %v21_v42, %v1832_v36  ;;  %v1367_v62 = vld [vmem:[%s2711_s0 + $0x58] sm:$0xf]  ;;  %v1722_v6 = vld [vmem:[%s2712_s1 + $0x10] sm:$0xff]  }
   0xb   :  { %v98_v47 = vor.u32 %v97_v39, %v93_v28  ;;  %v467_v48 = vrot.slane %v465_v41, 2  ;;  %v472_v49 = vrot.slane %v112_v40, 2  ;;  %1551 = vmatpush3.bf16.msra.mxu0 %v1720_v37  ;;  %1669 = vmatpush3.bf16.msra.mxu1 %v1720_v37  ;;  %v234_v52 = vsel %vm188_vm1, %v232_v30, %v233_v34  ;;  %v1385_v19 = vld [vmem:[%s2711_s0 + $0x5c] sm:$0xf]  ;;  %v1406_v20 = vld [vmem:[%s2711_s0 + $0x60] sm:$0xf] }
   0xc   :  { %594 = vrot.lane.b32.xlu1 %v191_v38, %s1738_s11  ;;  %vm463_vm3 = vsmask.f32 5376  ;;  %v470_v53 = vrot.slane %v468_v44, 3  ;;  %v1864_v54 = vcombine.low %v1770_v2, %v21_v42  ;;  %1552 = vmatprep.subr.bf16.mxu0 %v1721_v43  ;;  %v106_v58 = vor.u32 %v104_v46, %v102_v33  ;;  %v1971_v44 = vld [vmem:[%s2711_s0 + $0x24] sm:$0xf]  ;;  %v1727_v46 = vld [vmem:[%s2712_s1 + $0x68] sm:$0xff]  }
   0xd   :  { %v103_v56 = vsel %vm91_vm2, %v98_v47, %v102_v33  ;;  %v474_v57 = vor.u32 %v473_v45, %v472_v49  ;;  %v1870_v59 = vrot.slane %v108_v35, 1  ;;  %1662 = vmatprep.subr.bf16.mxu1 %v1721_v43  ;;  %v116_v0 = vshll.u32 %v1852_v50, 16  ;;  %v1726_v45 = vld [vmem:[%s2712_s1 + $0x20] sm:$0xff]  }
   0xe   :  { %574 = vrot.lane.b32.xlu0 %v103_v56, %s1739_s16  ;;  %v471_v60 = vor.u32 %v470_v53, %v467_v48  ;;  %v390_v63 = vrot.slane %v1864_v54, 2  ;;  %v120_v1 = vshrl.u32 %v1852_v50, 16  ;;  %v192_v4 = vrot.slane %v1773_v3, 1 }
   0xf   :  { %v1886_v5 = vcombine.low %v1857_v51, %v1365_v55  ;;  %v111_v8 = vsel %vm91_vm2, %v106_v58, %v1870_v59  ;;  %v1893_v9 = vcombine.low %v1366_v61, %v1367_v62  ;;  %1553 = vmatpush3.bf16.msra.mxu0 %v1722_v6  ;;  %v430_v15 = vrot.slane %v1852_v50, 2  ;;  %1670 = vmatpush3.bf16.msra.mxu1 %v1722_v6 }
  0x10   :  { %614 = vrot.lane.b32.xlu1 %v234_v52, %s1740_s29  ;;  %v475_v2 = vsel %vm463_vm3, %v471_v60, %v474_v57  ;;  %v391_v13 = vsel %vm386_vm0, %v388_v16, %v390_v63  ;;  %v476_v17 = vrot.slane %v120_v1, 2  ;;  %v477_v18 = vrot.slane %v116_v0, 3  ;;  %1554 = vmatprep.subr.bf16.mxu0 %v1723_v23  ;;  %v23_v52 = vld [vmem:[%s2711_s0 + $0x20] sm:$0xf] }
  0x11   :  { %v2719_v12 = vshll.u32 %v1886_v5, 16  ;;  %v193_v16 = vsel %vm188_vm1, %v190_v21, %v192_v4  ;;  %v235_v24 = vrot.slane %v1864_v54, 1  ;;  %v167_v26 = vshrl.u32 %v1886_v5, 16  ;;  %1663 = vmatprep.subr.bf16.mxu1 %v1723_v23 }
  0x12   :  { %674 = vrot.lane.b32.xlu0 %v475_v2, %s1740_s29  ;;  %v171_v27 = vshll.u32 %v1893_v9, 16  ;;  %v1930_v21 = vcombine.low %v1365_v55, %v1366_v61  ;;  %v1932_v28 = vcombine.low %v1367_v62, %v1385_v19  ;;  %v431_v30 = vsel %vm386_vm0, %v428_v14, %v430_v15  ;;  %v1725_v14 = vld [vmem:[%s2712_s1 + $0x60] sm:$0xff]   ;;  %v2004_v2 = vld [vmem:[%s2711_s0 + $0x5c] ss:$0 sps:$4 sm:$0x11]  }
  0x13   :  { %v1925_v25 = vrot.slane %v2719_v12, 1  ;;  %v1942_v31 = vor.u32 %v477_v18, %v476_v17  ;;  %v1944_v32 = vcombine.low %v1385_v19, %v1406_v20  ;;  %1555 = vmatpush3.bf16.msra.mxu0 %v1724_v29  ;;  %v236_v33 = vsel %vm188_vm1, %v233_v34, %v235_v24  ;;  %1671 = vmatpush3.bf16.msra.mxu1 %v1724_v29  ;;  %v2021_v19 = vld [vmem:[%s2711_s0 + $0x64] ss:$0 sps:$4 sm:$0x77]  }
  0x14   :  { %576 = vrot.lane.b32.xlu1 %v111_v8, %s1739_s16  ;;  %v1955_v37 = vrot.slane %v171_v27, 1  ;;  %v2718_v38 = vrot.slane %v1930_v21, 2  ;;  %v408_v39 = vrot.slane %v1932_v28, 2  ;;  %v175_v41 = vshrl.u32 %v1893_v9, 16  ;;  %1556 = vmatprep.subr.bf16.mxu0 %v1725_v14  ;;  %2731 = vst [vmem:[#allocation3_spill] sm:$0xff] %v2021_v19 }
  0x15   :  { %2730 = vst [vmem:[#allocation2_spill] sm:$0xff] %v1944_v32  ;;  %v169_v35 = vor.u32 %v167_v26, %v1925_v25  ;;  %v479_v34 = vsel %vm463_vm3, %v474_v57, %v1942_v31  ;;  %v526_v42 = vshrl.u32 %v1944_v32, 16  ;;  %v529_v43 = vshll.u32 %v1944_v32, 16  ;;  %1664 = vmatprep.subr.bf16.mxu1 %v1725_v14  ;;  %v2131_v12 = vld [vmem:[%s2711_s0 + $0x2c] ss:$0 sps:$4 sm:$0x33]  }
  0x16   :  { %636 = vrot.lane.b32.xlu0 %v391_v13, %s1739_s16  ;;  %v2717_v48 = vrot.slane %v1886_v5, 1  ;;  %v210_v49 = vrot.slane %v1893_v9, 1  ;;  %v409_v53 = vsel %vm386_vm0, %v2718_v38, %v408_v39  ;;  %v2716_v55 = vrot.slane %v1893_v9, 2 }
  0x17   :  { %v174_v47 = vsel %vm91_vm2, %v169_v35, %v1955_v37  ;;  %1557 = vmatpush3.bf16.msra.mxu0 %v1726_v45  ;;  %1672 = vmatpush3.bf16.msra.mxu1 %v1726_v45  ;;  %v454_v56 = vrot.slane %v1944_v32, 2  ;;  %v1996_v57 = vcombine.low %v23_v52, %v1971_v44  ;;  %v521_v58 = vrot.slane %v175_v41, 2 }
  0x18   :  { %596 = vrot.lane.b32.xlu1 %v193_v16, %s1738_s11  ;;  %1558 = vmatprep.subr.bf16.mxu0 %v1727_v46  ;;  %v522_v60 = vrot.slane %v171_v27, 3  ;;  %v528_v61 = vrot.slane %v526_v42, 2  ;;  %v531_v62 = vrot.slane %v529_v43, 3  ;;  %v211_v6 = vsel %vm188_vm1, %v2717_v48, %v210_v49  ;;  %v2036_v27 = vld [vmem:[%s2711_s0 + $0x60] ss:$0 sps:$4 sm:$0x33]  }
  0x19   :  { %1665 = vmatprep.subr.bf16.mxu1 %v1727_v46  ;;  %v2715_v8 = vrot.slane %v1930_v21, 1  ;;  %v262_v13 = vrot.slane %v1932_v28, 1  ;;  %v2015_v17 = vcombine.low %v1832_v36, %v23_v52  ;;  %v124_v18 = vshll.u32 %v1996_v57, 16  ;;  %v1729_v46 = vld [vmem:[%s2712_s1 + $0x70] sm:$0xff]  }
  0x1a   :  { %656 = vrot.lane.b32.xlu0 %v431_v30, %s1738_s11  ;;  %v455_v16 = vsel %vm386_vm0, %v2716_v55, %v454_v56  ;;  %v2028_v20 = vor.u32 %v522_v60, %v521_v58  ;;  %v2030_v23 = vor.u32 %v531_v62, %v528_v61  ;;  %v128_v36 = vshrl.u32 %v1996_v57, 16  ;;  %v1699_v52 = vld [vmem:[%s2711_s0 + $0x60] ss:$0 sps:$4 sm:$0x11]   ;;  %v215_v61 = vld [vmem:[%s2711_s0 + $0x28] sm:$0xf] }
  0x1b   :  { %v118_v29 = vrot.slane %v116_v0, 1  ;;  %v194_v30 = vrot.slane %v1852_v50, 1  ;;  %v263_v35 = vsel %vm188_vm1, %v2715_v8, %v262_v13  ;;  %v114_v14 = vor.u32 %v112_v40, %v1870_v59  ;;  %v413_v62 = vld [vmem:[%s2711_s0 + $0x2c] sm:$0xf]  ;;  %v1363_v8 = vld [vmem:[%s2711_s0 + $0x48] sm:$0xf] }
  0x1c   :  { %616 = vrot.lane.b32.xlu1 %v236_v33, %s1740_s29  ;;  %v1728_v33 = vld [vmem:[%s2712_s1 + $0x28] sm:$0xff]   ;;  %v179_v0 = vshll.u32 %v2004_v2, 16  ;;  %v392_v42 = vrot.slane %v2015_v17, 2  ;;  %v237_v43 = vrot.slane %v2015_v17, 1  ;;  %v481_v45 = vrot.slane %v124_v18, 3 }
  0x1d   :  { %1559 = vmatpush3.bf16.msra.mxu0 %v1728_v33  ;;  %v533_v40 = vsel %vm463_vm3, %v2028_v20, %v2030_v23  ;;  %v480_v59 = vrot.slane %v128_v36, 2  ;;  %1673 = vmatpush3.bf16.msra.mxu1 %v1728_v33  ;;  %v535_v58 = vshrl.u32 %v2021_v19, 16  ;;  %v538_v60 = vshll.u32 %v2021_v19, 16 }
  0x1e   :  { %676 = vrot.lane.b32.xlu0 %v479_v34, %s1740_s29  ;;  %v432_v34 = vrot.slane %v1996_v57, 2  ;;  %1560 = vmatprep.subr.bf16.mxu0 %v1729_v46  ;;  %v410_v33 = vrot.slane %v2036_v27, 2  ;;  %v212_v55 = vrot.slane %v2004_v2, 1  ;;  %v264_v38 = vrot.slane %v1699_v52, 1 }
  0x1f   :  { %1666 = vmatprep.subr.bf16.mxu1 %v1729_v46  ;;  %v177_v46 = vor.u32 %v175_v41, %v1955_v37  ;;  %v540_v48 = vrot.slane %v538_v60, 3  ;;  %v1731_v37 = vld [vmem:[%s2712_s1 + $0x78] sm:$0xff]   ;;  %v2139_v2 = vor.u32 %v481_v45, %v480_v59  ;;  %v126_v60 = vrot.slane %v124_v18, 1 }
  0x20   :  { %590 = vrot.lane.b32.xlu1 %v174_v47, %s1739_s16  ;;  %v1698_v47 = vld [vmem:[%s2711_s0 + $0x64] ss:$0 sps:$4 sm:$0x33]   ;;  %v411_v52 = vsel %vm386_vm0, %v408_v39, %v410_v33  ;;  %v213_v59 = vsel %vm188_vm1, %v210_v49, %v212_v55  ;;  %v396_v33 = vrot.slane %v2131_v12, 2  ;;  %vm271_vm4 = vsmask.f32 6400 }
  0x21   :  { %v456_v41 = vrot.slane %v1698_v47, 2  ;;  %v483_v55 = vsel %vm463_vm3, %v1942_v31, %v2139_v2  ;;  %v2733_v31 = vrot.slane %v1930_v21, 2  ;;  %vm548_vm5 = vcmask 1044480  }
  0x22   :  { %650 = vrot.lane.b32.xlu0 %v409_v53, %s1739_s16  ;;  %v1730_v53 = vld [vmem:[%s2712_s1 + $0x30] sm:$0xff]   ;;  %vm694_vm6 = vcmask 261120   ;;  %vm715_vm7 = vcmask 523264   ;;  %vm736_vm8 = vcmask 785408  }
  0x23   :  { %1561 = vmatpush3.bf16.msra.mxu0 %v1730_v53  ;;  %1674 = vmatpush3.bf16.msra.mxu1 %v1730_v53  ;;  %v2124_v53 = vcombine.low %v1971_v44, %v215_v61  ;;  %v1732_v44 = vld [vmem:[%s2712_s1 + $0x38] sm:$0xff]   ;;  %v457_v18 = vsel %vm386_vm0, %v454_v56, %v456_v41 }
  0x24   :  { %610 = vrot.lane.b32.xlu1 %v211_v6, %s1738_s11  ;;  %v119_v6 = vsel %vm91_vm2, %v114_v14, %v118_v29  ;;  %v393_v14 = vsel %vm386_vm0, %v390_v63, %v392_v42  ;;  %v433_v63 = vsel %vm386_vm0, %v430_v15, %v432_v34  ;;  %v238_v15 = vsel %vm188_vm1, %v235_v24, %v237_v43 }
  0x25   :  { %1562 = vmatprep.subr.bf16.mxu0 %v1731_v37  ;;  %v2721_v24 = vrot.slane %v1996_v57, 1  ;;  %1667 = vmatprep.subr.bf16.mxu1 %v1731_v37  ;;  %v394_v49 = vrot.slane %v2124_v53, 2  ;;  %v2212_v37 = vcombine.low %v1363_v8, %v1857_v51 }
  0x26   :  { %670 = vrot.lane.b32.xlu0 %v455_v16, %s1738_s11  ;;  %v181_v16 = vrot.slane %v179_v0, 1  ;;  %v195_v0 = vsel %vm188_vm1, %v192_v4, %v194_v30  ;;  %v537_v4 = vrot.slane %v535_v58, 2  ;;  %v122_v58 = vor.u32 %v120_v1, %v118_v29  ;;  %v2163_v1 = vld [vmem:[%s2711_s0 + $0x40] sm:$0xf] }
  0x27   :  { %1563 = vmatpush3.bf16.msra.mxu0 %v1732_v44  ;;  %v2171_v29 = vsel %vm188_vm1, %v262_v13, %v264_v38  ;;  %1675 = vmatpush3.bf16.msra.mxu1 %v1732_v44  ;;  %v2192_v13 = vsel %vm188_vm1, %v194_v30, %v2721_v24  ;;  %v2209_v30 = vsel %vm386_vm0, %v392_v42, %v394_v49  ;;  %v404_v44 = vrot.slane %v2212_v37, 2 }
  0x28   :  { %630 = vrot.lane.b32.xlu1 %v263_v35, %s1740_s29  ;;  %v2092_v35 = vld [vmem:[%s2711_s0 + $0x28] ss:$0 sps:$4 sm:$0x11]   ;;  %v182_v45 = vsel %vm91_vm2, %v177_v46, %v181_v16  ;;  %v2185_v38 = vsel %vm91_vm2, %v122_v58, %v126_v60  ;;  %v2229_v42 = vor.u32 %v128_v36, %v126_v60  ;;  %v258_v58 = vrot.slane %v2212_v37, 1 }
  0x29   :  { %v132_v39 = vshll.u32 %v2092_v35, 16  ;;  %v2723_v60 = vrot.slane %v1886_v5, 2  ;;  %v2737_v19 = vrot.slane %v2092_v35, 1 }
  0x2a   :  { %690 = vrot.lane.b32.xlu0 %v533_v40, %s1740_s29  ;;  %v1362_v40 = vld [vmem:[%s2711_s0 + $0x44] sm:$0xf] }
  0x2b   :  { %v2141_v47 = vcombine.low %v1362_v40, %v1363_v8 }
  0x2c   :  { %578 = vrot.lane.b32.xlu1 %v119_v6, %s1739_s16  ;;  %v2126_v6 = vcombine.low %v215_v61, %v413_v62  ;;  %v541_v61 = vor.u32 %v540_v48, %v537_v4  ;;  %v2180_v62 = vcombine.low %v2163_v1, %v1362_v40 }
  0x2d   :  { %v155_v56 = vshll.u32 %v2141_v47, 16  ;;  %v159_v16 = vshrl.u32 %v2141_v47, 16  ;;  %v2724_v36 = vrot.slane %v2141_v47, 1 }
  0x2e   :  { %638 = vrot.lane.b32.xlu0 %v393_v14, %s1739_s16  ;;  %v2720_v48 = vrot.slane %v2126_v6, 2  ;;  %v2199_v14 = vsel %vm463_vm3, %v2030_v23, %v541_v61  ;;  %v485_v46 = vshrl.u32 %v2126_v6, 16  ;;  %v488_v40 = vshll.u32 %v2126_v6, 16  ;;  %v2217_v23 = vld [vmem:[%s2712_s1 + $0x80] sm:$0xff]  }
  0x2f   :  { %v514_v4 = vrot.slane %v155_v56, 3  ;;  %v2725_v51 = vrot.slane %v2180_v62, 2  ;;  %v2722_v8 = vrot.slane %v2180_v62, 1  ;;  %v517_v61 = vrot.slane %v167_v26, 2  ;;  %1636 = vmatprep.subr.bf16.mxu1 %v2217_v23 }
  0x30   :  { %598 = vrot.lane.b32.xlu1 %v195_v0, %s1738_s11  ;;  %v2726_v0 = vrot.slane %v2124_v53, 1  ;;  %v2225_v41 = vsel %vm386_vm0, %v432_v34, %v2720_v48  ;;  %v2241_v34 = vrot.slane %v132_v39, 1 }
  0x31   :  { %v2252_v24 = vsel %vm386_vm0, %v2725_v51, %v404_v44  ;;  %v2257_v26 = vsel %vm188_vm1, %v2722_v8, %v258_v58  ;;  %v2735_v8 = vrot.slane %v1893_v9, 2 }
  0x32   :  { %658 = vrot.lane.b32.xlu0 %v433_v63, %s1738_s11  ;;  %v513_v63 = vrot.slane %v159_v16, 2 }
  0x34   :  { %618 = vrot.lane.b32.xlu1 %v238_v15, %s1740_s29  ;;  %v2233_v15 = vrot.slane %v155_v56, 1  ;;  %v2247_v48 = vor.u32 %v514_v4, %v513_v63  ;;  %v2264_v63 = vsel %vm386_vm0, %v404_v44, %v2733_v31  ;;  %v2734_v4 = vrot.slane %v1886_v5, 1 }
  0x35   :  { %v281_v44 = vshrl.u32 %v1784_v7, 16 }
  0x36   :  { %678 = vrot.lane.b32.xlu0 %v483_v55, %s1740_s29  ;;  %v2732_v55 = vshll.u32 %v1886_v5, 16 }
  0x38   :  { %592 = vrot.lane.b32.xlu1 %v182_v45, %s1739_s16  ;;  %v518_v56 = vrot.slane %v2732_v55, 3  ;;  %v161_v45 = vor.u32 %v159_v16, %v2233_v15  ;;  %v2271_v55 = vsel %vm188_vm1, %v2724_v36, %v2734_v4  ;;  %v2278_v16 = vsel %vm386_vm0, %v2723_v60, %v2735_v8 }
  0x39   :  { %v273_v4 = vshrl.u32 %v1791_v11, 16  ;;  %v283_v60 = vrot.slane %v281_v44, 1  ;;  %v293_v44 = vshll.u32 %v1864_v54, 16 }
  0x3a   :  { %652 = vrot.lane.b32.xlu0 %v411_v52, %s1739_s16  ;;  %v519_v39 = vor.u32 %v518_v56, %v517_v61  ;;  %v2285_v52 = vsel %vm188_vm1, %v237_v43, %v2726_v0  ;;  %v2289_v31 = vsel %vm91_vm2, %v161_v45, %v1925_v25  ;;  %v284_v61 = vshll.u32 %v1784_v7, 16 }
  0x3b   :  { %v487_v56 = vrot.slane %v485_v46, 2  ;;  %v276_v43 = vshll.u32 %v1791_v11, 16  ;;  %v2736_v25 = vrot.slane %v1930_v21, 1  ;;  %v275_v46 = vrot.slane %v273_v4, 1 }
  0x3c   :  { %612 = vrot.lane.b32.xlu1 %v213_v59, %s1738_s11  ;;  %v2296_v8 = vsel %vm463_vm3, %v2247_v48, %v519_v39  ;;  %v286_v36 = vrot.slane %v284_v61, 2  ;;  %v2307_v7 = vsel %vm463_vm3, %v519_v39, %v2028_v20  ;;  %v490_v59 = vrot.slane %v488_v40, 3 }
  0x3d   :  { %v2303_v45 = vsel %vm188_vm1, %v258_v58, %v2736_v25  ;;  %v278_v51 = vrot.slane %v276_v43, 2  ;;  %v290_v11 = vshrl.u32 %v1864_v54, 16  ;;  %v355_v61 = vshrl.u32 %v1930_v21, 16  ;;  %v2324_v54 = vld [vmem:[%s2711_s0 + $0x30] ss:$0 sps:$4 sm:$0x33]  }
  0x3e   :  { %672 = vrot.lane.b32.xlu0 %v457_v18, %s1738_s11  ;;  %v287_v0 = vor.u32 %v286_v36, %v283_v60  ;;  %v358_v20 = vshll.u32 %v1930_v21, 16  ;;  %v364_v39 = vshrl.u32 %v1932_v28, 16  ;;  %v367_v18 = vshll.u32 %v1932_v28, 16  ;;  %v1707_v28 = vld [vmem:[%s2711_s0 + $0x30] ss:$0 sps:$4 sm:$0x77]  }
  0x3f   :  { %v279_v58 = vor.u32 %v278_v51, %v275_v46  ;;  %v292_v40 = vrot.slane %v290_v11, 1  ;;  %v295_v4 = vrot.slane %v293_v44, 2  ;;  %v357_v43 = vrot.slane %v355_v61, 1  ;;  %v1358_v44 = vld [vmem:[%s2711_s0 + $0x34] sm:$0xf] }
  0x40   :  { %632 = vrot.lane.b32.xlu1 %v2171_v29, %s1740_s29  ;;  %v299_v36 = vshrl.u32 %v2015_v17, 16  ;;  %v360_v21 = vrot.slane %v358_v20, 2  ;;  %v366_v51 = vrot.slane %v364_v39, 1  ;;  %v369_v60 = vrot.slane %v367_v18, 2 }
  0x41   :  { %v2327_v29 = vsel %vm271_vm4, %v279_v58, %v287_v0  ;;  %v296_v25 = vor.u32 %v295_v4, %v292_v40  ;;  %v302_v11 = vshll.u32 %v2015_v17, 16  ;;  %v376_v20 = vshll.u32 %v2036_v27, 16  ;;  %v2346_v17 = vld [vmem:[%s2711_s0 + $0x38] sm:$0xf] }
  0x42   :  { %692 = vrot.lane.b32.xlu0 %v2199_v14, %s1740_s29  ;;  %v301_v46 = vrot.slane %v299_v36, 1  ;;  %v373_v14 = vshrl.u32 %v2036_v27, 16  ;;  %v2339_v61 = vor.u32 %v360_v21, %v357_v43  ;;  %v370_v58 = vor.u32 %v369_v60, %v366_v51 }
  0x43   :  { %v308_v39 = vshrl.u32 %v2124_v53, 16  ;;  %v2349_v18 = vsel %vm271_vm4, %v287_v0, %v296_v25  ;;  %v311_v4 = vshll.u32 %v2124_v53, 16  ;;  %v397_v27 = vsel %vm386_vm0, %v394_v49, %v396_v33  ;;  %v2377_v33 = vld [vmem:[%s2711_s0 + $0x3c] sm:$0xf] }
  0x44   :  { %580 = vrot.lane.b32.xlu1 %v2185_v38, %s1739_s16  ;;  %v304_v38 = vrot.slane %v302_v11, 2  ;;  %v375_v40 = vrot.slane %v373_v14, 1  ;;  %v2361_v43 = vsel %vm271_vm4, %v2339_v61, %v370_v58  ;;  %v378_v36 = vrot.slane %v376_v20, 2 }
  0x45   :  { %v310_v0 = vrot.slane %v308_v39, 1  ;;  %v2363_v21 = vor.u32 %v490_v59, %v487_v56  ;;  %v135_v51 = vsel %vm91_vm2, %v2229_v42, %v2241_v34  ;;  %v313_v11 = vrot.slane %v311_v4, 2 }
  0x46   :  { %640 = vrot.lane.b32.xlu0 %v2209_v30, %s1739_s16  ;;  %v1384_v30 = vld [vmem:[%s2711_s0 + $0x38] sm:$0xe]  ;;  %v305_v60 = vor.u32 %v304_v38, %v301_v46  ;;  %v436_v49 = vrot.slane %v2324_v54, 2  ;;  %v2380_v56 = vcombine.low %v1358_v44, %v2346_v17  ;;  %v379_v42 = vor.u32 %v378_v36, %v375_v40 }
  0x47   :  { %v317_v34 = vshrl.u32 %v2131_v12, 16  ;;  %v494_v59 = vshrl.u32 %v1707_v28, 16  ;;  %v314_v14 = vor.u32 %v313_v11, %v310_v0  ;;  %v497_v54 = vshll.u32 %v1707_v28, 16 }
  0x48   :  { %600 = vrot.lane.b32.xlu1 %v2192_v13, %s1738_s11  ;;  %v2384_v46 = vsel %vm271_vm4, %v296_v25, %v305_v60  ;;  %v320_v13 = vshll.u32 %v2131_v12, 16  ;;  %v2390_v20 = vcombine.low %v1384_v30, %v2377_v33  ;;  %v2393_v44 = vsel %vm271_vm4, %v370_v58, %v379_v42  ;;  %v1706_v25 = vld [vmem:[%s2711_s0 + $0x2c] ss:$0 sps:$4 sm:$0x11]  }
  0x49   :  { %v319_v39 = vrot.slane %v317_v34, 1  ;;  %v492_v38 = vsel %vm463_vm3, %v2139_v2, %v2363_v21  ;;  %v2403_v12 = vcombine.low %v2377_v33, %v2163_v1  ;;  %v142_v58 = vshll.u32 %v2380_v56, 16 }
  0x4a   :  { %660 = vrot.lane.b32.xlu0 %v2225_v41, %s1738_s11  ;;  %v2406_v41 = vsel %vm271_vm4, %v305_v60, %v314_v14  ;;  %v322_v40 = vrot.slane %v320_v13, 2  ;;  %v2729_v4 = vrot.slane %v2126_v6, 3  ;;  %v558_v2 = vrot.slane %v1707_v28, 3 }
  0x4b   :  { %v329_v36 = vshrl.u32 %v2390_v20, 16  ;;  %v332_v30 = vshll.u32 %v2390_v20, 16  ;;  %v337_v11 = vshrl.u32 %v2180_v62, 16  ;;  %v496_v60 = vrot.slane %v494_v59, 2 }
  0x4c   :  { %620 = vrot.lane.b32.xlu1 %v2285_v52, %s1740_s29  ;;  %v323_v0 = vor.u32 %v322_v40, %v319_v39  ;;  %v2419_v52 = vsel %vm548_vm5, %v2729_v4, %v558_v2  ;;  %v340_v34 = vshll.u32 %v2180_v62, 16  ;;  %v499_v28 = vrot.slane %v497_v54, 3  ;;  %v1402_v2 = vld [vmem:[%s2711_s0 + $0x38] sm:$0xc] }
  0x4d   :  { %v331_v42 = vrot.slane %v329_v36, 1  ;;  %v334_v39 = vrot.slane %v332_v30, 2  ;;  %v339_v40 = vrot.slane %v337_v11, 1  ;;  %v2738_v59 = vrot.slane %v1996_v57, 1 }
  0x4e   :  { %680 = vrot.lane.b32.xlu0 %v492_v38, %s1740_s29  ;;  %v2423_v13 = vsel %vm271_vm4, %v314_v14, %v323_v0  ;;  %v241_v32 = vrot.slane %v1706_v25, 1  ;;  %v1405_v14 = vld [vmem:[%s2711_s0 + $0x3c] sm:$0xc]  ;;  %v342_v54 = vrot.slane %v340_v34, 2  ;;  %v140_v36 = vshrl.u32 %v2380_v56, 16 }
  0x4f   :  { %v199_v38 = vsel %vm188_vm1, %v2738_v59, %v2737_v19  ;;  %v144_v0 = vrot.slane %v142_v58, 1  ;;  %v335_v35 = vor.u32 %v334_v39, %v331_v42  ;;  %v1381_v19 = vld [vmem:[%s2711_s0 + $0x34] sm:$0xe]  ;;  %v2739_v30 = vrot.slane %v2126_v6, 2 }
  0x50   :  { %582 = vrot.lane.b32.xlu1 %v135_v51, %s1739_s16  ;;  %v147_v51 = vshll.u32 %v2403_v12, 16  ;;  %v343_v25 = vor.u32 %v342_v54, %v339_v40  ;;  %v500_v59 = vor.u32 %v499_v28, %v496_v60  ;;  %v1404_v34 = vcombine.low %v1402_v2, %v2377_v33 }
  0x51   :  { %v437_v11 = vsel %vm386_vm0, %v2739_v30, %v436_v49  ;;  %v1411_v4 = vcombine.low %v1405_v14, %v2163_v1  ;;  %v145_v39 = vor.u32 %v144_v0, %v140_v36  ;;  %v1383_v54 = vcombine.low %v1381_v19, %v2346_v17 }
  0x52   :  { %642 = vrot.lane.b32.xlu0 %v397_v27, %s1739_s16  ;;  %v2450_v58 = vsel %vm271_vm4, %v335_v35, %v343_v25  ;;  %v2740_v27 = vrot.slane %v2124_v53, 1  ;;  %v149_v40 = vrot.slane %v147_v51, 1  ;;  %v346_v49 = vshrl.u32 %v2212_v37, 16 }
  0x53   :  { %v349_v33 = vshll.u32 %v2212_v37, 16  ;;  %v501_v60 = vsel %vm463_vm3, %v2363_v21, %v500_v59  ;;  %v401_v28 = vrot.slane %v1404_v34, 2  ;;  %v509_v2 = vshll.u32 %v1411_v4, 16 }
  0x54   :  { %602 = vrot.lane.b32.xlu1 %v199_v38, %s1738_s11  ;;  %v242_v42 = vsel %vm188_vm1, %v2740_v27, %v241_v32  ;;  %v506_v38 = vshrl.u32 %v1411_v4, 16  ;;  %v348_v53 = vrot.slane %v346_v49, 1  ;;  %v150_v14 = vsel %vm91_vm2, %v145_v39, %v149_v40 }
  0x55   :  { %v351_v32 = vrot.slane %v349_v33, 2  ;;  %v203_v36 = vrot.slane %v1383_v54, 1  ;;  %v204_v17 = vrot.slane %v2403_v12, 1  ;;  %v447_v0 = vrot.slane %v1411_v4, 2 }
  0x56   :  { %662 = vrot.lane.b32.xlu0 %v437_v11, %s1738_s11  ;;  %v2741_v37 = vrot.slane %v2180_v62, 2  ;;  %v448_v35 = vrot.slane %v2141_v47, 2  ;;  %v508_v19 = vrot.slane %v506_v38, 2  ;;  %v511_v30 = vrot.slane %v509_v2, 3 }
  0x57   :  { %v352_v51 = vor.u32 %v351_v32, %v348_v53  ;;  %v205_v59 = vsel %vm188_vm1, %v203_v36, %v204_v17  ;;  %v255_v34 = vrot.slane %v2390_v20, 1  ;;  %v151_v4 = vshrl.u32 %v2403_v12, 16 }
  0x58   :  { %622 = vrot.lane.b32.xlu1 %v242_v42, %s1740_s29  ;;  %v403_v21 = vsel %vm386_vm0, %v401_v28, %v2741_v37  ;;  %v449_v27 = vsel %vm386_vm0, %v447_v0, %v448_v35  ;;  %v512_v42 = vor.u32 %v511_v30, %v508_v19  ;;  %v2742_v39 = vrot.slane %v2180_v62, 1 }
  0x59   :  { %v2471_v11 = vsel %vm271_vm4, %v343_v25, %v352_v51  ;;  %v153_v49 = vor.u32 %v151_v4, %v149_v40  ;;  %v2491_v33 = vsel %vm271_vm4, %v352_v51, %v2339_v61  ;;  %v2743_v62 = vrot.slane %v2141_v47, 1 }
  0x5a   :  { %682 = vrot.lane.b32.xlu0 %v501_v60, %s1740_s29  ;;  %v257_v54 = vsel %vm188_vm1, %v255_v34, %v2742_v39  ;;  %v516_v25 = vsel %vm463_vm3, %v512_v42, %v2247_v48  ;;  %v2744_v48 = vrot.slane %v1886_v5, 2 }
  0x5b   :  { %v158_v20 = vsel %vm91_vm2, %v153_v49, %v2233_v15  ;;  %v207_v40 = vsel %vm188_vm1, %v204_v17, %v2743_v62 }
  0x5c   :  { %584 = vrot.lane.b32.xlu1 %v150_v14, %s1739_s16  ;;  %v451_v60 = vsel %vm386_vm0, %v448_v35, %v2744_v48 }
  0x5e   :  { %644 = vrot.lane.b32.xlu0 %v403_v21, %s1739_s16 }
  0x60   :  { %604 = vrot.lane.b32.xlu1 %v205_v59, %s1738_s11 }
  0x62   :  { %664 = vrot.lane.b32.xlu0 %v449_v27, %s1738_s11 }
  0x64   :  { %624 = vrot.lane.b32.xlu1 %v257_v54, %s1740_s29  ;;  %v1734_v54 = vld [vmem:[%s2712_s1 + $0x88] sm:$0xff]  }
  0x66   :  { %684 = vrot.lane.b32.xlu0 %v516_v25, %s1740_s29 }
  0x68   :  { %586 = vrot.lane.b32.xlu1 %v158_v20, %s1739_s16 }
  0x6a   :  { %646 = vrot.lane.b32.xlu0 %v2252_v24, %s1739_s16 }
  0x6c   :  { %606 = vrot.lane.b32.xlu1 %v207_v40, %s1738_s11 }
  0x6e   :  { %666 = vrot.lane.b32.xlu0 %v451_v60, %s1738_s11 }
  0x70   :  { %626 = vrot.lane.b32.xlu1 %v2257_v26, %s1740_s29 }
  0x72   :  { %686 = vrot.lane.b32.xlu0 %v2296_v8, %s1740_s29 }
  0x74   :  { %588 = vrot.lane.b32.xlu1 %v2289_v31, %s1739_s16 }
  0x76   :  { %648 = vrot.lane.b32.xlu0 %v2264_v63, %s1739_s16 }
  0x78   :  { %608 = vrot.lane.b32.xlu1 %v2271_v55, %s1738_s11 }
  0x7a   :  { %668 = vrot.lane.b32.xlu0 %v2278_v16, %s1738_s11  ;;  %v655_v24 = vpop.permute.xlu1 %654 }
  0x7b   :  { %v635_v15 = vpop.permute.xlu0 %634 }
  0x7c   :  { %628 = vrot.lane.b32.xlu1 %v2303_v45, %s1740_s29  ;;  %v769_v63 = vsel %vm694_vm6, %v2327_v29, %v635_v15 }
  0x7d   :  { %v798_v45 = vsel %vm715_vm7, %v769_v63, %v655_v24  ;;  %v543_v63 = vld [vmem:[%s2711_s0 + $0x8] sm:$0x8] }
  0x7e   :  { %688 = vrot.lane.b32.xlu0 %v2307_v7, %s1740_s29  ;;  %v595_v26 = vpop.permute.xlu1 %594 }
  0x80   :  { %v575_v31 = vpop.permute.xlu0 %574 }
  0x81   :  { %v696_v55 = vsel %vm694_vm6, %v1808_v22, %v575_v31 }
  0x82   :  { %v615_v16 = vpop.permute.xlu1 %614  ;;  %v717_v8 = vsel %vm715_vm7, %v696_v55, %v595_v26 }
  0x83   :  { %v738_v28 = vsel %vm736_vm8, %v717_v8, %v615_v16 }
  0x84   :  { %v675_v61 = vpop.permute.xlu0 %674 }
  0x85   :  { %v818_v7 = vsel %vm736_vm8, %v798_v45, %v675_v61 }
  0x86   :  { %1060 = vmatprep.mubr.bf16.mxu0 %v818_v7  ;;  %v577_v38 = vpop.permute.xlu1 %576 }
  0x87   :  { %1061 = vmatmul.mubr.bf16.vlgmr.msra.gmra.mrb[0].mxu0 %v738_v28  ;;  %v698_v22 = vsel %vm694_vm6, %v1789_v10, %v577_v38  ;;  %v550_v28 = vrot.slane %v1773_v3, 3 }
  0x88   :  { %v637_v2 = vpop.permute.xlu0 %636 }
  0x89   :  { %v772_v14 = vsel %vm694_vm6, %v2349_v18, %v637_v2 }
  0x8a   :  { %v597_v29 = vpop.permute.xlu1 %596 }
  0x8b   :  { %v719_v36 = vsel %vm715_vm7, %v698_v22, %v597_v29 }
  0x8c   :  { %v657_v53 = vpop.permute.xlu0 %656 }
  0x8d   :  { %v800_v17 = vsel %vm715_vm7, %v772_v14, %v657_v53 }
  0x8e   :  { %v617_v32 = vpop.permute.xlu1 %616 }
  0x8f   :  { %v741_v51 = vsel %vm736_vm8, %v719_v36, %v617_v32 }
  0x90   :  { %v677_v0 = vpop.permute.xlu0 %676 }
  0x91   :  { %v821_v37 = vsel %vm736_vm8, %v800_v17, %v677_v0  ;;  %v552_v0 = vrot.slane %v1852_v50, 3 }
  0x92   :  { %1068 = vmatprep.mubr.bf16.mxu0 %v821_v37  ;;  %v591_v21 = vpop.permute.xlu1 %590 }
  0x93   :  { %1069 = vmatmul.mubr.bf16.gmra.mrb[4].mxu0 %v741_v51  ;;  %v712_v10 = vsel %vm694_vm6, %v1886_v5, %v591_v21  ;;  %v553_v21 = vsel %vm548_vm5, %v550_v28, %v552_v0 }
  0x94   :  { %v651_v35 = vpop.permute.xlu0 %650 }
  0x95   :  { %v793_v18 = vsel %vm694_vm6, %v2361_v43, %v651_v35 }
  0x96   :  { %v611_v19 = vpop.permute.xlu1 %610 }
  0x97   :  { %v733_v34 = vsel %vm715_vm7, %v712_v10, %v611_v19 }
  0x98   :  { %v671_v30 = vpop.permute.xlu0 %670 }
  0x99   :  { %v814_v4 = vsel %vm715_vm7, %v793_v18, %v671_v30 }
  0x9a   :  { %v631_v59 = vpop.permute.xlu1 %630 }
  0x9b   :  { %v762_v42 = vsel %vm736_vm8, %v733_v34, %v631_v59 }
  0x9c   :  { %v691_v27 = vpop.permute.xlu0 %690 }
  0x9d   :  { %v842_v39 = vsel %vm736_vm8, %v814_v4, %v691_v27 }
  0x9e   :  { %1124 = vmatprep.mubr.bf16.mxu1 %v842_v39  ;;  %v579_v49 = vpop.permute.xlu1 %578  ;;  %v2745_v39 = vrot.slane %v2126_v6, 3 }
  0x9f   :  { %1125 = vmatmul.mubr.bf16.vlgmr.msra.gmra.mrb[0].mxu1 %v762_v42  ;;  %v700_v62 = vsel %vm694_vm6, %v1773_v3, %v579_v49 }
  0xa0   :  { %v639_v25 = vpop.permute.xlu0 %638  ;;  %1637 = vmatpush3.bf16.msra.mxu1 %v2217_v23 }
  0xa1   :  { %1638 = vmatprep.subr.bf16.mxu1 %v1734_v54  ;;  %v775_v48 = vsel %vm694_vm6, %v2384_v46, %v639_v25  ;;  %v1737_v46 = vld [vmem:[%s2711_s0 + $0xc] sm:$0xf] }
  0xa2   :  { %v599_v43 = vpop.permute.xlu1 %598  ;;  %v1418_v16 = vcombine.low %v543_v63, %v1737_v46  ;;  %v2746_v63 = vld [vmem:[#allocation2_spill] sm:$0xff] }
  0xa3   :  { %v721_v60 = vsel %vm715_vm7, %v700_v62, %v599_v43  ;;  %v564_v62 = vrot.slane %v2141_v47, 3 }
  0xa4   :  { %v659_v20 = vpop.permute.xlu0 %658  ;;  %1639 = vmatpush3.bf16.msra.mxu1 %v1734_v54  ;;  %v549_v45 = vrot.slane %v1418_v16, 3 }
  0xa5   :  { %v802_v24 = vsel %vm715_vm7, %v775_v48, %v659_v20 }
  0xa6   :  { %v619_v40 = vpop.permute.xlu1 %618  ;;  %v551_v36 = vsel %vm548_vm5, %v549_v45, %v550_v28 }
  0xa7   :  { %v744_v26 = vsel %vm736_vm8, %v721_v60, %v619_v40  ;;  %v566_v40 = vrot.slane %v1886_v5, 3 }
  0xa8   :  { %v679_v15 = vpop.permute.xlu0 %678 }
  0xa9   :  { %v824_v23 = vsel %vm736_vm8, %v802_v24, %v679_v15  ;;  %v567_v5 = vsel %vm548_vm5, %v564_v62, %v566_v40 }
  0xaa   :  { %1076 = vmatprep.mubr.bf16.mxu0 %v824_v23  ;;  %v593_v31 = vpop.permute.xlu1 %592 }
  0xab   :  { %1077 = vmatmul.mubr.bf16.gmra.mrb[8].mxu0 %v744_v26  ;;  %v714_v7 = vsel %vm694_vm6, %v1893_v9, %v593_v31 }
  0xac   :  { %v653_v55 = vpop.permute.xlu0 %652 }
  0xad   :  { %v796_v2 = vsel %vm694_vm6, %v2393_v44, %v653_v55  ;;  %v554_v44 = vrot.slane %v1996_v57, 3  ;;  %v570_v55 = vrot.slane %v2746_v63, 3 }
  0xae   :  { %v613_v8 = vpop.permute.xlu1 %612 }
  0xaf   :  { %v735_v29 = vsel %vm715_vm7, %v714_v7, %v613_v8  ;;  %v555_v35 = vsel %vm548_vm5, %v552_v0, %v554_v44  ;;  %v557_v54 = vsel %vm548_vm5, %v554_v44, %v2745_v39 }
  0xb0   :  { %v673_v61 = vpop.permute.xlu0 %672 }
  0xb1   :  { %v816_v53 = vsel %vm715_vm7, %v796_v2, %v673_v61 }
  0xb2   :  { %v633_v38 = vpop.permute.xlu1 %632 }
  0xb3   :  { %v765_v32 = vsel %vm736_vm8, %v735_v29, %v633_v38 }
  0xb4   :  { %v693_v22 = vpop.permute.xlu0 %692 }
  0xb5   :  { %v845_v14 = vsel %vm736_vm8, %v816_v53, %v693_v22  ;;  %v2747_v53 = vld [vmem:[#allocation3_spill] sm:$0xff] }
  0xb6   :  { %1132 = vmatprep.mubr.bf16.mxu1 %v845_v14  ;;  %v581_v3 = vpop.permute.xlu1 %580  ;;  %v572_v22 = vrot.slane %v2747_v53, 3 }
  0xb7   :  { %1133 = vmatmul.mubr.bf16.gmra.mrb[4].mxu1 %v765_v32  ;;  %v702_v19 = vsel %vm694_vm6, %v1852_v50, %v581_v3  ;;  %v1417_v50 = vld [vmem:[%s2711_s0 + $0x3c] sm:$0x8] }
  0xb8   :  { %v641_v17 = vpop.permute.xlu0 %640  ;;  %1640 = vmatprep.mubr.msk.bf16.mxu1 %vm694_vm6, %v551_v36  ;;  %v1419_v49 = vcombine.low %v1417_v50, %v2163_v1 }
  0xb9   :  { %v778_v10 = vsel %vm694_vm6, %v2406_v41, %v641_v17 }
  0xba   :  { %v601_v51 = vpop.permute.xlu1 %600  ;;  %v563_v20 = vrot.slane %v1419_v49, 3 }
  0xbb   :  { %v723_v59 = vsel %vm715_vm7, %v702_v19, %v601_v51 }
  0xbc   :  { %v661_v37 = vpop.permute.xlu0 %660 }
  0xbd   :  { %v804_v18 = vsel %vm715_vm7, %v778_v10, %v661_v37 }
  0xbe   :  { %v621_v30 = vpop.permute.xlu1 %620 }
  0xbf   :  { %1641 = vmatmul.mubr.msk.bf16.vlgmr.msra.gmra.mrb[8].mxu1 %vm694_vm6, %v553_v21  ;;  %v747_v4 = vsel %vm736_vm8, %v723_v59, %v621_v30 }
  0xc0   :  { %v681_v34 = vpop.permute.xlu0 %680  ;;  %1644 = vmatprep.mubr.msk.bf16.mxu1 %vm694_vm6, %v555_v35 }
  0xc1   :  { %v827_v27 = vsel %vm736_vm8, %v804_v18, %v681_v34 }
  0xc2   :  { %1084 = vmatprep.mubr.bf16.mxu0 %v827_v27  ;;  %v583_v42 = vpop.permute.xlu1 %582 }
  0xc3   :  { %1085 = vmatmul.mubr.bf16.gmra.mrb[12].mxu0 %v747_v4  ;;  %v704_v48 = vsel %vm694_vm6, %v1996_v57, %v583_v42 }
  0xc4   :  { %v643_v41 = vpop.permute.xlu0 %642 }
  0xc5   :  { %v781_v60 = vsel %vm694_vm6, %v2423_v13, %v643_v41  ;;  %v568_v13 = vrot.slane %v1893_v9, 3 }
  0xc6   :  { %v603_v25 = vpop.permute.xlu1 %602 }
  0xc7   :  { %1645 = vmatmul.mubr.msk.bf16.gmra.mrb[12].mxu1 %vm694_vm6, %v557_v54  ;;  %v725_v1 = vsel %vm715_vm7, %v704_v48, %v603_v25  ;;  %v569_v8 = vsel %vm548_vm5, %v566_v40, %v568_v13  ;;  %v571_v61 = vsel %vm548_vm5, %v568_v13, %v570_v55 }
  0xc8   :  { %v663_v43 = vpop.permute.xlu0 %662  ;;  %1648 = vmatprep.mubr.msk.bf16.mxu1 %vm694_vm6, %v2419_v52  ;;  %v565_v52 = vsel %vm548_vm5, %v563_v20, %v564_v62 }
  0xc9   :  { %v806_v24 = vsel %vm715_vm7, %v781_v60, %v663_v43 }
  0xca   :  { %v623_v6 = vpop.permute.xlu1 %622 }
  0xcb   :  { %v750_v26 = vsel %vm736_vm8, %v725_v1, %v623_v6 }
  0xcc   :  { %v683_v15 = vpop.permute.xlu0 %682 }
  0xcd   :  { %v830_v23 = vsel %vm736_vm8, %v806_v24, %v683_v15 }
  0xce   :  { %1092 = vmatprep.mubr.bf16.mxu0 %v830_v23  ;;  %v585_v31 = vpop.permute.xlu1 %584 }
  0xcf   :  { %1093 = vmatmul.mubr.bf16.gmra.mrb[16].mxu0 %v750_v26  ;;  %1649 = vmatmul.mubr.msk.bf16.gmra.mrb[16].mxu1 %vm694_vm6, %v565_v52  ;;  %v706_v45 = vsel %vm694_vm6, %v2380_v56, %v585_v31 }
  0xd0   :  { %v645_v57 = vpop.permute.xlu0 %644  ;;  %1652 = vmatprep.mubr.msk.bf16.mxu1 %vm694_vm6, %v567_v5 }
  0xd1   :  { %v784_v7 = vsel %vm694_vm6, %v2450_v58, %v645_v57  ;;  %v573_v58 = vsel %vm548_vm5, %v570_v55, %v572_v22 }
  0xd2   :  { %v605_v46 = vpop.permute.xlu1 %604 }
  0xd3   :  { %v727_v38 = vsel %vm715_vm7, %v706_v45, %v605_v46 }
  0xd4   :  { %v665_v16 = vpop.permute.xlu0 %664 }
  0xd5   :  { %v808_v9 = vsel %vm715_vm7, %v784_v7, %v665_v16 }
  0xd6   :  { %v625_v28 = vpop.permute.xlu1 %624 }
  0xd7   :  { %1653 = vmatmul.mubr.msk.bf16.gmra.mrb[20].mxu1 %vm694_vm6, %v569_v8  ;;  %v753_v29 = vsel %vm736_vm8, %v727_v38, %v625_v28  ;;  %v2655_v28 = vld [vmem:[%s2713_s2] ss:$0 sm:$0xff] }
  0xd8   :  { %v685_v2 = vpop.permute.xlu0 %684  ;;  %1656 = vmatprep.mubr.msk.bf16.mxu1 %vm694_vm6, %v571_v61 }
  0xd9   :  { %v833_v32 = vsel %vm736_vm8, %v808_v9, %v685_v2 }
  0xda   :  { %1100 = vmatprep.mubr.bf16.mxu0 %v833_v32  ;;  %v587_v56 = vpop.permute.xlu1 %586 }
  0xdb   :  { %1101 = vmatmul.mubr.bf16.gmra.mrb[20].mxu0 %v753_v29  ;;  %v708_v17 = vsel %vm694_vm6, %v2403_v12, %v587_v56 }
  0xdc   :  { %v647_v14 = vpop.permute.xlu0 %646 }
  0xdd   :  { %v787_v44 = vsel %vm694_vm6, %v2471_v11, %v647_v14 }
  0xde   :  { %v607_v36 = vpop.permute.xlu1 %606 }
  0xdf   :  { %1657 = vmatmul.mubr.msk.bf16.gmra.mrb[24].mxu1 %vm694_vm6, %v573_v58  ;;  %v729_v51 = vsel %vm715_vm7, %v708_v17, %v607_v36 }
  0xe0   :  { %v667_v3 = vpop.permute.xlu0 %666 }
  0xe1   :  { %v810_v37 = vsel %vm715_vm7, %v787_v44, %v667_v3 }
  0xe2   :  { %v627_v0 = vpop.permute.xlu1 %626 }
  0xe3   :  { %v756_v35 = vsel %vm736_vm8, %v729_v51, %v627_v0 }
  0xe4   :  { %v687_v21 = vpop.permute.xlu0 %686 }
  0xe5   :  { %v836_v19 = vsel %vm736_vm8, %v810_v37, %v687_v21 }
  0xe6   :  { %1108 = vmatprep.mubr.bf16.mxu0 %v836_v19  ;;  %v589_v30 = vpop.permute.xlu1 %588 }
  0xe7   :  { %1109 = vmatmul.mubr.bf16.gmra.mrb[24].mxu0 %v756_v35  ;;  %v710_v12 = vsel %vm694_vm6, %v2141_v47, %v589_v30 }
  0xe8   :  { %v649_v10 = vpop.permute.xlu0 %648 }
  0xe9   :  { %v790_v11 = vsel %vm694_vm6, %v2491_v33, %v649_v10 }
  0xea   :  { %v609_v59 = vpop.permute.xlu1 %608 }
  0xeb   :  { %v731_v4 = vsel %vm715_vm7, %v710_v12, %v609_v59 }
  0xec   :  { %v669_v18 = vpop.permute.xlu0 %668 }
  0xed   :  { %v812_v27 = vsel %vm715_vm7, %v790_v11, %v669_v18 }
  0xee   :  { %v629_v34 = vpop.permute.xlu1 %628 }
  0xef   :  { %v759_v42 = vsel %vm736_vm8, %v731_v4, %v629_v34 }
  0xf0   :  { %v689_v50 = vpop.permute.xlu0 %688 }
  0xf1   :  { %v839_v41 = vsel %vm736_vm8, %v812_v27, %v689_v50 }
  0xf2   :  { %1116 = vmatprep.mubr.bf16.mxu0 %v839_v41 }
  0xf3   :  { %1117 = vmatmul.mubr.bf16.gmra.mrb[28].mxu0 %v759_v42 }
 0x15a   :  { %v1564_v39 = vpop.f32.mrb[0].mxu0 }
 0x15b   :  { %v1565_v54 = vpop.f32.mrb[1].mxu0 }
 0x15c   :  { %v1566_v49 = vadd.f32 %v1565_v54, %v1564_v39  ;;  %v1567_v25 = vpop.f32.mrb[2].mxu0 }
 0x15d   :  { %v1568_v47 = vpop.f32.mrb[3].mxu0 }
 0x15e   :  { %v1569_v43 = vadd.f32 %v1568_v47, %v1567_v25  ;;  %v1063_v9 = vadd.f32 %v1566_v49, %v2655_v28 }
 0x160   :  { %v1066_v56 = vadd.f32 %v1569_v43, %v2655_v28 }
 0x166   :  { %v1570_v20 = vpop.f32.mrb[4].mxu0 }
 0x167   :  { %v1571_v62 = vpop.f32.mrb[5].mxu0 }
 0x168   :  { %v1572_v33 = vadd.f32 %v1571_v62, %v1570_v20  ;;  %v1573_v40 = vpop.f32.mrb[6].mxu0 }
 0x169   :  { %v1574_v48 = vpop.f32.mrb[7].mxu0 }
 0x16a   :  { %v1575_v6 = vadd.f32 %v1574_v48, %v1573_v40  ;;  %v1071_v7 = vadd.f32 %v1572_v33, %v2655_v28 }
 0x16c   :  { %v1074_v53 = vadd.f32 %v1575_v6, %v2655_v28 }
 0x172   :  { %v1612_v60 = vpop.f32.mrb[0].mxu1 }
 0x173   :  { %v1613_v1 = vpop.f32.mrb[1].mxu1 }
 0x174   :  { %v2644_v24 = vadd.f32 %v1613_v1, %v1612_v60  ;;  %v1615_v15 = vpop.f32.mrb[2].mxu1 }
 0x175   :  { %v1616_v26 = vpop.f32.mrb[3].mxu1 }
 0x176   :  { %v2646_v52 = vadd.f32 %v1616_v26, %v1615_v15 }
 0x17e   :  { %v1576_v23 = vpop.f32.mrb[8].mxu0 }
 0x17f   :  { %v1577_v5 = vpop.f32.mrb[9].mxu0 }
 0x180   :  { %v1578_v31 = vadd.f32 %v1577_v5, %v1576_v23  ;;  %v1579_v57 = vpop.f32.mrb[10].mxu0 }
 0x181   :  { %v1580_v13 = vpop.f32.mrb[11].mxu0 }
 0x182   :  { %v1581_v63 = vadd.f32 %v1580_v13, %v1579_v57  ;;  %v1079_v10 = vadd.f32 %v1578_v31, %v2655_v28 }
 0x184   :  { %v1082_v4 = vadd.f32 %v1581_v63, %v2655_v28 }
 0x18a   :  { %v1618_v55 = vpop.f32.mrb[4].mxu1 }
 0x18b   :  { %v1619_v46 = vpop.f32.mrb[5].mxu1 }
 0x18c   :  { %v2648_v16 = vadd.f32 %v1619_v46, %v1618_v55  ;;  %v1621_v8 = vpop.f32.mrb[6].mxu1 }
 0x18d   :  { %v1622_v61 = vpop.f32.mrb[7].mxu1 }
 0x18e   :  { %v2650_v45 = vadd.f32 %v1622_v61, %v1621_v8  ;;  %v1135_v61 = vadd.f32 %v2648_v16, %v2655_v28  ;;  %v1130_v16 = vadd.f32 %v2646_v52, %v2655_v28 }
 0x192   :  { %v1642_v38 = vpop.f32.mrb[8].mxu1 }
 0x193   :  { %v1184_v2 = vadd.f32 %v1642_v38, %v1071_v7  ;;  %v1175_v29 = vpop.f32.mrb[9].mxu1 }
 0x194   :  { %v1176_v22 = vadd.f32 %v1175_v29, %v1063_v9  ;;  %v1643_v32 = vpop.f32.mrb[10].mxu1 }
 0x195   :  { %v1187_v14 = vadd.f32 %v1643_v32, %v1074_v53  ;;  %v1178_v58 = vpop.f32.mrb[11].mxu1 }
 0x196   :  { %v1179_v36 = vadd.f32 %v1178_v58, %v1066_v56  ;;  %v1582_v3 = vpop.f32.mrb[12].mxu0 }
 0x197   :  { %v1497_v17 = vpack.c.bf16 %v1187_v14, %v1184_v2  ;;  %v1583_v0 = vpop.f32.mrb[13].mxu0  ;;  %v1127_v2 = vadd.f32 %v2644_v24, %v2655_v28 }
 0x198   :  { %v1492_v44 = vpack.c.bf16 %v1179_v36, %v1176_v22  ;;  %v1584_v51 = vadd.f32 %v1583_v0, %v1582_v3  ;;  %v1585_v37 = vpop.f32.mrb[14].mxu0  ;;  %v1138_v22 = vadd.f32 %v2650_v45, %v2655_v28 }
 0x199   :  { %1539 = vst [vmem:[%s2714_s3 + $0x8] sm:$0xff] %v1497_v17   ;;  %v1586_v21 = vpop.f32.mrb[15].mxu0 }
 0x19a   :  { %1493 = vst [vmem:[%s2714_s3] sm:$0xff] %v1492_v44   ;;  %v1587_v35 = vadd.f32 %v1586_v21, %v1585_v37  ;;  %v1087_v19 = vadd.f32 %v1584_v51, %v2655_v28  ;;  %v1646_v30 = vpop.f32.mrb[12].mxu1 }
 0x19b   :  { %v1191_v59 = vpop.f32.mrb[13].mxu1 }
 0x19c   :  { %v1200_v18 = vadd.f32 %v1646_v30, %v1087_v19  ;;  %v1192_v12 = vadd.f32 %v1191_v59, %v1079_v10  ;;  %v1090_v34 = vadd.f32 %v1587_v35, %v2655_v28  ;;  %v1647_v11 = vpop.f32.mrb[14].mxu1 }
 0x19d   :  { %v1194_v27 = vpop.f32.mrb[15].mxu1 }
 0x19e   :  { %v1203_v50 = vadd.f32 %v1647_v11, %v1090_v34  ;;  %v1195_v42 = vadd.f32 %v1194_v27, %v1082_v4 }
 0x1a0   :  { %v1507_v41 = vpack.c.bf16 %v1203_v50, %v1200_v18  ;;  %v1502_v39 = vpack.c.bf16 %v1195_v42, %v1192_v12 }
 0x1a2   :  { %1541 = vst [vmem:[%s2714_s3 + $0x18] sm:$0xff] %v1507_v41   ;;  %1540 = vst [vmem:[%s2714_s3 + $0x10] sm:$0xff] %v1502_v39   ;;  %v1588_v54 = vpop.f32.mrb[16].mxu0  ;;  %v1650_v49 = vpop.f32.mrb[16].mxu1 }
 0x1a3   :  { %v1589_v25 = vpop.f32.mrb[17].mxu0  ;;  %v1207_v47 = vpop.f32.mrb[17].mxu1 }
 0x1a4   :  { %v1590_v43 = vadd.f32 %v1589_v25, %v1588_v54  ;;  %v1591_v20 = vpop.f32.mrb[18].mxu0  ;;  %v1651_v62 = vpop.f32.mrb[18].mxu1 }
 0x1a5   :  { %v1592_v33 = vpop.f32.mrb[19].mxu0  ;;  %v1210_v40 = vpop.f32.mrb[19].mxu1 }
 0x1a6   :  { %v1593_v48 = vadd.f32 %v1592_v33, %v1591_v20  ;;  %v1095_v6 = vadd.f32 %v1590_v43, %v2655_v28 }
 0x1a8   :  { %v1208_v60 = vadd.f32 %v1207_v47, %v1095_v6  ;;  %v1098_v1 = vadd.f32 %v1593_v48, %v2655_v28 }
 0x1aa   :  { %v1211_v15 = vadd.f32 %v1210_v40, %v1098_v1  ;;  %v1654_v26 = vpop.f32.mrb[20].mxu1 }
 0x1ab   :  { %v1223_v23 = vpop.f32.mrb[21].mxu1 }
 0x1ac   :  { %v1512_v5 = vpack.c.bf16 %v1211_v15, %v1208_v60  ;;  %v1655_v31 = vpop.f32.mrb[22].mxu1 }
 0x1ad   :  { %v1226_v57 = vpop.f32.mrb[23].mxu1 }
 0x1ae   :  { %1542 = vst [vmem:[%s2714_s3 + $0x20] sm:$0xff] %v1512_v5   ;;  %v1594_v13 = vpop.f32.mrb[20].mxu0 }
 0x1af   :  { %v1595_v63 = vpop.f32.mrb[21].mxu0 }
 0x1b0   :  { %v1596_v55 = vadd.f32 %v1595_v63, %v1594_v13  ;;  %v1597_v46 = vpop.f32.mrb[22].mxu0 }
 0x1b1   :  { %v1598_v8 = vpop.f32.mrb[23].mxu0 }
 0x1b2   :  { %v1103_v7 = vadd.f32 %v1596_v55, %v2655_v28  ;;  %v1599_v38 = vadd.f32 %v1598_v8, %v1597_v46  ;;  %v1658_v9 = vpop.f32.mrb[24].mxu1 }
 0x1b3   :  { %v1248_v29 = vadd.f32 %v1658_v9, %v1135_v61  ;;  %v1239_v53 = vpop.f32.mrb[25].mxu1 }
 0x1b4   :  { %v1216_v32 = vadd.f32 %v1650_v49, %v1103_v7  ;;  %v1106_v56 = vadd.f32 %v1599_v38, %v2655_v28  ;;  %v1240_v14 = vadd.f32 %v1239_v53, %v1127_v2  ;;  %v1659_v58 = vpop.f32.mrb[26].mxu1 }
 0x1b5   :  { %v1251_v36 = vadd.f32 %v1659_v58, %v1138_v22  ;;  %v1242_v3 = vpop.f32.mrb[27].mxu1 }
 0x1b6   :  { %v1219_v17 = vadd.f32 %v1651_v62, %v1106_v56  ;;  %v1243_v0 = vadd.f32 %v1242_v3, %v1130_v16 }
 0x1b7   :  { %v1537_v44 = vpack.c.bf16 %v1251_v36, %v1248_v29 }
 0x1b8   :  { %v1517_v51 = vpack.c.bf16 %v1219_v17, %v1216_v32  ;;  %v1532_v24 = vpack.c.bf16 %v1243_v0, %v1240_v14 }
 0x1b9   :  { %1547 = vst [vmem:[%s2714_s3 + $0x48] sm:$0xff] %v1537_v44  }
 0x1ba   :  { %1543 = vst [vmem:[%s2714_s3 + $0x28] sm:$0xff] %v1517_v51   ;;  %1546 = vst [vmem:[%s2714_s3 + $0x40] sm:$0xff] %v1532_v24   ;;  %v1600_v52 = vpop.f32.mrb[24].mxu0 }
 0x1bb   :  { %v1601_v45 = vpop.f32.mrb[25].mxu0 }
 0x1bc   :  { %v1602_v37 = vadd.f32 %v1601_v45, %v1600_v52  ;;  %v1603_v21 = vpop.f32.mrb[26].mxu0 }
 0x1bd   :  { %v1604_v35 = vpop.f32.mrb[27].mxu0 }
 0x1be   :  { %v1111_v19 = vadd.f32 %v1602_v37, %v2655_v28  ;;  %v1605_v30 = vadd.f32 %v1604_v35, %v1603_v21 }
 0x1c0   :  { %v1224_v10 = vadd.f32 %v1223_v23, %v1111_v19  ;;  %v1114_v59 = vadd.f32 %v1605_v30, %v2655_v28 }
 0x1c2   :  { %v1227_v18 = vadd.f32 %v1226_v57, %v1114_v59 }
 0x1c4   :  { %v1522_v12 = vpack.c.bf16 %v1227_v18, %v1224_v10 }
 0x1c6   :  { %1544 = vst [vmem:[%s2714_s3 + $0x30] sm:$0xff] %v1522_v12   ;;  %v1606_v34 = vpop.f32.mrb[28].mxu0 }
 0x1c7   :  { %v1607_v11 = vpop.f32.mrb[29].mxu0 }
 0x1c8   :  { %v1608_v4 = vadd.f32 %v1607_v11, %v1606_v34  ;;  %v1609_v27 = vpop.f32.mrb[30].mxu0 }
 0x1c9   :  { %v1610_v50 = vpop.f32.mrb[31].mxu0 }
 0x1ca   :  { %v1119_v42 = vadd.f32 %v1608_v4, %v2655_v28  ;;  %v1611_v41 = vadd.f32 %v1610_v50, %v1609_v27 }
 0x1cc   :  { %v1232_v39 = vadd.f32 %v1654_v26, %v1119_v42  ;;  %v1122_v54 = vadd.f32 %v1611_v41, %v2655_v28 }
 0x1ce   :  { %v1235_v49 = vadd.f32 %v1655_v31, %v1122_v54 }
 0x1d0   :  { %v1527_v25 = vpack.c.bf16 %v1235_v49, %v1232_v39 }
 0x1d2   :  { %1545 = vst [vmem:[%s2714_s3 + $0x38] sm:$0xff] %v1527_v25  }

// kernel: a_call__.12
= control target key start
LH: loop header
LB: loop body
LE: loop exit
PB: predicated region body
PF: predicated region fallthrough
CT: control target
= control target key end

     0   :  { %vm45_vm0 = vcmask 130048   ;;  %s202_s1 = inlined_call_operand.vmem [shape: bf16[16,128], index: 1, kind: input, shape index: {}]   ;;  %s203_s0 = inlined_call_operand.vmem [shape: bf16[2,1,16,16], index: 0, kind: input, shape index: {}]   ;;  %s204_s2 = inlined_call_operand.vmem [shape: f32[1,128], index: 2, kind: input, shape index: {}]   ;;  %s205_s3 = inlined_call_operand.vmem [shape: bf16[32,128], index: 3, kind: output, shape index: {}]  }
   0x1   :  { %v161_v0 = vld [vmem:[%s202_s1] sm:$0xff]   ;;  %v163_v2 = vld [vmem:[%s203_s0 + $0x8] sm:$0xff]  }
   0x2   :  { %v162_v1 = vld [vmem:[%s203_s0] sm:$0xff]   ;;  %155 = vmatprep.subr.bf16.mxu0 %v161_v0 }
   0x3   :  { %156 = vmatpush3.bf16.msra.mxu0 %v161_v0  ;;  %157 = vmatprep.mubr.msk.bf16.mxu0 %vm45_vm0, %v162_v1  ;;  %v129_v4 = vld [vmem:[%s204_s2] ss:$0 sm:$0xff] }
   0x6   :  { %158 = vmatmul.mubr.msk.bf16.vlgmr.msra.gmra.mrb[0].mxu0 %vm45_vm0, %v163_v2 }
  0xd9   :  { %v159_v3 = vpop.f32.mrb[0].mxu0 }
  0xda   :  { %v86_v5 = vpop.f32.mrb[1].mxu0  ;;  %v95_v7 = vadd.f32 %v159_v3, %v129_v4 }
  0xdb   :  { %v160_v6 = vpop.f32.mrb[2].mxu0  ;;  %v87_v10 = vadd.f32 %v129_v4, %v86_v5 }
  0xdc   :  { %v98_v8 = vadd.f32 %v160_v6, %v129_v4  ;;  %v89_v9 = vpop.f32.mrb[3].mxu0 }
  0xdd   :  { %v90_v11 = vadd.f32 %v129_v4, %v89_v9 }
  0xde   :  { %v149_v12 = vpack.c.bf16 %v98_v8, %v95_v7 }
  0xdf   :  { %v144_v13 = vpack.c.bf16 %v90_v11, %v87_v10 }
  0xe0   :  { %151 = vst [vmem:[%s205_s3 + $0x8] sm:$0xff] %v149_v12  }
  0xe1   :  { %145 = vst [vmem:[%s205_s3] sm:$0xff] %v144_v13  }

// kernel: a_call__.15
= control target key start
LH: loop header
LB: loop body
LE: loop exit
PB: predicated region body
PF: predicated region fallthrough
CT: control target
= control target key end

     0   :  { %v104_v0 = vlaneseq  ;;  %v1365_v12 = vmov 0.8125   ;;  %v1366_v16 = vmov 1.875   ;;  %v1367_v18 = vmov 1.4375   ;;  %s2201_s0 = inlined_call_operand.vmem [shape: bf16[6,8,8,7], index: 0, kind: input, shape index: {}]   ;;  %s2202_s1 = inlined_call_operand.vmem [shape: f32[6,8,8,7], index: 1, kind: output, shape index: {}]  }
   0x1   :  { %v956_v1 = vld [vmem:[%s2201_s0] sm:$0xff]   ;;  %v1051_v2 = vld [vmem:[%s2201_s0 + $0x8] sm:$0xff]   ;;  %v1052_v6 = vld [vmem:[%s2201_s0 + $0x10] sm:$0xff]   ;;  %vm854_vm6 = vcmask 56320  }
   0x2   :  { %v957_v3 = vunpack.c.l.bf16 %v956_v1  ;;  %v1384_v4 = vand.u32 127, %v104_v0  ;;  %v107_v5 = vshrl.u32 %v104_v0, 7  ;;  %v958_v7 = vunpack.c.h.bf16 %v956_v1  ;;  %v1053_v35 = vld [vmem:[%s2201_s0 + $0x18] sm:$0xff]   ;;  %v1054_v42 = vld [vmem:[%s2201_s0 + $0x20] sm:$0xff]   ;;  %v1055_v52 = vld [vmem:[%s2201_s0 + $0x28] sm:$0xff]  }
   0x3   :  { %v961_v8 = vunpack.c.l.bf16 %v1051_v2  ;;  %v962_v9 = vunpack.c.h.bf16 %v1051_v2  ;;  %v965_v14 = vunpack.c.l.bf16 %v1052_v6  ;;  %v966_v15 = vunpack.c.h.bf16 %v1052_v6  ;;  %v1463_v60 = vld [vmem:[%s2201_s0 + $0x30] sm:$0xff]  }
   0x4   :  { %v108_v10 = vcvt.s32.f32 %v107_v5  ;;  %vm117_vm0 = vcmp.eq.s32.totalorder %v1384_v4, 0  ;;  %vm126_vm1 = vcmp.eq.s32.totalorder %v1384_v4, 2  ;;  %v907_v11 = vmul.f32 -1.442695, %v957_v3 }
   0x5   :  { %v1391_v13 = vsel %vm126_vm1, 0.625, %v1365_v12  ;;  %vm418_vm2 = vcmp.ge.s32.totalorder %v1384_v4, 2  ;;  %v1394_v17 = vsel %vm126_vm1, 1.0, %v1366_v16  ;;  %v1396_v19 = vsel %vm126_vm1, 2.0625, %v1367_v18 }
   0x6   :  { %1077 = vpow2.f32 %v907_v11  ;;  %vm419_vm3 = vcmp.lt.s32.totalorder %v1384_v4, 4  ;;  %v1401_v20 = vsel %vm117_vm0, %v108_v10, 0.0  ;;  %v1409_v22 = vsel %vm117_vm0, %v108_v10, 1.0 }
   0x7   :  { %vm1403_vm4 = vmand %vm418_vm2, %vm419_vm3  ;;  %v908_v23 = vmul.f32 -1.442695, %v958_v7  ;;  %v909_v24 = vmul.f32 -1.442695, %v961_v8  ;;  %v1417_v27 = vsel %vm117_vm0, %v108_v10, 2.0  ;;  %v1423_v32 = vsel %vm117_vm0, %v108_v10, 3.0 }
   0x8   :  { %v421_v25 = vsel %vm1403_vm4, %v957_v3, 0.0  ;;  %v422_v26 = vsel %vm1403_vm4, %v958_v7, 0.0  ;;  %v423_v28 = vsel %vm1403_vm4, %v961_v8, 0.0  ;;  %v910_v33 = vmul.f32 -1.442695, %v962_v9 }
   0x9   :  { %v469_v29 = vmul.f32 1.442695, %v421_v25  ;;  %1079 = vpow2.f32 %v908_v23  ;;  %v471_v30 = vmul.f32 1.442695, %v422_v26  ;;  %v473_v31 = vmul.f32 1.442695, %v423_v28 }
   0xa   :  { %1081 = vpow2.f32 %v909_v24  ;;  %v424_v34 = vsel %vm1403_vm4, %v962_v9, 0.0  ;;  %v1432_v37 = vsel %vm117_vm0, %v108_v10, 4.0  ;;  %v425_v38 = vsel %vm1403_vm4, %v965_v14, 0.0 }
   0xb   :  { %1083 = vpow2.f32 %v469_v29  ;;  %v475_v36 = vmul.f32 1.442695, %v424_v34  ;;  %v911_v39 = vmul.f32 -1.442695, %v965_v14  ;;  %v477_v40 = vmul.f32 1.442695, %v425_v38 }
   0xc   :  { %1085 = vpow2.f32 %v471_v30  ;;  %v1438_v41 = vsel %vm117_vm0, %v108_v10, 5.0  ;;  %v912_v43 = vmul.f32 -1.442695, %v966_v15  ;;  %v426_v44 = vsel %vm1403_vm4, %v966_v15, 0.0  ;;  %v1491_v38 = vld [vmem:[%s2201_s0 + $0x38] sm:$0xff]  }
   0xd   :  { %1087 = vpow2.f32 %v473_v31  ;;  %v969_v45 = vunpack.c.l.bf16 %v1053_v35  ;;  %v479_v46 = vmul.f32 1.442695, %v426_v44  ;;  %v1447_v47 = vsel %vm117_vm0, %v108_v10, 6.0 }
   0xe   :  { %1089 = vpow2.f32 %v910_v33  ;;  %v970_v48 = vunpack.c.h.bf16 %v1053_v35  ;;  %v1453_v50 = vsel %vm117_vm0, %v108_v10, 7.0  ;;  %v973_v51 = vunpack.c.l.bf16 %v1054_v42 }
   0xf   :  { %1091 = vpow2.f32 %v475_v36  ;;  %v427_v49 = vsel %vm1403_vm4, %v969_v45, 0.0  ;;  %v913_v54 = vmul.f32 -1.442695, %v969_v45  ;;  %v974_v62 = vunpack.c.h.bf16 %v1054_v42 }
  0x10   :  { %v1078_v53 = vpop.eup %1077  ;;  %1093 = vpow2.f32 %v911_v39  ;;  %v481_v55 = vmul.f32 1.442695, %v427_v49  ;;  %v428_v56 = vsel %vm1403_vm4, %v970_v48, 0.0  ;;  %v914_v58 = vmul.f32 -1.442695, %v970_v48 }
  0x11   :  { %v274_v57 = vadd.f32 1.0, %v1078_v53  ;;  %1095 = vpow2.f32 %v477_v40  ;;  %v483_v59 = vmul.f32 1.442695, %v428_v56  ;;  %v429_v61 = vsel %vm1403_vm4, %v973_v51, 0.0 }
  0x12   :  { %1097 = vpow2.f32 %v912_v43  ;;  %v977_v63 = vunpack.c.l.bf16 %v1055_v52  ;;  %v915_v1 = vmul.f32 -1.442695, %v973_v51  ;;  %v485_v2 = vmul.f32 1.442695, %v429_v61 }
  0x13   :  { %v1080_v0 = vpop.eup %1079  ;;  %1099 = vrcp.f32 %v274_v57  ;;  %v978_v3 = vunpack.c.h.bf16 %v1055_v52  ;;  %v430_v7 = vsel %vm1403_vm4, %v974_v62, 0.0  ;;  %v981_v8 = vunpack.c.l.bf16 %v1463_v60 }
  0x14   :  { %v1082_v5 = vpop.eup %1081  ;;  %v275_v6 = vadd.f32 1.0, %v1080_v0  ;;  %1101 = vpow2.f32 %v479_v46  ;;  %v916_v11 = vmul.f32 -1.442695, %v974_v62  ;;  %v1470_v12 = vmul.f32 1.442695, %v430_v7 }
  0x15   :  { %v1084_v9 = vpop.eup %1083  ;;  %v276_v10 = vadd.f32 1.0, %v1082_v5  ;;  %1103 = vpow2.f32 %v913_v54  ;;  %v1473_v16 = vmul.f32 -1.442695, %v977_v63  ;;  %v431_v18 = vsel %vm1403_vm4, %v977_v63, 0.0 }
  0x16   :  { %v1086_v14 = vpop.eup %1085  ;;  %v565_v15 = vmul.f32 %v1084_v9, %v1391_v13  ;;  %1105 = vrcp.f32 %v275_v6  ;;  %vm661_vm5 = vcmp.lt.s32.totalorder %v1384_v4, 2  ;;  %v1479_v25 = vmul.f32 -1.442695, %v978_v3 }
  0x17   :  { %v1088_v23 = vpop.eup %1087  ;;  %v566_v24 = vmul.f32 %v1086_v14, %v1391_v13  ;;  %1107 = vrcp.f32 %v276_v10  ;;  %v432_v26 = vsel %vm1403_vm4, %v978_v3, 0.0  ;;  %v489_v31 = vmul.f32 1.442695, %v431_v18 }
  0x18   :  { %v1090_v28 = vpop.eup %1089  ;;  %v613_v29 = vmul.f32 16.0, %v565_v15  ;;  %v567_v30 = vmul.f32 %v1088_v23, %v1391_v13  ;;  %1109 = vpow2.f32 %v481_v55  ;;  %v1486_v36 = vmul.f32 1.442695, %v432_v26 }
  0x19   :  { %v1092_v33 = vpop.eup %1091  ;;  %v1484_v34 = vmul.f32 16.0, %v566_v24  ;;  %v277_v35 = vadd.f32 1.0, %v1090_v28  ;;  %1111 = vpow2.f32 %v914_v58  ;;  %v1494_v42 = vmul.f32 -1.442695, %v981_v8 }
  0x1a   :  { %v1094_v39 = vpop.eup %1093  ;;  %v568_v40 = vmul.f32 %v1092_v33, %v1391_v13  ;;  %1113 = vpow2.f32 %v483_v59  ;;  %v433_v43 = vsel %vm1403_vm4, %v981_v8, 0.0  ;;  %v615_v45 = vmul.f32 16.0, %v567_v30 }
  0x1b   :  { %v1096_v44 = vpop.eup %1095  ;;  %1115 = vrcp.f32 %v277_v35  ;;  %v278_v46 = vadd.f32 1.0, %v1094_v39  ;;  %v982_v48 = vunpack.c.h.bf16 %v1463_v60  ;;  %v1500_v52 = vmul.f32 1.442695, %v433_v43 }
  0x1c   :  { %v1098_v49 = vpop.eup %1097  ;;  %v569_v51 = vmul.f32 %v1096_v44, %v1391_v13  ;;  %1117 = vpow2.f32 %v915_v1  ;;  %v985_v53 = vunpack.c.l.bf16 %v1491_v38  ;;  %v1503_v55 = vmul.f32 16.0, %v568_v40 }
  0x1d   :  { %v1100_v54 = vpop.eup %1099  ;;  %1119 = vrcp.f32 %v278_v46  ;;  %v279_v56 = vadd.f32 1.0, %v1098_v49  ;;  %v434_v57 = vsel %vm1403_vm4, %v982_v48, 0.0  ;;  %v1510_v61 = vmul.f32 -1.442695, %v982_v48  ;;  %v1566_v48 = vld [vmem:[%s2201_s0 + $0x40] sm:$0xff]  }
  0x1e   :  { %v1102_v58 = vpop.eup %1101  ;;  %v662_v59 = vadd.f32 %v1100_v54, %v1401_v20  ;;  %v758_v60 = vsel %vm1403_vm4, %v613_v29, %v1100_v54  ;;  %1121 = vpow2.f32 %v485_v2  ;;  %v1512_v63 = vmul.f32 16.0, %v569_v51 }
  0x1f   :  { %v1104_v62 = vpop.eup %1103  ;;  %1123 = vrcp.f32 %v279_v56  ;;  %v570_v0 = vmul.f32 %v1102_v58, %v1391_v13  ;;  %v1515_v1 = vmul.f32 1.442695, %v434_v57  ;;  %v1517_v7 = vmul.f32 -1.442695, %v985_v53 }
  0x20   :  { %v1106_v3 = vpop.eup %1105  ;;  %v710_v5 = vmul.f32 16.0, %v662_v59  ;;  %v280_v6 = vadd.f32 1.0, %v1104_v62  ;;  %1125 = vpow2.f32 %v916_v11  ;;  %v435_v10 = vsel %vm1403_vm4, %v985_v53, 0.0 }
  0x21   :  { %v1108_v8 = vpop.eup %1107  ;;  %v663_v9 = vadd.f32 %v1106_v3, %v1409_v22  ;;  %v759_v2 = vsel %vm1403_vm4, %v1484_v34, %v1106_v3  ;;  %1127 = vpow2.f32 %v1470_v12  ;;  %v1529_v18 = vmul.f32 16.0, %v570_v0 }
  0x22   :  { %v1110_v14 = vpop.eup %1109  ;;  %v806_v15 = vsel %vm661_vm5, %v710_v5, %v758_v60  ;;  %v664_v11 = vadd.f32 %v1108_v8, %v1417_v27  ;;  %1129 = vrcp.f32 %v280_v6  ;;  %v760_v12 = vsel %vm1403_vm4, %v615_v45, %v1108_v8 }
  0x23   :  { %v1112_v23 = vpop.eup %1111  ;;  %855 = vst.msk [vmem:[%s2202_s1] sm:$0xff] %vm854_vm6, %v806_v15  ;;  %v711_v24 = vmul.f32 16.0, %v663_v9  ;;  %v571_v26 = vmul.f32 %v1110_v14, %v1391_v13  ;;  %1131 = vpow2.f32 %v1473_v16  ;;  %v986_v33 = vunpack.c.h.bf16 %v1491_v38 }
  0x24   :  { %v1114_v28 = vpop.eup %1113  ;;  %v712_v29 = vmul.f32 16.0, %v664_v11  ;;  %v281_v30 = vadd.f32 1.0, %v1112_v23  ;;  %1133 = vpow2.f32 %v489_v31  ;;  %v1544_v40 = vmul.f32 1.442695, %v435_v10 }
  0x25   :  { %v1116_v34 = vpop.eup %1115  ;;  %v807_v35 = vsel %vm661_vm5, %v711_v24, %v759_v2  ;;  %v572_v39 = vmul.f32 %v1114_v28, %v1391_v13  ;;  %1135 = vpow2.f32 %v1479_v25  ;;  %v619_v38 = vmul.f32 16.0, %v571_v26 }
  0x26   :  { %v1118_v43 = vpop.eup %1117  ;;  %856 = vst.msk [vmem:[%s2202_s1 + $0x8] sm:$0xff] %vm854_vm6, %v807_v35  ;;  %v808_v16 = vsel %vm661_vm5, %v712_v29, %v760_v12  ;;  %v665_v31 = vadd.f32 %v1116_v34, %v1423_v32  ;;  %1137 = vrcp.f32 %v281_v30  ;;  %v761_v25 = vsel %vm1403_vm4, %v1503_v55, %v1116_v34 }
  0x27   :  { %v1120_v44 = vpop.eup %1119  ;;  %857 = vst.msk [vmem:[%s2202_s1 + $0x10] sm:$0xff] %vm854_vm6, %v808_v16  ;;  %v1560_v45 = vmul.f32 16.0, %v572_v39  ;;  %v282_v46 = vadd.f32 1.0, %v1118_v43  ;;  %1139 = vpow2.f32 %v1486_v36  ;;  %v1570_v54 = vmul.f32 -1.442695, %v986_v33 }
  0x28   :  { %v1122_v49 = vpop.eup %1121  ;;  %v713_v51 = vmul.f32 16.0, %v665_v31  ;;  %v666_v53 = vadd.f32 %v1120_v44, %v1432_v37  ;;  %1141 = vpow2.f32 %v1494_v42  ;;  %v762_v55 = vsel %vm1403_vm4, %v1512_v63, %v1120_v44 }
  0x29   :  { %v1124_v56 = vpop.eup %1123  ;;  %1143 = vrcp.f32 %v282_v46  ;;  %v573_v36 = vmul.f32 %v1122_v49, %v1394_v17  ;;  %v436_v57 = vsel %vm1403_vm4, %v986_v33, 0.0  ;;  %v989_v62 = vunpack.c.l.bf16 %v1566_v48 }
  0x2a   :  { %v1126_v58 = vpop.eup %1125  ;;  %v809_v59 = vsel %vm661_vm5, %v713_v51, %v761_v25  ;;  %v714_v60 = vmul.f32 16.0, %v666_v53  ;;  %v667_v42 = vadd.f32 %v1124_v56, %v1438_v41  ;;  %v763_v63 = vsel %vm1403_vm4, %v1529_v18, %v1124_v56  ;;  %v1059_v25 = vld [vmem:[%s2201_s0 + $0x48] sm:$0xff]  }
  0x2b   :  { %v1128_v0 = vpop.eup %1127  ;;  %858 = vst.msk [vmem:[%s2202_s1 + $0x18] sm:$0xff] %vm854_vm6, %v809_v59  ;;  %v1589_v3 = vmul.f32 16.0, %v573_v36  ;;  %v283_v5 = vadd.f32 1.0, %v1126_v58  ;;  %1145 = vpow2.f32 %v1500_v52  ;;  %v499_v15 = vmul.f32 1.442695, %v436_v57 }
  0x2c   :  { %v1130_v6 = vpop.eup %1129  ;;  %v810_v8 = vsel %vm661_vm5, %v714_v60, %v762_v55  ;;  %v715_v9 = vmul.f32 16.0, %v667_v42  ;;  %v574_v2 = vmul.f32 %v1128_v0, %v1394_v17  ;;  %1147 = vpow2.f32 %v1510_v61  ;;  %v1644_v55 = vld [vmem:[%s2201_s0 + $0x50] sm:$0xff]  }
  0x2d   :  { %v1132_v10 = vpop.eup %1131  ;;  %859 = vst.msk [vmem:[%s2202_s1 + $0x20] sm:$0xff] %vm854_vm6, %v810_v8  ;;  %v668_v14 = vadd.f32 %v1130_v6, %v1447_v47  ;;  %v764_v52 = vsel %vm1403_vm4, %v619_v38, %v1130_v6  ;;  %1149 = vrcp.f32 %v283_v5  ;;  %v923_v61 = vmul.f32 -1.442695, %v989_v62 }
  0x2e   :  { %v1134_v11 = vpop.eup %1133  ;;  %v811_v18 = vsel %vm661_vm5, %v715_v9, %v763_v63  ;;  %v284_v23 = vadd.f32 1.0, %v1132_v10  ;;  %1151 = vpow2.f32 %v1515_v1  ;;  %v437_v28 = vsel %vm1403_vm4, %v989_v62, 0.0 }
  0x2f   :  { %v1136_v24 = vpop.eup %1135  ;;  %860 = vst.msk [vmem:[%s2202_s1 + $0x28] sm:$0xff] %vm854_vm6, %v811_v18  ;;  %v716_v12 = vmul.f32 16.0, %v668_v14  ;;  %v575_v26 = vmul.f32 %v1134_v11, %v1394_v17  ;;  %1153 = vpow2.f32 %v1517_v7  ;;  %v1614_v30 = vmul.f32 16.0, %v574_v2 }
  0x30   :  { %v1138_v29 = vpop.eup %1137  ;;  %1155 = vrcp.f32 %v284_v23  ;;  %v285_v1 = vadd.f32 1.0, %v1136_v24  ;;  %v990_v33 = vunpack.c.h.bf16 %v1566_v48  ;;  %v501_v43 = vmul.f32 1.442695, %v437_v28 }
  0x31   :  { %v1140_v34 = vpop.eup %1139  ;;  %v812_v35 = vsel %vm661_vm5, %v716_v12, %v764_v52  ;;  %v669_v39 = vadd.f32 %v1138_v29, %v1453_v50  ;;  %v765_v7 = vsel %vm1403_vm4, %v1560_v45, %v1138_v29  ;;  %v1627_v31 = vmul.f32 16.0, %v575_v26 }
  0x32   :  { %v1142_v16 = vpop.eup %1141  ;;  %861 = vst.msk [vmem:[%s2202_s1 + $0x30] sm:$0xff] %vm854_vm6, %v812_v35  ;;  %1157 = vrcp.f32 %v285_v1  ;;  %v576_v38 = vmul.f32 %v1140_v34, %v1394_v17  ;;  %v438_v44 = vsel %vm1403_vm4, %v990_v33, 0.0  ;;  %v924_v49 = vmul.f32 -1.442695, %v990_v33 }
  0x33   :  { %v1144_v45 = vpop.eup %1143  ;;  %v717_v46 = vmul.f32 16.0, %v669_v39  ;;  %v286_v48 = vadd.f32 1.0, %v1142_v16  ;;  %1159 = vpow2.f32 %v1544_v40  ;;  %v503_v56 = vmul.f32 1.442695, %v438_v44 }
  0x34   :  { %v670_v51 = vadd.f32 %v1144_v45, %v1401_v20  ;;  %v766_v53 = vsel %vm1403_vm4, %v1589_v3, %v1144_v45  ;;  %1161 = vpow2.f32 %v1570_v54  ;;  %v1648_v40 = vmul.f32 16.0, %v576_v38 }
  0x35   :  { %v1146_v36 = vpop.eup %1145  ;;  %v813_v57 = vsel %vm661_vm5, %v717_v46, %v765_v7  ;;  %1163 = vrcp.f32 %v286_v48  ;;  %v993_v58 = vunpack.c.l.bf16 %v1059_v25  ;;  %v994_v42 = vunpack.c.h.bf16 %v1059_v25 }
  0x36   :  { %v1148_v59 = vpop.eup %1147  ;;  %862 = vst.msk [vmem:[%s2202_s1 + $0x38] sm:$0xff] %vm854_vm6, %v813_v57  ;;  %v718_v54 = vmul.f32 16.0, %v670_v51  ;;  %v577_v60 = vmul.f32 %v1146_v36, %v1394_v17  ;;  %1165 = vpow2.f32 %v499_v15  ;;  %v997_v3 = vunpack.c.l.bf16 %v1644_v55 }
  0x37   :  { %v1150_v62 = vpop.eup %1149  ;;  %v287_v0 = vadd.f32 1.0, %v1148_v59  ;;  %1167 = vpow2.f32 %v923_v61  ;;  %v439_v63 = vsel %vm1403_vm4, %v993_v58, 0.0  ;;  %v925_v2 = vmul.f32 -1.442695, %v993_v58 }
  0x38   :  { %v1152_v5 = vpop.eup %1151  ;;  %v814_v6 = vsel %vm661_vm5, %v718_v54, %v766_v53  ;;  %v671_v8 = vadd.f32 %v1150_v62, %v1409_v22  ;;  %v767_v9 = vsel %vm1403_vm4, %v1614_v30, %v1150_v62  ;;  %v625_v14 = vmul.f32 16.0, %v577_v60  ;;  %v1701_v53 = vld [vmem:[%s2201_s0 + $0x58] sm:$0xff]  }
  0x39   :  { %v1154_v10 = vpop.eup %1153  ;;  %863 = vst.msk [vmem:[%s2202_s1 + $0x40] sm:$0xff] %vm854_vm6, %v814_v6  ;;  %1169 = vrcp.f32 %v287_v0  ;;  %v578_v52 = vmul.f32 %v1152_v5, %v1394_v17  ;;  %v505_v15 = vmul.f32 1.442695, %v439_v63  ;;  %v440_v61 = vsel %vm1403_vm4, %v994_v42, 0.0 }
  0x3a   :  { %v1156_v11 = vpop.eup %1155  ;;  %v719_v18 = vmul.f32 16.0, %v671_v8  ;;  %v288_v23 = vadd.f32 1.0, %v1154_v10  ;;  %1171 = vpow2.f32 %v501_v43  ;;  %v926_v26 = vmul.f32 -1.442695, %v994_v42 }
  0x3b   :  { %v672_v24 = vadd.f32 %v1156_v11, %v1417_v27  ;;  %v768_v12 = vsel %vm1403_vm4, %v1627_v31, %v1156_v11  ;;  %1173 = vpow2.f32 %v924_v49  ;;  %v507_v30 = vmul.f32 1.442695, %v440_v61 }
  0x3c   :  { %v1158_v28 = vpop.eup %1157  ;;  %v815_v29 = vsel %vm661_vm5, %v719_v18, %v767_v9  ;;  %1175 = vrcp.f32 %v288_v23  ;;  %v927_v1 = vmul.f32 -1.442695, %v997_v3  ;;  %v441_v16 = vsel %vm1403_vm4, %v997_v3, 0.0 }
  0x3d   :  { %v1160_v33 = vpop.eup %1159  ;;  %864 = vst.msk [vmem:[%s2202_s1 + $0x48] sm:$0xff] %vm854_vm6, %v815_v29  ;;  %v720_v34 = vmul.f32 16.0, %v672_v24  ;;  %v673_v35 = vadd.f32 %v1158_v28, %v1423_v32  ;;  %v769_v39 = vsel %vm1403_vm4, %v1648_v40, %v1158_v28  ;;  %1177 = vpow2.f32 %v503_v56  ;;  %v1731_v24 = vld [vmem:[%s2201_s0 + $0x60] sm:$0xff]  }
  0x3e   :  { %v1162_v7 = vpop.eup %1161  ;;  %v579_v43 = vmul.f32 %v1160_v33, %v1394_v17  ;;  %1179 = vpow2.f32 %v925_v2  ;;  %v998_v31 = vunpack.c.h.bf16 %v1644_v55  ;;  %v626_v51 = vmul.f32 16.0, %v578_v52 }
  0x3f   :  { %v1164_v38 = vpop.eup %1163  ;;  %v816_v44 = vsel %vm661_vm5, %v720_v34, %v768_v12  ;;  %v721_v25 = vmul.f32 16.0, %v673_v35  ;;  %v289_v45 = vadd.f32 1.0, %v1162_v7  ;;  %1181 = vpow2.f32 %v505_v15 }
  0x40   :  { %v1166_v46 = vpop.eup %1165  ;;  %865 = vst.msk [vmem:[%s2202_s1 + $0x50] sm:$0xff] %vm854_vm6, %v816_v44  ;;  %v674_v48 = vadd.f32 %v1164_v38, %v1432_v37  ;;  %v770_v49 = vsel %vm1403_vm4, %v625_v14, %v1164_v38  ;;  %1183 = vpow2.f32 %v926_v26  ;;  %v627_v36 = vmul.f32 16.0, %v579_v43 }
  0x41   :  { %v1168_v56 = vpop.eup %1167  ;;  %v817_v55 = vsel %vm661_vm5, %v721_v25, %v769_v39  ;;  %1185 = vrcp.f32 %v289_v45  ;;  %v509_v57 = vmul.f32 1.442695, %v441_v16  ;;  %v928_v59 = vmul.f32 -1.442695, %v998_v31 }
  0x42   :  { %866 = vst.msk [vmem:[%s2202_s1 + $0x58] sm:$0xff] %vm854_vm6, %v817_v55  ;;  %v722_v40 = vmul.f32 16.0, %v674_v48  ;;  %v290_v58 = vadd.f32 1.0, %v1168_v56  ;;  %1187 = vpow2.f32 %v507_v30  ;;  %v580_v60 = vmul.f32 %v1166_v46, %v1394_v17 }
  0x43   :  { %v1170_v54 = vpop.eup %1169  ;;  %1189 = vpow2.f32 %v927_v1  ;;  %v442_v42 = vsel %vm1403_vm4, %v998_v31, 0.0  ;;  %v1001_v62 = vunpack.c.l.bf16 %v1701_v53  ;;  %v1002_v34 = vunpack.c.h.bf16 %v1701_v53 }
  0x44   :  { %v1172_v0 = vpop.eup %1171  ;;  %v818_v63 = vsel %vm661_vm5, %v722_v40, %v770_v49  ;;  %v675_v3 = vadd.f32 %v1170_v54, %v1438_v41  ;;  %v771_v5 = vsel %vm1403_vm4, %v626_v51, %v1170_v54  ;;  %1191 = vrcp.f32 %v290_v58 }
  0x45   :  { %v1174_v6 = vpop.eup %1173  ;;  %867 = vst.msk [vmem:[%s2202_s1 + $0x60] sm:$0xff] %vm854_vm6, %v818_v63  ;;  %v581_v8 = vmul.f32 %v1172_v0, %v1396_v19  ;;  %1193 = vpow2.f32 %v509_v57  ;;  %v511_v9 = vmul.f32 1.442695, %v442_v42  ;;  %v929_v2 = vmul.f32 -1.442695, %v1001_v62 }
  0x46   :  { %v1176_v10 = vpop.eup %1175  ;;  %v723_v14 = vmul.f32 16.0, %v675_v3  ;;  %v291_v52 = vadd.f32 1.0, %v1174_v6  ;;  %1195 = vpow2.f32 %v928_v59  ;;  %v443_v15 = vsel %vm1403_vm4, %v1001_v62, 0.0  ;;  %v1763_v62 = vld [vmem:[%s2201_s0 + $0x68] sm:$0xff]  }
  0x47   :  { %v1178_v11 = vpop.eup %1177  ;;  %v676_v18 = vadd.f32 %v1176_v10, %v1447_v47  ;;  %v772_v23 = vsel %vm1403_vm4, %v627_v36, %v1176_v10  ;;  %v628_v61 = vmul.f32 16.0, %v580_v60  ;;  %1197 = vpow2.f32 %v511_v9 }
  0x48   :  { %v1180_v12 = vpop.eup %1179  ;;  %v819_v26 = vsel %vm661_vm5, %v723_v14, %v771_v5  ;;  %1199 = vrcp.f32 %v291_v52  ;;  %v582_v28 = vmul.f32 %v1178_v11, %v1396_v19  ;;  %v513_v29 = vmul.f32 1.442695, %v443_v15 }
  0x49   :  { %v1182_v30 = vpop.eup %1181  ;;  %868 = vst.msk [vmem:[%s2202_s1 + $0x68] sm:$0xff] %vm854_vm6, %v819_v26  ;;  %v724_v1 = vmul.f32 16.0, %v676_v18  ;;  %v292_v33 = vadd.f32 1.0, %v1180_v12  ;;  %1201 = vpow2.f32 %v929_v2  ;;  %v629_v39 = vmul.f32 16.0, %v581_v8 }
  0x4a   :  { %v1184_v35 = vpop.eup %1183  ;;  %v583_v7 = vmul.f32 %v1182_v30, %v1396_v19  ;;  %1203 = vpow2.f32 %v513_v29  ;;  %v1005_v43 = vunpack.c.l.bf16 %v1731_v24  ;;  %v930_v44 = vmul.f32 -1.442695, %v1002_v34 }
  0x4b   :  { %v1186_v16 = vpop.eup %1185  ;;  %v820_v31 = vsel %vm661_vm5, %v724_v1, %v772_v23  ;;  %1205 = vrcp.f32 %v292_v33  ;;  %v293_v38 = vadd.f32 1.0, %v1184_v35  ;;  %v630_v48 = vmul.f32 16.0, %v582_v28 }
  0x4c   :  { %v1188_v25 = vpop.eup %1187  ;;  %869 = vst.msk [vmem:[%s2202_s1 + $0x70] sm:$0xff] %vm854_vm6, %v820_v31  ;;  %v677_v45 = vadd.f32 %v1186_v16, %v1453_v50  ;;  %v773_v46 = vsel %vm1403_vm4, %v628_v61, %v1186_v16  ;;  %v444_v49 = vsel %vm1403_vm4, %v1002_v34, 0.0  ;;  %v931_v55 = vmul.f32 -1.442695, %v1005_v43  ;;  %v1797_v16 = vld [vmem:[%s2201_s0 + $0x70] sm:$0xff]  }
  0x4d   :  { %v1190_v51 = vpop.eup %1189  ;;  %1207 = vrcp.f32 %v293_v38  ;;  %v584_v53 = vmul.f32 %v1188_v25, %v1396_v19  ;;  %v515_v56 = vmul.f32 1.442695, %v444_v49  ;;  %v445_v58 = vsel %vm1403_vm4, %v1005_v43, 0.0 }
  0x4e   :  { %v1192_v36 = vpop.eup %1191  ;;  %v725_v57 = vmul.f32 16.0, %v677_v45  ;;  %v294_v40 = vadd.f32 1.0, %v1190_v51  ;;  %1209 = vpow2.f32 %v930_v44  ;;  %v631_v42 = vmul.f32 16.0, %v583_v7 }
  0x4f   :  { %v1194_v59 = vpop.eup %1193  ;;  %v678_v54 = vadd.f32 %v1192_v36, %v1401_v20  ;;  %v774_v60 = vsel %vm1403_vm4, %v629_v39, %v1192_v36  ;;  %1211 = vpow2.f32 %v515_v56  ;;  %v517_v5 = vmul.f32 1.442695, %v445_v58 }
  0x50   :  { %v1196_v0 = vpop.eup %1195  ;;  %v821_v63 = vsel %vm661_vm5, %v725_v57, %v773_v46  ;;  %1213 = vrcp.f32 %v294_v40  ;;  %v585_v3 = vmul.f32 %v1194_v59, %v1396_v19  ;;  %v1006_v2 = vunpack.c.h.bf16 %v1731_v24 }
  0x51   :  { %v1198_v6 = vpop.eup %1197  ;;  %870 = vst.msk [vmem:[%s2202_s1 + $0x78] sm:$0xff] %vm854_vm6, %v821_v63  ;;  %v726_v8 = vmul.f32 16.0, %v678_v54  ;;  %v295_v9 = vadd.f32 1.0, %v1196_v0  ;;  %1215 = vpow2.f32 %v931_v55  ;;  %v632_v14 = vmul.f32 16.0, %v584_v53 }
  0x52   :  { %v1200_v10 = vpop.eup %1199  ;;  %v586_v52 = vmul.f32 %v1198_v6, %v1396_v19  ;;  %1217 = vpow2.f32 %v517_v5  ;;  %v1009_v15 = vunpack.c.l.bf16 %v1763_v62  ;;  %v1778_v61 = vmul.f32 16.0, %v585_v3 }
  0x53   :  { %v1202_v11 = vpop.eup %1201  ;;  %v822_v18 = vsel %vm661_vm5, %v726_v8, %v774_v60  ;;  %v679_v23 = vadd.f32 %v1200_v10, %v1409_v22  ;;  %1219 = vrcp.f32 %v295_v9  ;;  %v775_v24 = vsel %vm1403_vm4, %v630_v48, %v1200_v10 }
  0x54   :  { %v1204_v12 = vpop.eup %1203  ;;  %871 = vst.msk [vmem:[%s2202_s1 + $0x80] sm:$0xff] %vm854_vm6, %v822_v18  ;;  %v296_v26 = vadd.f32 1.0, %v1202_v11  ;;  %v932_v28 = vmul.f32 -1.442695, %v1006_v2  ;;  %v446_v29 = vsel %vm1403_vm4, %v1006_v2, 0.0  ;;  %v1788_v33 = vmul.f32 16.0, %v586_v52 }
  0x55   :  { %v1206_v30 = vpop.eup %1205  ;;  %v727_v1 = vmul.f32 16.0, %v679_v23  ;;  %v519_v34 = vmul.f32 1.442695, %v446_v29  ;;  %v933_v35 = vmul.f32 -1.442695, %v1009_v15  ;;  %v587_v7 = vmul.f32 %v1204_v12, %v1396_v19 }
  0x56   :  { %v680_v39 = vadd.f32 %v1206_v30, %v1417_v27  ;;  %1221 = vrcp.f32 %v296_v26  ;;  %v447_v43 = vsel %vm1403_vm4, %v1009_v15, 0.0  ;;  %v776_v44 = vsel %vm1403_vm4, %v631_v42, %v1206_v30  ;;  %v1065_v15 = vld [vmem:[%s2201_s0 + $0x78] sm:$0xff]  }
  0x57   :  { %v1208_v31 = vpop.eup %1207  ;;  %v823_v38 = vsel %vm661_vm5, %v727_v1, %v775_v24  ;;  %1223 = vpow2.f32 %v932_v28  ;;  %v521_v25 = vmul.f32 1.442695, %v447_v43  ;;  %v1010_v56 = vunpack.c.h.bf16 %v1763_v62 }
  0x58   :  { %v1210_v45 = vpop.eup %1209  ;;  %872 = vst.msk [vmem:[%s2202_s1 + $0x88] sm:$0xff] %vm854_vm6, %v823_v38  ;;  %v728_v46 = vmul.f32 16.0, %v680_v39  ;;  %v681_v48 = vadd.f32 %v1208_v31, %v1423_v32  ;;  %v777_v49 = vsel %vm1403_vm4, %v632_v14, %v1208_v31  ;;  %1225 = vpow2.f32 %v519_v34 }
  0x59   :  { %v1212_v51 = vpop.eup %1211  ;;  %v297_v53 = vadd.f32 1.0, %v1210_v45  ;;  %1227 = vpow2.f32 %v933_v35  ;;  %v1013_v55 = vunpack.c.l.bf16 %v1797_v16  ;;  %v635_v60 = vmul.f32 16.0, %v587_v7 }
  0x5a   :  { %v1214_v36 = vpop.eup %1213  ;;  %v824_v57 = vsel %vm661_vm5, %v728_v46, %v776_v44  ;;  %v729_v40 = vmul.f32 16.0, %v681_v48  ;;  %v588_v58 = vmul.f32 %v1212_v51, %v1396_v19  ;;  %1229 = vpow2.f32 %v521_v25 }
  0x5b   :  { %v1216_v59 = vpop.eup %1215  ;;  %873 = vst.msk [vmem:[%s2202_s1 + $0x90] sm:$0xff] %vm854_vm6, %v824_v57  ;;  %v682_v54 = vadd.f32 %v1214_v36, %v1432_v37  ;;  %1231 = vrcp.f32 %v297_v53  ;;  %v934_v42 = vmul.f32 -1.442695, %v1010_v56  ;;  %v778_v63 = vsel %vm1403_vm4, %v1778_v61, %v1214_v36 }
  0x5c   :  { %v1218_v62 = vpop.eup %1217  ;;  %v825_v0 = vsel %vm661_vm5, %v729_v40, %v777_v49  ;;  %v298_v3 = vadd.f32 1.0, %v1216_v59  ;;  %v448_v5 = vsel %vm1403_vm4, %v1010_v56, 0.0  ;;  %v1831_v9 = vmul.f32 16.0, %v588_v58  ;;  %v1066_v40 = vld [vmem:[%s2201_s0 + $0x80] sm:$0xff]  }
  0x5d   :  { %v1220_v6 = vpop.eup %1219  ;;  %874 = vst.msk [vmem:[%s2202_s1 + $0x98] sm:$0xff] %vm854_vm6, %v825_v0  ;;  %v730_v8 = vmul.f32 16.0, %v682_v54  ;;  %1233 = vpow2.f32 %v934_v42  ;;  %v523_v2 = vmul.f32 1.442695, %v448_v5  ;;  %v589_v14 = vmul.f32 %v1218_v62, %v1391_v13 }
  0x5e   :  { %v683_v10 = vadd.f32 %v1220_v6, %v1438_v41  ;;  %1235 = vrcp.f32 %v298_v3  ;;  %v935_v52 = vmul.f32 -1.442695, %v1013_v55  ;;  %v779_v18 = vsel %vm1403_vm4, %v1788_v33, %v1220_v6 }
  0x5f   :  { %v826_v11 = vsel %vm661_vm5, %v730_v8, %v778_v63  ;;  %1237 = vpow2.f32 %v523_v2  ;;  %v449_v23 = vsel %vm1403_vm4, %v1013_v55, 0.0  ;;  %v1014_v26 = vunpack.c.h.bf16 %v1797_v16 }
  0x60   :  { %v1222_v61 = vpop.eup %1221  ;;  %875 = vst.msk [vmem:[%s2202_s1 + $0xa0] sm:$0xff] %vm854_vm6, %v826_v11  ;;  %v731_v12 = vmul.f32 16.0, %v683_v10  ;;  %1239 = vpow2.f32 %v935_v52  ;;  %v525_v24 = vmul.f32 1.442695, %v449_v23  ;;  %v1017_v1 = vunpack.c.l.bf16 %v1065_v15 }
  0x61   :  { %v1224_v28 = vpop.eup %1223  ;;  %v684_v29 = vadd.f32 %v1222_v61, %v1447_v47  ;;  %v780_v30 = vsel %vm1403_vm4, %v635_v60, %v1222_v61  ;;  %v1018_v33 = vunpack.c.h.bf16 %v1065_v15  ;;  %v936_v7 = vmul.f32 -1.442695, %v1014_v26 }
  0x62   :  { %v1226_v34 = vpop.eup %1225  ;;  %v827_v35 = vsel %vm661_vm5, %v731_v12, %v779_v18  ;;  %v299_v39 = vadd.f32 1.0, %v1224_v28  ;;  %1241 = vpow2.f32 %v525_v24  ;;  %v450_v38 = vsel %vm1403_vm4, %v1014_v26, 0.0  ;;  %v1067_v18 = vld [vmem:[%s2201_s0 + $0x88] sm:$0xff]  }
  0x63   :  { %v1228_v43 = vpop.eup %1227  ;;  %876 = vst.msk [vmem:[%s2202_s1 + $0xa8] sm:$0xff] %vm854_vm6, %v827_v35  ;;  %v732_v16 = vmul.f32 16.0, %v684_v29  ;;  %v590_v31 = vmul.f32 %v1226_v34, %v1391_v13  ;;  %v937_v44 = vmul.f32 -1.442695, %v1017_v1  ;;  %v527_v46 = vmul.f32 1.442695, %v450_v38 }
  0x64   :  { %v1230_v25 = vpop.eup %1229  ;;  %1243 = vrcp.f32 %v299_v39  ;;  %v300_v45 = vadd.f32 1.0, %v1228_v43  ;;  %v451_v48 = vsel %vm1403_vm4, %v1017_v1, 0.0  ;;  %v637_v53 = vmul.f32 16.0, %v589_v14 }
  0x65   :  { %v1232_v49 = vpop.eup %1231  ;;  %v828_v51 = vsel %vm661_vm5, %v732_v16, %v780_v30  ;;  %v1866_v56 = vmul.f32 16.0, %v590_v31  ;;  %1245 = vpow2.f32 %v936_v7  ;;  %v591_v36 = vmul.f32 %v1230_v25, %v1391_v13 }
  0x66   :  { %877 = vst.msk [vmem:[%s2202_s1 + $0xb0] sm:$0xff] %vm854_vm6, %v828_v51  ;;  %v685_v55 = vadd.f32 %v1232_v49, %v1453_v50  ;;  %1247 = vrcp.f32 %v300_v45  ;;  %v529_v57 = vmul.f32 1.442695, %v451_v48  ;;  %v781_v59 = vsel %vm1403_vm4, %v1831_v9, %v1232_v49 }
  0x67   :  { %v1234_v58 = vpop.eup %1233  ;;  %1249 = vpow2.f32 %v527_v46  ;;  %v938_v54 = vmul.f32 -1.442695, %v1018_v33  ;;  %v452_v60 = vsel %vm1403_vm4, %v1018_v33, 0.0  ;;  %v1021_v8 = vunpack.c.l.bf16 %v1066_v40 }
  0x68   :  { %v1236_v42 = vpop.eup %1235  ;;  %v733_v62 = vmul.f32 16.0, %v685_v55  ;;  %v301_v0 = vadd.f32 1.0, %v1234_v58  ;;  %1251 = vpow2.f32 %v937_v44  ;;  %v531_v63 = vmul.f32 1.442695, %v452_v60 }
  0x69   :  { %v1238_v3 = vpop.eup %1237  ;;  %v686_v5 = vadd.f32 %v1236_v42, %v1401_v20  ;;  %v782_v6 = vsel %vm1403_vm4, %v637_v53, %v1236_v42  ;;  %1253 = vpow2.f32 %v529_v57  ;;  %v1022_v14 = vunpack.c.h.bf16 %v1066_v40 }
  0x6a   :  { %v1240_v2 = vpop.eup %1239  ;;  %v829_v9 = vsel %vm661_vm5, %v733_v62, %v781_v59  ;;  %1255 = vrcp.f32 %v301_v0  ;;  %v592_v10 = vmul.f32 %v1238_v3, %v1391_v13  ;;  %v939_v11 = vmul.f32 -1.442695, %v1021_v8  ;;  %v1068_v62 = vld [vmem:[%s2201_s0 + $0x90] sm:$0xff]  }
  0x6b   :  { %878 = vst.msk [vmem:[%s2202_s1 + $0xb8] sm:$0xff] %vm854_vm6, %v829_v9  ;;  %v734_v52 = vmul.f32 16.0, %v686_v5  ;;  %v302_v15 = vadd.f32 1.0, %v1240_v2  ;;  %1257 = vpow2.f32 %v938_v54  ;;  %v639_v61 = vmul.f32 16.0, %v591_v36 }
  0x6c   :  { %v1242_v23 = vpop.eup %1241  ;;  %1259 = vpow2.f32 %v531_v63  ;;  %v453_v12 = vsel %vm1403_vm4, %v1021_v8, 0.0  ;;  %v940_v24 = vmul.f32 -1.442695, %v1022_v14  ;;  %v1899_v28 = vmul.f32 16.0, %v592_v10 }
  0x6d   :  { %v830_v26 = vsel %vm661_vm5, %v734_v52, %v782_v6  ;;  %1261 = vrcp.f32 %v302_v15  ;;  %v533_v29 = vmul.f32 1.442695, %v453_v12  ;;  %v454_v1 = vsel %vm1403_vm4, %v1022_v14, 0.0 }
  0x6e   :  { %v1244_v30 = vpop.eup %1243  ;;  %879 = vst.msk [vmem:[%s2202_s1 + $0xc0] sm:$0xff] %vm854_vm6, %v830_v26  ;;  %1263 = vpow2.f32 %v939_v11  ;;  %v1025_v33 = vunpack.c.l.bf16 %v1067_v18  ;;  %v1026_v34 = vunpack.c.h.bf16 %v1067_v18  ;;  %v593_v43 = vmul.f32 %v1242_v23, %v1391_v13 }
  0x6f   :  { %v1246_v35 = vpop.eup %1245  ;;  %v687_v39 = vadd.f32 %v1244_v30, %v1409_v22  ;;  %v783_v7 = vsel %vm1403_vm4, %v1866_v56, %v1244_v30  ;;  %1265 = vpow2.f32 %v533_v29  ;;  %v535_v38 = vmul.f32 1.442695, %v454_v1 }
  0x70   :  { %v1248_v16 = vpop.eup %1247  ;;  %v303_v31 = vadd.f32 1.0, %v1246_v35  ;;  %1267 = vpow2.f32 %v940_v24  ;;  %v941_v44 = vmul.f32 -1.442695, %v1025_v33  ;;  %v455_v49 = vsel %vm1403_vm4, %v1025_v33, 0.0 }
  0x71   :  { %v1250_v25 = vpop.eup %1249  ;;  %v735_v45 = vmul.f32 16.0, %v687_v39  ;;  %v688_v46 = vadd.f32 %v1248_v16, %v1417_v27  ;;  %v784_v48 = vsel %vm1403_vm4, %v639_v61, %v1248_v16  ;;  %v537_v56 = vmul.f32 1.442695, %v455_v49 }
  0x72   :  { %v1252_v51 = vpop.eup %1251  ;;  %1269 = vrcp.f32 %v303_v31  ;;  %v594_v53 = vmul.f32 %v1250_v25, %v1391_v13  ;;  %v942_v55 = vmul.f32 -1.442695, %v1026_v34  ;;  %v641_v54 = vmul.f32 16.0, %v593_v43 }
  0x73   :  { %v1254_v36 = vpop.eup %1253  ;;  %v831_v57 = vsel %vm661_vm5, %v735_v45, %v783_v7  ;;  %v736_v40 = vmul.f32 16.0, %v688_v46  ;;  %v304_v58 = vadd.f32 1.0, %v1252_v51  ;;  %1271 = vpow2.f32 %v535_v38  ;;  %v1069_v7 = vld [vmem:[%s2201_s0 + $0x98] sm:$0xff]  }
  0x74   :  { %v1256_v59 = vpop.eup %1255  ;;  %880 = vst.msk [vmem:[%s2202_s1 + $0xc8] sm:$0xff] %vm854_vm6, %v831_v57  ;;  %v595_v60 = vmul.f32 %v1254_v36, %v1391_v13  ;;  %1273 = vpow2.f32 %v941_v44  ;;  %v456_v42 = vsel %vm1403_vm4, %v1026_v34, 0.0  ;;  %v1933_v5 = vmul.f32 16.0, %v594_v53 }
  0x75   :  { %v1258_v0 = vpop.eup %1257  ;;  %v832_v63 = vsel %vm661_vm5, %v736_v40, %v784_v48  ;;  %v689_v3 = vadd.f32 %v1256_v59, %v1423_v32  ;;  %1275 = vrcp.f32 %v304_v58  ;;  %v785_v8 = vsel %vm1403_vm4, %v1899_v28, %v1256_v59  ;;  %v1974_v48 = vld [vmem:[%s2201_s0 + $0xa0] sm:$0xff]  }
  0x76   :  { %v1260_v6 = vpop.eup %1259  ;;  %881 = vst.msk [vmem:[%s2202_s1 + $0xd0] sm:$0xff] %vm854_vm6, %v832_v63  ;;  %v305_v2 = vadd.f32 1.0, %v1258_v0  ;;  %1277 = vpow2.f32 %v537_v56  ;;  %v539_v9 = vmul.f32 1.442695, %v456_v42  ;;  %v1942_v52 = vmul.f32 16.0, %v595_v60 }
  0x77   :  { %v1262_v10 = vpop.eup %1261  ;;  %v737_v14 = vmul.f32 16.0, %v689_v3  ;;  %1279 = vpow2.f32 %v942_v55  ;;  %v1029_v15 = vunpack.c.l.bf16 %v1068_v62  ;;  %v596_v23 = vmul.f32 %v1260_v6, %v1391_v13 }
  0x78   :  { %v1264_v11 = vpop.eup %1263  ;;  %v690_v18 = vadd.f32 %v1262_v10, %v1432_v37  ;;  %1281 = vrcp.f32 %v305_v2  ;;  %v1030_v61 = vunpack.c.h.bf16 %v1068_v62  ;;  %v786_v26 = vsel %vm1403_vm4, %v641_v54, %v1262_v10 }
  0x79   :  { %v1266_v12 = vpop.eup %1265  ;;  %v833_v24 = vsel %vm661_vm5, %v737_v14, %v785_v8  ;;  %v306_v28 = vadd.f32 1.0, %v1264_v11  ;;  %1283 = vpow2.f32 %v539_v9  ;;  %v943_v13 = vmul.f32 -1.442695, %v1029_v15 }
  0x7a   :  { %v1268_v29 = vpop.eup %1267  ;;  %882 = vst.msk [vmem:[%s2202_s1 + $0xd8] sm:$0xff] %vm854_vm6, %v833_v24  ;;  %v738_v30 = vmul.f32 16.0, %v690_v18  ;;  %v597_v1 = vmul.f32 %v1266_v12, %v1394_v17  ;;  %v457_v33 = vsel %vm1403_vm4, %v1029_v15, 0.0  ;;  %v944_v39 = vmul.f32 -1.442695, %v1030_v61 }
  0x7b   :  { %1285 = vrcp.f32 %v306_v28  ;;  %v307_v34 = vadd.f32 1.0, %v1268_v29  ;;  %v541_v35 = vmul.f32 1.442695, %v457_v33  ;;  %v644_v31 = vmul.f32 16.0, %v596_v23 }
  0x7c   :  { %v1270_v43 = vpop.eup %1269  ;;  %v834_v16 = vsel %vm661_vm5, %v738_v30, %v786_v26  ;;  %1287 = vpow2.f32 %v943_v13  ;;  %v458_v38 = vsel %vm1403_vm4, %v1030_v61, 0.0  ;;  %v1969_v45 = vmul.f32 16.0, %v597_v1 }
  0x7d   :  { %v1272_v44 = vpop.eup %1271  ;;  %883 = vst.msk [vmem:[%s2202_s1 + $0xe0] sm:$0xff] %vm854_vm6, %v834_v16  ;;  %v691_v25 = vadd.f32 %v1270_v43, %v1438_v41  ;;  %1289 = vrcp.f32 %v307_v34  ;;  %v543_v46 = vmul.f32 1.442695, %v458_v38  ;;  %v787_v51 = vsel %vm1403_vm4, %v1933_v5, %v1270_v43 }
  0x7e   :  { %v1274_v49 = vpop.eup %1273  ;;  %1291 = vpow2.f32 %v541_v35  ;;  %v1033_v53 = vunpack.c.l.bf16 %v1069_v7  ;;  %v1034_v56 = vunpack.c.h.bf16 %v1069_v7  ;;  %v598_v57 = vmul.f32 %v1272_v44, %v1394_v17 }
  0x7f   :  { %v1276_v55 = vpop.eup %1275  ;;  %v739_v36 = vmul.f32 16.0, %v691_v25  ;;  %v308_v40 = vadd.f32 1.0, %v1274_v49  ;;  %1293 = vpow2.f32 %v944_v39  ;;  %v1037_v60 = vunpack.c.l.bf16 %v1974_v48 }
  0x80   :  { %v1278_v58 = vpop.eup %1277  ;;  %v692_v59 = vadd.f32 %v1276_v55, %v1447_v47  ;;  %v788_v54 = vsel %vm1403_vm4, %v1942_v52, %v1276_v55  ;;  %1295 = vpow2.f32 %v543_v46  ;;  %v945_v63 = vmul.f32 -1.442695, %v1033_v53 }
  0x81   :  { %v1280_v42 = vpop.eup %1279  ;;  %v835_v62 = vsel %vm661_vm5, %v739_v36, %v787_v51  ;;  %1297 = vrcp.f32 %v308_v40  ;;  %v599_v0 = vmul.f32 %v1278_v58, %v1394_v17  ;;  %v459_v8 = vsel %vm1403_vm4, %v1033_v53, 0.0  ;;  %v1071_v53 = vld [vmem:[%s2201_s0 + $0xa8] sm:$0xff]  }
  0x82   :  { %v1282_v3 = vpop.eup %1281  ;;  %884 = vst.msk [vmem:[%s2202_s1 + $0xe8] sm:$0xff] %vm854_vm6, %v835_v62  ;;  %v740_v5 = vmul.f32 16.0, %v692_v59  ;;  %v309_v6 = vadd.f32 1.0, %v1280_v42  ;;  %v946_v2 = vmul.f32 -1.442695, %v1034_v56  ;;  %v646_v52 = vmul.f32 16.0, %v598_v57 }
  0x83   :  { %v1284_v9 = vpop.eup %1283  ;;  %v693_v10 = vadd.f32 %v1282_v3, %v1453_v50  ;;  %v789_v14 = vsel %vm1403_vm4, %v644_v31, %v1282_v3  ;;  %1299 = vpow2.f32 %v945_v63  ;;  %v1999_v11 = vmul.f32 16.0, %v599_v0 }
  0x84   :  { %v836_v15 = vsel %vm661_vm5, %v740_v5, %v788_v54  ;;  %1301 = vrcp.f32 %v309_v6  ;;  %v545_v18 = vmul.f32 1.442695, %v459_v8  ;;  %v460_v12 = vsel %vm1403_vm4, %v1034_v56, 0.0 }
  0x85   :  { %v1286_v23 = vpop.eup %1285  ;;  %885 = vst.msk [vmem:[%s2202_s1 + $0xf0] sm:$0xff] %vm854_vm6, %v836_v15  ;;  %v741_v61 = vmul.f32 16.0, %v693_v10  ;;  %1303 = vpow2.f32 %v946_v2  ;;  %v947_v24 = vmul.f32 -1.442695, %v1037_v60  ;;  %v600_v30 = vmul.f32 %v1284_v9, %v1394_v17  ;;  %v1072_v10 = vld [vmem:[%s2201_s0 + $0xb0] sm:$0xff]  }
  0x86   :  { %v1288_v26 = vpop.eup %1287  ;;  %v694_v28 = vadd.f32 %v1286_v23, %v1401_v20  ;;  %v790_v29 = vsel %vm1403_vm4, %v1969_v45, %v1286_v23  ;;  %1305 = vpow2.f32 %v545_v18  ;;  %v547_v34 = vmul.f32 1.442695, %v460_v12 }
  0x87   :  { %v1290_v1 = vpop.eup %1289  ;;  %v837_v13 = vsel %vm661_vm5, %v741_v61, %v789_v14  ;;  %v310_v33 = vadd.f32 1.0, %v1288_v26  ;;  %1307 = vpow2.f32 %v947_v24  ;;  %v461_v16 = vsel %vm1403_vm4, %v1037_v60, 0.0 }
  0x88   :  { %v1292_v35 = vpop.eup %1291  ;;  %886 = vst.msk [vmem:[%s2202_s1 + $0xf8] sm:$0xff] %vm854_vm6, %v837_v13  ;;  %v742_v39 = vmul.f32 16.0, %v694_v28  ;;  %v695_v7 = vadd.f32 %v1290_v1, %v1409_v22  ;;  %v791_v43 = vsel %vm1403_vm4, %v646_v52, %v1290_v1  ;;  %v549_v44 = vmul.f32 1.442695, %v461_v16 }
  0x89   :  { %v1294_v31 = vpop.eup %1293  ;;  %1309 = vrcp.f32 %v310_v33  ;;  %v601_v38 = vmul.f32 %v1292_v35, %v1394_v17  ;;  %v1038_v25 = vunpack.c.h.bf16 %v1974_v48  ;;  %v648_v55 = vmul.f32 16.0, %v600_v30 }
  0x8a   :  { %v1296_v45 = vpop.eup %1295  ;;  %v838_v46 = vsel %vm661_vm5, %v742_v39, %v790_v29  ;;  %v743_v49 = vmul.f32 16.0, %v695_v7  ;;  %v311_v51 = vadd.f32 1.0, %v1294_v31  ;;  %1311 = vpow2.f32 %v547_v34 }
  0x8b   :  { %v1298_v56 = vpop.eup %1297  ;;  %887 = vst.msk [vmem:[%s2202_s1 + $0x100] sm:$0xff] %vm854_vm6, %v838_v46  ;;  %1313 = vpow2.f32 %v549_v44  ;;  %v948_v48 = vmul.f32 -1.442695, %v1038_v25  ;;  %v2037_v40 = vmul.f32 16.0, %v601_v38  ;;  %v462_v54 = vsel %vm1403_vm4, %v1038_v25, 0.0 }
  0x8c   :  { %v839_v36 = vsel %vm661_vm5, %v743_v49, %v791_v43  ;;  %v696_v57 = vadd.f32 %v1298_v56, %v1417_v27  ;;  %1315 = vrcp.f32 %v311_v51  ;;  %v792_v59 = vsel %vm1403_vm4, %v1999_v11, %v1298_v56 }
  0x8d   :  { %v1300_v58 = vpop.eup %1299  ;;  %888 = vst.msk [vmem:[%s2202_s1 + $0x108] sm:$0xff] %vm854_vm6, %v839_v36  ;;  %1317 = vpow2.f32 %v948_v48  ;;  %v1041_v60 = vunpack.c.l.bf16 %v1071_v53  ;;  %v551_v63 = vmul.f32 1.442695, %v462_v54  ;;  %v1042_v3 = vunpack.c.h.bf16 %v1071_v53 }
  0x8e   :  { %v1302_v42 = vpop.eup %1301  ;;  %v744_v62 = vmul.f32 16.0, %v696_v57  ;;  %v312_v0 = vadd.f32 1.0, %v1300_v58  ;;  %v602_v2 = vmul.f32 %v1296_v45, %v1394_v17  ;;  %v1045_v28 = vunpack.c.l.bf16 %v1072_v10 }
  0x8f   :  { %v1304_v5 = vpop.eup %1303  ;;  %v697_v6 = vadd.f32 %v1302_v42, %v1423_v32  ;;  %v793_v8 = vsel %vm1403_vm4, %v648_v55, %v1302_v42  ;;  %v949_v9 = vmul.f32 -1.442695, %v1041_v60  ;;  %v463_v11 = vsel %vm1403_vm4, %v1041_v60, 0.0 }
  0x90   :  { %v1306_v14 = vpop.eup %1305  ;;  %v840_v52 = vsel %vm661_vm5, %v744_v62, %v792_v59  ;;  %1319 = vrcp.f32 %v312_v0  ;;  %v313_v15 = vadd.f32 1.0, %v1304_v5  ;;  %v950_v12 = vmul.f32 -1.442695, %v1042_v3 }
  0x91   :  { %v1308_v18 = vpop.eup %1307  ;;  %889 = vst.msk [vmem:[%s2202_s1 + $0x110] sm:$0xff] %vm854_vm6, %v840_v52  ;;  %v745_v23 = vmul.f32 16.0, %v697_v6  ;;  %v603_v61 = vmul.f32 %v1306_v14, %v1394_v17  ;;  %1321 = vpow2.f32 %v551_v63  ;;  %v464_v26 = vsel %vm1403_vm4, %v1042_v3, 0.0 }
  0x92   :  { %1323 = vrcp.f32 %v313_v15  ;;  %v314_v24 = vadd.f32 1.0, %v1308_v18  ;;  %v650_v1 = vmul.f32 16.0, %v602_v2  ;;  %v553_v13 = vmul.f32 1.442695, %v463_v11 }
  0x93   :  { %v1310_v29 = vpop.eup %1309  ;;  %v841_v30 = vsel %vm661_vm5, %v745_v23, %v793_v8  ;;  %1325 = vpow2.f32 %v949_v9  ;;  %v555_v35 = vmul.f32 1.442695, %v464_v26  ;;  %v951_v39 = vmul.f32 -1.442695, %v1045_v28 }
  0x94   :  { %v1312_v33 = vpop.eup %1311  ;;  %890 = vst.msk [vmem:[%s2202_s1 + $0x118] sm:$0xff] %vm854_vm6, %v841_v30  ;;  %v698_v34 = vadd.f32 %v1310_v29, %v1432_v37  ;;  %1327 = vrcp.f32 %v314_v24  ;;  %v794_v43 = vsel %vm1403_vm4, %v2037_v40, %v1310_v29  ;;  %v465_v31 = vsel %vm1403_vm4, %v1045_v28, 0.0 }
  0x95   :  { %v1314_v7 = vpop.eup %1313  ;;  %v604_v16 = vmul.f32 %v1312_v33, %v1394_v17  ;;  %v1046_v38 = vunpack.c.h.bf16 %v1072_v10  ;;  %v651_v45 = vmul.f32 16.0, %v603_v61  ;;  %1329 = vpow2.f32 %v950_v12  ;;  %v1073_v17 = vld [vmem:[%s2201_s0 + $0xb8] sm:$0xff]  }
  0x96   :  { %v1316_v44 = vpop.eup %1315  ;;  %v746_v25 = vmul.f32 16.0, %v698_v34  ;;  %v605_v46 = vmul.f32 %v1314_v7, %v1396_v19  ;;  %1331 = vpow2.f32 %v553_v13  ;;  %v557_v56 = vmul.f32 1.442695, %v465_v31 }
  0x97   :  { %v1318_v49 = vpop.eup %1317  ;;  %v699_v51 = vadd.f32 %v1316_v44, %v1438_v41  ;;  %v795_v53 = vsel %vm1403_vm4, %v650_v1, %v1316_v44  ;;  %v652_v48 = vmul.f32 16.0, %v604_v16  ;;  %1333 = vpow2.f32 %v951_v39 }
  0x98   :  { %v842_v55 = vsel %vm661_vm5, %v746_v25, %v794_v43  ;;  %v315_v36 = vadd.f32 1.0, %v1318_v49  ;;  %1335 = vpow2.f32 %v555_v35  ;;  %v952_v40 = vmul.f32 -1.442695, %v1046_v38 }
  0x99   :  { %891 = vst.msk [vmem:[%s2202_s1 + $0x120] sm:$0xff] %vm854_vm6, %v842_v55  ;;  %v747_v57 = vmul.f32 16.0, %v699_v51  ;;  %v466_v58 = vsel %vm1403_vm4, %v1046_v38, 0.0  ;;  %v653_v54 = vmul.f32 16.0, %v605_v46  ;;  %v1049_v60 = vunpack.c.l.bf16 %v1073_v17 }
  0x9a   :  { %v1320_v59 = vpop.eup %1319  ;;  %1337 = vrcp.f32 %v315_v36  ;;  %v1050_v42 = vunpack.c.h.bf16 %v1073_v17  ;;  %v559_v3 = vmul.f32 1.442695, %v466_v58 }
  0x9b   :  { %v1322_v62 = vpop.eup %1321  ;;  %v843_v0 = vsel %vm661_vm5, %v747_v57, %v795_v53  ;;  %v700_v63 = vadd.f32 %v1320_v59, %v1447_v47  ;;  %1339 = vpow2.f32 %v952_v40  ;;  %v796_v6 = vsel %vm1403_vm4, %v651_v45, %v1320_v59 }
  0x9c   :  { %v1324_v5 = vpop.eup %1323  ;;  %892 = vst.msk [vmem:[%s2202_s1 + $0x128] sm:$0xff] %vm854_vm6, %v843_v0  ;;  %1341 = vpow2.f32 %v557_v56  ;;  %v953_v8 = vmul.f32 -1.442695, %v1049_v60  ;;  %v467_v2 = vsel %vm1403_vm4, %v1049_v60, 0.0  ;;  %v606_v52 = vmul.f32 %v1322_v62, %v1396_v19 }
  0x9d   :  { %v1326_v9 = vpop.eup %1325  ;;  %v748_v10 = vmul.f32 16.0, %v700_v63  ;;  %v701_v14 = vadd.f32 %v1324_v5, %v1453_v50  ;;  %v561_v15 = vmul.f32 1.442695, %v467_v2  ;;  %v797_v18 = vsel %vm1403_vm4, %v652_v48, %v1324_v5 }
  0x9e   :  { %v1328_v11 = vpop.eup %1327  ;;  %v316_v23 = vadd.f32 1.0, %v1326_v9  ;;  %1343 = vpow2.f32 %v953_v8  ;;  %v954_v61 = vmul.f32 -1.442695, %v1050_v42  ;;  %v468_v30 = vsel %vm1403_vm4, %v1050_v42, 0.0 }
  0x9f   :  { %v844_v12 = vsel %vm661_vm5, %v748_v10, %v796_v6  ;;  %v749_v24 = vmul.f32 16.0, %v701_v14  ;;  %v702_v26 = vadd.f32 %v1328_v11, %v1401_v20  ;;  %1345 = vpow2.f32 %v559_v3  ;;  %v1330_v28 = vpop.eup %1329 }
  0xa0   :  { %893 = vst.msk [vmem:[%s2202_s1 + $0x130] sm:$0xff] %vm854_vm6, %v844_v12  ;;  %v798_v29 = vsel %vm1403_vm4, %v653_v54, %v1328_v11  ;;  %1347 = vrcp.f32 %v316_v23  ;;  %v1332_v1 = vpop.eup %1331  ;;  %v317_v20 = vadd.f32 1.0, %v1330_v28  ;;  %v654_v35 = vmul.f32 16.0, %v606_v52 }
  0xa1   :  { %v845_v13 = vsel %vm661_vm5, %v749_v24, %v797_v18  ;;  %v750_v33 = vmul.f32 16.0, %v702_v26  ;;  %1349 = vpow2.f32 %v561_v15  ;;  %v1334_v34 = vpop.eup %1333  ;;  %v563_v39 = vmul.f32 1.442695, %v468_v30 }
  0xa2   :  { %894 = vst.msk [vmem:[%s2202_s1 + $0x138] sm:$0xff] %vm854_vm6, %v845_v13  ;;  %1351 = vpow2.f32 %v954_v61  ;;  %v1336_v7 = vpop.eup %1335  ;;  %v318_v16 = vadd.f32 1.0, %v1334_v34  ;;  %v607_v38 = vmul.f32 %v1332_v1, %v1396_v19 }
  0xa3   :  { %v846_v43 = vsel %vm661_vm5, %v750_v33, %v798_v29  ;;  %1353 = vrcp.f32 %v317_v20  ;;  %v608_v53 = vmul.f32 %v1336_v7, %v1396_v19 }
  0xa4   :  { %v1338_v31 = vpop.eup %1337  ;;  %895 = vst.msk [vmem:[%s2202_s1 + $0x140] sm:$0xff] %vm854_vm6, %v846_v43  ;;  %1355 = vrcp.f32 %v318_v16  ;;  %v655_v17 = vmul.f32 16.0, %v607_v38 }
  0xa5   :  { %v1340_v44 = vpop.eup %1339  ;;  %v703_v25 = vadd.f32 %v1338_v31, %v1409_v22  ;;  %v799_v46 = vsel %vm1403_vm4, %v654_v35, %v1338_v31  ;;  %1357 = vpow2.f32 %v563_v39  ;;  %v656_v59 = vmul.f32 16.0, %v608_v53 }
  0xa6   :  { %v1342_v45 = vpop.eup %1341  ;;  %v319_v49 = vadd.f32 1.0, %v1340_v44 }
  0xa7   :  { %v751_v51 = vmul.f32 16.0, %v703_v25  ;;  %v609_v36 = vmul.f32 %v1342_v45, %v1396_v19 }
  0xa8   :  { %v1344_v56 = vpop.eup %1343  ;;  %1359 = vrcp.f32 %v319_v49 }
  0xa9   :  { %v1346_v55 = vpop.eup %1345  ;;  %v847_v48 = vsel %vm661_vm5, %v751_v51, %v799_v46  ;;  %v320_v22 = vadd.f32 1.0, %v1344_v56  ;;  %v657_v63 = vmul.f32 16.0, %v609_v36 }
  0xaa   :  { %v1348_v57 = vpop.eup %1347  ;;  %896 = vst.msk [vmem:[%s2202_s1 + $0x148] sm:$0xff] %vm854_vm6, %v847_v48  ;;  %v610_v42 = vmul.f32 %v1346_v55, %v1396_v19 }
  0xab   :  { %v1350_v40 = vpop.eup %1349  ;;  %v704_v58 = vadd.f32 %v1348_v57, %v1417_v27  ;;  %1361 = vrcp.f32 %v320_v22  ;;  %v800_v60 = vsel %vm1403_vm4, %v655_v17, %v1348_v57 }
  0xac   :  { %v1352_v54 = vpop.eup %1351  ;;  %v611_v2 = vmul.f32 %v1350_v40, %v1396_v19 }
  0xad   :  { %v1354_v62 = vpop.eup %1353  ;;  %v752_v0 = vmul.f32 16.0, %v704_v58  ;;  %v321_v3 = vadd.f32 1.0, %v1352_v54 }
  0xae   :  { %v705_v5 = vadd.f32 %v1354_v62, %v1423_v32  ;;  %v1356_v6 = vpop.eup %1355  ;;  %v801_v27 = vsel %vm1403_vm4, %v656_v59, %v1354_v62  ;;  %v658_v32 = vmul.f32 16.0, %v610_v42  ;;  %v659_v61 = vmul.f32 16.0, %v611_v2 }
  0xaf   :  { %v848_v8 = vsel %vm661_vm5, %v752_v0, %v800_v60  ;;  %1363 = vrcp.f32 %v321_v3  ;;  %v1358_v9 = vpop.eup %1357  ;;  %v706_v14 = vadd.f32 %v1356_v6, %v1432_v37  ;;  %v802_v52 = vsel %vm1403_vm4, %v657_v63, %v1356_v6 }
  0xb0   :  { %897 = vst.msk [vmem:[%s2202_s1 + $0x150] sm:$0xff] %vm854_vm6, %v848_v8  ;;  %v753_v10 = vmul.f32 16.0, %v705_v5  ;;  %v612_v12 = vmul.f32 %v1358_v9, %v1396_v19 }
  0xb1   :  { %v754_v18 = vmul.f32 16.0, %v706_v14 }
  0xb2   :  { %v1360_v15 = vpop.eup %1359  ;;  %v849_v11 = vsel %vm661_vm5, %v753_v10, %v801_v27  ;;  %v660_v30 = vmul.f32 16.0, %v612_v12 }
  0xb3   :  { %898 = vst.msk [vmem:[%s2202_s1 + $0x158] sm:$0xff] %vm854_vm6, %v849_v11  ;;  %v707_v23 = vadd.f32 %v1360_v15, %v1438_v41  ;;  %v850_v37 = vsel %vm661_vm5, %v754_v18, %v802_v52  ;;  %v803_v24 = vsel %vm1403_vm4, %v658_v32, %v1360_v15 }
  0xb4   :  { %899 = vst.msk [vmem:[%s2202_s1 + $0x160] sm:$0xff] %vm854_vm6, %v850_v37 }
  0xb5   :  { %v1362_v26 = vpop.eup %1361  ;;  %v755_v28 = vmul.f32 16.0, %v707_v23 }
  0xb6   :  { %v708_v29 = vadd.f32 %v1362_v26, %v1447_v47  ;;  %v804_v19 = vsel %vm1403_vm4, %v659_v61, %v1362_v26 }
  0xb7   :  { %v851_v41 = vsel %vm661_vm5, %v755_v28, %v803_v24 }
  0xb8   :  { %900 = vst.msk [vmem:[%s2202_s1 + $0x168] sm:$0xff] %vm854_vm6, %v851_v41  ;;  %v756_v1 = vmul.f32 16.0, %v708_v29 }
  0xb9   :  { %v1364_v13 = vpop.eup %1363 }
  0xba   :  { %v852_v33 = vsel %vm661_vm5, %v756_v1, %v804_v19  ;;  %v709_v20 = vadd.f32 %v1364_v13, %v1453_v50  ;;  %v805_v47 = vsel %vm1403_vm4, %v660_v30, %v1364_v13 }
  0xbb   :  { %901 = vst.msk [vmem:[%s2202_s1 + $0x170] sm:$0xff] %vm854_vm6, %v852_v33 }
  0xbc   :  { %v757_v34 = vmul.f32 16.0, %v709_v20 }
  0xbe   :  { %v853_v35 = vsel %vm661_vm5, %v757_v34, %v805_v47 }
  0xbf   :  { %902 = vst.msk [vmem:[%s2202_s1 + $0x178] sm:$0xff] %vm854_vm6, %v853_v35 }

// kernel: a_call__.13
= control target key start
LH: loop header
LB: loop body
LE: loop exit
PB: predicated region body
PF: predicated region fallthrough
CT: control target
= control target key end

     0   :  { %v56_v0 = vlaneseq  ;;  %v638_v16 = vmov 1.90625   ;;  %v639_v48 = vmov 1.40625   ;;  %vm438_vm6 = vcmask 52224   ;;  %s1105_s0 = inlined_call_operand.vmem [shape: bf16[6,4,4,7], index: 0, kind: input, shape index: {}]   ;;  %s1106_s1 = inlined_call_operand.vmem [shape: f32[6,4,4,7], index: 1, kind: output, shape index: {}]  }
   0x1   :  { %v8_v1 = vld [vmem:[%s1105_s0] sm:$0x3]  ;;  %v9_v2 = vld [vmem:[%s1105_s0 + $0x2] sm:$0x3]  ;;  %v10_v3 = vld [vmem:[%s1105_s0 + $0x4] sm:$0x3] }
   0x2   :  { %v32_v4 = vunpack.c.l.bf16 %v8_v1  ;;  %v660_v5 = vand.u32 127, %v56_v0  ;;  %v59_v6 = vshrl.u32 %v56_v0, 7  ;;  %v33_v7 = vunpack.c.l.bf16 %v9_v2  ;;  %v11_v8 = vld [vmem:[%s1105_s0 + $0x6] sm:$0x3]  ;;  %v12_v9 = vld [vmem:[%s1105_s0 + $0x8] sm:$0x3] }
   0x3   :  { %v34_v10 = vunpack.c.l.bf16 %v10_v3  ;;  %v35_v13 = vunpack.c.l.bf16 %v11_v8  ;;  %v36_v14 = vunpack.c.l.bf16 %v12_v9  ;;  %v13_v20 = vld [vmem:[%s1105_s0 + $0xa] sm:$0x3]  ;;  %v14_v25 = vld [vmem:[%s1105_s0 + $0xc] sm:$0x3]  ;;  %v15_v26 = vld [vmem:[%s1105_s0 + $0xe] sm:$0x3] }
   0x4   :  { %v60_v11 = vcvt.s32.f32 %v59_v6  ;;  %vm65_vm0 = vcmp.eq.s32.totalorder %v660_v5, 0  ;;  %vm70_vm1 = vcmp.eq.s32.totalorder %v660_v5, 2  ;;  %v467_v12 = vmul.f32 -1.442695, %v32_v4  ;;  %v16_v36 = vld [vmem:[%s1105_s0 + $0x10] sm:$0x3] }
   0x5   :  { %vm218_vm2 = vcmp.ge.s32.totalorder %v660_v5, 2  ;;  %vm219_vm3 = vcmp.lt.s32.totalorder %v660_v5, 4  ;;  %v678_v17 = vsel %vm70_vm1, 0.9375, %v638_v16  ;;  %v468_v19 = vmul.f32 -1.442695, %v33_v7 }
   0x6   :  { %v674_v15 = vsel %vm65_vm0, %v60_v11, 0.0  ;;  %494 = vpow2.f32 %v467_v12  ;;  %vm680_vm4 = vmand %vm218_vm2, %vm219_vm3  ;;  %v691_v22 = vsel %vm65_vm0, %v60_v11, 1.0  ;;  %v469_v24 = vmul.f32 -1.442695, %v34_v10  ;;  %v17_v46 = vld [vmem:[%s1105_s0 + $0x12] sm:$0x3] }
   0x7   :  { %v221_v21 = vsel %vm680_vm4, %v32_v4, 0.0  ;;  %v222_v23 = vsel %vm680_vm4, %v33_v7, 0.0  ;;  %496 = vpow2.f32 %v468_v19  ;;  %v223_v29 = vsel %vm680_vm4, %v34_v10, 0.0  ;;  %v18_v47 = vld [vmem:[%s1105_s0 + $0x14] sm:$0x3] }
   0x8   :  { %v245_v27 = vmul.f32 1.442695, %v221_v21  ;;  %v247_v28 = vmul.f32 1.442695, %v222_v23  ;;  %v705_v30 = vsel %vm65_vm0, %v60_v11, 2.0  ;;  %498 = vpow2.f32 %v469_v24 }
   0x9   :  { %v249_v31 = vmul.f32 1.442695, %v223_v29  ;;  %v470_v32 = vmul.f32 -1.442695, %v35_v13  ;;  %v709_v33 = vsel %vm65_vm0, %v60_v11, 3.0  ;;  %v224_v34 = vsel %vm680_vm4, %v35_v13, 0.0 }
   0xa   :  { %500 = vpow2.f32 %v245_v27  ;;  %v471_v35 = vmul.f32 -1.442695, %v36_v14  ;;  %v251_v37 = vmul.f32 1.442695, %v224_v34  ;;  %v225_v38 = vsel %vm680_vm4, %v36_v14, 0.0 }
   0xb   :  { %502 = vpow2.f32 %v247_v28  ;;  %v37_v39 = vunpack.c.l.bf16 %v13_v20  ;;  %v253_v40 = vmul.f32 1.442695, %v225_v38  ;;  %v38_v41 = vunpack.c.l.bf16 %v14_v25  ;;  %v19_v52 = vld [vmem:[%s1105_s0 + $0x16] sm:$0x3]  ;;  %v20_v62 = vld [vmem:[%s1105_s0 + $0x18] sm:$0x3] }
   0xc   :  { %504 = vpow2.f32 %v249_v31  ;;  %v39_v42 = vunpack.c.l.bf16 %v15_v26  ;;  %v40_v45 = vunpack.c.l.bf16 %v16_v36  ;;  %v728_v49 = vsel %vm70_vm1, 1.9375, %v639_v48 }
   0xd   :  { %506 = vpow2.f32 %v470_v32  ;;  %v472_v43 = vmul.f32 -1.442695, %v37_v39  ;;  %v226_v44 = vsel %vm680_vm4, %v37_v39, 0.0  ;;  %v227_v51 = vsel %vm680_vm4, %v38_v41, 0.0  ;;  %v21_v39 = vld [vmem:[%s1105_s0 + $0x1a] sm:$0x3] }
   0xe   :  { %508 = vpow2.f32 %v251_v37  ;;  %v255_v50 = vmul.f32 1.442695, %v226_v44  ;;  %v473_v53 = vmul.f32 -1.442695, %v38_v41  ;;  %v257_v54 = vmul.f32 1.442695, %v227_v51 }
   0xf   :  { %510 = vpow2.f32 %v471_v35  ;;  %v228_v55 = vsel %vm680_vm4, %v39_v42, 0.0  ;;  %v474_v57 = vmul.f32 -1.442695, %v39_v42  ;;  %v475_v60 = vmul.f32 -1.442695, %v40_v45 }
  0x10   :  { %v495_v56 = vpop.eup %494  ;;  %512 = vpow2.f32 %v253_v40  ;;  %v259_v58 = vmul.f32 1.442695, %v228_v55  ;;  %v229_v61 = vsel %vm680_vm4, %v40_v45, 0.0  ;;  %v640_v0 = vmov 3.71875   ;;  %v775_v44 = vld [vmem:[%s1105_s0 + $0x1c] sm:$0x3] }
  0x11   :  { %v146_v59 = vadd.f32 1.0, %v495_v56  ;;  %514 = vpow2.f32 %v472_v43  ;;  %v497_v63 = vpop.eup %496  ;;  %v744_v1 = vsel %vm70_vm1, 1.84375, %v640_v0  ;;  %v41_v2 = vunpack.c.l.bf16 %v17_v46 }
  0x12   :  { %516 = vpow2.f32 %v255_v50  ;;  %v42_v3 = vunpack.c.l.bf16 %v18_v47  ;;  %v499_v4 = vpop.eup %498  ;;  %v147_v6 = vadd.f32 1.0, %v497_v63  ;;  %v261_v7 = vmul.f32 1.442695, %v229_v61  ;;  %v785_v50 = vld [vmem:[%s1105_s0 + $0x1e] sm:$0x3] }
  0x13   :  { %518 = vrcp.f32 %v146_v59  ;;  %v43_v8 = vunpack.c.l.bf16 %v19_v52  ;;  %v148_v10 = vadd.f32 1.0, %v499_v4  ;;  %v230_v11 = vsel %vm680_vm4, %v41_v2, 0.0 }
  0x14   :  { %v501_v9 = vpop.eup %500  ;;  %520 = vpow2.f32 %v473_v53  ;;  %v44_v12 = vunpack.c.l.bf16 %v20_v62  ;;  %v476_v16 = vmul.f32 -1.442695, %v41_v2  ;;  %v263_v19 = vmul.f32 1.442695, %v230_v11 }
  0x15   :  { %v503_v13 = vpop.eup %502  ;;  %v293_v14 = vmul.f32 %v501_v9, %v678_v17  ;;  %522 = vrcp.f32 %v147_v6  ;;  %v750_v23 = vmul.f32 -1.442695, %v42_v3  ;;  %v231_v24 = vsel %vm680_vm4, %v42_v3, 0.0 }
  0x16   :  { %v505_v20 = vpop.eup %504  ;;  %v294_v21 = vmul.f32 %v503_v13, %v678_v17  ;;  %524 = vrcp.f32 %v148_v10  ;;  %vm341_vm5 = vcmp.lt.s32.totalorder %v660_v5, 2  ;;  %v758_v28 = vmul.f32 -1.442695, %v43_v8 }
  0x17   :  { %v507_v25 = vpop.eup %506  ;;  %v754_v26 = vmul.f32 32.0, %v293_v14  ;;  %v295_v27 = vmul.f32 %v505_v20, %v678_v17  ;;  %526 = vpow2.f32 %v257_v54  ;;  %v265_v32 = vmul.f32 1.442695, %v231_v24 }
  0x18   :  { %v509_v29 = vpop.eup %508  ;;  %v149_v31 = vadd.f32 1.0, %v507_v25  ;;  %528 = vpow2.f32 %v474_v57  ;;  %v232_v34 = vsel %vm680_vm4, %v43_v8, 0.0  ;;  %v318_v36 = vmul.f32 32.0, %v294_v21 }
  0x19   :  { %v511_v35 = vpop.eup %510  ;;  %v762_v37 = vmul.f32 32.0, %v295_v27  ;;  %v296_v38 = vmul.f32 %v509_v29, %v678_v17  ;;  %530 = vpow2.f32 %v259_v58  ;;  %v768_v42 = vmul.f32 1.442695, %v232_v34 }
  0x1a   :  { %v513_v40 = vpop.eup %512  ;;  %532 = vrcp.f32 %v149_v31  ;;  %v150_v41 = vadd.f32 1.0, %v511_v35  ;;  %v233_v43 = vsel %vm680_vm4, %v44_v12, 0.0  ;;  %v780_v48 = vmul.f32 -1.442695, %v44_v12 }
  0x1b   :  { %v515_v45 = vpop.eup %514  ;;  %v777_v46 = vmul.f32 32.0, %v296_v38  ;;  %v297_v47 = vmul.f32 %v513_v40, %v728_v49  ;;  %534 = vpow2.f32 %v475_v60  ;;  %v787_v53 = vmul.f32 1.442695, %v233_v43 }
  0x1c   :  { %v517_v51 = vpop.eup %516  ;;  %536 = vrcp.f32 %v150_v41  ;;  %v151_v52 = vadd.f32 1.0, %v515_v45  ;;  %v45_v54 = vunpack.c.l.bf16 %v21_v39  ;;  %v46_v58 = vunpack.c.l.bf16 %v775_v44 }
  0x1d   :  { %v519_v55 = vpop.eup %518  ;;  %v789_v56 = vmul.f32 32.0, %v297_v47  ;;  %v298_v57 = vmul.f32 %v517_v51, %v728_v49  ;;  %538 = vpow2.f32 %v261_v7  ;;  %v47_v62 = vunpack.c.l.bf16 %v785_v50 }
  0x1e   :  { %v521_v59 = vpop.eup %520  ;;  %v342_v60 = vadd.f32 %v519_v55, %v674_v15  ;;  %v390_v61 = vsel %vm680_vm4, %v754_v26, %v519_v55  ;;  %540 = vrcp.f32 %v151_v52  ;;  %v800_v3 = vmul.f32 -1.442695, %v45_v54 }
  0x1f   :  { %v523_v63 = vpop.eup %522  ;;  %v798_v0 = vmul.f32 32.0, %v298_v57  ;;  %v152_v2 = vadd.f32 1.0, %v521_v59  ;;  %542 = vpow2.f32 %v476_v16  ;;  %v234_v8 = vsel %vm680_vm4, %v45_v54, 0.0 }
  0x20   :  { %v525_v4 = vpop.eup %524  ;;  %v366_v6 = vmul.f32 32.0, %v342_v60  ;;  %v343_v7 = vadd.f32 %v523_v63, %v691_v22  ;;  %544 = vpow2.f32 %v263_v19  ;;  %v391_v10 = vsel %vm680_vm4, %v318_v36, %v523_v63 }
  0x21   :  { %v527_v9 = vpop.eup %526  ;;  %v344_v11 = vadd.f32 %v525_v4, %v705_v30  ;;  %v392_v12 = vsel %vm680_vm4, %v762_v37, %v525_v4  ;;  %546 = vrcp.f32 %v152_v2  ;;  %v271_v25 = vmul.f32 1.442695, %v234_v8 }
  0x22   :  { %v529_v13 = vpop.eup %528  ;;  %v414_v14 = vsel %vm341_vm5, %v366_v6, %v390_v61  ;;  %v367_v16 = vmul.f32 32.0, %v343_v7  ;;  %v299_v19 = vmul.f32 %v527_v9, %v728_v49  ;;  %548 = vpow2.f32 %v750_v23  ;;  %v26_v9 = vld [vmem:[%s1105_s0 + $0x24] sm:$0x3] }
  0x23   :  { %v531_v20 = vpop.eup %530  ;;  %439 = vst.msk [vmem:[%s1106_s1] sm:$0xf] %vm438_vm6, %v414_v14  ;;  %v368_v21 = vmul.f32 32.0, %v344_v11  ;;  %v153_v24 = vadd.f32 1.0, %v529_v13  ;;  %550 = vpow2.f32 %v265_v32  ;;  %v481_v31 = vmul.f32 -1.442695, %v46_v58 }
  0x24   :  { %v533_v26 = vpop.eup %532  ;;  %v415_v27 = vsel %vm341_vm5, %v367_v16, %v391_v10  ;;  %v300_v29 = vmul.f32 %v531_v20, %v728_v49  ;;  %552 = vpow2.f32 %v758_v28  ;;  %v323_v35 = vmul.f32 32.0, %v299_v19 }
  0x25   :  { %v535_v23 = vpop.eup %534  ;;  %440 = vst.msk [vmem:[%s1106_s1 + $0x4] sm:$0xf] %vm438_vm6, %v415_v27  ;;  %v416_v34 = vsel %vm341_vm5, %v368_v21, %v392_v12  ;;  %v345_v32 = vadd.f32 %v533_v26, %v709_v33  ;;  %554 = vrcp.f32 %v153_v24  ;;  %v393_v28 = vsel %vm680_vm4, %v777_v46, %v533_v26 }
  0x26   :  { %v537_v36 = vpop.eup %536  ;;  %441 = vst.msk [vmem:[%s1106_s1 + $0x8] sm:$0xf] %vm438_vm6, %v416_v34  ;;  %v154_v37 = vadd.f32 1.0, %v535_v23  ;;  %556 = vpow2.f32 %v768_v42  ;;  %v235_v38 = vsel %vm680_vm4, %v46_v58, 0.0  ;;  %v841_v43 = vmul.f32 32.0, %v300_v29 }
  0x27   :  { %v539_v39 = vpop.eup %538  ;;  %v369_v40 = vmul.f32 32.0, %v345_v32  ;;  %v346_v41 = vadd.f32 %v537_v36, %v674_v15  ;;  %558 = vpow2.f32 %v780_v48  ;;  %v394_v45 = vsel %vm680_vm4, %v789_v56, %v537_v36 }
  0x28   :  { %v541_v44 = vpop.eup %540  ;;  %560 = vrcp.f32 %v154_v37  ;;  %v301_v46 = vmul.f32 %v539_v39, %v744_v1  ;;  %v273_v42 = vmul.f32 1.442695, %v235_v38  ;;  %v482_v55 = vmul.f32 -1.442695, %v47_v62 }
  0x29   :  { %v543_v47 = vpop.eup %542  ;;  %v417_v51 = vsel %vm341_vm5, %v369_v40, %v393_v28  ;;  %v370_v52 = vmul.f32 32.0, %v346_v41  ;;  %v347_v54 = vadd.f32 %v541_v44, %v691_v22  ;;  %v395_v56 = vsel %vm680_vm4, %v798_v0, %v541_v44  ;;  %v24_v0 = vld [vmem:[%s1105_s0 + $0x20] sm:$0x3] }
  0x2a   :  { %v545_v48 = vpop.eup %544  ;;  %442 = vst.msk [vmem:[%s1106_s1 + $0xc] sm:$0xf] %vm438_vm6, %v417_v51  ;;  %v155_v57 = vadd.f32 1.0, %v543_v47  ;;  %562 = vpow2.f32 %v787_v53  ;;  %v236_v58 = vsel %vm680_vm4, %v47_v62, 0.0  ;;  %v325_v62 = vmul.f32 32.0, %v301_v46 }
  0x2b   :  { %v547_v59 = vpop.eup %546  ;;  %v418_v60 = vsel %vm341_vm5, %v370_v52, %v394_v45  ;;  %v371_v61 = vmul.f32 32.0, %v347_v54  ;;  %v302_v63 = vmul.f32 %v545_v48, %v744_v1  ;;  %564 = vpow2.f32 %v800_v3  ;;  %v25_v3 = vld [vmem:[%s1105_s0 + $0x22] sm:$0x3]  ;;  %v27_v45 = vld [vmem:[%s1105_s0 + $0x26] sm:$0x3] }
  0x2c   :  { %v549_v2 = vpop.eup %548  ;;  %443 = vst.msk [vmem:[%s1106_s1 + $0x10] sm:$0xf] %vm438_vm6, %v418_v60  ;;  %v348_v50 = vadd.f32 %v547_v59, %v705_v30  ;;  %v396_v53 = vsel %vm680_vm4, %v323_v35, %v547_v59  ;;  %566 = vrcp.f32 %v155_v57  ;;  %v275_v8 = vmul.f32 1.442695, %v236_v58  ;;  %v28_v52 = vld [vmem:[%s1105_s0 + $0x28] sm:$0x3] }
  0x2d   :  { %v551_v4 = vpop.eup %550  ;;  %v419_v6 = vsel %vm341_vm5, %v371_v61, %v395_v56  ;;  %v156_v7 = vadd.f32 1.0, %v549_v2  ;;  %568 = vpow2.f32 %v271_v25  ;;  %v48_v13 = vunpack.c.l.bf16 %v24_v0 }
  0x2e   :  { %v553_v10 = vpop.eup %552  ;;  %444 = vst.msk [vmem:[%s1106_s1 + $0x14] sm:$0xf] %vm438_vm6, %v419_v6  ;;  %v372_v11 = vmul.f32 32.0, %v348_v50  ;;  %v303_v12 = vmul.f32 %v551_v4, %v744_v1  ;;  %570 = vpow2.f32 %v481_v31  ;;  %v892_v16 = vmul.f32 32.0, %v302_v63 }
  0x2f   :  { %v555_v14 = vpop.eup %554  ;;  %572 = vrcp.f32 %v156_v7  ;;  %v157_v19 = vadd.f32 1.0, %v553_v10  ;;  %v49_v20 = vunpack.c.l.bf16 %v25_v3  ;;  %v50_v27 = vunpack.c.l.bf16 %v26_v9 }
  0x30   :  { %v557_v21 = vpop.eup %556  ;;  %v420_v24 = vsel %vm341_vm5, %v372_v11, %v396_v53  ;;  %v349_v25 = vadd.f32 %v555_v14, %v709_v33  ;;  %v397_v26 = vsel %vm680_vm4, %v841_v43, %v555_v14  ;;  %v904_v31 = vmul.f32 32.0, %v303_v12 }
  0x31   :  { %v559_v29 = vpop.eup %558  ;;  %445 = vst.msk [vmem:[%s1106_s1 + $0x18] sm:$0xf] %vm438_vm6, %v420_v24  ;;  %574 = vrcp.f32 %v157_v19  ;;  %v304_v23 = vmul.f32 %v557_v21, %v744_v1  ;;  %v237_v34 = vsel %vm680_vm4, %v48_v13, 0.0  ;;  %v483_v28 = vmul.f32 -1.442695, %v48_v13 }
  0x32   :  { %v561_v32 = vpop.eup %560  ;;  %v373_v35 = vmul.f32 32.0, %v349_v25  ;;  %v158_v36 = vadd.f32 1.0, %v559_v29  ;;  %576 = vpow2.f32 %v273_v42  ;;  %v277_v39 = vmul.f32 1.442695, %v237_v34 }
  0x33   :  { %v350_v37 = vadd.f32 %v561_v32, %v674_v15  ;;  %v398_v38 = vsel %vm680_vm4, %v325_v62, %v561_v32  ;;  %578 = vpow2.f32 %v482_v55  ;;  %v914_v43 = vmul.f32 32.0, %v304_v23 }
  0x34   :  { %v563_v40 = vpop.eup %562  ;;  %v421_v41 = vsel %vm341_vm5, %v373_v35, %v397_v26  ;;  %580 = vrcp.f32 %v158_v36  ;;  %v238_v44 = vsel %vm680_vm4, %v49_v20, 0.0  ;;  %v484_v51 = vmul.f32 -1.442695, %v49_v20  ;;  %v29_v35 = vld [vmem:[%s1105_s0 + $0x2a] sm:$0x3] }
  0x35   :  { %v565_v46 = vpop.eup %564  ;;  %446 = vst.msk [vmem:[%s1106_s1 + $0x1c] sm:$0xf] %vm438_vm6, %v421_v41  ;;  %v374_v42 = vmul.f32 32.0, %v350_v37  ;;  %v305_v47 = vmul.f32 %v563_v40, %v678_v17  ;;  %582 = vpow2.f32 %v275_v8  ;;  %v279_v48 = vmul.f32 1.442695, %v238_v44 }
  0x36   :  { %v567_v54 = vpop.eup %566  ;;  %v159_v55 = vadd.f32 1.0, %v565_v46  ;;  %584 = vpow2.f32 %v483_v28  ;;  %v485_v56 = vmul.f32 -1.442695, %v50_v27  ;;  %v239_v61 = vsel %vm680_vm4, %v50_v27, 0.0  ;;  %v30_v36 = vld [vmem:[%s1105_s0 + $0x2c] sm:$0x3] }
  0x37   :  { %v569_v57 = vpop.eup %568  ;;  %v422_v58 = vsel %vm341_vm5, %v374_v42, %v398_v38  ;;  %v351_v59 = vadd.f32 %v567_v54, %v691_v22  ;;  %v399_v60 = vsel %vm680_vm4, %v892_v16, %v567_v54  ;;  %v329_v0 = vmul.f32 32.0, %v305_v47 }
  0x38   :  { %v571_v63 = vpop.eup %570  ;;  %447 = vst.msk [vmem:[%s1106_s1 + $0x20] sm:$0xf] %vm438_vm6, %v422_v58  ;;  %586 = vrcp.f32 %v159_v55  ;;  %v306_v2 = vmul.f32 %v569_v57, %v678_v17  ;;  %v51_v50 = vunpack.c.l.bf16 %v27_v45  ;;  %v52_v4 = vunpack.c.l.bf16 %v28_v52 }
  0x39   :  { %v573_v53 = vpop.eup %572  ;;  %v375_v62 = vmul.f32 32.0, %v351_v59  ;;  %v160_v3 = vadd.f32 1.0, %v571_v63  ;;  %588 = vpow2.f32 %v277_v39  ;;  %v281_v8 = vmul.f32 1.442695, %v239_v61 }
  0x3a   :  { %v352_v6 = vadd.f32 %v573_v53, %v705_v30  ;;  %v400_v7 = vsel %vm680_vm4, %v904_v31, %v573_v53  ;;  %590 = vpow2.f32 %v484_v51  ;;  %v486_v11 = vmul.f32 -1.442695, %v51_v50 }
  0x3b   :  { %v575_v9 = vpop.eup %574  ;;  %v423_v10 = vsel %vm341_vm5, %v375_v62, %v399_v60  ;;  %592 = vrcp.f32 %v160_v3  ;;  %v240_v12 = vsel %vm680_vm4, %v51_v50, 0.0  ;;  %v487_v25 = vmul.f32 -1.442695, %v52_v4  ;;  %v31_v50 = vld [vmem:[%s1105_s0 + $0x2e] sm:$0x3] }
  0x3c   :  { %v577_v13 = vpop.eup %576  ;;  %448 = vst.msk [vmem:[%s1106_s1 + $0x24] sm:$0xf] %vm438_vm6, %v423_v10  ;;  %v376_v14 = vmul.f32 32.0, %v352_v6  ;;  %v353_v16 = vadd.f32 %v575_v9, %v709_v33  ;;  %v401_v19 = vsel %vm680_vm4, %v914_v43, %v575_v9  ;;  %594 = vpow2.f32 %v279_v48 }
  0x3d   :  { %v579_v20 = vpop.eup %578  ;;  %v307_v21 = vmul.f32 %v577_v13, %v678_v17  ;;  %596 = vpow2.f32 %v485_v56  ;;  %v283_v24 = vmul.f32 1.442695, %v240_v12  ;;  %v330_v32 = vmul.f32 32.0, %v306_v2 }
  0x3e   :  { %v581_v26 = vpop.eup %580  ;;  %v424_v27 = vsel %vm341_vm5, %v376_v14, %v400_v7  ;;  %v377_v29 = vmul.f32 32.0, %v353_v16  ;;  %v161_v31 = vadd.f32 1.0, %v579_v20  ;;  %598 = vpow2.f32 %v281_v8 }
  0x3f   :  { %v583_v23 = vpop.eup %582  ;;  %449 = vst.msk [vmem:[%s1106_s1 + $0x28] sm:$0xf] %vm438_vm6, %v424_v27  ;;  %v354_v34 = vadd.f32 %v581_v26, %v674_v15  ;;  %600 = vpow2.f32 %v486_v11  ;;  %v402_v38 = vsel %vm680_vm4, %v329_v0, %v581_v26  ;;  %v241_v39 = vsel %vm680_vm4, %v52_v4, 0.0 }
  0x40   :  { %v585_v28 = vpop.eup %584  ;;  %v425_v37 = vsel %vm341_vm5, %v377_v29, %v401_v19  ;;  %602 = vrcp.f32 %v161_v31  ;;  %v285_v43 = vmul.f32 1.442695, %v241_v39  ;;  %v331_v45 = vmul.f32 32.0, %v307_v21 }
  0x41   :  { %450 = vst.msk [vmem:[%s1106_s1 + $0x2c] sm:$0xf] %vm438_vm6, %v425_v37  ;;  %v378_v40 = vmul.f32 32.0, %v354_v34  ;;  %v162_v41 = vadd.f32 1.0, %v585_v28  ;;  %604 = vpow2.f32 %v283_v24  ;;  %v53_v46 = vunpack.c.l.bf16 %v29_v35 }
  0x42   :  { %v587_v44 = vpop.eup %586  ;;  %606 = vpow2.f32 %v487_v25  ;;  %v54_v42 = vunpack.c.l.bf16 %v30_v36  ;;  %v308_v54 = vmul.f32 %v583_v23, %v678_v17  ;;  %v55_v12 = vunpack.c.l.bf16 %v31_v50 }
  0x43   :  { %v589_v47 = vpop.eup %588  ;;  %v426_v51 = vsel %vm341_vm5, %v378_v40, %v402_v38  ;;  %v355_v52 = vadd.f32 %v587_v44, %v691_v22  ;;  %608 = vrcp.f32 %v162_v41  ;;  %v403_v48 = vsel %vm680_vm4, %v330_v32, %v587_v44 }
  0x44   :  { %v591_v55 = vpop.eup %590  ;;  %451 = vst.msk [vmem:[%s1106_s1 + $0x30] sm:$0xf] %vm438_vm6, %v426_v51  ;;  %610 = vpow2.f32 %v285_v43  ;;  %v488_v56 = vmul.f32 -1.442695, %v53_v46  ;;  %v242_v57 = vsel %vm680_vm4, %v53_v46, 0.0  ;;  %v309_v2 = vmul.f32 %v589_v47, %v728_v49 }
  0x45   :  { %v593_v58 = vpop.eup %592  ;;  %v379_v59 = vmul.f32 32.0, %v355_v52  ;;  %v163_v60 = vadd.f32 1.0, %v591_v55  ;;  %v287_v61 = vmul.f32 1.442695, %v242_v57  ;;  %v489_v17 = vmul.f32 -1.442695, %v54_v42 }
  0x46   :  { %v595_v63 = vpop.eup %594  ;;  %v356_v0 = vadd.f32 %v593_v58, %v705_v30  ;;  %612 = vpow2.f32 %v488_v56  ;;  %v404_v3 = vsel %vm680_vm4, %v331_v45, %v593_v58  ;;  %v243_v4 = vsel %vm680_vm4, %v54_v42, 0.0 }
  0x47   :  { %v597_v53 = vpop.eup %596  ;;  %v427_v62 = vsel %vm341_vm5, %v379_v59, %v403_v48  ;;  %614 = vrcp.f32 %v163_v60  ;;  %v332_v8 = vmul.f32 32.0, %v308_v54  ;;  %v289_v11 = vmul.f32 1.442695, %v243_v4 }
  0x48   :  { %v599_v6 = vpop.eup %598  ;;  %452 = vst.msk [vmem:[%s1106_s1 + $0x34] sm:$0xf] %vm438_vm6, %v427_v62  ;;  %v380_v7 = vmul.f32 32.0, %v356_v0  ;;  %v164_v9 = vadd.f32 1.0, %v597_v53  ;;  %616 = vpow2.f32 %v287_v61  ;;  %v333_v21 = vmul.f32 32.0, %v309_v2 }
  0x49   :  { %v601_v10 = vpop.eup %600  ;;  %618 = vpow2.f32 %v489_v17  ;;  %v310_v24 = vmul.f32 %v595_v63, %v728_v49  ;;  %v490_v27 = vmul.f32 -1.442695, %v55_v12  ;;  %v244_v29 = vsel %vm680_vm4, %v55_v12, 0.0 }
  0x4a   :  { %v603_v13 = vpop.eup %602  ;;  %v428_v14 = vsel %vm341_vm5, %v380_v7, %v404_v3  ;;  %620 = vrcp.f32 %v164_v9  ;;  %v165_v16 = vadd.f32 1.0, %v601_v10  ;;  %v311_v36 = vmul.f32 %v599_v6, %v728_v49 }
  0x4b   :  { %v605_v19 = vpop.eup %604  ;;  %453 = vst.msk [vmem:[%s1106_s1 + $0x38] sm:$0xf] %vm438_vm6, %v428_v14  ;;  %v357_v20 = vadd.f32 %v603_v13, %v709_v33  ;;  %v405_v26 = vsel %vm680_vm4, %v332_v8, %v603_v13  ;;  %v291_v28 = vmul.f32 1.442695, %v244_v29  ;;  %v334_v39 = vmul.f32 32.0, %v310_v24 }
  0x4c   :  { %v607_v25 = vpop.eup %606  ;;  %622 = vrcp.f32 %v165_v16  ;;  %v312_v43 = vmul.f32 %v605_v19, %v728_v49  ;;  %v335_v51 = vmul.f32 32.0, %v311_v36 }
  0x4d   :  { %v609_v31 = vpop.eup %608  ;;  %v381_v23 = vmul.f32 32.0, %v357_v20  ;;  %v166_v34 = vadd.f32 1.0, %v607_v25  ;;  %624 = vpow2.f32 %v289_v11 }
  0x4e   :  { %v611_v32 = vpop.eup %610  ;;  %v358_v35 = vadd.f32 %v609_v31, %v674_v15  ;;  %626 = vpow2.f32 %v490_v27  ;;  %v406_v38 = vsel %vm680_vm4, %v333_v21, %v609_v31  ;;  %v336_v56 = vmul.f32 32.0, %v312_v43 }
  0x4f   :  { %v429_v37 = vsel %vm341_vm5, %v381_v23, %v405_v26  ;;  %628 = vrcp.f32 %v166_v34  ;;  %v313_v49 = vmul.f32 %v611_v32, %v744_v1 }
  0x50   :  { %v613_v40 = vpop.eup %612  ;;  %454 = vst.msk [vmem:[%s1106_s1 + $0x3c] sm:$0xf] %vm438_vm6, %v429_v37  ;;  %v382_v41 = vmul.f32 32.0, %v358_v35  ;;  %630 = vpow2.f32 %v291_v28 }
  0x51   :  { %v615_v44 = vpop.eup %614  ;;  %v167_v45 = vadd.f32 1.0, %v613_v40  ;;  %v337_v2 = vmul.f32 32.0, %v313_v49 }
  0x52   :  { %v617_v46 = vpop.eup %616  ;;  %v430_v42 = vsel %vm341_vm5, %v382_v41, %v406_v38  ;;  %v359_v47 = vadd.f32 %v615_v44, %v691_v22  ;;  %v407_v54 = vsel %vm680_vm4, %v334_v39, %v615_v44 }
  0x53   :  { %v619_v52 = vpop.eup %618  ;;  %455 = vst.msk [vmem:[%s1106_s1 + $0x40] sm:$0xf] %vm438_vm6, %v430_v42  ;;  %632 = vrcp.f32 %v167_v45  ;;  %v314_v50 = vmul.f32 %v617_v46, %v744_v1 }
  0x54   :  { %v621_v55 = vpop.eup %620  ;;  %v383_v48 = vmul.f32 32.0, %v359_v47  ;;  %v168_v57 = vadd.f32 1.0, %v619_v52 }
  0x55   :  { %v360_v58 = vadd.f32 %v621_v55, %v705_v30  ;;  %v408_v61 = vsel %vm680_vm4, %v335_v51, %v621_v55  ;;  %v338_v12 = vmul.f32 32.0, %v314_v50 }
  0x56   :  { %v623_v59 = vpop.eup %622  ;;  %v431_v60 = vsel %vm341_vm5, %v383_v48, %v407_v54  ;;  %634 = vrcp.f32 %v168_v57 }
  0x57   :  { %v625_v17 = vpop.eup %624  ;;  %456 = vst.msk [vmem:[%s1106_s1 + $0x44] sm:$0xf] %vm438_vm6, %v431_v60  ;;  %v384_v63 = vmul.f32 32.0, %v360_v58  ;;  %v361_v0 = vadd.f32 %v623_v59, %v709_v33  ;;  %v409_v62 = vsel %vm680_vm4, %v336_v56, %v623_v59 }
  0x58   :  { %v627_v53 = vpop.eup %626  ;;  %v315_v9 = vmul.f32 %v625_v17, %v744_v1 }
  0x59   :  { %v629_v3 = vpop.eup %628  ;;  %v432_v4 = vsel %vm341_vm5, %v384_v63, %v408_v61  ;;  %v385_v6 = vmul.f32 32.0, %v361_v0  ;;  %v169_v7 = vadd.f32 1.0, %v627_v53 }
  0x5a   :  { %457 = vst.msk [vmem:[%s1106_s1 + $0x48] sm:$0xf] %vm438_vm6, %v432_v4  ;;  %v362_v8 = vadd.f32 %v629_v3, %v674_v15  ;;  %v410_v11 = vsel %vm680_vm4, %v337_v2, %v629_v3  ;;  %v631_v13 = vpop.eup %630  ;;  %v339_v20 = vmul.f32 32.0, %v315_v9 }
  0x5b   :  { %v433_v10 = vsel %vm341_vm5, %v385_v6, %v409_v62  ;;  %636 = vrcp.f32 %v169_v7  ;;  %v316_v24 = vmul.f32 %v631_v13, %v744_v1 }
  0x5c   :  { %458 = vst.msk [vmem:[%s1106_s1 + $0x4c] sm:$0xf] %vm438_vm6, %v433_v10  ;;  %v386_v14 = vmul.f32 32.0, %v362_v8 }
  0x5d   :  { %v633_v16 = vpop.eup %632  ;;  %v340_v23 = vmul.f32 32.0, %v316_v24 }
  0x5e   :  { %v434_v15 = vsel %vm341_vm5, %v386_v14, %v410_v11  ;;  %v363_v19 = vadd.f32 %v633_v16, %v691_v22  ;;  %v411_v21 = vsel %vm680_vm4, %v338_v12, %v633_v16 }
  0x5f   :  { %459 = vst.msk [vmem:[%s1106_s1 + $0x50] sm:$0xf] %vm438_vm6, %v434_v15 }
  0x60   :  { %v635_v25 = vpop.eup %634  ;;  %v387_v26 = vmul.f32 32.0, %v363_v19 }
  0x61   :  { %v364_v27 = vadd.f32 %v635_v25, %v705_v30  ;;  %v412_v22 = vsel %vm680_vm4, %v339_v20, %v635_v25 }
  0x62   :  { %v435_v29 = vsel %vm341_vm5, %v387_v26, %v411_v21 }
  0x63   :  { %460 = vst.msk [vmem:[%s1106_s1 + $0x54] sm:$0xf] %vm438_vm6, %v435_v29  ;;  %v388_v31 = vmul.f32 32.0, %v364_v27 }
  0x65   :  { %v637_v34 = vpop.eup %636  ;;  %v436_v1 = vsel %vm341_vm5, %v388_v31, %v412_v22 }
  0x66   :  { %461 = vst.msk [vmem:[%s1106_s1 + $0x58] sm:$0xf] %vm438_vm6, %v436_v1  ;;  %v365_v30 = vadd.f32 %v637_v34, %v709_v33  ;;  %v413_v32 = vsel %vm680_vm4, %v340_v23, %v637_v34 }
  0x68   :  { %v389_v35 = vmul.f32 32.0, %v365_v30 }
  0x6a   :  { %v437_v36 = vsel %vm341_vm5, %v389_v35, %v413_v32 }
  0x6b   :  { %462 = vst.msk [vmem:[%s1106_s1 + $0x5c] sm:$0xf] %vm438_vm6, %v437_v36 }

</bundles_post_ra>
